<compile_context>
chip_gen: v7x
topology: tpu7x:2x2x1
jax: 0.10.0
libtpu: 0.0.40
codegen_flags: <defaults>
</compile_context>

<pallas_src>
import jax
import jax.numpy as jnp
from jax.experimental import pallas as pl
from jax.experimental.pallas import tpu as pltpu


_TAPS = tuple((dh, dw) for dh in (-1, 0, 1) for dw in (-1, 0, 1))
_POOL2_ROWS = (0, 4, 32, 36)   # valid rows per 64-row batch block after pool2


# ------------------------------ fused kernel -------------------------------

def _snake_fused_kernel(x_ref, w1_ref, b1_ref, w2_ref, b2_ref, w3_ref, b3_ref,
                        wfc1_ref, bfc1_ref, wfc2_ref, bfc2_ref,
                        o_ref, tap2_ref, tap3_ref, p2_ref):
    f32, bf16 = jnp.float32, jnp.bfloat16
    R = x_ref.shape[0]          # rows in this batch tile = BT * 64
    BT = R // 64

    # Per-row (h, w) coordinates on the 8x8 board (row r = b*64 + h*8 + w).
    r = jax.lax.broadcasted_iota(jnp.int32, (R, 1), 0)
    w_pos = jnp.bitwise_and(r, 7)
    h_pos = jnp.bitwise_and(jnp.right_shift(r, 3), 7)

    def shift_rows(v, off):
        # y[r] = v[(r + off) % R]; wrapped / cross-batch rows are always
        # masked or never selected downstream, so wraparound is harmless.
        if off == 0:
            return v
        return pltpu.roll(v, (-off) % R, 0)

    def tap_mask(dh, dw, dil):
        # Zero-padding mask for tap (dh, dw) on a grid with spatial stride dil.
        hh = h_pos + dh * dil
        ww = w_pos + dw * dil
        ok = (hh >= 0) & (hh <= 8 - dil) & (ww >= 0) & (ww <= 8 - dil)
        return jnp.where(ok, 1.0, 0.0)

    masks1 = [tap_mask(dh, dw, 1) for (dh, dw) in _TAPS]   # conv1 / conv2
    masks2 = [tap_mask(dh, dw, 2) for (dh, dw) in _TAPS]   # conv3 (stride-2)

    x = x_ref[...].astype(f32)                              # (R, 1)

    # ---- conv1 (1 -> 32): Cin = 1 => 9 VPU broadcast-FMA taps (no MXU) -----
    acc1 = jnp.zeros((R, 32), f32)
    for t, (dh, dw) in enumerate(_TAPS):
        xs = shift_rows(x, dh * 8 + dw) * masks1[t]         # (R, 1)
        acc1 = acc1 + xs * w1_ref[t:t + 1, :]               # (R, 32)
    a1 = jnp.maximum(acc1 + b1_ref[...], 0.0)

    # ---- conv2 (32 -> 64): ONE wide-K (R,288)x(288,64) bf16 MXU matmul -----
    for t, (dh, dw) in enumerate(_TAPS):
        xs = shift_rows(a1, dh * 8 + dw) * masks1[t]
        tap2_ref[:, t * 32:(t + 1) * 32] = xs.astype(bf16)
    a2 = jnp.maximum(
        jnp.dot(tap2_ref[...], w2_ref[...], preferred_element_type=f32)
        + b2_ref[...], 0.0)

    # ---- maxpool 2x2/2 (fused): valid results at rows with even h and w ----
    p1 = jnp.maximum(jnp.maximum(a2, shift_rows(a2, 1)),
                     jnp.maximum(shift_rows(a2, 8), shift_rows(a2, 9)))

    # ---- conv3 (64 -> 64) on the stride-2 grid: ONE (R,576)x(576,64) dot ---
    for t, (dh, dw) in enumerate(_TAPS):
        xs = shift_rows(p1, (dh * 8 + dw) * 2) * masks2[t]
        tap3_ref[:, t * 64:(t + 1) * 64] = xs.astype(bf16)
    a3 = jnp.maximum(
        jnp.dot(tap3_ref[...], w3_ref[...], preferred_element_type=f32)
        + b3_ref[...], 0.0)

    # ---- maxpool 2x2/2 on the stride-2 grid: valid rows at h, w in {0, 4} --
    p2_ref[...] = jnp.maximum(jnp.maximum(a3, shift_rows(a3, 2)),
                              jnp.maximum(shift_rows(a3, 16), shift_rows(a3, 18)))

    # ---- flatten (torch C,H,W folded into wfc1) + fc1 ----------------------
    # O(BT) strided row gather (replaces the old O(BT^2) selection matmuls):
    # spatial slot s lives at row b*64 + pos, pos in {0, 4, 32, 36}.
    y = jnp.zeros((BT, 256), f32) + bfc1_ref[...]
    for s, pos in enumerate(_POOL2_ROWS):
        g = p2_ref[pl.ds(pos, BT, stride=64), :].astype(bf16)    # (BT, 64)
        y = y + jnp.dot(g, wfc1_ref[s * 64:(s + 1) * 64, :],
                        preferred_element_type=f32)              # (BT, 256)
    a_fc1 = jnp.maximum(y, 0.0)

    # nn.Dropout(p=0.5) is identity at inference time.
    out = jnp.dot(a_fc1.astype(bf16), wfc2_ref[...],
                  preferred_element_type=f32) + bfc2_ref[...]    # (BT, 128)
    o_ref[...] = out.astype(o_ref.dtype)


# --------------------------- weight pre-packing -----------------------------

def prepare_params(params):
    """One-time weight packing (outside the hot path).  Conv weights become
    per-tap (Cin, Cout) row blocks stacked into a (9*Cin, Cout) wide-K matrix
    (tap t = (dh+1)*3 + (dw+1)); fc weights are transposed; fc1 rows are
    re-ordered to [spatial slot s][channel c] so the torch Flatten (c*4 + s)
    feature order is absorbed by the weight; fc2 weight/bias are zero-padded
    to 128 output lanes.  MXU weights are stored in bf16."""
    f32, bf16 = jnp.float32, jnp.bfloat16
    w1, w2, w3 = params["w1"], params["w2"], params["w3"]
    wfc1, wfc2 = params["wfc1"], params["wfc2"]
    wfc2_p = jnp.zeros((256, 128), f32).at[:, :4].set(wfc2.T.astype(f32))
    bfc2_p = jnp.zeros((1, 128), f32).at[:, :4].set(
        params["bfc2"].reshape(1, 4).astype(f32))
    return {
        "w1": w1.reshape(32, 9).T.astype(f32),                             # (9, 32)
        "w2": jnp.transpose(w2, (2, 3, 1, 0)).reshape(288, 64).astype(bf16),
        "w3": jnp.transpose(w3, (2, 3, 1, 0)).reshape(576, 64).astype(bf16),
        "wfc1": jnp.transpose(wfc1.reshape(256, 64, 4),
                              (2, 1, 0)).reshape(256, 256).astype(bf16),
        "wfc2": wfc2_p.astype(bf16),                                       # (256,128)
        "b1": params["b1"].reshape(1, 32).astype(f32),
        "b2": params["b2"].reshape(1, 64).astype(f32),
        "b3": params["b3"].reshape(1, 64).astype(f32),
        "bfc1": params["bfc1"].reshape(1, 256).astype(f32),
        "bfc2": bfc2_p,
    }


_WEIGHT_NAMES = ("w1", "b1", "w2", "b2", "w3", "b3",
                 "wfc1", "bfc1", "wfc2", "bfc2")


# -------------------------------- forward ----------------------------------

def snake_net_forward(packed, x_nchw):
    B = x_nchw.shape[0]
    assert x_nchw.shape[1:] == (1, 8, 8), x_nchw.shape

    # Big batch tiles: R = BT*64 rows per grid step (live VMEM ~16 MiB at
    # BT=64).  B > 64 is zero-padded to a multiple of 64 (>= 2 "parallel"
    # grid steps once B >= 128, which feeds both v7x TensorCores).
    BT = B if B <= 64 else 64
    Bp = -(-B // BT) * BT
    R = BT * 64

    # NCHW (B,1,8,8) -> rows (B*64, 1); row r = b*64 + h*8 + w (free reshape).
    x2d = x_nchw.reshape(B * 64, 1).astype(jnp.float32)
    if Bp != B:
        x2d = jnp.pad(x2d, ((0, (Bp - B) * 64), (0, 0)))

    def _const_spec(name):
        shape = packed[name].shape
        return pl.BlockSpec(shape, lambda i: (0, 0))

    flops = Bp * (64 * (2 * 9 * 32 + 2 * 288 * 64 + 2 * 576 * 64)
                  + 2 * 256 * 256 + 2 * 256 * 128)
    bytes_accessed = int(4 * x2d.size + 4 * Bp * 128
                         + sum(int(packed[n].size) * packed[n].dtype.itemsize
                               for n in _WEIGHT_NAMES))

    out = pl.pallas_call(
        _snake_fused_kernel,
        out_shape=jax.ShapeDtypeStruct((Bp, 128), jnp.float32),
        grid=(Bp // BT,),
        in_specs=[pl.BlockSpec((R, 1), lambda i: (i, 0))]
                 + [_const_spec(n) for n in _WEIGHT_NAMES],
        out_specs=pl.BlockSpec((BT, 128), lambda i: (i, 0)),
        scratch_shapes=[pltpu.VMEM((R, 288), jnp.bfloat16),   # conv2 wide-K taps
                        pltpu.VMEM((R, 576), jnp.bfloat16),   # conv3 wide-K taps
                        pltpu.VMEM((R, 64), jnp.float32)],    # pool2 output
        compiler_params=pltpu.CompilerParams(
            dimension_semantics=("parallel",),
            vmem_limit_bytes=48 * 1024 * 1024),
        cost_estimate=pl.CostEstimate(flops=int(flops), transcendentals=0,
                                      bytes_accessed=bytes_accessed),
    )(x2d, *[packed[n] for n in _WEIGHT_NAMES])
    return out[:B, :4]


# ------------------------------- parameters --------------------------------

def init_params(key):
    ks = jax.random.split(key, 10)

    def uniform(k, shape, fan_in):
        bound = 1.0 / jnp.sqrt(float(fan_in))
        return jax.random.uniform(k, shape, jnp.float32, -bound, bound)

    return {
        "w1": uniform(ks[0], (32, 1, 3, 3), 1 * 9),
        "b1": uniform(ks[1], (32,), 1 * 9),
        "w2": uniform(ks[2], (64, 32, 3, 3), 32 * 9),
        "b2": uniform(ks[3], (64,), 32 * 9),
        "w3": uniform(ks[4], (64, 64, 3, 3), 64 * 9),
        "b3": uniform(ks[5], (64,), 64 * 9),
        "wfc1": uniform(ks[6], (256, 256), 256),   # torch Linear weight: (out, in)
        "bfc1": uniform(ks[7], (256,), 256),
        "wfc2": uniform(ks[8], (4, 256), 256),
        "bfc2": uniform(ks[9], (4,), 256),
    }


# -------------------------- pure-XLA reference ------------------------------

def reference_forward(params, x_nchw):
    """Non-Pallas reference with the exact torch SnakeNet semantics."""
    hp = jax.lax.Precision.HIGHEST

    def conv(x, w, b):
        y = jax.lax.conv_general_dilated(
            x, w, window_strides=(1, 1), padding=((1, 1), (1, 1)),
            dimension_numbers=("NCHW", "OIHW", "NCHW"), precision=hp)
        return jax.nn.relu(y + b[None, :, None, None])

    def pool(x):
        B, C, H, W = x.shape
        return x.reshape(B, C, H // 2, 2, W // 2, 2).max(axis=(3, 5))

    x = conv(x_nchw, params["w1"], params["b1"])
    x = conv(x, params["w2"], params["b2"])
    x = pool(x)
    x = conv(x, params["w3"], params["b3"])
    x = pool(x)
    x = x.reshape(x.shape[0], -1)                 # torch Flatten: (C, H, W)
    x = jax.nn.relu(jnp.dot(x, params["wfc1"].T, precision=hp) + params["bfc1"])
    return jnp.dot(x, params["wfc2"].T, precision=hp) + params["bfc2"]


if __name__ == "__main__":
    key = jax.random.PRNGKey(0)
    pkey, xkey = jax.random.split(key)
    params = init_params(pkey)
    packed = prepare_params(params)               # one-time weight prep

    # board_size = 8 is implied by Linear(64*2*2, 256) after two 2x2 maxpools.
    board_size = 8
    x = jax.random.normal(xkey, (2, 1, board_size, board_size), jnp.float32)

    fwd = jax.jit(snake_net_forward)
    out = fwd(packed, x)
    jax.block_until_ready(out)
    assert out.shape == (2, 4), out.shape

    # Numerical check vs. the f32 XLA reference (bf16 MXU operands -> ~1e-3
    # typical error on O(0.1) logits; 3e-2 is a comfortable bound).
    ref = jax.jit(reference_forward)(params, x)
    jax.block_until_ready(ref)
    max_err = float(jnp.max(jnp.abs(out - ref)))
    assert max_err < 3e-2, f"Pallas kernel mismatch vs reference: {max_err}"

    # Larger batch: exercises multiple grid steps and the batch-padding path.
    xb = jax.random.normal(jax.random.PRNGKey(1), (80, 1, 8, 8), jnp.float32)
    out_b = fwd(packed, xb)
    jax.block_until_ready(out_b)
    assert out_b.shape == (80, 4), out_b.shape
    ref_b = jax.jit(reference_forward)(params, xb)
    max_err_b = float(jnp.max(jnp.abs(out_b - ref_b)))
    assert max_err_b < 3e-2, f"large-batch mismatch vs reference: {max_err_b}"

    print("KERNEL_OK")
</pallas_src>

<mosaic_0001>
module attributes {stable_mosaic.version = 11 : i64} {
  func.func @_snake_fused_kernel(%arg0: i32, %arg1: memref<128x1xf32, #tpu.memory_space<vmem>>, %arg2: memref<9x32xf32, #tpu.memory_space<vmem>>, %arg3: memref<1x32xf32, #tpu.memory_space<vmem>>, %arg4: memref<288x64xbf16, #tpu.memory_space<vmem>>, %arg5: memref<1x64xf32, #tpu.memory_space<vmem>>, %arg6: memref<576x64xbf16, #tpu.memory_space<vmem>>, %arg7: memref<1x64xf32, #tpu.memory_space<vmem>>, %arg8: memref<256x256xbf16, #tpu.memory_space<vmem>>, %arg9: memref<1x256xf32, #tpu.memory_space<vmem>>, %arg10: memref<256x128xbf16, #tpu.memory_space<vmem>>, %arg11: memref<1x128xf32, #tpu.memory_space<vmem>>, %arg12: memref<2x128xf32, #tpu.memory_space<vmem>>, %arg13: memref<128x288xbf16, #tpu.memory_space<vmem>>, %arg14: memref<128x576xbf16, #tpu.memory_space<vmem>>, %arg15: memref<128x64xf32, #tpu.memory_space<vmem>>) attributes {dimension_semantics = [#tpu.dimension_semantics<parallel>], iteration_bounds = array<i64: 1>, scalar_prefetch = 0 : i64, scratch_operands = 3 : i64, tpu.core_type = #tpu.core_type<tc>, window_params = [{transform_indices = @transform_0, window_bounds = array<i64: 128, 1>}, {pipeline_mode = #tpu.pipeline_mode<synchronous>, transform_indices = @transform_1, window_bounds = array<i64: 9, 32>}, {pipeline_mode = #tpu.pipeline_mode<synchronous>, transform_indices = @transform_2, window_bounds = array<i64: 1, 32>}, {pipeline_mode = #tpu.pipeline_mode<synchronous>, transform_indices = @transform_3, window_bounds = array<i64: 288, 64>}, {pipeline_mode = #tpu.pipeline_mode<synchronous>, transform_indices = @transform_4, window_bounds = array<i64: 1, 64>}, {pipeline_mode = #tpu.pipeline_mode<synchronous>, transform_indices = @transform_5, window_bounds = array<i64: 576, 64>}, {pipeline_mode = #tpu.pipeline_mode<synchronous>, transform_indices = @transform_6, window_bounds = array<i64: 1, 64>}, {pipeline_mode = #tpu.pipeline_mode<synchronous>, transform_indices = @transform_7, window_bounds = array<i64: 256, 256>}, {pipeline_mode = #tpu.pipeline_mode<synchronous>, transform_indices = @transform_8, window_bounds = array<i64: 1, 256>}, {pipeline_mode = #tpu.pipeline_mode<synchronous>, transform_indices = @transform_9, window_bounds = array<i64: 256, 128>}, {pipeline_mode = #tpu.pipeline_mode<synchronous>, transform_indices = @transform_10, window_bounds = array<i64: 1, 128>}, {transform_indices = @transform_11, window_bounds = array<i64: 2, 128>}]} {
    %0 = tpu.iota {dimensions = array<i32: 0>} : vector<128x1xi32>
    %c7_i32 = arith.constant 7 : i32
    %1 = vector.broadcast %c7_i32 : i32 to vector<128x1xi32>
    %2 = arith.andi %0, %1 : vector<128x1xi32>
    %c3_i32 = arith.constant 3 : i32
    %3 = vector.broadcast %c3_i32 : i32 to vector<128x1xi32>
    %4 = arith.shrsi %0, %3 : vector<128x1xi32>
    %c7_i32_0 = arith.constant 7 : i32
    %5 = vector.broadcast %c7_i32_0 : i32 to vector<128x1xi32>
    %6 = arith.andi %4, %5 : vector<128x1xi32>
    %c-1_i32 = arith.constant -1 : i32
    %7 = vector.broadcast %c-1_i32 : i32 to vector<128x1xi32>
    %8 = arith.addi %6, %7 : vector<128x1xi32>
    %c-1_i32_1 = arith.constant -1 : i32
    %9 = vector.broadcast %c-1_i32_1 : i32 to vector<128x1xi32>
    %10 = arith.addi %2, %9 : vector<128x1xi32>
    %c0_i32 = arith.constant 0 : i32
    %11 = vector.broadcast %c0_i32 : i32 to vector<128x1xi32>
    %12 = arith.cmpi sge, %8, %11 : vector<128x1xi32>
    %c7_i32_2 = arith.constant 7 : i32
    %13 = vector.broadcast %c7_i32_2 : i32 to vector<128x1xi32>
    %14 = arith.cmpi sle, %8, %13 : vector<128x1xi32>
    %15 = arith.andi %12, %14 : vector<128x1xi1>
    %c0_i32_3 = arith.constant 0 : i32
    %16 = vector.broadcast %c0_i32_3 : i32 to vector<128x1xi32>
    %17 = arith.cmpi sge, %10, %16 : vector<128x1xi32>
    %18 = arith.andi %15, %17 : vector<128x1xi1>
    %c7_i32_4 = arith.constant 7 : i32
    %19 = vector.broadcast %c7_i32_4 : i32 to vector<128x1xi32>
    %20 = arith.cmpi sle, %10, %19 : vector<128x1xi32>
    %21 = arith.andi %18, %20 : vector<128x1xi1>
    %cst = arith.constant 1.000000e+00 : f32
    %cst_5 = arith.constant 0.000000e+00 : f32
    %22 = vector.broadcast %cst : f32 to vector<128x1xf32>
    %23 = vector.broadcast %cst_5 : f32 to vector<128x1xf32>
    %24 = arith.select %21, %22, %23 : vector<128x1xi1>, vector<128x1xf32>
    %c-1_i32_6 = arith.constant -1 : i32
    %25 = vector.broadcast %c-1_i32_6 : i32 to vector<128x1xi32>
    %26 = arith.addi %6, %25 : vector<128x1xi32>
    %c0_i32_7 = arith.constant 0 : i32
    %27 = vector.broadcast %c0_i32_7 : i32 to vector<128x1xi32>
    %28 = arith.addi %2, %27 : vector<128x1xi32>
    %c0_i32_8 = arith.constant 0 : i32
    %29 = vector.broadcast %c0_i32_8 : i32 to vector<128x1xi32>
    %30 = arith.cmpi sge, %26, %29 : vector<128x1xi32>
    %c7_i32_9 = arith.constant 7 : i32
    %31 = vector.broadcast %c7_i32_9 : i32 to vector<128x1xi32>
    %32 = arith.cmpi sle, %26, %31 : vector<128x1xi32>
    %33 = arith.andi %30, %32 : vector<128x1xi1>
    %c0_i32_10 = arith.constant 0 : i32
    %34 = vector.broadcast %c0_i32_10 : i32 to vector<128x1xi32>
    %35 = arith.cmpi sge, %28, %34 : vector<128x1xi32>
    %36 = arith.andi %33, %35 : vector<128x1xi1>
    %c7_i32_11 = arith.constant 7 : i32
    %37 = vector.broadcast %c7_i32_11 : i32 to vector<128x1xi32>
    %38 = arith.cmpi sle, %28, %37 : vector<128x1xi32>
    %39 = arith.andi %36, %38 : vector<128x1xi1>
    %cst_12 = arith.constant 1.000000e+00 : f32
    %cst_13 = arith.constant 0.000000e+00 : f32
    %40 = vector.broadcast %cst_12 : f32 to vector<128x1xf32>
    %41 = vector.broadcast %cst_13 : f32 to vector<128x1xf32>
    %42 = arith.select %39, %40, %41 : vector<128x1xi1>, vector<128x1xf32>
    %c-1_i32_14 = arith.constant -1 : i32
    %43 = vector.broadcast %c-1_i32_14 : i32 to vector<128x1xi32>
    %44 = arith.addi %6, %43 : vector<128x1xi32>
    %c1_i32 = arith.constant 1 : i32
    %45 = vector.broadcast %c1_i32 : i32 to vector<128x1xi32>
    %46 = arith.addi %2, %45 : vector<128x1xi32>
    %c0_i32_15 = arith.constant 0 : i32
    %47 = vector.broadcast %c0_i32_15 : i32 to vector<128x1xi32>
    %48 = arith.cmpi sge, %44, %47 : vector<128x1xi32>
    %c7_i32_16 = arith.constant 7 : i32
    %49 = vector.broadcast %c7_i32_16 : i32 to vector<128x1xi32>
    %50 = arith.cmpi sle, %44, %49 : vector<128x1xi32>
    %51 = arith.andi %48, %50 : vector<128x1xi1>
    %c0_i32_17 = arith.constant 0 : i32
    %52 = vector.broadcast %c0_i32_17 : i32 to vector<128x1xi32>
    %53 = arith.cmpi sge, %46, %52 : vector<128x1xi32>
    %54 = arith.andi %51, %53 : vector<128x1xi1>
    %c7_i32_18 = arith.constant 7 : i32
    %55 = vector.broadcast %c7_i32_18 : i32 to vector<128x1xi32>
    %56 = arith.cmpi sle, %46, %55 : vector<128x1xi32>
    %57 = arith.andi %54, %56 : vector<128x1xi1>
    %cst_19 = arith.constant 1.000000e+00 : f32
    %cst_20 = arith.constant 0.000000e+00 : f32
    %58 = vector.broadcast %cst_19 : f32 to vector<128x1xf32>
    %59 = vector.broadcast %cst_20 : f32 to vector<128x1xf32>
    %60 = arith.select %57, %58, %59 : vector<128x1xi1>, vector<128x1xf32>
    %c0_i32_21 = arith.constant 0 : i32
    %61 = vector.broadcast %c0_i32_21 : i32 to vector<128x1xi32>
    %62 = arith.addi %6, %61 : vector<128x1xi32>
    %c-1_i32_22 = arith.constant -1 : i32
    %63 = vector.broadcast %c-1_i32_22 : i32 to vector<128x1xi32>
    %64 = arith.addi %2, %63 : vector<128x1xi32>
    %c0_i32_23 = arith.constant 0 : i32
    %65 = vector.broadcast %c0_i32_23 : i32 to vector<128x1xi32>
    %66 = arith.cmpi sge, %62, %65 : vector<128x1xi32>
    %c7_i32_24 = arith.constant 7 : i32
    %67 = vector.broadcast %c7_i32_24 : i32 to vector<128x1xi32>
    %68 = arith.cmpi sle, %62, %67 : vector<128x1xi32>
    %69 = arith.andi %66, %68 : vector<128x1xi1>
    %c0_i32_25 = arith.constant 0 : i32
    %70 = vector.broadcast %c0_i32_25 : i32 to vector<128x1xi32>
    %71 = arith.cmpi sge, %64, %70 : vector<128x1xi32>
    %72 = arith.andi %69, %71 : vector<128x1xi1>
    %c7_i32_26 = arith.constant 7 : i32
    %73 = vector.broadcast %c7_i32_26 : i32 to vector<128x1xi32>
    %74 = arith.cmpi sle, %64, %73 : vector<128x1xi32>
    %75 = arith.andi %72, %74 : vector<128x1xi1>
    %cst_27 = arith.constant 1.000000e+00 : f32
    %cst_28 = arith.constant 0.000000e+00 : f32
    %76 = vector.broadcast %cst_27 : f32 to vector<128x1xf32>
    %77 = vector.broadcast %cst_28 : f32 to vector<128x1xf32>
    %78 = arith.select %75, %76, %77 : vector<128x1xi1>, vector<128x1xf32>
    %c0_i32_29 = arith.constant 0 : i32
    %79 = vector.broadcast %c0_i32_29 : i32 to vector<128x1xi32>
    %80 = arith.addi %6, %79 : vector<128x1xi32>
    %c0_i32_30 = arith.constant 0 : i32
    %81 = vector.broadcast %c0_i32_30 : i32 to vector<128x1xi32>
    %82 = arith.addi %2, %81 : vector<128x1xi32>
    %c0_i32_31 = arith.constant 0 : i32
    %83 = vector.broadcast %c0_i32_31 : i32 to vector<128x1xi32>
    %84 = arith.cmpi sge, %80, %83 : vector<128x1xi32>
    %c7_i32_32 = arith.constant 7 : i32
    %85 = vector.broadcast %c7_i32_32 : i32 to vector<128x1xi32>
    %86 = arith.cmpi sle, %80, %85 : vector<128x1xi32>
    %87 = arith.andi %84, %86 : vector<128x1xi1>
    %c0_i32_33 = arith.constant 0 : i32
    %88 = vector.broadcast %c0_i32_33 : i32 to vector<128x1xi32>
    %89 = arith.cmpi sge, %82, %88 : vector<128x1xi32>
    %90 = arith.andi %87, %89 : vector<128x1xi1>
    %c7_i32_34 = arith.constant 7 : i32
    %91 = vector.broadcast %c7_i32_34 : i32 to vector<128x1xi32>
    %92 = arith.cmpi sle, %82, %91 : vector<128x1xi32>
    %93 = arith.andi %90, %92 : vector<128x1xi1>
    %cst_35 = arith.constant 1.000000e+00 : f32
    %cst_36 = arith.constant 0.000000e+00 : f32
    %94 = vector.broadcast %cst_35 : f32 to vector<128x1xf32>
    %95 = vector.broadcast %cst_36 : f32 to vector<128x1xf32>
    %96 = arith.select %93, %94, %95 : vector<128x1xi1>, vector<128x1xf32>
    %c0_i32_37 = arith.constant 0 : i32
    %97 = vector.broadcast %c0_i32_37 : i32 to vector<128x1xi32>
    %98 = arith.addi %6, %97 : vector<128x1xi32>
    %c1_i32_38 = arith.constant 1 : i32
    %99 = vector.broadcast %c1_i32_38 : i32 to vector<128x1xi32>
    %100 = arith.addi %2, %99 : vector<128x1xi32>
    %c0_i32_39 = arith.constant 0 : i32
    %101 = vector.broadcast %c0_i32_39 : i32 to vector<128x1xi32>
    %102 = arith.cmpi sge, %98, %101 : vector<128x1xi32>
    %c7_i32_40 = arith.constant 7 : i32
    %103 = vector.broadcast %c7_i32_40 : i32 to vector<128x1xi32>
    %104 = arith.cmpi sle, %98, %103 : vector<128x1xi32>
    %105 = arith.andi %102, %104 : vector<128x1xi1>
    %c0_i32_41 = arith.constant 0 : i32
    %106 = vector.broadcast %c0_i32_41 : i32 to vector<128x1xi32>
    %107 = arith.cmpi sge, %100, %106 : vector<128x1xi32>
    %108 = arith.andi %105, %107 : vector<128x1xi1>
    %c7_i32_42 = arith.constant 7 : i32
    %109 = vector.broadcast %c7_i32_42 : i32 to vector<128x1xi32>
    %110 = arith.cmpi sle, %100, %109 : vector<128x1xi32>
    %111 = arith.andi %108, %110 : vector<128x1xi1>
    %cst_43 = arith.constant 1.000000e+00 : f32
    %cst_44 = arith.constant 0.000000e+00 : f32
    %112 = vector.broadcast %cst_43 : f32 to vector<128x1xf32>
    %113 = vector.broadcast %cst_44 : f32 to vector<128x1xf32>
    %114 = arith.select %111, %112, %113 : vector<128x1xi1>, vector<128x1xf32>
    %c1_i32_45 = arith.constant 1 : i32
    %115 = vector.broadcast %c1_i32_45 : i32 to vector<128x1xi32>
    %116 = arith.addi %6, %115 : vector<128x1xi32>
    %c-1_i32_46 = arith.constant -1 : i32
    %117 = vector.broadcast %c-1_i32_46 : i32 to vector<128x1xi32>
    %118 = arith.addi %2, %117 : vector<128x1xi32>
    %c0_i32_47 = arith.constant 0 : i32
    %119 = vector.broadcast %c0_i32_47 : i32 to vector<128x1xi32>
    %120 = arith.cmpi sge, %116, %119 : vector<128x1xi32>
    %c7_i32_48 = arith.constant 7 : i32
    %121 = vector.broadcast %c7_i32_48 : i32 to vector<128x1xi32>
    %122 = arith.cmpi sle, %116, %121 : vector<128x1xi32>
    %123 = arith.andi %120, %122 : vector<128x1xi1>
    %c0_i32_49 = arith.constant 0 : i32
    %124 = vector.broadcast %c0_i32_49 : i32 to vector<128x1xi32>
    %125 = arith.cmpi sge, %118, %124 : vector<128x1xi32>
    %126 = arith.andi %123, %125 : vector<128x1xi1>
    %c7_i32_50 = arith.constant 7 : i32
    %127 = vector.broadcast %c7_i32_50 : i32 to vector<128x1xi32>
    %128 = arith.cmpi sle, %118, %127 : vector<128x1xi32>
    %129 = arith.andi %126, %128 : vector<128x1xi1>
    %cst_51 = arith.constant 1.000000e+00 : f32
    %cst_52 = arith.constant 0.000000e+00 : f32
    %130 = vector.broadcast %cst_51 : f32 to vector<128x1xf32>
    %131 = vector.broadcast %cst_52 : f32 to vector<128x1xf32>
    %132 = arith.select %129, %130, %131 : vector<128x1xi1>, vector<128x1xf32>
    %c1_i32_53 = arith.constant 1 : i32
    %133 = vector.broadcast %c1_i32_53 : i32 to vector<128x1xi32>
    %134 = arith.addi %6, %133 : vector<128x1xi32>
    %c0_i32_54 = arith.constant 0 : i32
    %135 = vector.broadcast %c0_i32_54 : i32 to vector<128x1xi32>
    %136 = arith.addi %2, %135 : vector<128x1xi32>
    %c0_i32_55 = arith.constant 0 : i32
    %137 = vector.broadcast %c0_i32_55 : i32 to vector<128x1xi32>
    %138 = arith.cmpi sge, %134, %137 : vector<128x1xi32>
    %c7_i32_56 = arith.constant 7 : i32
    %139 = vector.broadcast %c7_i32_56 : i32 to vector<128x1xi32>
    %140 = arith.cmpi sle, %134, %139 : vector<128x1xi32>
    %141 = arith.andi %138, %140 : vector<128x1xi1>
    %c0_i32_57 = arith.constant 0 : i32
    %142 = vector.broadcast %c0_i32_57 : i32 to vector<128x1xi32>
    %143 = arith.cmpi sge, %136, %142 : vector<128x1xi32>
    %144 = arith.andi %141, %143 : vector<128x1xi1>
    %c7_i32_58 = arith.constant 7 : i32
    %145 = vector.broadcast %c7_i32_58 : i32 to vector<128x1xi32>
    %146 = arith.cmpi sle, %136, %145 : vector<128x1xi32>
    %147 = arith.andi %144, %146 : vector<128x1xi1>
    %cst_59 = arith.constant 1.000000e+00 : f32
    %cst_60 = arith.constant 0.000000e+00 : f32
    %148 = vector.broadcast %cst_59 : f32 to vector<128x1xf32>
    %149 = vector.broadcast %cst_60 : f32 to vector<128x1xf32>
    %150 = arith.select %147, %148, %149 : vector<128x1xi1>, vector<128x1xf32>
    %c1_i32_61 = arith.constant 1 : i32
    %151 = vector.broadcast %c1_i32_61 : i32 to vector<128x1xi32>
    %152 = arith.addi %6, %151 : vector<128x1xi32>
    %c1_i32_62 = arith.constant 1 : i32
    %153 = vector.broadcast %c1_i32_62 : i32 to vector<128x1xi32>
    %154 = arith.addi %2, %153 : vector<128x1xi32>
    %c0_i32_63 = arith.constant 0 : i32
    %155 = vector.broadcast %c0_i32_63 : i32 to vector<128x1xi32>
    %156 = arith.cmpi sge, %152, %155 : vector<128x1xi32>
    %c7_i32_64 = arith.constant 7 : i32
    %157 = vector.broadcast %c7_i32_64 : i32 to vector<128x1xi32>
    %158 = arith.cmpi sle, %152, %157 : vector<128x1xi32>
    %159 = arith.andi %156, %158 : vector<128x1xi1>
    %c0_i32_65 = arith.constant 0 : i32
    %160 = vector.broadcast %c0_i32_65 : i32 to vector<128x1xi32>
    %161 = arith.cmpi sge, %154, %160 : vector<128x1xi32>
    %162 = arith.andi %159, %161 : vector<128x1xi1>
    %c7_i32_66 = arith.constant 7 : i32
    %163 = vector.broadcast %c7_i32_66 : i32 to vector<128x1xi32>
    %164 = arith.cmpi sle, %154, %163 : vector<128x1xi32>
    %165 = arith.andi %162, %164 : vector<128x1xi1>
    %cst_67 = arith.constant 1.000000e+00 : f32
    %cst_68 = arith.constant 0.000000e+00 : f32
    %166 = vector.broadcast %cst_67 : f32 to vector<128x1xf32>
    %167 = vector.broadcast %cst_68 : f32 to vector<128x1xf32>
    %168 = arith.select %165, %166, %167 : vector<128x1xi1>, vector<128x1xf32>
    %c-2_i32 = arith.constant -2 : i32
    %169 = vector.broadcast %c-2_i32 : i32 to vector<128x1xi32>
    %170 = arith.addi %6, %169 : vector<128x1xi32>
    %c-2_i32_69 = arith.constant -2 : i32
    %171 = vector.broadcast %c-2_i32_69 : i32 to vector<128x1xi32>
    %172 = arith.addi %2, %171 : vector<128x1xi32>
    %c0_i32_70 = arith.constant 0 : i32
    %173 = vector.broadcast %c0_i32_70 : i32 to vector<128x1xi32>
    %174 = arith.cmpi sge, %170, %173 : vector<128x1xi32>
    %c6_i32 = arith.constant 6 : i32
    %175 = vector.broadcast %c6_i32 : i32 to vector<128x1xi32>
    %176 = arith.cmpi sle, %170, %175 : vector<128x1xi32>
    %177 = arith.andi %174, %176 : vector<128x1xi1>
    %c0_i32_71 = arith.constant 0 : i32
    %178 = vector.broadcast %c0_i32_71 : i32 to vector<128x1xi32>
    %179 = arith.cmpi sge, %172, %178 : vector<128x1xi32>
    %180 = arith.andi %177, %179 : vector<128x1xi1>
    %c6_i32_72 = arith.constant 6 : i32
    %181 = vector.broadcast %c6_i32_72 : i32 to vector<128x1xi32>
    %182 = arith.cmpi sle, %172, %181 : vector<128x1xi32>
    %183 = arith.andi %180, %182 : vector<128x1xi1>
    %cst_73 = arith.constant 1.000000e+00 : f32
    %cst_74 = arith.constant 0.000000e+00 : f32
    %184 = vector.broadcast %cst_73 : f32 to vector<128x1xf32>
    %185 = vector.broadcast %cst_74 : f32 to vector<128x1xf32>
    %186 = arith.select %183, %184, %185 : vector<128x1xi1>, vector<128x1xf32>
    %c-2_i32_75 = arith.constant -2 : i32
    %187 = vector.broadcast %c-2_i32_75 : i32 to vector<128x1xi32>
    %188 = arith.addi %6, %187 : vector<128x1xi32>
    %c0_i32_76 = arith.constant 0 : i32
    %189 = vector.broadcast %c0_i32_76 : i32 to vector<128x1xi32>
    %190 = arith.addi %2, %189 : vector<128x1xi32>
    %c0_i32_77 = arith.constant 0 : i32
    %191 = vector.broadcast %c0_i32_77 : i32 to vector<128x1xi32>
    %192 = arith.cmpi sge, %188, %191 : vector<128x1xi32>
    %c6_i32_78 = arith.constant 6 : i32
    %193 = vector.broadcast %c6_i32_78 : i32 to vector<128x1xi32>
    %194 = arith.cmpi sle, %188, %193 : vector<128x1xi32>
    %195 = arith.andi %192, %194 : vector<128x1xi1>
    %c0_i32_79 = arith.constant 0 : i32
    %196 = vector.broadcast %c0_i32_79 : i32 to vector<128x1xi32>
    %197 = arith.cmpi sge, %190, %196 : vector<128x1xi32>
    %198 = arith.andi %195, %197 : vector<128x1xi1>
    %c6_i32_80 = arith.constant 6 : i32
    %199 = vector.broadcast %c6_i32_80 : i32 to vector<128x1xi32>
    %200 = arith.cmpi sle, %190, %199 : vector<128x1xi32>
    %201 = arith.andi %198, %200 : vector<128x1xi1>
    %cst_81 = arith.constant 1.000000e+00 : f32
    %cst_82 = arith.constant 0.000000e+00 : f32
    %202 = vector.broadcast %cst_81 : f32 to vector<128x1xf32>
    %203 = vector.broadcast %cst_82 : f32 to vector<128x1xf32>
    %204 = arith.select %201, %202, %203 : vector<128x1xi1>, vector<128x1xf32>
    %c-2_i32_83 = arith.constant -2 : i32
    %205 = vector.broadcast %c-2_i32_83 : i32 to vector<128x1xi32>
    %206 = arith.addi %6, %205 : vector<128x1xi32>
    %c2_i32 = arith.constant 2 : i32
    %207 = vector.broadcast %c2_i32 : i32 to vector<128x1xi32>
    %208 = arith.addi %2, %207 : vector<128x1xi32>
    %c0_i32_84 = arith.constant 0 : i32
    %209 = vector.broadcast %c0_i32_84 : i32 to vector<128x1xi32>
    %210 = arith.cmpi sge, %206, %209 : vector<128x1xi32>
    %c6_i32_85 = arith.constant 6 : i32
    %211 = vector.broadcast %c6_i32_85 : i32 to vector<128x1xi32>
    %212 = arith.cmpi sle, %206, %211 : vector<128x1xi32>
    %213 = arith.andi %210, %212 : vector<128x1xi1>
    %c0_i32_86 = arith.constant 0 : i32
    %214 = vector.broadcast %c0_i32_86 : i32 to vector<128x1xi32>
    %215 = arith.cmpi sge, %208, %214 : vector<128x1xi32>
    %216 = arith.andi %213, %215 : vector<128x1xi1>
    %c6_i32_87 = arith.constant 6 : i32
    %217 = vector.broadcast %c6_i32_87 : i32 to vector<128x1xi32>
    %218 = arith.cmpi sle, %208, %217 : vector<128x1xi32>
    %219 = arith.andi %216, %218 : vector<128x1xi1>
    %cst_88 = arith.constant 1.000000e+00 : f32
    %cst_89 = arith.constant 0.000000e+00 : f32
    %220 = vector.broadcast %cst_88 : f32 to vector<128x1xf32>
    %221 = vector.broadcast %cst_89 : f32 to vector<128x1xf32>
    %222 = arith.select %219, %220, %221 : vector<128x1xi1>, vector<128x1xf32>
    %c0_i32_90 = arith.constant 0 : i32
    %223 = vector.broadcast %c0_i32_90 : i32 to vector<128x1xi32>
    %224 = arith.addi %6, %223 : vector<128x1xi32>
    %c-2_i32_91 = arith.constant -2 : i32
    %225 = vector.broadcast %c-2_i32_91 : i32 to vector<128x1xi32>
    %226 = arith.addi %2, %225 : vector<128x1xi32>
    %c0_i32_92 = arith.constant 0 : i32
    %227 = vector.broadcast %c0_i32_92 : i32 to vector<128x1xi32>
    %228 = arith.cmpi sge, %224, %227 : vector<128x1xi32>
    %c6_i32_93 = arith.constant 6 : i32
    %229 = vector.broadcast %c6_i32_93 : i32 to vector<128x1xi32>
    %230 = arith.cmpi sle, %224, %229 : vector<128x1xi32>
    %231 = arith.andi %228, %230 : vector<128x1xi1>
    %c0_i32_94 = arith.constant 0 : i32
    %232 = vector.broadcast %c0_i32_94 : i32 to vector<128x1xi32>
    %233 = arith.cmpi sge, %226, %232 : vector<128x1xi32>
    %234 = arith.andi %231, %233 : vector<128x1xi1>
    %c6_i32_95 = arith.constant 6 : i32
    %235 = vector.broadcast %c6_i32_95 : i32 to vector<128x1xi32>
    %236 = arith.cmpi sle, %226, %235 : vector<128x1xi32>
    %237 = arith.andi %234, %236 : vector<128x1xi1>
    %cst_96 = arith.constant 1.000000e+00 : f32
    %cst_97 = arith.constant 0.000000e+00 : f32
    %238 = vector.broadcast %cst_96 : f32 to vector<128x1xf32>
    %239 = vector.broadcast %cst_97 : f32 to vector<128x1xf32>
    %240 = arith.select %237, %238, %239 : vector<128x1xi1>, vector<128x1xf32>
    %c0_i32_98 = arith.constant 0 : i32
    %241 = vector.broadcast %c0_i32_98 : i32 to vector<128x1xi32>
    %242 = arith.addi %6, %241 : vector<128x1xi32>
    %c0_i32_99 = arith.constant 0 : i32
    %243 = vector.broadcast %c0_i32_99 : i32 to vector<128x1xi32>
    %244 = arith.addi %2, %243 : vector<128x1xi32>
    %c0_i32_100 = arith.constant 0 : i32
    %245 = vector.broadcast %c0_i32_100 : i32 to vector<128x1xi32>
    %246 = arith.cmpi sge, %242, %245 : vector<128x1xi32>
    %c6_i32_101 = arith.constant 6 : i32
    %247 = vector.broadcast %c6_i32_101 : i32 to vector<128x1xi32>
    %248 = arith.cmpi sle, %242, %247 : vector<128x1xi32>
    %249 = arith.andi %246, %248 : vector<128x1xi1>
    %c0_i32_102 = arith.constant 0 : i32
    %250 = vector.broadcast %c0_i32_102 : i32 to vector<128x1xi32>
    %251 = arith.cmpi sge, %244, %250 : vector<128x1xi32>
    %252 = arith.andi %249, %251 : vector<128x1xi1>
    %c6_i32_103 = arith.constant 6 : i32
    %253 = vector.broadcast %c6_i32_103 : i32 to vector<128x1xi32>
    %254 = arith.cmpi sle, %244, %253 : vector<128x1xi32>
    %255 = arith.andi %252, %254 : vector<128x1xi1>
    %cst_104 = arith.constant 1.000000e+00 : f32
    %cst_105 = arith.constant 0.000000e+00 : f32
    %256 = vector.broadcast %cst_104 : f32 to vector<128x1xf32>
    %257 = vector.broadcast %cst_105 : f32 to vector<128x1xf32>
    %258 = arith.select %255, %256, %257 : vector<128x1xi1>, vector<128x1xf32>
    %c0_i32_106 = arith.constant 0 : i32
    %259 = vector.broadcast %c0_i32_106 : i32 to vector<128x1xi32>
    %260 = arith.addi %6, %259 : vector<128x1xi32>
    %c2_i32_107 = arith.constant 2 : i32
    %261 = vector.broadcast %c2_i32_107 : i32 to vector<128x1xi32>
    %262 = arith.addi %2, %261 : vector<128x1xi32>
    %c0_i32_108 = arith.constant 0 : i32
    %263 = vector.broadcast %c0_i32_108 : i32 to vector<128x1xi32>
    %264 = arith.cmpi sge, %260, %263 : vector<128x1xi32>
    %c6_i32_109 = arith.constant 6 : i32
    %265 = vector.broadcast %c6_i32_109 : i32 to vector<128x1xi32>
    %266 = arith.cmpi sle, %260, %265 : vector<128x1xi32>
    %267 = arith.andi %264, %266 : vector<128x1xi1>
    %c0_i32_110 = arith.constant 0 : i32
    %268 = vector.broadcast %c0_i32_110 : i32 to vector<128x1xi32>
    %269 = arith.cmpi sge, %262, %268 : vector<128x1xi32>
    %270 = arith.andi %267, %269 : vector<128x1xi1>
    %c6_i32_111 = arith.constant 6 : i32
    %271 = vector.broadcast %c6_i32_111 : i32 to vector<128x1xi32>
    %272 = arith.cmpi sle, %262, %271 : vector<128x1xi32>
    %273 = arith.andi %270, %272 : vector<128x1xi1>
    %cst_112 = arith.constant 1.000000e+00 : f32
    %cst_113 = arith.constant 0.000000e+00 : f32
    %274 = vector.broadcast %cst_112 : f32 to vector<128x1xf32>
    %275 = vector.broadcast %cst_113 : f32 to vector<128x1xf32>
    %276 = arith.select %273, %274, %275 : vector<128x1xi1>, vector<128x1xf32>
    %c2_i32_114 = arith.constant 2 : i32
    %277 = vector.broadcast %c2_i32_114 : i32 to vector<128x1xi32>
    %278 = arith.addi %6, %277 : vector<128x1xi32>
    %c-2_i32_115 = arith.constant -2 : i32
    %279 = vector.broadcast %c-2_i32_115 : i32 to vector<128x1xi32>
    %280 = arith.addi %2, %279 : vector<128x1xi32>
    %c0_i32_116 = arith.constant 0 : i32
    %281 = vector.broadcast %c0_i32_116 : i32 to vector<128x1xi32>
    %282 = arith.cmpi sge, %278, %281 : vector<128x1xi32>
    %c6_i32_117 = arith.constant 6 : i32
    %283 = vector.broadcast %c6_i32_117 : i32 to vector<128x1xi32>
    %284 = arith.cmpi sle, %278, %283 : vector<128x1xi32>
    %285 = arith.andi %282, %284 : vector<128x1xi1>
    %c0_i32_118 = arith.constant 0 : i32
    %286 = vector.broadcast %c0_i32_118 : i32 to vector<128x1xi32>
    %287 = arith.cmpi sge, %280, %286 : vector<128x1xi32>
    %288 = arith.andi %285, %287 : vector<128x1xi1>
    %c6_i32_119 = arith.constant 6 : i32
    %289 = vector.broadcast %c6_i32_119 : i32 to vector<128x1xi32>
    %290 = arith.cmpi sle, %280, %289 : vector<128x1xi32>
    %291 = arith.andi %288, %290 : vector<128x1xi1>
    %cst_120 = arith.constant 1.000000e+00 : f32
    %cst_121 = arith.constant 0.000000e+00 : f32
    %292 = vector.broadcast %cst_120 : f32 to vector<128x1xf32>
    %293 = vector.broadcast %cst_121 : f32 to vector<128x1xf32>
    %294 = arith.select %291, %292, %293 : vector<128x1xi1>, vector<128x1xf32>
    %c2_i32_122 = arith.constant 2 : i32
    %295 = vector.broadcast %c2_i32_122 : i32 to vector<128x1xi32>
    %296 = arith.addi %6, %295 : vector<128x1xi32>
    %c0_i32_123 = arith.constant 0 : i32
    %297 = vector.broadcast %c0_i32_123 : i32 to vector<128x1xi32>
    %298 = arith.addi %2, %297 : vector<128x1xi32>
    %c0_i32_124 = arith.constant 0 : i32
    %299 = vector.broadcast %c0_i32_124 : i32 to vector<128x1xi32>
    %300 = arith.cmpi sge, %296, %299 : vector<128x1xi32>
    %c6_i32_125 = arith.constant 6 : i32
    %301 = vector.broadcast %c6_i32_125 : i32 to vector<128x1xi32>
    %302 = arith.cmpi sle, %296, %301 : vector<128x1xi32>
    %303 = arith.andi %300, %302 : vector<128x1xi1>
    %c0_i32_126 = arith.constant 0 : i32
    %304 = vector.broadcast %c0_i32_126 : i32 to vector<128x1xi32>
    %305 = arith.cmpi sge, %298, %304 : vector<128x1xi32>
    %306 = arith.andi %303, %305 : vector<128x1xi1>
    %c6_i32_127 = arith.constant 6 : i32
    %307 = vector.broadcast %c6_i32_127 : i32 to vector<128x1xi32>
    %308 = arith.cmpi sle, %298, %307 : vector<128x1xi32>
    %309 = arith.andi %306, %308 : vector<128x1xi1>
    %cst_128 = arith.constant 1.000000e+00 : f32
    %cst_129 = arith.constant 0.000000e+00 : f32
    %310 = vector.broadcast %cst_128 : f32 to vector<128x1xf32>
    %311 = vector.broadcast %cst_129 : f32 to vector<128x1xf32>
    %312 = arith.select %309, %310, %311 : vector<128x1xi1>, vector<128x1xf32>
    %c2_i32_130 = arith.constant 2 : i32
    %313 = vector.broadcast %c2_i32_130 : i32 to vector<128x1xi32>
    %314 = arith.addi %6, %313 : vector<128x1xi32>
    %c2_i32_131 = arith.constant 2 : i32
    %315 = vector.broadcast %c2_i32_131 : i32 to vector<128x1xi32>
    %316 = arith.addi %2, %315 : vector<128x1xi32>
    %c0_i32_132 = arith.constant 0 : i32
    %317 = vector.broadcast %c0_i32_132 : i32 to vector<128x1xi32>
    %318 = arith.cmpi sge, %314, %317 : vector<128x1xi32>
    %c6_i32_133 = arith.constant 6 : i32
    %319 = vector.broadcast %c6_i32_133 : i32 to vector<128x1xi32>
    %320 = arith.cmpi sle, %314, %319 : vector<128x1xi32>
    %321 = arith.andi %318, %320 : vector<128x1xi1>
    %c0_i32_134 = arith.constant 0 : i32
    %322 = vector.broadcast %c0_i32_134 : i32 to vector<128x1xi32>
    %323 = arith.cmpi sge, %316, %322 : vector<128x1xi32>
    %324 = arith.andi %321, %323 : vector<128x1xi1>
    %c6_i32_135 = arith.constant 6 : i32
    %325 = vector.broadcast %c6_i32_135 : i32 to vector<128x1xi32>
    %326 = arith.cmpi sle, %316, %325 : vector<128x1xi32>
    %327 = arith.andi %324, %326 : vector<128x1xi1>
    %cst_136 = arith.constant 1.000000e+00 : f32
    %cst_137 = arith.constant 0.000000e+00 : f32
    %328 = vector.broadcast %cst_136 : f32 to vector<128x1xf32>
    %329 = vector.broadcast %cst_137 : f32 to vector<128x1xf32>
    %330 = arith.select %327, %328, %329 : vector<128x1xi1>, vector<128x1xf32>
    %c0 = arith.constant 0 : index
    %c0_138 = arith.constant 0 : index
    %331 = vector.load %arg1[%c0, %c0_138] : memref<128x1xf32, #tpu.memory_space<vmem>>, vector<128x1xf32>
    %cst_139 = arith.constant 0.000000e+00 : f32
    %332 = vector.broadcast %cst_139 : f32 to vector<128x32xf32>
    %c9_i32 = arith.constant 9 : i32
    %333 = tpu.dynamic_rotate %331 by %c9_i32 dim 0 : vector<128x1xf32>, i32 -> vector<128x1xf32>
    %334 = arith.mulf %333, %24 : vector<128x1xf32>
    %c0_140 = arith.constant 0 : index
    %c0_141 = arith.constant 0 : index
    %335 = vector.load %arg2[%c0_140, %c0_141] : memref<9x32xf32, #tpu.memory_space<vmem>>, vector<1x32xf32>
    %336 = vector.broadcast %334 : vector<128x1xf32> to vector<128x32xf32>
    %337 = vector.broadcast %335 : vector<1x32xf32> to vector<128x32xf32>
    %338 = arith.mulf %336, %337 : vector<128x32xf32>
    %339 = arith.addf %332, %338 : vector<128x32xf32>
    %c8_i32 = arith.constant 8 : i32
    %340 = tpu.dynamic_rotate %331 by %c8_i32 dim 0 : vector<128x1xf32>, i32 -> vector<128x1xf32>
    %341 = arith.mulf %340, %42 : vector<128x1xf32>
    %c1 = arith.constant 1 : index
    %c0_142 = arith.constant 0 : index
    %342 = vector.load %arg2[%c1, %c0_142] : memref<9x32xf32, #tpu.memory_space<vmem>>, vector<1x32xf32>
    %343 = vector.broadcast %341 : vector<128x1xf32> to vector<128x32xf32>
    %344 = vector.broadcast %342 : vector<1x32xf32> to vector<128x32xf32>
    %345 = arith.mulf %343, %344 : vector<128x32xf32>
    %346 = arith.addf %339, %345 : vector<128x32xf32>
    %c7_i32_143 = arith.constant 7 : i32
    %347 = tpu.dynamic_rotate %331 by %c7_i32_143 dim 0 : vector<128x1xf32>, i32 -> vector<128x1xf32>
    %348 = arith.mulf %347, %60 : vector<128x1xf32>
    %c2 = arith.constant 2 : index
    %c0_144 = arith.constant 0 : index
    %349 = vector.load %arg2[%c2, %c0_144] : memref<9x32xf32, #tpu.memory_space<vmem>>, vector<1x32xf32>
    %350 = vector.broadcast %348 : vector<128x1xf32> to vector<128x32xf32>
    %351 = vector.broadcast %349 : vector<1x32xf32> to vector<128x32xf32>
    %352 = arith.mulf %350, %351 : vector<128x32xf32>
    %353 = arith.addf %346, %352 : vector<128x32xf32>
    %c1_i32_145 = arith.constant 1 : i32
    %354 = tpu.dynamic_rotate %331 by %c1_i32_145 dim 0 : vector<128x1xf32>, i32 -> vector<128x1xf32>
    %355 = arith.mulf %354, %78 : vector<128x1xf32>
    %c3 = arith.constant 3 : index
    %c0_146 = arith.constant 0 : index
    %356 = vector.load %arg2[%c3, %c0_146] : memref<9x32xf32, #tpu.memory_space<vmem>>, vector<1x32xf32>
    %357 = vector.broadcast %355 : vector<128x1xf32> to vector<128x32xf32>
    %358 = vector.broadcast %356 : vector<1x32xf32> to vector<128x32xf32>
    %359 = arith.mulf %357, %358 : vector<128x32xf32>
    %360 = arith.addf %353, %359 : vector<128x32xf32>
    %361 = arith.mulf %331, %96 : vector<128x1xf32>
    %c4 = arith.constant 4 : index
    %c0_147 = arith.constant 0 : index
    %362 = vector.load %arg2[%c4, %c0_147] : memref<9x32xf32, #tpu.memory_space<vmem>>, vector<1x32xf32>
    %363 = vector.broadcast %361 : vector<128x1xf32> to vector<128x32xf32>
    %364 = vector.broadcast %362 : vector<1x32xf32> to vector<128x32xf32>
    %365 = arith.mulf %363, %364 : vector<128x32xf32>
    %366 = arith.addf %360, %365 : vector<128x32xf32>
    %c127_i32 = arith.constant 127 : i32
    %367 = tpu.dynamic_rotate %331 by %c127_i32 dim 0 : vector<128x1xf32>, i32 -> vector<128x1xf32>
    %368 = arith.mulf %367, %114 : vector<128x1xf32>
    %c5 = arith.constant 5 : index
    %c0_148 = arith.constant 0 : index
    %369 = vector.load %arg2[%c5, %c0_148] : memref<9x32xf32, #tpu.memory_space<vmem>>, vector<1x32xf32>
    %370 = vector.broadcast %368 : vector<128x1xf32> to vector<128x32xf32>
    %371 = vector.broadcast %369 : vector<1x32xf32> to vector<128x32xf32>
    %372 = arith.mulf %370, %371 : vector<128x32xf32>
    %373 = arith.addf %366, %372 : vector<128x32xf32>
    %c121_i32 = arith.constant 121 : i32
    %374 = tpu.dynamic_rotate %331 by %c121_i32 dim 0 : vector<128x1xf32>, i32 -> vector<128x1xf32>
    %375 = arith.mulf %374, %132 : vector<128x1xf32>
    %c6 = arith.constant 6 : index
    %c0_149 = arith.constant 0 : index
    %376 = vector.load %arg2[%c6, %c0_149] : memref<9x32xf32, #tpu.memory_space<vmem>>, vector<1x32xf32>
    %377 = vector.broadcast %375 : vector<128x1xf32> to vector<128x32xf32>
    %378 = vector.broadcast %376 : vector<1x32xf32> to vector<128x32xf32>
    %379 = arith.mulf %377, %378 : vector<128x32xf32>
    %380 = arith.addf %373, %379 : vector<128x32xf32>
    %c120_i32 = arith.constant 120 : i32
    %381 = tpu.dynamic_rotate %331 by %c120_i32 dim 0 : vector<128x1xf32>, i32 -> vector<128x1xf32>
    %382 = arith.mulf %381, %150 : vector<128x1xf32>
    %c7 = arith.constant 7 : index
    %c0_150 = arith.constant 0 : index
    %383 = vector.load %arg2[%c7, %c0_150] : memref<9x32xf32, #tpu.memory_space<vmem>>, vector<1x32xf32>
    %384 = vector.broadcast %382 : vector<128x1xf32> to vector<128x32xf32>
    %385 = vector.broadcast %383 : vector<1x32xf32> to vector<128x32xf32>
    %386 = arith.mulf %384, %385 : vector<128x32xf32>
    %387 = arith.addf %380, %386 : vector<128x32xf32>
    %c119_i32 = arith.constant 119 : i32
    %388 = tpu.dynamic_rotate %331 by %c119_i32 dim 0 : vector<128x1xf32>, i32 -> vector<128x1xf32>
    %389 = arith.mulf %388, %168 : vector<128x1xf32>
    %c8 = arith.constant 8 : index
    %c0_151 = arith.constant 0 : index
    %390 = vector.load %arg2[%c8, %c0_151] : memref<9x32xf32, #tpu.memory_space<vmem>>, vector<1x32xf32>
    %391 = vector.broadcast %389 : vector<128x1xf32> to vector<128x32xf32>
    %392 = vector.broadcast %390 : vector<1x32xf32> to vector<128x32xf32>
    %393 = arith.mulf %391, %392 : vector<128x32xf32>
    %394 = arith.addf %387, %393 : vector<128x32xf32>
    %c0_152 = arith.constant 0 : index
    %c0_153 = arith.constant 0 : index
    %395 = vector.load %arg3[%c0_152, %c0_153] : memref<1x32xf32, #tpu.memory_space<vmem>>, vector<1x32xf32>
    %396 = vector.broadcast %395 : vector<1x32xf32> to vector<128x32xf32>
    %397 = arith.addf %394, %396 : vector<128x32xf32>
    %cst_154 = arith.constant 0.000000e+00 : f32
    %398 = vector.broadcast %cst_154 : f32 to vector<128x32xf32>
    %399 = arith.maximumf %397, %398 : vector<128x32xf32>
    %c9_i32_155 = arith.constant 9 : i32
    %400 = tpu.dynamic_rotate %399 by %c9_i32_155 dim 0 : vector<128x32xf32>, i32 -> vector<128x32xf32>
    %401 = vector.broadcast %24 : vector<128x1xf32> to vector<128x32xf32>
    %402 = arith.mulf %400, %401 : vector<128x32xf32>
    %403 = arith.truncf %402 : vector<128x32xf32> to vector<128x32xbf16>
    %c0_156 = arith.constant 0 : index
    %c0_157 = arith.constant 0 : index
    %404 = vector.load %arg13[%c0_156, %c0_157] : memref<128x288xbf16, #tpu.memory_space<vmem>>, vector<128x32xbf16>
    tpu.vector_store %arg13[%c0_156, %c0_157], %403 {strides = array<i32>} : memref<128x288xbf16, #tpu.memory_space<vmem>>, vector<128x32xbf16>,
    %c8_i32_158 = arith.constant 8 : i32
    %405 = tpu.dynamic_rotate %399 by %c8_i32_158 dim 0 : vector<128x32xf32>, i32 -> vector<128x32xf32>
    %406 = vector.broadcast %42 : vector<128x1xf32> to vector<128x32xf32>
    %407 = arith.mulf %405, %406 : vector<128x32xf32>
    %408 = arith.truncf %407 : vector<128x32xf32> to vector<128x32xbf16>
    %c0_159 = arith.constant 0 : index
    %c32 = arith.constant 32 : index
    %409 = vector.load %arg13[%c0_159, %c32] : memref<128x288xbf16, #tpu.memory_space<vmem>>, vector<128x32xbf16>
    tpu.vector_store %arg13[%c0_159, %c32], %408 {strides = array<i32>} : memref<128x288xbf16, #tpu.memory_space<vmem>>, vector<128x32xbf16>,
    %c7_i32_160 = arith.constant 7 : i32
    %410 = tpu.dynamic_rotate %399 by %c7_i32_160 dim 0 : vector<128x32xf32>, i32 -> vector<128x32xf32>
    %411 = vector.broadcast %60 : vector<128x1xf32> to vector<128x32xf32>
    %412 = arith.mulf %410, %411 : vector<128x32xf32>
    %413 = arith.truncf %412 : vector<128x32xf32> to vector<128x32xbf16>
    %c0_161 = arith.constant 0 : index
    %c64 = arith.constant 64 : index
    %414 = vector.load %arg13[%c0_161, %c64] : memref<128x288xbf16, #tpu.memory_space<vmem>>, vector<128x32xbf16>
    tpu.vector_store %arg13[%c0_161, %c64], %413 {strides = array<i32>} : memref<128x288xbf16, #tpu.memory_space<vmem>>, vector<128x32xbf16>,
    %c1_i32_162 = arith.constant 1 : i32
    %415 = tpu.dynamic_rotate %399 by %c1_i32_162 dim 0 : vector<128x32xf32>, i32 -> vector<128x32xf32>
    %416 = vector.broadcast %78 : vector<128x1xf32> to vector<128x32xf32>
    %417 = arith.mulf %415, %416 : vector<128x32xf32>
    %418 = arith.truncf %417 : vector<128x32xf32> to vector<128x32xbf16>
    %c0_163 = arith.constant 0 : index
    %c96 = arith.constant 96 : index
    %419 = vector.load %arg13[%c0_163, %c96] : memref<128x288xbf16, #tpu.memory_space<vmem>>, vector<128x32xbf16>
    tpu.vector_store %arg13[%c0_163, %c96], %418 {strides = array<i32>} : memref<128x288xbf16, #tpu.memory_space<vmem>>, vector<128x32xbf16>,
    %420 = vector.broadcast %96 : vector<128x1xf32> to vector<128x32xf32>
    %421 = arith.mulf %399, %420 : vector<128x32xf32>
    %422 = arith.truncf %421 : vector<128x32xf32> to vector<128x32xbf16>
    %c0_164 = arith.constant 0 : index
    %c128 = arith.constant 128 : index
    %423 = vector.load %arg13[%c0_164, %c128] : memref<128x288xbf16, #tpu.memory_space<vmem>>, vector<128x32xbf16>
    tpu.vector_store %arg13[%c0_164, %c128], %422 {strides = array<i32>} : memref<128x288xbf16, #tpu.memory_space<vmem>>, vector<128x32xbf16>,
    %c127_i32_165 = arith.constant 127 : i32
    %424 = tpu.dynamic_rotate %399 by %c127_i32_165 dim 0 : vector<128x32xf32>, i32 -> vector<128x32xf32>
    %425 = vector.broadcast %114 : vector<128x1xf32> to vector<128x32xf32>
    %426 = arith.mulf %424, %425 : vector<128x32xf32>
    %427 = arith.truncf %426 : vector<128x32xf32> to vector<128x32xbf16>
    %c0_166 = arith.constant 0 : index
    %c160 = arith.constant 160 : index
    %428 = vector.load %arg13[%c0_166, %c160] : memref<128x288xbf16, #tpu.memory_space<vmem>>, vector<128x32xbf16>
    tpu.vector_store %arg13[%c0_166, %c160], %427 {strides = array<i32>} : memref<128x288xbf16, #tpu.memory_space<vmem>>, vector<128x32xbf16>,
    %c121_i32_167 = arith.constant 121 : i32
    %429 = tpu.dynamic_rotate %399 by %c121_i32_167 dim 0 : vector<128x32xf32>, i32 -> vector<128x32xf32>
    %430 = vector.broadcast %132 : vector<128x1xf32> to vector<128x32xf32>
    %431 = arith.mulf %429, %430 : vector<128x32xf32>
    %432 = arith.truncf %431 : vector<128x32xf32> to vector<128x32xbf16>
    %c0_168 = arith.constant 0 : index
    %c192 = arith.constant 192 : index
    %433 = vector.load %arg13[%c0_168, %c192] : memref<128x288xbf16, #tpu.memory_space<vmem>>, vector<128x32xbf16>
    tpu.vector_store %arg13[%c0_168, %c192], %432 {strides = array<i32>} : memref<128x288xbf16, #tpu.memory_space<vmem>>, vector<128x32xbf16>,
    %c120_i32_169 = arith.constant 120 : i32
    %434 = tpu.dynamic_rotate %399 by %c120_i32_169 dim 0 : vector<128x32xf32>, i32 -> vector<128x32xf32>
    %435 = vector.broadcast %150 : vector<128x1xf32> to vector<128x32xf32>
    %436 = arith.mulf %434, %435 : vector<128x32xf32>
    %437 = arith.truncf %436 : vector<128x32xf32> to vector<128x32xbf16>
    %c0_170 = arith.constant 0 : index
    %c224 = arith.constant 224 : index
    %438 = vector.load %arg13[%c0_170, %c224] : memref<128x288xbf16, #tpu.memory_space<vmem>>, vector<128x32xbf16>
    tpu.vector_store %arg13[%c0_170, %c224], %437 {strides = array<i32>} : memref<128x288xbf16, #tpu.memory_space<vmem>>, vector<128x32xbf16>,
    %c119_i32_171 = arith.constant 119 : i32
    %439 = tpu.dynamic_rotate %399 by %c119_i32_171 dim 0 : vector<128x32xf32>, i32 -> vector<128x32xf32>
    %440 = vector.broadcast %168 : vector<128x1xf32> to vector<128x32xf32>
    %441 = arith.mulf %439, %440 : vector<128x32xf32>
    %442 = arith.truncf %441 : vector<128x32xf32> to vector<128x32xbf16>
    %c0_172 = arith.constant 0 : index
    %c256 = arith.constant 256 : index
    %443 = vector.load %arg13[%c0_172, %c256] : memref<128x288xbf16, #tpu.memory_space<vmem>>, vector<128x32xbf16>
    tpu.vector_store %arg13[%c0_172, %c256], %442 {strides = array<i32>} : memref<128x288xbf16, #tpu.memory_space<vmem>>, vector<128x32xbf16>,
    %c0_173 = arith.constant 0 : index
    %c0_174 = arith.constant 0 : index
    %444 = vector.load %arg13[%c0_173, %c0_174] : memref<128x288xbf16, #tpu.memory_space<vmem>>, vector<128x288xbf16>
    %c0_175 = arith.constant 0 : index
    %c0_176 = arith.constant 0 : index
    %445 = vector.load %arg4[%c0_175, %c0_176] : memref<288x64xbf16, #tpu.memory_space<vmem>>, vector<288x64xbf16>
    %cst_177 = arith.constant dense<0.000000e+00> : vector<128x64xf32>
    %446 = tpu.matmul %444, %445, %cst_177 {dimension_numbers = #tpu.dot_dimension_numbers<[1], [0], [0], [1], [0, 0, 1, 1], [], []>} : vector<128x288xbf16>, vector<288x64xbf16>, vector<128x64xf32> -> vector<128x64xf32>
    %c0_178 = arith.constant 0 : index
    %c0_179 = arith.constant 0 : index
    %447 = vector.load %arg5[%c0_178, %c0_179] : memref<1x64xf32, #tpu.memory_space<vmem>>, vector<1x64xf32>
    %448 = vector.broadcast %447 : vector<1x64xf32> to vector<128x64xf32>
    %449 = arith.addf %446, %448 : vector<128x64xf32>
    %cst_180 = arith.constant 0.000000e+00 : f32
    %450 = vector.broadcast %cst_180 : f32 to vector<128x64xf32>
    %451 = arith.maximumf %449, %450 : vector<128x64xf32>
    %c127_i32_181 = arith.constant 127 : i32
    %452 = tpu.dynamic_rotate %451 by %c127_i32_181 dim 0 : vector<128x64xf32>, i32 -> vector<128x64xf32>
    %453 = arith.maximumf %451, %452 : vector<128x64xf32>
    %c120_i32_182 = arith.constant 120 : i32
    %454 = tpu.dynamic_rotate %451 by %c120_i32_182 dim 0 : vector<128x64xf32>, i32 -> vector<128x64xf32>
    %c119_i32_183 = arith.constant 119 : i32
    %455 = tpu.dynamic_rotate %451 by %c119_i32_183 dim 0 : vector<128x64xf32>, i32 -> vector<128x64xf32>
    %456 = arith.maximumf %454, %455 : vector<128x64xf32>
    %457 = arith.maximumf %453, %456 : vector<128x64xf32>
    %c18_i32 = arith.constant 18 : i32
    %458 = tpu.dynamic_rotate %457 by %c18_i32 dim 0 : vector<128x64xf32>, i32 -> vector<128x64xf32>
    %459 = vector.broadcast %186 : vector<128x1xf32> to vector<128x64xf32>
    %460 = arith.mulf %458, %459 : vector<128x64xf32>
    %461 = arith.truncf %460 : vector<128x64xf32> to vector<128x64xbf16>
    %c0_184 = arith.constant 0 : index
    %c0_185 = arith.constant 0 : index
    %462 = vector.load %arg14[%c0_184, %c0_185] : memref<128x576xbf16, #tpu.memory_space<vmem>>, vector<128x64xbf16>
    tpu.vector_store %arg14[%c0_184, %c0_185], %461 {strides = array<i32>} : memref<128x576xbf16, #tpu.memory_space<vmem>>, vector<128x64xbf16>,
    %c16_i32 = arith.constant 16 : i32
    %463 = tpu.dynamic_rotate %457 by %c16_i32 dim 0 : vector<128x64xf32>, i32 -> vector<128x64xf32>
    %464 = vector.broadcast %204 : vector<128x1xf32> to vector<128x64xf32>
    %465 = arith.mulf %463, %464 : vector<128x64xf32>
    %466 = arith.truncf %465 : vector<128x64xf32> to vector<128x64xbf16>
    %c0_186 = arith.constant 0 : index
    %c64_187 = arith.constant 64 : index
    %467 = vector.load %arg14[%c0_186, %c64_187] : memref<128x576xbf16, #tpu.memory_space<vmem>>, vector<128x64xbf16>
    tpu.vector_store %arg14[%c0_186, %c64_187], %466 {strides = array<i32>} : memref<128x576xbf16, #tpu.memory_space<vmem>>, vector<128x64xbf16>,
    %c14_i32 = arith.constant 14 : i32
    %468 = tpu.dynamic_rotate %457 by %c14_i32 dim 0 : vector<128x64xf32>, i32 -> vector<128x64xf32>
    %469 = vector.broadcast %222 : vector<128x1xf32> to vector<128x64xf32>
    %470 = arith.mulf %468, %469 : vector<128x64xf32>
    %471 = arith.truncf %470 : vector<128x64xf32> to vector<128x64xbf16>
    %c0_188 = arith.constant 0 : index
    %c128_189 = arith.constant 128 : index
    %472 = vector.load %arg14[%c0_188, %c128_189] : memref<128x576xbf16, #tpu.memory_space<vmem>>, vector<128x64xbf16>
    tpu.vector_store %arg14[%c0_188, %c128_189], %471 {strides = array<i32>} : memref<128x576xbf16, #tpu.memory_space<vmem>>, vector<128x64xbf16>,
    %c2_i32_190 = arith.constant 2 : i32
    %473 = tpu.dynamic_rotate %457 by %c2_i32_190 dim 0 : vector<128x64xf32>, i32 -> vector<128x64xf32>
    %474 = vector.broadcast %240 : vector<128x1xf32> to vector<128x64xf32>
    %475 = arith.mulf %473, %474 : vector<128x64xf32>
    %476 = arith.truncf %475 : vector<128x64xf32> to vector<128x64xbf16>
    %c0_191 = arith.constant 0 : index
    %c192_192 = arith.constant 192 : index
    %477 = vector.load %arg14[%c0_191, %c192_192] : memref<128x576xbf16, #tpu.memory_space<vmem>>, vector<128x64xbf16>
    tpu.vector_store %arg14[%c0_191, %c192_192], %476 {strides = array<i32>} : memref<128x576xbf16, #tpu.memory_space<vmem>>, vector<128x64xbf16>,
    %478 = vector.broadcast %258 : vector<128x1xf32> to vector<128x64xf32>
    %479 = arith.mulf %457, %478 : vector<128x64xf32>
    %480 = arith.truncf %479 : vector<128x64xf32> to vector<128x64xbf16>
    %c0_193 = arith.constant 0 : index
    %c256_194 = arith.constant 256 : index
    %481 = vector.load %arg14[%c0_193, %c256_194] : memref<128x576xbf16, #tpu.memory_space<vmem>>, vector<128x64xbf16>
    tpu.vector_store %arg14[%c0_193, %c256_194], %480 {strides = array<i32>} : memref<128x576xbf16, #tpu.memory_space<vmem>>, vector<128x64xbf16>,
    %c126_i32 = arith.constant 126 : i32
    %482 = tpu.dynamic_rotate %457 by %c126_i32 dim 0 : vector<128x64xf32>, i32 -> vector<128x64xf32>
    %483 = vector.broadcast %276 : vector<128x1xf32> to vector<128x64xf32>
    %484 = arith.mulf %482, %483 : vector<128x64xf32>
    %485 = arith.truncf %484 : vector<128x64xf32> to vector<128x64xbf16>
    %c0_195 = arith.constant 0 : index
    %c320 = arith.constant 320 : index
    %486 = vector.load %arg14[%c0_195, %c320] : memref<128x576xbf16, #tpu.memory_space<vmem>>, vector<128x64xbf16>
    tpu.vector_store %arg14[%c0_195, %c320], %485 {strides = array<i32>} : memref<128x576xbf16, #tpu.memory_space<vmem>>, vector<128x64xbf16>,
    %c114_i32 = arith.constant 114 : i32
    %487 = tpu.dynamic_rotate %457 by %c114_i32 dim 0 : vector<128x64xf32>, i32 -> vector<128x64xf32>
    %488 = vector.broadcast %294 : vector<128x1xf32> to vector<128x64xf32>
    %489 = arith.mulf %487, %488 : vector<128x64xf32>
    %490 = arith.truncf %489 : vector<128x64xf32> to vector<128x64xbf16>
    %c0_196 = arith.constant 0 : index
    %c384 = arith.constant 384 : index
    %491 = vector.load %arg14[%c0_196, %c384] : memref<128x576xbf16, #tpu.memory_space<vmem>>, vector<128x64xbf16>
    tpu.vector_store %arg14[%c0_196, %c384], %490 {strides = array<i32>} : memref<128x576xbf16, #tpu.memory_space<vmem>>, vector<128x64xbf16>,
    %c112_i32 = arith.constant 112 : i32
    %492 = tpu.dynamic_rotate %457 by %c112_i32 dim 0 : vector<128x64xf32>, i32 -> vector<128x64xf32>
    %493 = vector.broadcast %312 : vector<128x1xf32> to vector<128x64xf32>
    %494 = arith.mulf %492, %493 : vector<128x64xf32>
    %495 = arith.truncf %494 : vector<128x64xf32> to vector<128x64xbf16>
    %c0_197 = arith.constant 0 : index
    %c448 = arith.constant 448 : index
    %496 = vector.load %arg14[%c0_197, %c448] : memref<128x576xbf16, #tpu.memory_space<vmem>>, vector<128x64xbf16>
    tpu.vector_store %arg14[%c0_197, %c448], %495 {strides = array<i32>} : memref<128x576xbf16, #tpu.memory_space<vmem>>, vector<128x64xbf16>,
    %c110_i32 = arith.constant 110 : i32
    %497 = tpu.dynamic_rotate %457 by %c110_i32 dim 0 : vector<128x64xf32>, i32 -> vector<128x64xf32>
    %498 = vector.broadcast %330 : vector<128x1xf32> to vector<128x64xf32>
    %499 = arith.mulf %497, %498 : vector<128x64xf32>
    %500 = arith.truncf %499 : vector<128x64xf32> to vector<128x64xbf16>
    %c0_198 = arith.constant 0 : index
    %c512 = arith.constant 512 : index
    %501 = vector.load %arg14[%c0_198, %c512] : memref<128x576xbf16, #tpu.memory_space<vmem>>, vector<128x64xbf16>
    tpu.vector_store %arg14[%c0_198, %c512], %500 {strides = array<i32>} : memref<128x576xbf16, #tpu.memory_space<vmem>>, vector<128x64xbf16>,
    %c0_199 = arith.constant 0 : index
    %c0_200 = arith.constant 0 : index
    %502 = vector.load %arg14[%c0_199, %c0_200] : memref<128x576xbf16, #tpu.memory_space<vmem>>, vector<128x576xbf16>
    %c0_201 = arith.constant 0 : index
    %c0_202 = arith.constant 0 : index
    %503 = vector.load %arg6[%c0_201, %c0_202] : memref<576x64xbf16, #tpu.memory_space<vmem>>, vector<576x64xbf16>
    %cst_203 = arith.constant dense<0.000000e+00> : vector<128x64xf32>
    %504 = tpu.matmul %502, %503, %cst_203 {dimension_numbers = #tpu.dot_dimension_numbers<[1], [0], [0], [1], [0, 0, 1, 1], [], []>} : vector<128x576xbf16>, vector<576x64xbf16>, vector<128x64xf32> -> vector<128x64xf32>
    %c0_204 = arith.constant 0 : index
    %c0_205 = arith.constant 0 : index
    %505 = vector.load %arg7[%c0_204, %c0_205] : memref<1x64xf32, #tpu.memory_space<vmem>>, vector<1x64xf32>
    %506 = vector.broadcast %505 : vector<1x64xf32> to vector<128x64xf32>
    %507 = arith.addf %504, %506 : vector<128x64xf32>
    %cst_206 = arith.constant 0.000000e+00 : f32
    %508 = vector.broadcast %cst_206 : f32 to vector<128x64xf32>
    %509 = arith.maximumf %507, %508 : vector<128x64xf32>
    %c126_i32_207 = arith.constant 126 : i32
    %510 = tpu.dynamic_rotate %509 by %c126_i32_207 dim 0 : vector<128x64xf32>, i32 -> vector<128x64xf32>
    %511 = arith.maximumf %509, %510 : vector<128x64xf32>
    %c112_i32_208 = arith.constant 112 : i32
    %512 = tpu.dynamic_rotate %509 by %c112_i32_208 dim 0 : vector<128x64xf32>, i32 -> vector<128x64xf32>
    %c110_i32_209 = arith.constant 110 : i32
    %513 = tpu.dynamic_rotate %509 by %c110_i32_209 dim 0 : vector<128x64xf32>, i32 -> vector<128x64xf32>
    %514 = arith.maximumf %512, %513 : vector<128x64xf32>
    %515 = arith.maximumf %511, %514 : vector<128x64xf32>
    %c0_210 = arith.constant 0 : index
    %c0_211 = arith.constant 0 : index
    %516 = vector.load %arg15[%c0_210, %c0_211] : memref<128x64xf32, #tpu.memory_space<vmem>>, vector<128x64xf32>
    tpu.vector_store %arg15[%c0_210, %c0_211], %515 {strides = array<i32>} : memref<128x64xf32, #tpu.memory_space<vmem>>, vector<128x64xf32>,
    %cst_212 = arith.constant 0.000000e+00 : f32
    %517 = vector.broadcast %cst_212 : f32 to vector<2x256xf32>
    %c0_213 = arith.constant 0 : index
    %c0_214 = arith.constant 0 : index
    %518 = vector.load %arg9[%c0_213, %c0_214] : memref<1x256xf32, #tpu.memory_space<vmem>>, vector<1x256xf32>
    %519 = vector.broadcast %518 : vector<1x256xf32> to vector<2x256xf32>
    %520 = arith.addf %517, %519 : vector<2x256xf32>
    %c0_215 = arith.constant 0 : index
    %c0_216 = arith.constant 0 : index
    %521 = tpu.strided_load %arg15[%c0_215, %c0_216] {strides = array<i32: 64, 1>} : memref<128x64xf32, #tpu.memory_space<vmem>>, vector<2x64xf32>
    %522 = arith.truncf %521 : vector<2x64xf32> to vector<2x64xbf16>
    %c0_217 = arith.constant 0 : index
    %c0_218 = arith.constant 0 : index
    %523 = vector.load %arg8[%c0_217, %c0_218] : memref<256x256xbf16, #tpu.memory_space<vmem>>, vector<64x256xbf16>
    %cst_219 = arith.constant dense<0.000000e+00> : vector<2x256xf32>
    %524 = tpu.matmul %522, %523, %cst_219 {dimension_numbers = #tpu.dot_dimension_numbers<[1], [0], [0], [1], [0, 0, 1, 1], [], []>} : vector<2x64xbf16>, vector<64x256xbf16>, vector<2x256xf32> -> vector<2x256xf32>
    %525 = arith.addf %520, %524 : vector<2x256xf32>
    %c4_220 = arith.constant 4 : index
    %c0_221 = arith.constant 0 : index
    %526 = tpu.strided_load %arg15[%c4_220, %c0_221] {strides = array<i32: 64, 1>} : memref<128x64xf32, #tpu.memory_space<vmem>>, vector<2x64xf32>
    %527 = arith.truncf %526 : vector<2x64xf32> to vector<2x64xbf16>
    %c64_222 = arith.constant 64 : index
    %c0_223 = arith.constant 0 : index
    %528 = vector.load %arg8[%c64_222, %c0_223] : memref<256x256xbf16, #tpu.memory_space<vmem>>, vector<64x256xbf16>
    %cst_224 = arith.constant dense<0.000000e+00> : vector<2x256xf32>
    %529 = tpu.matmul %527, %528, %cst_224 {dimension_numbers = #tpu.dot_dimension_numbers<[1], [0], [0], [1], [0, 0, 1, 1], [], []>} : vector<2x64xbf16>, vector<64x256xbf16>, vector<2x256xf32> -> vector<2x256xf32>
    %530 = arith.addf %525, %529 : vector<2x256xf32>
    %c32_225 = arith.constant 32 : index
    %c0_226 = arith.constant 0 : index
    %531 = tpu.strided_load %arg15[%c32_225, %c0_226] {strides = array<i32: 64, 1>} : memref<128x64xf32, #tpu.memory_space<vmem>>, vector<2x64xf32>
    %532 = arith.truncf %531 : vector<2x64xf32> to vector<2x64xbf16>
    %c128_227 = arith.constant 128 : index
    %c0_228 = arith.constant 0 : index
    %533 = vector.load %arg8[%c128_227, %c0_228] : memref<256x256xbf16, #tpu.memory_space<vmem>>, vector<64x256xbf16>
    %cst_229 = arith.constant dense<0.000000e+00> : vector<2x256xf32>
    %534 = tpu.matmul %532, %533, %cst_229 {dimension_numbers = #tpu.dot_dimension_numbers<[1], [0], [0], [1], [0, 0, 1, 1], [], []>} : vector<2x64xbf16>, vector<64x256xbf16>, vector<2x256xf32> -> vector<2x256xf32>
    %535 = arith.addf %530, %534 : vector<2x256xf32>
    %c36 = arith.constant 36 : index
    %c0_230 = arith.constant 0 : index
    %536 = tpu.strided_load %arg15[%c36, %c0_230] {strides = array<i32: 64, 1>} : memref<128x64xf32, #tpu.memory_space<vmem>>, vector<2x64xf32>
    %537 = arith.truncf %536 : vector<2x64xf32> to vector<2x64xbf16>
    %c192_231 = arith.constant 192 : index
    %c0_232 = arith.constant 0 : index
    %538 = vector.load %arg8[%c192_231, %c0_232] : memref<256x256xbf16, #tpu.memory_space<vmem>>, vector<64x256xbf16>
    %cst_233 = arith.constant dense<0.000000e+00> : vector<2x256xf32>
    %539 = tpu.matmul %537, %538, %cst_233 {dimension_numbers = #tpu.dot_dimension_numbers<[1], [0], [0], [1], [0, 0, 1, 1], [], []>} : vector<2x64xbf16>, vector<64x256xbf16>, vector<2x256xf32> -> vector<2x256xf32>
    %540 = arith.addf %535, %539 : vector<2x256xf32>
    %cst_234 = arith.constant 0.000000e+00 : f32
    %541 = vector.broadcast %cst_234 : f32 to vector<2x256xf32>
    %542 = arith.maximumf %540, %541 : vector<2x256xf32>
    %543 = arith.truncf %542 : vector<2x256xf32> to vector<2x256xbf16>
    %c0_235 = arith.constant 0 : index
    %c0_236 = arith.constant 0 : index
    %544 = vector.load %arg10[%c0_235, %c0_236] : memref<256x128xbf16, #tpu.memory_space<vmem>>, vector<256x128xbf16>
    %cst_237 = arith.constant dense<0.000000e+00> : vector<2x128xf32>
    %545 = tpu.matmul %543, %544, %cst_237 {dimension_numbers = #tpu.dot_dimension_numbers<[1], [0], [0], [1], [0, 0, 1, 1], [], []>} : vector<2x256xbf16>, vector<256x128xbf16>, vector<2x128xf32> -> vector<2x128xf32>
    %c0_238 = arith.constant 0 : index
    %c0_239 = arith.constant 0 : index
    %546 = vector.load %arg11[%c0_238, %c0_239] : memref<1x128xf32, #tpu.memory_space<vmem>>, vector<1x128xf32>
    %547 = vector.broadcast %546 : vector<1x128xf32> to vector<2x128xf32>
    %548 = arith.addf %545, %547 : vector<2x128xf32>
    %c0_240 = arith.constant 0 : index
    %c0_241 = arith.constant 0 : index
    %549 = vector.load %arg12[%c0_240, %c0_241] : memref<2x128xf32, #tpu.memory_space<vmem>>, vector<2x128xf32>
    tpu.vector_store %arg12[%c0_240, %c0_241], %548 {strides = array<i32>} : memref<2x128xf32, #tpu.memory_space<vmem>>, vector<2x128xf32>,
    return
  }
  func.func @transform_0(%arg0: i32) -> (i32, i32) {
    %c0_i32 = arith.constant 0 : i32
    %c0_i32_0 = arith.constant 0 : i32
    return %arg0, %c0_i32 : i32, i32
  }
  func.func @transform_1(%arg0: i32) -> (i32, i32) {
    %c0_i32 = arith.constant 0 : i32
    %c0_i32_0 = arith.constant 0 : i32
    %c0_i32_1 = arith.constant 0 : i32
    return %c0_i32, %c0_i32_0 : i32, i32
  }
  func.func @transform_2(%arg0: i32) -> (i32, i32) {
    %c0_i32 = arith.constant 0 : i32
    %c0_i32_0 = arith.constant 0 : i32
    %c0_i32_1 = arith.constant 0 : i32
    return %c0_i32, %c0_i32_0 : i32, i32
  }
  func.func @transform_3(%arg0: i32) -> (i32, i32) {
    %c0_i32 = arith.constant 0 : i32
    %c0_i32_0 = arith.constant 0 : i32
    %c0_i32_1 = arith.constant 0 : i32
    return %c0_i32, %c0_i32_0 : i32, i32
  }
  func.func @transform_4(%arg0: i32) -> (i32, i32) {
    %c0_i32 = arith.constant 0 : i32
    %c0_i32_0 = arith.constant 0 : i32
    %c0_i32_1 = arith.constant 0 : i32
    return %c0_i32, %c0_i32_0 : i32, i32
  }
  func.func @transform_5(%arg0: i32) -> (i32, i32) {
    %c0_i32 = arith.constant 0 : i32
    %c0_i32_0 = arith.constant 0 : i32
    %c0_i32_1 = arith.constant 0 : i32
    return %c0_i32, %c0_i32_0 : i32, i32
  }
  func.func @transform_6(%arg0: i32) -> (i32, i32) {
    %c0_i32 = arith.constant 0 : i32
    %c0_i32_0 = arith.constant 0 : i32
    %c0_i32_1 = arith.constant 0 : i32
    return %c0_i32, %c0_i32_0 : i32, i32
  }
  func.func @transform_7(%arg0: i32) -> (i32, i32) {
    %c0_i32 = arith.constant 0 : i32
    %c0_i32_0 = arith.constant 0 : i32
    %c0_i32_1 = arith.constant 0 : i32
    return %c0_i32, %c0_i32_0 : i32, i32
  }
  func.func @transform_8(%arg0: i32) -> (i32, i32) {
    %c0_i32 = arith.constant 0 : i32
    %c0_i32_0 = arith.constant 0 : i32
    %c0_i32_1 = arith.constant 0 : i32
    return %c0_i32, %c0_i32_0 : i32, i32
  }
  func.func @transform_9(%arg0: i32) -> (i32, i32) {
    %c0_i32 = arith.constant 0 : i32
    %c0_i32_0 = arith.constant 0 : i32
    %c0_i32_1 = arith.constant 0 : i32
    return %c0_i32, %c0_i32_0 : i32, i32
  }
  func.func @transform_10(%arg0: i32) -> (i32, i32) {
    %c0_i32 = arith.constant 0 : i32
    %c0_i32_0 = arith.constant 0 : i32
    %c0_i32_1 = arith.constant 0 : i32
    return %c0_i32, %c0_i32_0 : i32, i32
  }
  func.func @transform_11(%arg0: i32) -> (i32, i32) {
    %c0_i32 = arith.constant 0 : i32
    %c0_i32_0 = arith.constant 0 : i32
    return %arg0, %c0_i32 : i32, i32
  }
}

</mosaic_0001>

<bundles_post_ra>
// kernel: snake_net_forward.1
= control target key start
LH: loop header
LB: loop body
LE: loop exit
PB: predicated region body
PF: predicated region fallthrough
CT: control target
= control target key end

     0   :  { %v40_v0 = vlaneseq  ;;  %v13787_v1 = vmov 0   ;;  %v13804_v29 = vmov 0.0   ;;  %s13770_s0 = inlined_call_operand.vmem [shape: f32[128,1], index: 0, kind: input, shape index: {}]   ;;  %s13771_s1 = inlined_call_operand.vmem [shape: f32[9,32], index: 1, kind: input, shape index: {}]   ;;  %s13772_s2 = inlined_call_operand.vmem [shape: f32[1,32], index: 2, kind: input, shape index: {}]   ;;  %s13773_s3 = inlined_call_operand.vmem [shape: bf16[288,64], index: 3, kind: input, shape index: {}]   ;;  %s13774_s4 = inlined_call_operand.vmem [shape: f32[1,64], index: 4, kind: input, shape index: {}]   ;;  %s13775_s5 = inlined_call_operand.vmem [shape: bf16[576,64], index: 5, kind: input, shape index: {}]   ;;  %s13776_s6 = inlined_call_operand.vmem [shape: f32[1,64], index: 6, kind: input, shape index: {}]   ;;  %s13777_s7 = inlined_call_operand.vmem [shape: bf16[256,256], index: 7, kind: input, shape index: {}]   ;;  %s13778_s8 = inlined_call_operand.vmem [shape: f32[1,256], index: 8, kind: input, shape index: {}]   ;;  %s13779_s9 = inlined_call_operand.vmem [shape: bf16[256,128], index: 9, kind: input, shape index: {}]   ;;  %s13780_s10 = inlined_call_operand.vmem [shape: f32[1,128], index: 10, kind: input, shape index: {}]   ;;  %s13781_s11 = inlined_call_operand.hbm [shape: f32[2,128], index: 11, kind: output, shape index: {}]  }
   0x1   :  { %6152 = vset.pattern.permute.xlu1 %v13787_v1  ;;  %6153 = vset.pattern.permute.xlu0 %v13787_v1  ;;  %v6381_v2 = vld [vmem:[%s13770_s0 + $0x70] sm:$0xff]  ;;  %v6388_v4 = vld [vmem:[%s13770_s0 + $0x78] sm:$0xff]  ;;  %v6398_v8 = vld [vmem:[%s13770_s0] sm:$0xff] }
   0x2   :  { %14343 = vst [vmem:[#allocation8_spill] sm:$0xff] %v6381_v2  ;;  %v6383_v3 = vshrl.u32 %v40_v0, 7  ;;  %v1575_v7 = vrot.slane %v6381_v2, 7  ;;  %v1576_v9 = vrot.slane %v6388_v4, 7  ;;  %v1860_v16 = vrot.slane %v6398_v8, 1  ;;  %v6440_v27 = vld [vmem:[%s13770_s0 + $0x8] sm:$0xff] }
   0x3   :  { %v1875_v17 = vrot.slane %v6388_v4, 1  ;;  %v13792_v33 = vrot.slane %v6440_v27, 7  ;;  %v6457_v34 = vld [vmem:[%s13770_s0 + $0x68] sm:$0xff]  ;;  %v1561_v38 = vrot.slane %v6398_v8, 7  ;;  %v1861_v42 = vrot.slane %v6440_v27, 1  ;;  %v6548_v60 = vld [vmem:[%s13770_s0 + $0x10] sm:$0xff] }
   0x4   :  { %14344 = vst [vmem:[#allocation9_spill] sm:$0xff] %v6383_v3  ;;  %v73_v5 = vshra.s32 %v6383_v3, 3  ;;  %v6392_v6 = vand.u32 7, %v6383_v3  ;;  %v43_v10 = vadd.s32 16, %v6383_v3  ;;  %v6411_v14 = vadd.s32 120, %v6383_v3 }
   0x5   :  { %v42_v18 = vadd.s32 8, %v6383_v3  ;;  %vm13836_vm0 = vcmp.lt.s32.totalorder %v6383_v3, 7  ;;  %vm13784_vm1 = vcmp.lt.s32.totalorder %v6383_v3, 1  ;;  %v13790_v46 = vrot.slane %v6457_v34, 7 }
   0x6   :  { %14345 = vst [vmem:[#allocation10_spill] sm:$0xff] %v6392_v6  ;;  %v6402_v11 = vand.u32 7, %v73_v5  ;;  %v6405_v12 = vadd.s32 4294967295, %v6392_v6  ;;  %v6408_v13 = vadd.s32 1, %v6392_v6  ;;  %v75_v15 = vshra.s32 %v43_v10, 3 }
   0x7   :  { %v88_v20 = vshra.s32 %v6411_v14, 3  ;;  %v74_v22 = vshra.s32 %v42_v18, 3  ;;  %v6426_v24 = vand.u32 7, %v43_v10  ;;  %v6434_v25 = vsel %vm13784_vm1, %v1575_v7, %v1576_v9 }
   0x8   :  { %14346 = vst [vmem:[#allocation11_spill] sm:$0xff] %v6402_v11  ;;  %v105_v19 = vadd.s32 4294967295, %v6402_v11  ;;  %vm185_vm2 = vcmp.ge.s32.totalorder %v6405_v12, 0  ;;  %v6421_v21 = vand.u32 7, %v75_v15  ;;  %vm13782_vm3 = vcmp.le.s32.totalorder %v6408_v13, 7  ;;  %14350 = vst [vmem:[#allocation15_spill] sm:$0xff] %v6434_v25 }
   0x9   :  { %v6424_v23 = vand.u32 7, %v88_v20  ;;  %14349 = vst [vmem:[#allocation14_spill] sm:$0xff] %v6426_v24  ;;  %v6442_v28 = vand.u32 7, %v74_v22  ;;  %v6451_v32 = vadd.s32 4294967295, %v6426_v24  ;;  %v6472_v37 = vsel %vm13836_vm0, %v1875_v17, %v1860_v16 }
   0xa   :  { %14347 = vst [vmem:[#allocation12_spill] sm:$0xff] %v6421_v21  ;;  %vm137_vm4 = vcmp.ge.s32.totalorder %v105_v19, 0  ;;  %vm153_vm5 = vcmp.le.s32.totalorder %v105_v19, 7  ;;  %v107_v26 = vadd.s32 4294967295, %v6421_v21  ;;  %14354 = vst [vmem:[#allocation19_spill] sm:$0xff] %v6472_v37  ;;  %v6489_v45 = vand.u32 7, %v42_v18 }
   0xb   :  { %14348 = vst [vmem:[#allocation13_spill] sm:$0xff] %v6424_v23  ;;  %vm169_vm6 = vmand %vm137_vm4, %vm153_vm5  ;;  %v120_v31 = vadd.s32 4294967295, %v6424_v23  ;;  %v106_v41 = vadd.s32 4294967295, %v6442_v28  ;;  %vm13803_vm14 = vcmp.ge.s32.totalorder %v6451_v32, 0  ;;  %v6533_v56 = vsel %vm13784_vm1, %v1561_v38, %v13792_v33 }
   0xc   :  { %14351 = vst [vmem:[#allocation16_spill] sm:$0xff] %v6442_v28  ;;  %v6445_v30 = vsel %vm169_vm6, 1.0, %v13804_v29  ;;  %vm201_vm7 = vmand %vm169_vm6, %vm185_vm2  ;;  %vm139_vm9 = vcmp.ge.s32.totalorder %v107_v26, 0  ;;  %vm155_vm10 = vcmp.le.s32.totalorder %v107_v26, 7  ;;  %v6513_v52 = vadd.s32 4294967295, %v6489_v45 }
   0xd   :  { %14352 = vst [vmem:[#allocation17_spill] sm:$0xff] %v6445_v30  ;;  %v1727_v35 = vmul.f32 %v6388_v4, %v6445_v30  ;;  %v6462_v36 = vsel %vm201_vm7, 1.0, %v13804_v29  ;;  %vm409_vm8 = vmand %vm169_vm6, %vm13782_vm3  ;;  %vm152_vm11 = vcmp.ge.s32.totalorder %v120_v31, 0  ;;  %vm168_vm12 = vcmp.le.s32.totalorder %v120_v31, 7 }
   0xe   :  { %14353 = vst [vmem:[#allocation18_spill] sm:$0xff] %v6462_v36  ;;  %v1594_v39 = vmul.f32 %v6434_v25, %v6462_v36  ;;  %v6478_v40 = vsel %vm409_vm8, 1.0, %v13804_v29  ;;  %vm6482_vm13 = vmand %vm139_vm9, %vm155_vm10  ;;  %vm138_vm4 = vcmp.ge.s32.totalorder %v106_v41, 0  ;;  %vm154_vm5 = vcmp.le.s32.totalorder %v106_v41, 7 }
   0xf   :  { %14355 = vst [vmem:[#allocation20_spill] sm:$0xff] %v6478_v40  ;;  %1746 = vperm.xlu1 %6152, %v1727_v35   ;;  %v1893_v44 = vmul.f32 %v6472_v37, %v6478_v40  ;;  %14358 = vst [vmem:[#allocation21_spill] sm:$0xff] %v6489_v45  ;;  %v6495_v47 = vsel %vm6482_vm13, 1.0, %v13804_v29  ;;  %v6516_v53 = vadd.s32 1, %v6489_v45  ;;  %v6536_v57 = vand.u32 7, %v6411_v14 }
  0x10   :  { %1613 = vperm.xlu0 %6153, %v1594_v39   ;;  %14359 = vst [vmem:[#allocation22_spill] sm:$0xff] %v6495_v47  ;;  %vm6497_vm15 = vmand %vm152_vm11, %vm168_vm12  ;;  %v1729_v49 = vmul.f32 %v6440_v27, %v6495_v47  ;;  %vm186_vm8 = vcmp.ge.s32.totalorder %v6513_v52, 0  ;;  %v6558_v61 = vsel %vm13784_vm1, %v1576_v9, %v1561_v38  ;;  %v13789_v5 = vrot.slane %v6381_v2, 1 }
  0x11   :  { %v6506_v50 = vsel %vm6497_vm15, 1.0, %v13804_v29  ;;  %vm6508_vm6 = vmand %vm138_vm4, %vm154_vm5  ;;  %14366 = vst [vmem:[#allocation25_spill] sm:$0xff] %v6536_v57  ;;  %vm13783_vm9 = vcmp.le.s32.totalorder %v6516_v53, 7  ;;  %v6561_v62 = vadd.s32 4294967295, %v6536_v57  ;;  %v6564_v63 = vadd.s32 1, %v6536_v57 }
  0x12   :  { %14362 = vst [vmem:[#allocation23_spill] sm:$0xff] %v6506_v50  ;;  %v1742_v54 = vmul.f32 %v6381_v2, %v6506_v50  ;;  %v6523_v55 = vsel %vm6508_vm6, 1.0, %v13804_v29  ;;  %vm203_vm7 = vmand %vm6482_vm13, %vm13803_vm14  ;;  %v6575_v10 = vadd.s32 1, %v6426_v24  ;;  %v13791_v14 = vrot.slane %v6548_v60, 1 }
  0x13   :  { %14365 = vst [vmem:[#allocation24_spill] sm:$0xff] %v6523_v55  ;;  %1756 = vperm.xlu1 %6152, %v1729_v49   ;;  %v1728_v58 = vmul.f32 %v6398_v8, %v6523_v55  ;;  %v6541_v59 = vsel %vm203_vm7, 1.0, %v13804_v29  ;;  %vm202_vm10 = vmand %vm6508_vm6, %vm186_vm8  ;;  %vm13797_vm12 = vcmp.ge.s32.totalorder %v6561_v62, 0  ;;  %vm13837_vm4 = vcmp.le.s32.totalorder %v6564_v63, 7 }
  0x14   :  { %1912 = vperm.xlu0 %6153, %v1893_v44   ;;  %14367 = vst [vmem:[#allocation26_spill] sm:$0xff] %v6541_v59  ;;  %v6567_v0 = vsel %vm202_vm10, 1.0, %v13804_v29  ;;  %vm410_vm11 = vmand %vm6508_vm6, %vm13783_vm9  ;;  %v1596_v9 = vmul.f32 %v6533_v56, %v6541_v59  ;;  %vm395_vm6 = vcmp.le.s32.totalorder %v6575_v10, 7  ;;  %vm13785_vm7 = vcmp.ge.s32.totalorder %v6442_v28, 0 }
  0x15   :  { %14368 = vst [vmem:[#allocation27_spill] sm:$0xff] %v6567_v0  ;;  %v1595_v15 = vmul.f32 %v6558_v61, %v6567_v0  ;;  %vm216_vm5 = vmand %vm6497_vm15, %vm13797_vm12  ;;  %vm458_vm10 = vcmp.le.s32.totalorder %v6442_v28, 7  ;;  %v6592_v18 = vsel %vm410_vm11, 1.0, %v13804_v29  ;;  %v6600_v19 = vsel %vm13836_vm0, %v1860_v16, %v1861_v42 }
  0x16   :  { %14369 = vst [vmem:[#allocation28_spill] sm:$0xff] %v6592_v18  ;;  %v6603_v20 = vsel %vm216_vm5, 1.0, %v13804_v29  ;;  %v6611_v22 = vsel %vm13784_vm1, %v13790_v46, %v1575_v7  ;;  %vm424_vm11 = vmand %vm6497_vm15, %vm13837_vm4  ;;  %vm13786_vm9 = vcmp.ge.s32.totalorder %v6402_v11, 0  ;;  %vm457_vm1 = vcmp.le.s32.totalorder %v6402_v11, 7 }
  0x17   :  { %1821 = vperm.xlu1 %6152, %v1742_v54   ;;  %14370 = vst [vmem:[#allocation29_spill] sm:$0xff] %v6603_v20  ;;  %14371 = vst [vmem:[#allocation30_spill] sm:$0xff] %v6611_v22  ;;  %v13800_v7 = vrot.slane %v6548_v60, 7  ;;  %v1894_v26 = vmul.f32 %v6600_v19, %v6592_v18  ;;  %v1609_v31 = vmul.f32 %v6611_v22, %v6603_v20  ;;  %v6635_v35 = vsel %vm424_vm11, 1.0, %v13804_v29 }
  0x18   :  { %1751 = vperm.xlu0 %6153, %v1728_v58   ;;  %vm411_vm3 = vmand %vm6482_vm13, %vm395_vm6  ;;  %14374 = vst [vmem:[#allocation31_spill] sm:$0xff] %v6635_v35  ;;  %v6643_v38 = vsel %vm13836_vm0, %v13789_v5, %v1875_v17  ;;  %v6654_v41 = vsel %vm13836_vm0, %v1861_v42, %v13791_v14  ;;  %vm13793_vm15 = vcmp.ge.s32.totalorder %v6424_v23, 0  ;;  %v44_v17 = vadd.s32 24, %v6383_v3 }
  0x19   :  { %vm6623_vm5 = vmand %vm13785_vm7, %vm458_vm10  ;;  %14375 = vst [vmem:[#allocation32_spill] sm:$0xff] %v6643_v38  ;;  %v6646_v39 = vsel %vm411_vm3, 1.0, %v13804_v29  ;;  %vm472_vm10 = vcmp.le.s32.totalorder %v6424_v23, 7  ;;  %v45_v42 = vadd.s32 32, %v6383_v3  ;;  %v1908_v44 = vmul.f32 %v6643_v38, %v6635_v35 }
  0x1a   :  { %14376 = vst [vmem:[#allocation33_spill] sm:$0xff] %v6646_v39  ;;  %vm490_vm13 = vmand %vm6623_vm5, %vm186_vm8  ;;  %vm13794_vm7 = vcmp.ge.s32.totalorder %v6421_v21, 0  ;;  %v6677_v48 = vand.u32 7, %v44_v17  ;;  %v76_v49 = vshra.s32 %v44_v17, 3  ;;  %v1895_v51 = vmul.f32 %v6654_v41, %v6646_v39 }
  0x1b   :  { %1623 = vperm.xlu1 %6152, %v1596_v9   ;;  %vm6664_vm3 = vmand %vm13786_vm9, %vm457_vm1  ;;  %v6682_v54 = vsel %vm490_vm13, 1.0, %v13804_v29  ;;  %vm459_vm1 = vcmp.le.s32.totalorder %v6421_v21, 7  ;;  %v77_v58 = vshra.s32 %v45_v42, 3  ;;  %v6706_v5 = vand.u32 7, %v45_v42 }
  0x1c   :  { %1618 = vperm.xlu0 %6153, %v1595_v15   ;;  %vm489_vm11 = vmand %vm6664_vm3, %vm185_vm2  ;;  %14379 = vst [vmem:[#allocation34_spill] sm:$0xff] %v6677_v48  ;;  %v6704_v1 = vadd.s32 4294967295, %v6677_v48  ;;  %v14390_v42 = vrot.slane %v6440_v27, 7  ;;  %v6757_v45 = vsel %vm6623_vm5, 1.0, %v13804_v29  ;;  %v14399_v24 = vmov 0.0  }
  0x1d   :  { %14380 = vst [vmem:[#allocation35_spill] sm:$0xff] %v6682_v54  ;;  %v6686_v9 = vsel %vm489_vm11, 1.0, %v13804_v29  ;;  %vm6690_vm9 = vmand %vm13793_vm15, %vm472_vm10  ;;  %vm14391_vm15 = vcmp.lt.s32.totalorder %v6383_v3, 1  ;;  %v6743_v6 = vadd.s32 4294967295, %v6706_v5  ;;  %v14405_v0 = vrot.slane %v6548_v60, 7 }
  0x1e   :  { %14381 = vst [vmem:[#allocation36_spill] sm:$0xff] %v6686_v9  ;;  %vm504_vm13 = vmand %vm6690_vm9, %vm13797_vm12  ;;  %v2026_v46 = vmul.f32 %v6558_v61, %v6686_v9  ;;  %vm13818_vm12 = vcmp.ge.s32.totalorder %v6704_v1, 0 }
  0x1f   :  { %1917 = vperm.xlu1 %6152, %v1894_v26   ;;  %v6694_v26 = vand.u32 7, %v76_v49  ;;  %14386 = vst [vmem:[#allocation39_spill] sm:$0xff] %v6706_v5  ;;  %v2027_v49 = vmul.f32 %v6533_v56, %v6682_v54  ;;  %vm6714_vm10 = vmand %vm13794_vm7, %vm459_vm1  ;;  %v6720_v33 = vsel %vm504_vm13, 1.0, %v13804_v29  ;;  %v6820_v54 = vsel %vm6690_vm9, 1.0, %v14399_v24 }
  0x20   :  { %1688 = vperm.xlu0 %6153, %v1609_v31   ;;  %v6700_v31 = vand.u32 7, %v77_v58  ;;  %14389 = vst [vmem:[#allocation40_spill] sm:$0xff] %v6720_v33  ;;  %vm491_vm11 = vmand %vm6714_vm10, %vm13803_vm14  ;;  %vm13817_vm14 = vcmp.ge.s32.totalorder %v6743_v6, 0  ;;  %v6783_v35 = vsel %vm6714_vm10, 1.0, %v14399_v24  ;;  %v2174_v16 = vmul.f32 %v6388_v4, %v6820_v54  ;;  %v6867_v4 = vld [vmem:[%s13770_s0 + $0x20] sm:$0xff] }
  0x21   :  { %14384 = vst [vmem:[#allocation37_spill] sm:$0xff] %v6694_v26  ;;  %v108_v17 = vadd.s32 4294967295, %v6694_v26  ;;  %14395 = vst [vmem:[#allocation42_spill] sm:$0xff] %v6757_v45  ;;  %v635_v58 = vadd.s32 1, %v6421_v21 }
  0x22   :  { %14385 = vst [vmem:[#allocation38_spill] sm:$0xff] %v6700_v31  ;;  %v109_v14 = vadd.s32 4294967295, %v6700_v31  ;;  %14401 = vst [vmem:[#allocation45_spill] sm:$0xff] %v6783_v35 }
  0x23   :  { %1987 = vperm.xlu1 %6152, %v1908_v44   ;;  %v6732_v44 = vsel %vm14391_vm15, %v14390_v42, %v13800_v7  ;;  %vm140_vm1 = vcmp.ge.s32.totalorder %v108_v17, 0  ;;  %vm156_vm7 = vcmp.le.s32.totalorder %v108_v17, 7  ;;  %v2041_v42 = vmul.f32 %v6434_v25, %v6720_v33  ;;  %v6752_v7 = vld [vmem:[%s13770_s0 + $0x18] sm:$0xff]  ;;  %14407 = vst [vmem:[#allocation48_spill] sm:$0xff] %v6820_v54 }
  0x24   :  { %1922 = vperm.xlu0 %6153, %v1895_v51   ;;  %v6735_v51 = vsel %vm491_vm11, 1.0, %v13804_v29  ;;  %vm6737_vm13 = vmand %vm140_vm1, %vm156_vm7  ;;  %vm141_vm15 = vcmp.ge.s32.totalorder %v109_v14, 0  ;;  %vm157_vm11 = vcmp.le.s32.totalorder %v109_v14, 7  ;;  %v14404_v36 = vrot.slane %v6752_v7, 7 }
  0x25   :  { %14392 = vst [vmem:[#allocation41_spill] sm:$0xff] %v6735_v51  ;;  %v2028_v17 = vmul.f32 %v6732_v44, %v6735_v51  ;;  %vm204_vm7 = vmand %vm6737_vm13, %vm13818_vm12  ;;  %v6797_v50 = vsel %vm6737_vm13, 1.0, %v14399_v24 }
  0x26   :  { %vm6768_vm1 = vmand %vm141_vm15, %vm157_vm11  ;;  %v6778_v33 = vsel %vm204_vm7, 1.0, %v14399_v24  ;;  %14402 = vst [vmem:[#allocation46_spill] sm:$0xff] %v6797_v50  ;;  %vm14406_vm11 = vcmp.lt.s32.totalorder %v6383_v3, 1  ;;  %v1730_v51 = vmul.f32 %v6548_v60, %v6797_v50  ;;  %vm14409_vm7 = vcmp.le.s32.totalorder %v6516_v53, 7 }
  0x27   :  { %2050 = vperm.xlu1 %6152, %v2027_v49   ;;  %v2160_v49 = vmul.f32 %v6440_v27, %v6757_v45  ;;  %14400 = vst [vmem:[#allocation44_spill] sm:$0xff] %v6778_v33  ;;  %vm205_vm15 = vmand %vm6768_vm1, %vm13817_vm14 }
  0x28   :  { %2045 = vperm.xlu0 %6153, %v2026_v46   ;;  %v6762_v46 = vsel %vm6664_vm3, 1.0, %v13804_v29  ;;  %v6800_v20 = vsel %vm205_vm15, 1.0, %v14399_v24  ;;  %vm602_vm15 = vmand %vm6623_vm5, %vm14409_vm7 }
  0x29   :  { %14396 = vst [vmem:[#allocation43_spill] sm:$0xff] %v6762_v46  ;;  %v2159_v29 = vmul.f32 %v6398_v8, %v6762_v46  ;;  %14403 = vst [vmem:[#allocation47_spill] sm:$0xff] %v6800_v20  ;;  %v6847_v43 = vsel %vm602_vm15, 1.0, %v14399_v24 }
  0x2a   :  { %14411 = vst [vmem:[#allocation50_spill] sm:$0xff] %v6847_v43 }
  0x2b   :  { %2120 = vperm.xlu1 %6152, %v2041_v42   ;;  %v1597_v42 = vmul.f32 %v6732_v44, %v6778_v33 }
  0x2c   :  { %2055 = vperm.xlu0 %6153, %v2028_v17   ;;  %v2161_v17 = vmul.f32 %v6548_v60, %v6783_v35 }
  0x2f   :  { %2183 = vperm.xlu1 %6152, %v2160_v49   ;;  %v6811_v49 = vadd.s32 1, %v6677_v48  ;;  %v1863_v48 = vrot.slane %v6752_v7, 1 }
  0x30   :  { %2178 = vperm.xlu0 %6153, %v2159_v29   ;;  %v6808_v29 = vsel %vm14406_vm11, %v14405_v0, %v14404_v36  ;;  %v6825_v36 = vsel %vm6768_vm1, 1.0, %v14399_v24  ;;  %v634_v0 = vadd.s32 1, %v6442_v28  ;;  %vm14410_vm11 = vcmp.le.s32.totalorder %v6408_v13, 7 }
  0x31   :  { %v1598_v39 = vmul.f32 %v6808_v29, %v6800_v20  ;;  %14408 = vst [vmem:[#allocation49_spill] sm:$0xff] %v6825_v36  ;;  %vm601_vm14 = vmand %vm6664_vm3, %vm14410_vm11  ;;  %vm13824_vm12 = vcmp.le.s32.totalorder %v6811_v49, 7  ;;  %v1731_v28 = vmul.f32 %v6752_v7, %v6825_v36 }
  0x32   :  { %v6850_v9 = vsel %vm601_vm14, 1.0, %v14399_v24  ;;  %vm6856_vm5 = vmand %vm6737_vm13, %vm13824_vm12  ;;  %vm650_vm3 = vcmp.ge.s32.totalorder %v634_v0, 0  ;;  %vm666_vm7 = vcmp.le.s32.totalorder %v634_v0, 7 }
  0x33   :  { %1628 = vperm.xlu1 %6152, %v1597_v42   ;;  %v633_v42 = vadd.s32 1, %v6402_v11  ;;  %14412 = vst [vmem:[#allocation51_spill] sm:$0xff] %v6850_v9  ;;  %vm603_vm11 = vmand %vm6714_vm10, %vm395_vm6  ;;  %v2292_v0 = vmul.f32 %v6600_v19, %v6850_v9  ;;  %v6890_v15 = vsel %vm6856_vm5, 1.0, %v14399_v24  ;;  %v14420_v11 = vrot.slane %v6548_v60, 1 }
  0x34   :  { %2188 = vperm.xlu0 %6153, %v2161_v17   ;;  %v6839_v17 = vadd.s32 1, %v6706_v5  ;;  %vm6873_vm13 = vmand %vm6690_vm9, %vm13837_vm4  ;;  %14419 = vst [vmem:[#allocation52_spill] sm:$0xff] %v6890_v15 }
  0x35   :  { %vm649_vm14 = vcmp.ge.s32.totalorder %v633_v42, 0  ;;  %vm665_vm15 = vcmp.le.s32.totalorder %v633_v42, 7  ;;  %vm6883_vm10 = vmand %vm650_vm3, %vm666_vm7  ;;  %vm13835_vm3 = vcmp.ge.s32.totalorder %v6694_v26, 0  ;;  %vm460_vm7 = vcmp.le.s32.totalorder %v6694_v26, 7 }
  0x36   :  { %vm13834_vm12 = vcmp.le.s32.totalorder %v6839_v17, 7  ;;  %vm6902_vm9 = vmand %vm649_vm14, %vm665_vm15  ;;  %vm651_vm14 = vcmp.ge.s32.totalorder %v635_v58, 0  ;;  %vm667_vm15 = vcmp.le.s32.totalorder %v635_v58, 7  ;;  %v6936_v58 = vsel %vm6873_vm13, 1.0, %v14399_v24 }
  0x37   :  { %1761 = vperm.xlu1 %6152, %v1730_v51   ;;  %v2293_v51 = vmul.f32 %v6654_v41, %v6847_v43  ;;  %vm413_vm5 = vmand %vm6768_vm1, %vm13834_vm12  ;;  %14428 = vst [vmem:[#allocation54_spill] sm:$0xff] %v6936_v58  ;;  %v2307_v57 = vmul.f32 %v6472_v37, %v6936_v58 }
  0x38   :  { %1633 = vperm.xlu0 %6153, %v1598_v39   ;;  %vm6929_vm1 = vmand %vm6902_vm9, %vm185_vm2 }
  0x39   :  { %vm6949_vm2 = vmand %vm13835_vm3, %vm460_vm7  ;;  %vm14438_vm3 = vcmp.ge.s32.totalorder %v6451_v32, 0 }
  0x3b   :  { %2253 = vperm.xlu1 %6152, %v2174_v16   ;;  %v6899_v16 = vsel %vm603_vm11, 1.0, %v14399_v24  ;;  %vm6917_vm11 = vmand %vm6883_vm10, %vm186_vm8 }
  0x3c   :  { %1766 = vperm.xlu0 %6153, %v1731_v28   ;;  %v6896_v28 = vsel %vm13836_vm0, %v14420_v11, %v1863_v48  ;;  %14421 = vst [vmem:[#allocation53_spill] sm:$0xff] %v6899_v16  ;;  %v648_v11 = vadd.s32 1, %v6424_v23  ;;  %vm6953_vm8 = vmand %vm651_vm14, %vm667_vm15  ;;  %vm13855_vm14 = vcmp.ge.s32.totalorder %v6700_v31, 0  ;;  %vm461_vm15 = vcmp.le.s32.totalorder %v6700_v31, 7 }
  0x3d   :  { %v1896_v14 = vmul.f32 %v6896_v28, %v6890_v15  ;;  %v2294_v21 = vmul.f32 %v6896_v28, %v6899_v16  ;;  %vm6987_vm4 = vmand %vm13855_vm14, %vm461_vm15  ;;  %v14449_v15 = vrot.slane %v6867_v4, 7  ;;  %v14450_v16 = vrot.slane %v6752_v7, 7 }
  0x3e   :  { %vm664_vm13 = vcmp.ge.s32.totalorder %v648_v11, 0  ;;  %vm680_vm12 = vcmp.le.s32.totalorder %v648_v11, 7  ;;  %v6970_v11 = vsel %vm6917_vm11, 1.0, %v14399_v24  ;;  %vm14446_vm11 = vcmp.ge.s32.totalorder %v6743_v6, 0 }
  0x3f   :  { %2316 = vperm.xlu1 %6152, %v2293_v51   ;;  %v6939_v51 = vsel %vm413_vm5, 1.0, %v14399_v24  ;;  %vm14435_vm5 = vcmp.ge.s32.totalorder %v6704_v1, 0  ;;  %14436 = vst [vmem:[#allocation56_spill] sm:$0xff] %v6970_v11  ;;  %v2426_v32 = vmul.f32 %v6732_v44, %v6970_v11  ;;  %vm14460_vm15 = vcmp.le.s32.totalorder %v6516_v53, 7 }
  0x40   :  { %2311 = vperm.xlu0 %6153, %v2292_v0   ;;  %14429 = vst [vmem:[#allocation55_spill] sm:$0xff] %v6939_v51  ;;  %v14430_v0 = vrot.slane %v6867_v4, 1  ;;  %vm492_vm7 = vmand %vm6949_vm2, %vm14435_vm5 }
  0x41   :  { %vm6981_vm5 = vmand %vm664_vm13, %vm680_vm12  ;;  %v6997_v58 = vsel %vm492_vm7, 1.0, %v14399_v24  ;;  %vm14445_vm12 = vcmp.ge.s32.totalorder %v6561_v62, 0  ;;  %v47_v62 = vadd.s32 48, %v6383_v3 }
  0x42   :  { %v6945_v23 = vsel %vm13836_vm0, %v1863_v48, %v14430_v0  ;;  %vm699_vm0 = vmand %vm6953_vm8, %vm14438_vm3  ;;  %v46_v0 = vadd.s32 40, %v6383_v3  ;;  %14443 = vst [vmem:[#allocation58_spill] sm:$0xff] %v6997_v58 }
  0x43   :  { %1927 = vperm.xlu1 %6152, %v1896_v14   ;;  %v1897_v48 = vmul.f32 %v6945_v23, %v6939_v51  ;;  %v7000_v51 = vsel %vm699_vm0, 1.0, %v14399_v24  ;;  %vm712_vm3 = vmand %vm6981_vm5, %vm14445_vm12  ;;  %vm14451_vm0 = vcmp.lt.s32.totalorder %v6383_v3, 1 }
  0x44   :  { %2321 = vperm.xlu0 %6153, %v2294_v21   ;;  %v6975_v21 = vsel %vm6929_vm1, 1.0, %v14399_v24  ;;  %14444 = vst [vmem:[#allocation59_spill] sm:$0xff] %v7000_v51  ;;  %vm493_vm1 = vmand %vm6987_vm4, %vm14446_vm11  ;;  %v78_v44 = vshra.s32 %v46_v0, 3  ;;  %v7017_v36 = vsel %vm712_vm3, 1.0, %v14399_v24  ;;  %vm14463_vm3 = vcmp.le.s32.totalorder %v6408_v13, 7 }
  0x45   :  { %14437 = vst [vmem:[#allocation57_spill] sm:$0xff] %v6975_v21  ;;  %v2425_v52 = vmul.f32 %v6533_v56, %v6975_v21  ;;  %v2029_v56 = vmul.f32 %v6808_v29, %v6997_v58  ;;  %14447 = vst [vmem:[#allocation60_spill] sm:$0xff] %v7017_v36  ;;  %v7039_v21 = vsel %vm6883_vm10, 1.0, %v14399_v24 }
  0x46   :  { %14453 = vst [vmem:[#allocation63_spill] sm:$0xff] %v7039_v21  ;;  %vm810_vm12 = vmand %vm6883_vm10, %vm14460_vm15 }
  0x47   :  { %2386 = vperm.xlu1 %6152, %v2307_v57   ;;  %v7020_v57 = vsel %vm493_vm1, 1.0, %v14399_v24  ;;  %vm809_vm11 = vmand %vm6902_vm9, %vm14463_vm3  ;;  %v7106_v5 = vsel %vm810_vm12, 1.0, %v14399_v24  ;;  %vm14477_vm3 = vcmp.le.s32.totalorder %v6811_v49, 7 }
  0x48   :  { %1932 = vperm.xlu0 %6153, %v1897_v48   ;;  %v2427_v48 = vmul.f32 %v6808_v29, %v7000_v51  ;;  %14448 = vst [vmem:[#allocation61_spill] sm:$0xff] %v7020_v57  ;;  %v2440_v29 = vmul.f32 %v6558_v61, %v7017_v36  ;;  %v79_v51 = vshra.s32 %v47_v62, 3  ;;  %v2559_v61 = vmul.f32 %v6548_v60, %v7039_v21 }
  0x49   :  { %v7058_v36 = vsel %vm6949_vm2, 1.0, %v14399_v24  ;;  %v7068_v60 = vand.u32 7, %v47_v62  ;;  %v7082_v62 = vsel %vm6981_vm5, 1.0, %v14399_v24  ;;  %14466 = vst [vmem:[#allocation72_spill] sm:$0xff] %v7106_v5 }
  0x4a   :  { %14457 = vst [vmem:[#allocation67_spill] sm:$0xff] %v7058_v36  ;;  %14461 = vst [vmem:[#allocation70_spill] sm:$0xff] %v7082_v62  ;;  %v2573_v42 = vmul.f32 %v6398_v8, %v7082_v62  ;;  %v7122_v8 = vld [vmem:[%s13770_s0 + $0x28] sm:$0xff] }
  0x4b   :  { %2449 = vperm.xlu1 %6152, %v2426_v32   ;;  %v7028_v32 = vsel %vm14451_vm0, %v14450_v16, %v14449_v15  ;;  %v7044_v15 = vsel %vm6902_vm9, 1.0, %v14399_v24  ;;  %v7046_v16 = vand.u32 7, %v46_v0  ;;  %v7063_v0 = vsel %vm6953_vm8, 1.0, %v14399_v24  ;;  %14459 = vst [vmem:[#allocation69_spill] sm:$0xff] %v7068_v60 }
  0x4c   :  { %2444 = vperm.xlu0 %6153, %v2425_v52   ;;  %v7030_v52 = vand.u32 7, %v78_v44  ;;  %v2030_v58 = vmul.f32 %v7028_v32, %v7020_v57  ;;  %14454 = vst [vmem:[#allocation64_spill] sm:$0xff] %v7044_v15  ;;  %14458 = vst [vmem:[#allocation68_spill] sm:$0xff] %v7063_v0  ;;  %v14511_v11 = vrot.slane %v7122_v8, 7 }
  0x4d   :  { %14455 = vst [vmem:[#allocation65_spill] sm:$0xff] %v7046_v16 }
  0x4e   :  { %14452 = vst [vmem:[#allocation62_spill] sm:$0xff] %v7030_v52  ;;  %v110_v44 = vadd.s32 4294967295, %v7030_v52 }
  0x4f   :  { %2060 = vperm.xlu1 %6152, %v2029_v56   ;;  %v2558_v56 = vmul.f32 %v6440_v27, %v7044_v15  ;;  %v2162_v27 = vmul.f32 %v6752_v7, %v7058_v36 }
  0x50   :  { %2454 = vperm.xlu0 %6153, %v2427_v48   ;;  %v7053_v48 = vand.u32 7, %v79_v51  ;;  %vm142_vm13 = vcmp.ge.s32.totalorder %v110_v44, 0  ;;  %vm158_vm7 = vcmp.le.s32.totalorder %v110_v44, 7  ;;  %v2560_v51 = vmul.f32 %v6752_v7, %v7063_v0 }
  0x51   :  { %v7087_v44 = vsel %vm6987_vm4, 1.0, %v14399_v24  ;;  %vm7093_vm1 = vmand %vm142_vm13, %vm158_vm7  ;;  %v7099_v7 = vadd.s32 4294967295, %v7068_v60  ;;  %v636_v0 = vadd.s32 1, %v6694_v26  ;;  %v48_v26 = vadd.s32 56, %v6383_v3 }
  0x52   :  { %14456 = vst [vmem:[#allocation66_spill] sm:$0xff] %v7053_v48  ;;  %14462 = vst [vmem:[#allocation71_spill] sm:$0xff] %v7087_v44  ;;  %v2163_v13 = vmul.f32 %v6867_v4, %v7087_v44  ;;  %v7168_v44 = vadd.s32 1, %v7046_v16  ;;  %vm463_vm14 = vcmp.le.s32.totalorder %v7053_v48, 7 }
  0x53   :  { %2519 = vperm.xlu1 %6152, %v2440_v29   ;;  %v111_v29 = vadd.s32 4294967295, %v7053_v48  ;;  %vm811_vm13 = vmand %vm6953_vm8, %vm395_vm6  ;;  %vm13874_vm12 = vcmp.ge.s32.totalorder %v7099_v7, 0  ;;  %vm14476_vm8 = vcmp.lt.s32.totalorder %v6383_v3, 1 }
  0x54   :  { %2065 = vperm.xlu0 %6153, %v2030_v58   ;;  %v7066_v58 = vadd.s32 4294967295, %v7046_v16  ;;  %v1865_v16 = vrot.slane %v7122_v8, 1 }
  0x55   :  { %vm143_vm0 = vcmp.ge.s32.totalorder %v111_v29, 0  ;;  %vm159_vm15 = vcmp.le.s32.totalorder %v111_v29, 7 }
  0x56   :  { %vm13873_vm10 = vcmp.ge.s32.totalorder %v7066_v58, 0  ;;  %vm7124_vm7 = vmand %vm143_vm0, %vm159_vm15 }
  0x57   :  { %2582 = vperm.xlu1 %6152, %v2559_v61   ;;  %v7109_v61 = vsel %vm809_vm11, 1.0, %v14399_v24  ;;  %vm206_vm9 = vmand %vm7093_vm1, %vm13873_vm10 }
  0x58   :  { %2577 = vperm.xlu0 %6153, %v2558_v56   ;;  %14467 = vst [vmem:[#allocation73_spill] sm:$0xff] %v7109_v61  ;;  %v2691_v10 = vmul.f32 %v6654_v41, %v7109_v61  ;;  %v7134_v54 = vsel %vm206_vm9, 1.0, %v14399_v24  ;;  %vm207_vm6 = vmand %vm7124_vm7, %vm13874_vm12  ;;  %vm398_vm9 = vcmp.le.s32.totalorder %v7168_v44, 7 }
  0x59   :  { %14470 = vst [vmem:[#allocation74_spill] sm:$0xff] %v7134_v54  ;;  %v7157_v29 = vsel %vm207_vm6, 1.0, %v14399_v24  ;;  %vm604_vm11 = vmand %vm6949_vm2, %vm14477_vm3  ;;  %vm14480_vm2 = vcmp.le.s32.totalorder %v6564_v63, 7 }
  0x5a   :  { %14473 = vst [vmem:[#allocation77_spill] sm:$0xff] %v7157_v29  ;;  %v7187_v12 = vsel %vm604_vm11, 1.0, %v14399_v24  ;;  %vm7198_vm15 = vmand %vm6981_vm5, %vm14480_vm2  ;;  %vm652_vm5 = vcmp.ge.s32.totalorder %v636_v0, 0  ;;  %vm668_vm2 = vcmp.le.s32.totalorder %v636_v0, 7 }
  0x5b   :  { %2193 = vperm.xlu1 %6152, %v2162_v27   ;;  %v2692_v27 = vmul.f32 %v6896_v28, %v7106_v5  ;;  %v1599_v28 = vmul.f32 %v7028_v32, %v7134_v54  ;;  %14478 = vst [vmem:[#allocation78_spill] sm:$0xff] %v7187_v12  ;;  %v2295_v14 = vmul.f32 %v6945_v23, %v7187_v12  ;;  %v7232_v0 = vsel %vm7198_vm15, 1.0, %v14399_v24 }
  0x5c   :  { %2587 = vperm.xlu0 %6153, %v2560_v51   ;;  %v7137_v51 = vsel %vm811_vm13, 1.0, %v14399_v24  ;;  %vm14483_vm13 = vcmp.le.s32.totalorder %v6839_v17, 7  ;;  %14488 = vst [vmem:[#allocation80_spill] sm:$0xff] %v7232_v0  ;;  %vm13871_vm15 = vcmp.ge.s32.totalorder %v7053_v48, 0 }
  0x5d   :  { %14471 = vst [vmem:[#allocation75_spill] sm:$0xff] %v7137_v51  ;;  %v2693_v41 = vmul.f32 %v6945_v23, %v7137_v51  ;;  %vm605_vm6 = vmand %vm6987_vm4, %vm14483_vm13 }
  0x5e   :  { %vm7225_vm4 = vmand %vm7093_vm1, %vm398_vm9  ;;  %v7235_v23 = vsel %vm605_vm6, 1.0, %v14399_v24  ;;  %vm13872_vm6 = vcmp.ge.s32.totalorder %v7030_v52, 0 }
  0x5f   :  { %2652 = vperm.xlu1 %6152, %v2573_v42   ;;  %v7149_v42 = vadd.s32 1, %v7068_v60  ;;  %v637_v60 = vadd.s32 1, %v6700_v31  ;;  %14489 = vst [vmem:[#allocation81_spill] sm:$0xff] %v7235_v23 }
  0x60   :  { %2198 = vperm.xlu0 %6153, %v2163_v13   ;;  %v7154_v13 = vsel %vm7093_vm1, 1.0, %v14399_v24  ;;  %vm7247_vm1 = vmand %vm652_vm5, %vm668_vm2  ;;  %vm462_vm5 = vcmp.le.s32.totalorder %v7030_v52, 7 }
  0x61   :  { %14472 = vst [vmem:[#allocation76_spill] sm:$0xff] %v7154_v13  ;;  %v1732_v51 = vmul.f32 %v6867_v4, %v7154_v13  ;;  %vm399_vm0 = vcmp.le.s32.totalorder %v7149_v42, 7  ;;  %vm669_vm3 = vcmp.le.s32.totalorder %v637_v60, 7 }
  0x62   :  { %vm7212_vm11 = vmand %vm7124_vm7, %vm399_vm0 }
  0x63   :  { %2715 = vperm.xlu1 %6152, %v2692_v27   ;;  %v14474_v27 = vrot.slane %v7122_v8, 7 }
  0x64   :  { %2710 = vperm.xlu0 %6153, %v2691_v10   ;;  %v14475_v10 = vrot.slane %v6867_v4, 7 }
  0x66   :  { %v7165_v57 = vsel %vm14476_vm8, %v14475_v10, %v14474_v27  ;;  %v7184_v10 = vld [vmem:[%s13770_s0 + $0x30] sm:$0xff]  ;;  %vm653_vm8 = vcmp.ge.s32.totalorder %v637_v60, 0 }
  0x67   :  { %1638 = vperm.xlu1 %6152, %v1599_v28   ;;  %v1600_v27 = vmul.f32 %v7165_v57, %v7157_v29  ;;  %v7192_v28 = vsel %vm7124_vm7, 1.0, %v14399_v24  ;;  %vm14491_vm7 = vcmp.lt.s32.totalorder %v6383_v3, 7  ;;  %vm7243_vm13 = vmand %vm653_vm8, %vm669_vm3  ;;  %vm14496_vm8 = vcmp.ge.s32.totalorder %v6743_v6, 0 }
  0x68   :  { %2720 = vperm.xlu0 %6153, %v2693_v41   ;;  %14479 = vst [vmem:[#allocation79_spill] sm:$0xff] %v7192_v28  ;;  %v1733_v39 = vmul.f32 %v7122_v8, %v7192_v28  ;;  %v49_v41 = vadd.s32 64, %v6383_v3  ;;  %vm701_vm3 = vmand %vm7243_vm13, %vm14496_vm8  ;;  %v7279_v6 = vsel %vm7225_vm4, 1.0, %v14399_v24  ;;  %v80_v28 = vshra.s32 %v48_v26, 3 }
  0x69   :  { %vm14499_vm2 = vmmov %vm14491_vm7  ;;  %14500 = vst [vmem:[#allocation83_spill] sm:$0xff] %v7279_v6  ;;  %v7302_v29 = vsel %vm701_vm3, 1.0, %v14399_v24  ;;  %vm14512_vm3 = vcmp.lt.s32.totalorder %v6383_v3, 1 }
  0x6a   :  { %v81_v56 = vshra.s32 %v49_v41, 3  ;;  %14506 = vst [vmem:[#allocation84_spill] sm:$0xff] %v7302_v29  ;;  %v7322_v13 = vand.u32 7, %v80_v28 }
  0x6b   :  { %1771 = vperm.xlu1 %6152, %v1732_v51   ;;  %v14490_v51 = vrot.slane %v6867_v4, 1 }
  0x6c   :  { %1643 = vperm.xlu0 %6153, %v1600_v27   ;;  %14509 = vst [vmem:[#allocation87_spill] sm:$0xff] %v7322_v13 }
  0x6d   :  { %v7241_v27 = vsel %vm14491_vm7, %v14490_v51, %v1865_v16  ;;  %v2706_v51 = vmul.f32 %v6600_v19, %v7232_v0  ;;  %vm14501_vm7 = vcmp.ge.s32.totalorder %v6704_v1, 0 }
  0x6e   :  { %v2296_v31 = vmul.f32 %v7241_v27, %v7235_v23  ;;  %vm700_vm8 = vmand %vm7247_vm1, %vm14501_vm7 }
  0x6f   :  { %2326 = vperm.xlu1 %6152, %v2295_v14   ;;  %v7268_v14 = vsel %vm7212_vm11, 1.0, %v14399_v24  ;;  %vm7287_vm11 = vmand %vm13871_vm15, %vm463_vm14  ;;  %v7305_v23 = vsel %vm700_vm8, 1.0, %v14399_v24  ;;  %vm14518_vm8 = vcmp.le.s32.totalorder %v6839_v17, 7  ;;  %vm14521_vm15 = vcmp.le.s32.totalorder %v6811_v49, 7 }
  0x70   :  { %1776 = vperm.xlu0 %6153, %v1733_v39   ;;  %14497 = vst [vmem:[#allocation82_spill] sm:$0xff] %v7268_v14  ;;  %v14498_v39 = vrot.slane %v7184_v10, 1  ;;  %14507 = vst [vmem:[#allocation85_spill] sm:$0xff] %v7305_v23 }
  0x71   :  { %vm495_vm14 = vmand %vm7287_vm11, %vm13874_vm12 }
  0x72   :  { %v7274_v19 = vsel %vm14499_vm2, %v1865_v16, %v14498_v39  ;;  %vm7293_vm2 = vmand %vm13872_vm6, %vm462_vm5  ;;  %v1898_v39 = vmul.f32 %v7241_v27, %v7279_v6  ;;  %v2428_v6 = vmul.f32 %v7028_v32, %v7305_v23  ;;  %v7325_v12 = vsel %vm495_vm14, 1.0, %v14399_v24 }
  0x73   :  { %2785 = vperm.xlu1 %6152, %v2706_v51   ;;  %v1899_v1 = vmul.f32 %v7274_v19, %v7268_v14  ;;  %vm494_vm4 = vmand %vm7293_vm2, %vm13873_vm10  ;;  %v7316_v51 = vand.u32 7, %v81_v56  ;;  %v2429_v14 = vmul.f32 %v7165_v57, %v7302_v29  ;;  %14510 = vst [vmem:[#allocation88_spill] sm:$0xff] %v7325_v12  ;;  %v7339_v29 = vand.u32 7, %v48_v26 }
  0x74   :  { %2331 = vperm.xlu0 %6153, %v2296_v31   ;;  %v1567_v31 = vrot.slane %v7184_v10, 7  ;;  %v7334_v56 = vsel %vm494_vm4, 1.0, %v14399_v24  ;;  %v7349_v23 = vsel %vm7243_vm13, 1.0, %v14399_v24  ;;  %v7354_v26 = vsel %vm7247_vm1, 1.0, %v14399_v24  ;;  %vm813_vm14 = vmand %vm7243_vm13, %vm14518_vm8 }
  0x75   :  { %14508 = vst [vmem:[#allocation86_spill] sm:$0xff] %v7316_v51  ;;  %14513 = vst [vmem:[#allocation89_spill] sm:$0xff] %v7334_v56  ;;  %v2031_v28 = vmul.f32 %v7165_v57, %v7334_v56  ;;  %v2562_v57 = vmul.f32 %v7122_v8, %v7349_v23 }
  0x76   :  { %v7331_v40 = vsel %vm14512_vm3, %v14511_v11, %v1567_v31  ;;  %14515 = vst [vmem:[#allocation91_spill] sm:$0xff] %v7339_v29  ;;  %v112_v11 = vadd.s32 4294967295, %v7322_v13  ;;  %14516 = vst [vmem:[#allocation92_spill] sm:$0xff] %v7349_v23 }
  0x77   :  { %1942 = vperm.xlu1 %6152, %v1899_v1   ;;  %v7336_v1 = vand.u32 7, %v49_v41  ;;  %v2032_v32 = vmul.f32 %v7331_v40, %v7325_v12  ;;  %14517 = vst [vmem:[#allocation93_spill] sm:$0xff] %v7354_v26  ;;  %vm812_vm6 = vmand %vm7247_vm1, %vm14521_vm15 }
  0x78   :  { %1937 = vperm.xlu0 %6153, %v1898_v39   ;;  %v113_v39 = vadd.s32 4294967295, %v7316_v51  ;;  %vm144_vm4 = vcmp.ge.s32.totalorder %v112_v11, 0  ;;  %vm160_vm3 = vcmp.le.s32.totalorder %v112_v11, 7  ;;  %v7407_v11 = vsel %vm812_vm6, 1.0, %v14399_v24 }
  0x79   :  { %14514 = vst [vmem:[#allocation90_spill] sm:$0xff] %v7336_v1  ;;  %v7357_v41 = vadd.s32 4294967295, %v7336_v1  ;;  %vm7394_vm8 = vmand %vm144_vm4, %vm160_vm3  ;;  %vm14529_vm6 = vcmp.lt.s32.totalorder %v6383_v3, 1 }
  0x7a   :  { %vm145_vm5 = vcmp.ge.s32.totalorder %v113_v39, 0  ;;  %vm161_vm7 = vcmp.le.s32.totalorder %v113_v39, 7  ;;  %v7373_v39 = vsel %vm7287_vm11, 1.0, %v14399_v24  ;;  %14527 = vst [vmem:[#allocation97_spill] sm:$0xff] %v7407_v11  ;;  %vm606_vm4 = vmand %vm7293_vm2, %vm398_vm9 }
  0x7b   :  { %2464 = vperm.xlu1 %6152, %v2429_v14   ;;  %v7360_v14 = vadd.s32 4294967295, %v7339_v29  ;;  %14519 = vst [vmem:[#allocation94_spill] sm:$0xff] %v7373_v39  ;;  %vm7384_vm10 = vmand %vm145_vm5, %vm161_vm7  ;;  %vm193_vm13 = vcmp.ge.s32.totalorder %v7357_v41, 0  ;;  %v2165_v49 = vmul.f32 %v7184_v10, %v7373_v39  ;;  %v7423_v39 = vadd.s32 1, %v7336_v1 }
  0x7c   :  { %2459 = vperm.xlu0 %6153, %v2428_v6   ;;  %v2561_v6 = vmul.f32 %v6867_v4, %v7354_v26  ;;  %v7392_v4 = vld [vmem:[%s13770_s0 + $0x38] sm:$0xff]  ;;  %vm209_vm1 = vmand %vm7384_vm10, %vm193_vm13  ;;  %v638_v1 = vadd.s32 1, %v7030_v52 }
  0x7d   :  { %vm192_vm12 = vcmp.ge.s32.totalorder %v7360_v14, 0  ;;  %v7426_v12 = vsel %vm209_vm1, 1.0, %v14399_v24  ;;  %vm13897_vm5 = vcmp.le.s32.totalorder %v7423_v39, 7  ;;  %vm7461_vm7 = vmand %vm7287_vm11, %vm399_vm0  ;;  %v14565_v25 = vrot.slane %v7392_v4, 7 }
  0x7e   :  { %vm208_vm15 = vmand %vm7394_vm8, %vm192_vm12  ;;  %14528 = vst [vmem:[#allocation98_spill] sm:$0xff] %v7426_v12 }
  0x7f   :  { %2075 = vperm.xlu1 %6152, %v2032_v32   ;;  %v7378_v32 = vsel %vm7293_vm2, 1.0, %v14399_v24  ;;  %vm7484_vm1 = vmand %vm7384_vm10, %vm13897_vm5 }
  0x80   :  { %2070 = vperm.xlu0 %6153, %v2031_v28   ;;  %14520 = vst [vmem:[#allocation95_spill] sm:$0xff] %v7378_v32  ;;  %v2164_v60 = vmul.f32 %v7122_v8, %v7378_v32  ;;  %v7404_v28 = vsel %vm813_vm14, 1.0, %v14399_v24 }
  0x81   :  { %14526 = vst [vmem:[#allocation96_spill] sm:$0xff] %v7404_v28  ;;  %v2695_v8 = vmul.f32 %v7274_v19, %v7404_v28 }
  0x83   :  { %2597 = vperm.xlu1 %6152, %v2562_v57   ;;  %v13882_v57 = vrot.slane %v7392_v4, 7 }
  0x84   :  { %2592 = vperm.xlu0 %6153, %v2561_v6   ;;  %v2694_v6 = vmul.f32 %v7241_v27, %v7407_v11  ;;  %v639_v27 = vadd.s32 1, %v7053_v48  ;;  %v7476_v48 = vld [vmem:[%s13770_s0 + $0x40] sm:$0xff]  ;;  %v50_v11 = vadd.s32 72, %v6383_v3 }
  0x85   :  { %v7432_v23 = vsel %vm14529_vm6, %v1567_v31, %v13882_v57  ;;  %v7450_v31 = vsel %vm7384_vm10, 1.0, %v14399_v24  ;;  %v7455_v57 = vsel %vm7394_vm8, 1.0, %v14399_v24  ;;  %vm670_vm6 = vcmp.le.s32.totalorder %v638_v1, 7 }
  0x86   :  { %v1602_v28 = vmul.f32 %v7432_v23, %v7426_v12  ;;  %14531 = vst [vmem:[#allocation100_spill] sm:$0xff] %v7450_v31  ;;  %14532 = vst [vmem:[#allocation101_spill] sm:$0xff] %v7455_v57  ;;  %vm655_vm11 = vcmp.ge.s32.totalorder %v639_v27, 0  ;;  %vm671_vm3 = vcmp.le.s32.totalorder %v639_v27, 7  ;;  %v1735_v16 = vmul.f32 %v7392_v4, %v7450_v31 }
  0x87   :  { %2208 = vperm.xlu1 %6152, %v2165_v49   ;;  %v7435_v49 = vsel %vm208_vm15, 1.0, %v14399_v24  ;;  %vm654_vm15 = vcmp.ge.s32.totalorder %v638_v1, 0  ;;  %v1734_v12 = vmul.f32 %v7184_v10, %v7455_v57  ;;  %v7503_v1 = vsel %vm7461_vm7, 1.0, %v14399_v24 }
  0x88   :  { %2203 = vperm.xlu0 %6153, %v2164_v60   ;;  %14530 = vst [vmem:[#allocation99_spill] sm:$0xff] %v7435_v49  ;;  %v7438_v60 = vadd.s32 1, %v7339_v29  ;;  %v1601_v56 = vmul.f32 %v7331_v40, %v7435_v49  ;;  %14539 = vst [vmem:[#allocation102_spill] sm:$0xff] %v7503_v1  ;;  %vm14541_vm10 = vcmp.lt.s32.totalorder %v6383_v3, 7  ;;  %v7512_v31 = vsel %vm606_vm4, 1.0, %v14399_v24 }
  0x89   :  { %14542 = vst [vmem:[#allocation103_spill] sm:$0xff] %v7512_v31  ;;  %vm13916_vm7 = vcmp.ge.s32.totalorder %v7316_v51, 0  ;;  %vm465_vm4 = vcmp.le.s32.totalorder %v7316_v51, 7  ;;  %v51_v27 = vadd.s32 80, %v6383_v3  ;;  %v2297_v53 = vmul.f32 %v7274_v19, %v7512_v31 }
  0x8a   :  { %vm13892_vm14 = vcmp.le.s32.totalorder %v7438_v60, 7  ;;  %v82_v18 = vshra.s32 %v50_v11, 3  ;;  %v14564_v37 = vrot.slane %v7476_v48, 7 }
  0x8b   :  { %2730 = vperm.xlu1 %6152, %v2695_v8   ;;  %vm7496_vm2 = vmand %vm7394_vm8, %vm13892_vm14 }
  0x8c   :  { %2725 = vperm.xlu0 %6153, %v2694_v6   ;;  %v1867_v6 = vrot.slane %v7392_v4, 1  ;;  %vm7516_vm8 = vmand %vm655_vm11, %vm671_vm3  ;;  %vm14547_vm11 = vcmp.ge.s32.totalorder %v7099_v7, 0  ;;  %v7560_v19 = vsel %vm7496_vm2, 1.0, %v14399_v24 }
  0x8d   :  { %vm7520_vm14 = vmand %vm654_vm15, %vm670_vm6  ;;  %vm464_vm15 = vcmp.le.s32.totalorder %v7322_v13, 7  ;;  %vm14552_vm6 = vcmp.lt.s32.totalorder %v6383_v3, 7  ;;  %14553 = vst [vmem:[#allocation105_spill] sm:$0xff] %v7560_v19 }
  0x8e   :  { %v7467_v29 = vpop.permute.xlu1 %1746  ;;  %vm7540_vm3 = vmand %vm7516_vm8, %vm14547_vm11  ;;  %vm14554_vm11 = vcmp.ge.s32.totalorder %v7066_v58, 0  ;;  %v83_v58 = vshra.s32 %v51_v27, 3 }
  0x8f   :  { %v7478_v63 = vpop.permute.xlu0 %1613  ;;  %1653 = vperm.xlu1 %6152, %v1602_v28   ;;  %vm702_vm5 = vmand %vm7520_vm14, %vm14554_vm11  ;;  %v7589_v9 = vsel %vm7540_vm3, 1.0, %v14399_v24 }
  0x90   :  { %1648 = vperm.xlu0 %6153, %v1601_v56   ;;  %v14540_v56 = vrot.slane %v7184_v10, 1  ;;  %14559 = vst [vmem:[#allocation106_spill] sm:$0xff] %v7589_v9  ;;  %v7592_v43 = vsel %vm702_vm5, 1.0, %v14399_v24  ;;  %vm14566_vm5 = vcmp.lt.s32.totalorder %v6383_v3, 1  ;;  %vm7671_vm11 = vmand %vm7516_vm8, %vm399_vm0 }
  0x91   :  { %14560 = vst [vmem:[#allocation107_spill] sm:$0xff] %v7592_v43  ;;  %v2430_v55 = vmul.f32 %v7331_v40, %v7592_v43  ;;  %v7636_v43 = vand.u32 7, %v50_v11  ;;  %v7651_v11 = vsel %vm7520_vm14, 1.0, %v14399_v24  ;;  %vm814_vm0 = vmand %vm7520_vm14, %vm398_vm9 }
  0x92   :  { %v7509_v28 = vsel %vm14541_vm10, %v14540_v56, %v1867_v6  ;;  %v7524_v49 = vpop.permute.xlu1 %1756  ;;  %vm13940_vm10 = vcmp.ge.s32.totalorder %v7322_v13, 0  ;;  %14571 = vst [vmem:[#allocation115_spill] sm:$0xff] %v7651_v11  ;;  %v2563_v20 = vmul.f32 %v7184_v10, %v7651_v11  ;;  %v7697_v10 = vld [vmem:[%s13770_s0 + $0x48] sm:$0xff] }
  0x93   :  { %v7526_v32 = vpop.permute.xlu0 %1912  ;;  %1786 = vperm.xlu1 %6152, %v1735_v16   ;;  %v2298_v56 = vmul.f32 %v7509_v28, %v7503_v1  ;;  %v14551_v16 = vrot.slane %v7476_v48, 1  ;;  %v1900_v31 = vmul.f32 %v7509_v28, %v7560_v19  ;;  %v2431_v19 = vmul.f32 %v7432_v23, %v7589_v9  ;;  %14569 = vst [vmem:[#allocation113_spill] sm:$0xff] %v7636_v43 }
  0x94   :  { %1781 = vperm.xlu0 %6153, %v1734_v12   ;;  %v7549_v12 = vsel %vm7484_vm1, 1.0, %v14399_v24  ;;  %vm7568_vm1 = vmand %vm13916_vm7, %vm465_vm4 }
  0x95   :  { %14550 = vst [vmem:[#allocation104_spill] sm:$0xff] %v7549_v12  ;;  %v7555_v7 = vsel %vm14552_vm6, %v1867_v6, %v14551_v16  ;;  %vm7578_vm6 = vmand %vm13940_vm10, %vm464_vm15 }
  0x96   :  { %v7572_v1 = vpop.permute.xlu1 %1821  ;;  %v1901_v16 = vmul.f32 %v7555_v7, %v7549_v12  ;;  %vm497_vm2 = vmand %vm7568_vm1, %vm193_vm13  ;;  %v7607_v12 = vand.u32 7, %v83_v58  ;;  %v7624_v58 = vsel %vm14566_vm5, %v14565_v25, %v14564_v37 }
  0x97   :  { %v7574_v6 = vpop.permute.xlu0 %1751  ;;  %2341 = vperm.xlu1 %6152, %v2298_v56   ;;  %vm496_vm4 = vmand %vm7578_vm6, %vm192_vm12  ;;  %v7616_v30 = vsel %vm497_vm2, 1.0, %v14399_v24 }
  0x98   :  { %2336 = vperm.xlu0 %6153, %v2297_v53   ;;  %14561 = vst [vmem:[#allocation108_spill] sm:$0xff] %v7607_v12  ;;  %v7613_v53 = vand.u32 7, %v82_v18  ;;  %14563 = vst [vmem:[#allocation110_spill] sm:$0xff] %v7616_v30  ;;  %v115_v18 = vadd.s32 4294967295, %v7607_v12  ;;  %v2034_v54 = vmul.f32 %v7624_v58, %v7616_v30 }
  0x9a   :  { %v7603_v56 = vpop.permute.xlu1 %1623  ;;  %14562 = vst [vmem:[#allocation109_spill] sm:$0xff] %v7613_v53  ;;  %v114_v37 = vadd.s32 4294967295, %v7613_v53  ;;  %vm147_vm3 = vcmp.ge.s32.totalorder %v115_v18, 0  ;;  %vm163_vm15 = vcmp.le.s32.totalorder %v115_v18, 7  ;;  %v7683_v18 = vsel %vm7578_vm6, 1.0, %v14399_v24 }
  0x9b   :  { %v7605_v26 = vpop.permute.xlu0 %1618  ;;  %1952 = vperm.xlu1 %6152, %v1901_v16   ;;  %v7629_v16 = vand.u32 7, %v51_v27  ;;  %v7646_v27 = vsel %vm7516_vm8, 1.0, %v14399_v24  ;;  %14576 = vst [vmem:[#allocation118_spill] sm:$0xff] %v7683_v18  ;;  %vm7689_vm8 = vmand %vm147_vm3, %vm163_vm15 }
  0x9c   :  { %1947 = vperm.xlu0 %6153, %v1900_v31   ;;  %v7627_v31 = vsel %vm496_vm4, 1.0, %v14399_v24  ;;  %14570 = vst [vmem:[#allocation114_spill] sm:$0xff] %v7646_v27  ;;  %vm146_vm2 = vcmp.ge.s32.totalorder %v114_v37, 0  ;;  %vm162_vm4 = vcmp.le.s32.totalorder %v114_v37, 7  ;;  %v2166_v37 = vmul.f32 %v7392_v4, %v7683_v18 }
  0x9d   :  { %14567 = vst [vmem:[#allocation111_spill] sm:$0xff] %v7627_v31  ;;  %14568 = vst [vmem:[#allocation112_spill] sm:$0xff] %v7629_v16  ;;  %v2033_v25 = vmul.f32 %v7432_v23, %v7627_v31  ;;  %v7661_v23 = vadd.s32 4294967295, %v7636_v43  ;;  %v2564_v31 = vmul.f32 %v7392_v4, %v7646_v27 }
  0x9e   :  { %v7631_v9 = vpop.permute.xlu1 %1917  ;;  %vm7703_vm7 = vmand %vm146_vm2, %vm162_vm4 }
  0x9f   :  { %v7633_v40 = vpop.permute.xlu0 %1688  ;;  %2474 = vperm.xlu1 %6152, %v2431_v19   ;;  %vm13992_vm9 = vcmp.ge.s32.totalorder %v7661_v23, 0 }
  0xa0   :  { %2469 = vperm.xlu0 %6153, %v2430_v55   ;;  %v7654_v55 = vadd.s32 4294967295, %v7629_v16 }
  0xa2   :  { %v7656_v19 = vpop.permute.xlu1 %1987  ;;  %vm195_vm5 = vcmp.ge.s32.totalorder %v7654_v55, 0 }
  0xa3   :  { %14572 = vst [vmem:[#allocation116_spill] sm:$0xff] %v7656_v19  ;;  %v7658_v30 = vpop.permute.xlu0 %1922  ;;  %2085 = vperm.xlu1 %6152, %v2034_v54   ;;  %v7678_v54 = vsel %vm7568_vm1, 1.0, %v14399_v24 }
  0xa4   :  { %2080 = vperm.xlu0 %6153, %v2033_v25   ;;  %14575 = vst [vmem:[#allocation117_spill] sm:$0xff] %v7678_v54  ;;  %v2167_v8 = vmul.f32 %v7476_v48, %v7678_v54 }
  0xa6   :  { %v7699_v57 = vpop.permute.xlu1 %2050 }
  0xa7   :  { %v7701_v25 = vpop.permute.xlu0 %2045  ;;  %2607 = vperm.xlu1 %6152, %v2564_v31  }
  0xa8   :  { %2602 = vperm.xlu0 %6153, %v2563_v20  }
  0xa9   :  { %16 = vsyncpa [#allocation6], 0  ;;  %v7715_v27 = vsel %vm7671_vm11, 1.0, %v14399_v24  ;;  %v7718_v11 = vsel %vm814_vm0, 1.0, %v14399_v24  ;;  %v7738_v18 = vadd.s32 1, %v7629_v16  ;;  %v14586_v35 = vrot.slane %v7697_v10, 7 }
  0xaa   :  { %14581 = vst [vmem:[#allocation119_spill] sm:$0xff] %v7715_v27  ;;  %14582 = vst [vmem:[#allocation120_spill] sm:$0xff] %v7718_v11  ;;  %v7729_v4 = vpop.permute.xlu1 %2120  ;;  %v2697_v31 = vmul.f32 %v7555_v7, %v7715_v27  ;;  %v2696_v54 = vmul.f32 %v7509_v28, %v7718_v11  ;;  %v14587_v38 = vrot.slane %v7476_v48, 7  ;;  %vm14588_vm15 = vcmp.lt.s32.totalorder %v6383_v3, 1  ;;  %v7799_v52 = vld [vmem:[%s13770_s0 + $0x50] sm:$0xff]  ;;  %s6312_s29 = smov 32  }
  0xab   :  { %vm211_vm14 = vmand %vm7689_vm8, %vm195_vm5  ;;  %14583 = vst [vmem:[#allocation121_spill] sm:$0xff] %v7729_v4  ;;  %v7731_v36 = vpop.permute.xlu0 %2055  ;;  %2218 = vperm.xlu1 %6152, %v2167_v8   ;;  %v7755_v27 = vadd.s32 1, %v7636_v43  ;;  %v641_v28 = vadd.s32 1, %v7316_v51  ;;  %v640_v5 = vadd.s32 1, %v7322_v13  ;;  %vm13993_vm11 = vcmp.le.s32.totalorder %v7738_v18, 7  ;;  %s6313_s15 = smov 64  }
  0xac   :  { %vm210_vm3 = vmand %vm7703_vm7, %vm13992_vm9  ;;  %2213 = vperm.xlu0 %6153, %v2166_v37   ;;  %14584 = vst [vmem:[#allocation122_spill] sm:$0xff] %v7738_v18  ;;  %v7741_v20 = vsel %vm211_vm14, 1.0, %v14399_v24  ;;  %v7749_v8 = vsel %vm14588_vm15, %v14587_v38, %v14586_v35  ;;  %v7771_v43 = vsel %vm7689_vm8, 1.0, %v14399_v24  ;;  %v7776_v51 = vsel %vm7703_vm7, 1.0, %v14399_v24  ;;  %s6314_s16 = smov 96  }
  0xad   :  { %14585 = vst [vmem:[#allocation123_spill] sm:$0xff] %v7741_v20  ;;  %v7752_v37 = vsel %vm210_vm3, 1.0, %v14399_v24  ;;  %14590 = vst [vmem:[#allocation125_spill] sm:$0xff] %v7755_v27  ;;  %v1604_v35 = vmul.f32 %v7749_v8, %v7741_v20  ;;  %vm14593_vm2 = vcmp.le.s32.totalorder %v7423_v39, 7  ;;  %vm13944_vm0 = vcmp.le.s32.totalorder %v7755_v27, 7 }
  0xae   :  { %14589 = vst [vmem:[#allocation124_spill] sm:$0xff] %v7752_v37  ;;  %v7758_v16 = vpop.permute.xlu1 %2183  ;;  %v1603_v38 = vmul.f32 %v7624_v58, %v7752_v37  ;;  %14591 = vst [vmem:[#allocation126_spill] sm:$0xff] %v7771_v43  ;;  %vm14596_vm14 = vcmp.le.s32.totalorder %v7438_v60, 7  ;;  %vm673_vm15 = vcmp.le.s32.totalorder %v641_v28, 7  ;;  %v1737_v61 = vmul.f32 %v7697_v10, %v7771_v43 }
  0xaf   :  { %v7760_v11 = vpop.permute.xlu0 %2178  ;;  %2740 = vperm.xlu1 %6152, %v2697_v31   ;;  %14592 = vst [vmem:[#allocation127_spill] sm:$0xff] %v7776_v51  ;;  %vm7782_vm4 = vmand %vm7568_vm1, %vm14593_vm2  ;;  %v1869_v31 = vrot.slane %v7697_v10, 1  ;;  %vm657_vm1 = vcmp.ge.s32.totalorder %v641_v28, 0  ;;  %v1736_v22 = vmul.f32 %v7476_v48, %v7776_v51  ;;  %v53_v13 = vadd.s32 96, %v6383_v3 }
  0xb0   :  { %2735 = vperm.xlu0 %6153, %v2696_v54   ;;  %vm7792_vm3 = vmand %vm7578_vm6, %vm14596_vm14  ;;  %vm656_vm6 = vcmp.ge.s32.totalorder %v640_v5, 0  ;;  %vm672_vm14 = vcmp.le.s32.totalorder %v640_v5, 7  ;;  %v7828_v5 = vsel %vm7782_vm4, 1.0, %v14399_v24  ;;  %v14631_v50 = vrot.slane %v7799_v52, 7 }
  0xb1   :  { %vm7809_vm2 = vmand %vm7689_vm8, %vm13993_vm11  ;;  %14604 = vst [vmem:[#allocation129_spill] sm:$0xff] %v7828_v5  ;;  %vm14606_vm8 = vcmp.lt.s32.totalorder %v6383_v3, 7  ;;  %v7839_v43 = vsel %vm7792_vm3, 1.0, %v14399_v24  ;;  %vm467_vm3 = vcmp.le.s32.totalorder %v7607_v12, 7  ;;  %v85_v14 = vshra.s32 %v53_v13, 3 }
  0xb2   :  { %v7801_v20 = vpop.permute.xlu1 %1628  ;;  %vm7821_vm10 = vmand %vm7703_vm7, %vm13944_vm0  ;;  %14607 = vst [vmem:[#allocation130_spill] sm:$0xff] %v7839_v43  ;;  %vm13965_vm0 = vcmp.ge.s32.totalorder %v7613_v53, 0  ;;  %v2299_v44 = vmul.f32 %v7555_v7, %v7839_v43  ;;  %v14632_v45 = vrot.slane %v7697_v10, 7 }
  0xb3   :  { %14599 = vst [vmem:[#allocation128_spill] sm:$0xff] %v7801_v20  ;;  %v7803_v37 = vpop.permute.xlu0 %2188  ;;  %1663 = vperm.xlu1 %6152, %v1604_v35   ;;  %v14605_v35 = vrot.slane %v7476_v48, 1  ;;  %vm7844_vm7 = vmand %vm657_vm1, %vm673_vm15  ;;  %vm466_vm15 = vcmp.le.s32.totalorder %v7613_v53, 7  ;;  %v7888_v7 = vsel %vm7821_vm10, 1.0, %v14399_v24 }
  0xb4   :  { %1658 = vperm.xlu0 %6153, %v1603_v38   ;;  %vm7848_vm4 = vmand %vm656_vm6, %vm672_vm14  ;;  %vm14618_vm6 = vcmp.lt.s32.totalorder %v6383_v3, 7  ;;  %14619 = vst [vmem:[#allocation134_spill] sm:$0xff] %v7888_v7  ;;  %v7978_v47 = vsel %vm7844_vm7, 1.0, %v14399_v24 }
  0xb5   :  { %v7834_v38 = vsel %vm14606_vm8, %v14605_v35, %v1869_v31  ;;  %vm13963_vm8 = vcmp.ge.s32.totalorder %v7607_v12, 0  ;;  %vm7868_vm1 = vmand %vm7844_vm7, %vm193_vm13  ;;  %14638 = vst [vmem:[#allocation146_spill] sm:$0xff] %v7978_v47  ;;  %v2566_v15 = vmul.f32 %v7697_v10, %v7978_v47 }
  0xb6   :  { %v7852_v62 = vpop.permute.xlu1 %1761  ;;  %v2300_v28 = vmul.f32 %v7834_v38, %v7828_v5  ;;  %vm704_vm13 = vmand %vm7848_vm4, %vm192_vm12  ;;  %v1902_v43 = vmul.f32 %v7834_v38, %v7888_v7 }
  0xb7   :  { %14612 = vst [vmem:[#allocation131_spill] sm:$0xff] %v7852_v62  ;;  %v7854_v35 = vpop.permute.xlu0 %1633  ;;  %1796 = vperm.xlu1 %6152, %v1737_v61   ;;  %v14617_v61 = vrot.slane %v7799_v52, 1  ;;  %vm7906_vm14 = vmand %vm13965_vm0, %vm466_vm15  ;;  %v7920_v62 = vsel %vm704_vm13, 1.0, %v14399_v24 }
  0xb8   :  { %14613 = vst [vmem:[#allocation132_spill] sm:$0xff] %v7854_v35  ;;  %1791 = vperm.xlu0 %6153, %v1736_v22   ;;  %v52_v35 = vadd.s32 88, %v6383_v3  ;;  %v7877_v22 = vsel %vm7809_vm2, 1.0, %v14399_v24  ;;  %vm7896_vm2 = vmand %vm13963_vm8, %vm467_vm3  ;;  %v2432_v33 = vmul.f32 %v7624_v58, %v7920_v62  ;;  %vm14633_vm3 = vcmp.lt.s32.totalorder %v6383_v3, 1  ;;  %v6154_v58 = vld [vmem:[%s13773_s3 + $0x80] sm:$0xff]  }
  0xb9   :  { %14616 = vst [vmem:[#allocation133_spill] sm:$0xff] %v7877_v22  ;;  %v7883_v41 = vsel %vm14618_vm6, %v1869_v31, %v14617_v61  ;;  %14627 = vst [vmem:[#allocation138_spill] sm:$0xff] %v7920_v62  ;;  %6088 = vmatprep.subr.bf16.mxu1 %v6154_v58  ;;  %vm14644_vm6 = vcmp.le.s32.totalorder %v7423_v39, 7  ;;  %v8030_v51 = vsel %vm7906_vm14, 1.0, %v14399_v24  ;;  %v14665_v39 = vrot.slane %v7799_v52, 7 }
  0xba   :  { %v7900_v5 = vpop.permute.xlu1 %2253  ;;  %v1903_v61 = vmul.f32 %v7883_v41, %v7877_v22  ;;  %v84_v20 = vshra.s32 %v52_v35, 3  ;;  %vm499_vm12 = vmand %vm7896_vm2, %vm195_vm5  ;;  %v7935_v22 = vand.u32 7, %v85_v14  ;;  %v7952_v14 = vsel %vm14633_vm3, %v14632_v45, %v14631_v50  ;;  %6089 = vmatpush3.bf16.msra.mxu1 %v6154_v58  ;;  %v8001_v58 = vld [vmem:[%s13770_s0 + $0x58] sm:$0xff]  ;;  %14650 = vst [vmem:[#allocation155_spill] sm:$0xff] %v8030_v51 }
  0xbb   :  { %14622 = vst [vmem:[#allocation135_spill] sm:$0xff] %v7900_v5  ;;  %v7902_v31 = vpop.permute.xlu0 %1766  ;;  %2351 = vperm.xlu1 %6152, %v2300_v28   ;;  %vm498_vm10 = vmand %vm7906_vm14, %vm13992_vm9  ;;  %v7944_v59 = vsel %vm499_vm12, 1.0, %v14399_v24  ;;  %v8067_v5 = vadd.s32 1, %v7607_v12  ;;  %v2168_v19 = vmul.f32 %v7697_v10, %v8030_v51  ;;  %v14664_v10 = vrot.slane %v8001_v58, 7  ;;  %v8127_v51 = vld [vmem:[%s13771_s1] ss:$0 sm:$0xff] }
  0xbc   :  { %14623 = vst [vmem:[#allocation136_spill] sm:$0xff] %v7902_v31  ;;  %2346 = vperm.xlu0 %6153, %v2299_v44   ;;  %v7917_v31 = vsel %vm7868_vm1, 1.0, %v14399_v24  ;;  %14628 = vst [vmem:[#allocation139_spill] sm:$0xff] %v7935_v22  ;;  %v7941_v44 = vand.u32 7, %v84_v20  ;;  %v7960_v20 = vand.u32 7, %v53_v13  ;;  %v117_v45 = vadd.s32 4294967295, %v7935_v22 }
  0xbd   :  { %14626 = vst [vmem:[#allocation137_spill] sm:$0xff] %v7917_v31  ;;  %v2433_v7 = vmul.f32 %v7749_v8, %v7917_v31  ;;  %14630 = vst [vmem:[#allocation141_spill] sm:$0xff] %v7944_v59  ;;  %v55_v31 = vadd.s32 112, %v6383_v3  ;;  %v2036_v50 = vmul.f32 %v7952_v14, %v7944_v59  ;;  %vm14686_vm9 = vcmp.le.s32.totalorder %v7755_v27, 7 }
  0xbe   :  { %v7931_v28 = vpop.permute.xlu1 %2316  ;;  %14629 = vst [vmem:[#allocation140_spill] sm:$0xff] %v7941_v44  ;;  %14635 = vst [vmem:[#allocation143_spill] sm:$0xff] %v7960_v20  ;;  %vm149_vm1 = vcmp.ge.s32.totalorder %v117_v45, 0  ;;  %vm165_vm15 = vcmp.le.s32.totalorder %v117_v45, 7  ;;  %v8060_v45 = vadd.s32 1, %v7960_v20 }
  0xbf   :  { %v7933_v0 = vpop.permute.xlu0 %2311  ;;  %1962 = vperm.xlu1 %6152, %v1903_v61   ;;  %v7962_v61 = vand.u32 7, %v52_v35  ;;  %v116_v35 = vadd.s32 4294967295, %v7941_v44  ;;  %v87_v59 = vshra.s32 %v55_v31, 3  ;;  %vm8011_vm13 = vmand %vm7844_vm7, %vm14644_vm6  ;;  %vm14651_vm7 = vcmp.le.s32.totalorder %v7438_v60, 7  ;;  %14671 = vst [vmem:[#allocation160_spill] sm:$0xff] %v8127_v51 }
  0xc0   :  { %1957 = vperm.xlu0 %6153, %v1902_v43   ;;  %v7955_v43 = vsel %vm498_vm10, 1.0, %v14399_v24  ;;  %vm8036_vm3 = vmand %vm7848_vm4, %vm14651_vm7  ;;  %v1871_v60 = vrot.slane %v8001_v58, 1 }
  0xc1   :  { %14634 = vst [vmem:[#allocation142_spill] sm:$0xff] %v7955_v43  ;;  %14636 = vst [vmem:[#allocation144_spill] sm:$0xff] %v7962_v61  ;;  %v2035_v13 = vmul.f32 %v7749_v8, %v7955_v43  ;;  %v7992_v8 = vadd.s32 4294967295, %v7962_v61  ;;  %vm148_vm12 = vcmp.ge.s32.totalorder %v116_v35, 0  ;;  %vm164_vm10 = vcmp.le.s32.totalorder %v116_v35, 7 }
  0xc2   :  { %v7965_v62 = vpop.permute.xlu1 %1927  ;;  %vm8042_vm6 = vmand %vm149_vm1, %vm165_vm15  ;;  %v8064_v47 = vadd.s32 1, %v7962_v61  ;;  %v8069_v4 = vand.u32 7, %v87_v59  ;;  %v8094_v59 = vadd.s32 1, %v7613_v53  ;;  %vm14666_vm15 = vcmp.lt.s32.totalorder %v6383_v3, 1 }
  0xc3   :  { %14637 = vst [vmem:[#allocation145_spill] sm:$0xff] %v7965_v62  ;;  %v7967_v46 = vpop.permute.xlu0 %2321  ;;  %2484 = vperm.xlu1 %6152, %v2433_v7   ;;  %v7983_v62 = vsel %vm7848_vm4, 1.0, %v14399_v24  ;;  %v7989_v7 = vadd.s32 4294967295, %v7960_v20  ;;  %14641 = vst [vmem:[#allocation149_spill] sm:$0xff] %v7992_v8  ;;  %vm13989_vm0 = vcmp.ge.s32.totalorder %v7992_v8, 0  ;;  %v8083_v20 = vsel %vm8036_vm3, 1.0, %v14399_v24 }
  0xc4   :  { %2479 = vperm.xlu0 %6153, %v2432_v33   ;;  %14639 = vst [vmem:[#allocation147_spill] sm:$0xff] %v7983_v62  ;;  %v6155_v33 = vld [vmem:[%s13773_s3 + $0x88] sm:$0xff]   ;;  %v2565_v2 = vmul.f32 %v7476_v48, %v7983_v62  ;;  %v8025_v48 = vsel %vm7896_vm2, 1.0, %v14399_v24  ;;  %vm8055_vm4 = vmand %vm148_vm12, %vm164_vm10  ;;  %v8108_v61 = vsel %vm14666_vm15, %v14665_v39, %v14664_v10  ;;  %v14669_v53 = vrot.slane %v7799_v52, 1 }
  0xc5   :  { %14640 = vst [vmem:[#allocation148_spill] sm:$0xff] %v7989_v7  ;;  %6090 = vmatprep.subr.bf16.mxu1 %v6155_v33  ;;  %14649 = vst [vmem:[#allocation154_spill] sm:$0xff] %v8025_v48  ;;  %vm13990_vm8 = vcmp.ge.s32.totalorder %v7989_v7, 0  ;;  %v2169_v35 = vmul.f32 %v7799_v52, %v8025_v48  ;;  %vm14670_vm12 = vcmp.lt.s32.totalorder %v6383_v3, 7  ;;  %vm14028_vm10 = vcmp.le.s32.totalorder %v8060_v45, 7 }
  0xc6   :  { %v7994_v43 = vpop.permute.xlu1 %2386  ;;  %6091 = vmatpush3.bf16.msra.mxu1 %v6155_v33  ;;  %14658 = vst [vmem:[#allocation156_spill] sm:$0xff] %v8069_v4  ;;  %14660 = vst [vmem:[#allocation158_spill] sm:$0xff] %v8083_v20  ;;  %v8122_v48 = vsel %vm14670_vm12, %v14669_v53, %v1871_v60  ;;  %vm404_vm3 = vcmp.le.s32.totalorder %v8064_v47, 7  ;;  %vm659_vm15 = vcmp.ge.s32.totalorder %v8067_v5, 0  ;;  %v8145_v53 = vld [vmem:[%s13771_s1 + $0x1] ss:$0 sm:$0xff] }
  0xc7   :  { %14642 = vst [vmem:[#allocation150_spill] sm:$0xff] %v7994_v43  ;;  %v7996_v21 = vpop.permute.xlu0 %1932  ;;  %2095 = vperm.xlu1 %6152, %v2036_v50   ;;  %v8018_v50 = vld [vmem:[%s13770_s0 + $0x60] sm:$0xff]  ;;  %v8078_v43 = vsel %vm8011_vm13, 1.0, %v14399_v24  ;;  %vm8089_vm1 = vmand %vm8042_vm6, %vm13990_vm8  ;;  %v8176_v12 = vsel %vm8042_vm6, 1.0, %v14399_v24 }
  0xc8   :  { %14643 = vst [vmem:[#allocation151_spill] sm:$0xff] %v7996_v21  ;;  %2090 = vperm.xlu0 %6153, %v2035_v13   ;;  %14647 = vst [vmem:[#allocation152_spill] sm:$0xff] %v8018_v50  ;;  %v8020_v13 = vand.u32 7, %v55_v31  ;;  %v1739_v27 = vmul.f32 %v8001_v58, %v8176_v12  ;;  %v8319_v33 = vld [vmem:[%s13771_s1 + $0x6] ss:$0 sm:$0xff] }
  0xc9   :  { %14659 = vst [vmem:[#allocation157_spill] sm:$0xff] %v8078_v43  ;;  %vm8114_vm13 = vmand %vm8055_vm4, %vm13989_vm0  ;;  %vm468_vm0 = vcmp.le.s32.totalorder %v7941_v44, 7 }
  0xca   :  { %14648 = vst [vmem:[#allocation153_spill] sm:$0xff] %v8020_v13  ;;  %v8050_v54 = vpop.permute.xlu1 %2449  ;;  %v8097_v21 = vadd.s32 4294967295, %v8020_v13  ;;  %vm14675_vm7 = vmmov %vm14670_vm12  ;;  %v8161_v7 = vsel %vm8114_vm13, 1.0, %v14399_v24  ;;  %vm675_vm12 = vcmp.le.s32.totalorder %v8067_v5, 7  ;;  %v8249_v42 = vadd.s32 1, %v8020_v13 }
  0xcb   :  { %v8052_v62 = vpop.permute.xlu0 %2444  ;;  %2617 = vperm.xlu1 %6152, %v2566_v15   ;;  %v8100_v15 = vadd.s32 1, %v8069_v4  ;;  %14678 = vst [vmem:[#allocation165_spill] sm:$0xff] %v8161_v7  ;;  %14680 = vst [vmem:[#allocation167_spill] sm:$0xff] %v8176_v12 }
  0xcc   :  { %2612 = vperm.xlu0 %6153, %v2565_v2   ;;  %14663 = vst [vmem:[#allocation159_spill] sm:$0xff] %v8097_v21  ;;  %v14674_v21 = vrot.slane %v8018_v50, 1  ;;  %v1828_v2 = vmul.f32 %v8145_v53, %v7467_v29  ;;  %vm8212_vm8 = vmand %vm7896_vm2, %vm13993_vm11  ;;  %vm14690_vm2 = vcmp.lt.s32.totalorder %v6383_v3, 1  ;;  %vm14010_vm11 = vcmp.ge.s32.totalorder %v7941_v44, 0 }
  0xcd   :  { %vm8230_vm13 = vmand %vm7906_vm14, %vm14686_vm9  ;;  %v8271_v12 = vsel %vm8212_vm8, 1.0, %v14399_v24 }
  0xce   :  { %v8129_v10 = vpop.permute.xlu1 %2060  ;;  %v8138_v8 = vsel %vm14675_vm7, %v1871_v60, %v14674_v21  ;;  %v2698_v60 = vmul.f32 %v7834_v38, %v8083_v20  ;;  %v8156_v21 = vsel %vm8089_vm1, 1.0, %v14399_v24  ;;  %v1829_v38 = vmul.f32 %v8145_v53, %v7574_v6  ;;  %v8189_v6 = vld [vmem:[%s13771_s1 + $0x3] ss:$0 sm:$0xff]  ;;  %vm14692_vm7 = vmmov %vm14690_vm2  ;;  %14693 = vst [vmem:[#allocation171_spill] sm:$0xff] %v8271_v12 }
  0xcf   :  { %14672 = vst [vmem:[#allocation161_spill] sm:$0xff] %v8129_v10  ;;  %v8131_v39 = vpop.permute.xlu0 %2454  ;;  %14676 = vst [vmem:[#allocation163_spill] sm:$0xff] %v8138_v8  ;;  %v1696_v10 = vmul.f32 %v8127_v51, %v7605_v26  ;;  %2228 = vperm.xlu1 %6152, %v2169_v35   ;;  %v1573_v26 = vrot.slane %v8018_v50, 7  ;;  %vm674_vm1 = vcmp.le.s32.totalorder %v8094_v59, 7  ;;  %v8180_v35 = vadd.s32 4294967295, %v8069_v4 }
  0xd0   :  { %14673 = vst [vmem:[#allocation162_spill] sm:$0xff] %v8131_v39  ;;  %2223 = vperm.xlu0 %6153, %v2168_v19   ;;  %v2699_v39 = vmul.f32 %v7883_v41, %v8078_v43  ;;  %14677 = vst [vmem:[#allocation164_spill] sm:$0xff] %v8156_v21  ;;  %v8169_v19 = vld [vmem:[%s13771_s1 + $0x2] ss:$0 sm:$0xff]  ;;  %v1695_v43 = vmul.f32 %v8127_v51, %v7478_v63  ;;  %v1606_v8 = vmul.f32 %v8108_v61, %v8156_v21 }
  0xd1   :  { %14679 = vst [vmem:[#allocation166_spill] sm:$0xff] %v8169_v19  ;;  %v8200_v4 = vsel %vm8055_vm4, 1.0, %v14399_v24  ;;  %v1845_v29 = vadd.f32 %v1829_v38, %v1696_v10  ;;  %v1995_v63 = vmul.f32 %v8169_v19, %v7631_v9  ;;  %v1994_v10 = vmul.f32 %v8169_v19, %v7526_v32  ;;  %v8224_v9 = vld [vmem:[%s13771_s1 + $0x4] ss:$0 sm:$0xff]  ;;  %vm8277_vm9 = vmand %vm8042_vm6, %vm14028_vm10 }
  0xd2   :  { %v8191_v20 = vpop.permute.xlu1 %2519  ;;  %14683 = vst [vmem:[#allocation170_spill] sm:$0xff] %v8200_v4  ;;  %v14691_v32 = vrot.slane %v6457_v34, 7  ;;  %v1738_v18 = vmul.f32 %v7799_v52, %v8200_v4  ;;  %v1844_v34 = vadd.f32 %v1828_v2, %v1695_v43  ;;  %v1996_v43 = vmul.f32 %v8169_v19, %v7658_v30  ;;  %vm8294_vm8 = vmand %vm659_vm15, %vm675_vm12 }
  0xd3   :  { %14681 = vst [vmem:[#allocation168_spill] sm:$0xff] %v8191_v20  ;;  %v8193_v50 = vpop.permute.xlu0 %2065  ;;  %2750 = vperm.xlu1 %6152, %v2699_v39   ;;  %v8217_v20 = vadd.s32 104, %v6383_v3  ;;  %v14689_v39 = vrot.slane %v8001_v58, 7  ;;  %v2261_v2 = vmul.f32 %v8224_v9, %v7758_v16  ;;  %v8288_v21 = vsel %vm8230_vm13, 1.0, %v14399_v24  ;;  %vm8304_vm14 = vmand %vm8055_vm4, %vm404_vm3 }
  0xd4   :  { %14682 = vst [vmem:[#allocation169_spill] sm:$0xff] %v8193_v50  ;;  %2745 = vperm.xlu0 %6153, %v2698_v60   ;;  %v1605_v50 = vmul.f32 %v7952_v14, %v8161_v7  ;;  %v8246_v38 = vsel %vm14692_vm7, %v1573_v26, %v14691_v32  ;;  %v1697_v7 = vmul.f32 %v8127_v51, %v7603_v56  ;;  %v8266_v56 = vld [vmem:[%s13771_s1 + $0x5] ss:$0 sm:$0xff]  ;;  %14696 = vst [vmem:[#allocation172_spill] sm:$0xff] %v8288_v21 }
  0xd5   :  { %v8238_v60 = vsel %vm14690_vm2, %v14689_v39, %v1573_v26  ;;  %v2128_v39 = vmul.f32 %v8189_v6, %v7699_v57  ;;  %v1830_v26 = vmul.f32 %v8145_v53, %v7524_v49  ;;  %v2127_v32 = vmul.f32 %v8189_v6, %v7701_v25  ;;  %vm8333_vm6 = vmand %vm8294_vm8, %vm195_vm5 }
  0xd6   :  { %v2583_v13 = vpop.permute.xlu1 %2582  ;;  %v2011_v25 = vadd.f32 %v1995_v63, %v1845_v29  ;;  %v2010_v29 = vadd.f32 %v1994_v10, %v1844_v34  ;;  %v2260_v30 = vmul.f32 %v8224_v9, %v7760_v11  ;;  %v86_v5 = vshra.s32 %v8217_v20, 3 }
  0xd7   :  { %v2578_v57 = vpop.permute.xlu0 %2577  ;;  %1673 = vperm.xlu1 %6152, %v1606_v8   ;;  %v8309_v8 = vand.u32 7, %v8217_v20  ;;  %v2129_v10 = vmul.f32 %v8189_v6, %v7731_v36  ;;  %v2394_v11 = vmul.f32 %v8266_v56, %v7931_v28  ;;  %v2393_v34 = vmul.f32 %v8266_v56, %v7933_v0  ;;  %v8340_v0 = vld [vmem:[%s13771_s1 + $0x7] ss:$0 sm:$0xff] }
  0xd8   :  { %1668 = vperm.xlu0 %6153, %v1605_v50   ;;  %v1846_v50 = vadd.f32 %v1830_v26, %v1697_v7  ;;  %v2144_v63 = vadd.f32 %v2128_v39, %v2011_v25  ;;  %v2143_v17 = vadd.f32 %v2127_v32, %v2010_v29  ;;  %v2302_v7 = vmul.f32 %v8122_v48, %v8271_v12  ;;  %v14721_v28 = vld [vmem:[#allocation148_spill] sm:$0xff] }
  0xd9   :  { %14701 = vst [vmem:[#allocation173_spill] sm:$0xff] %v8309_v8  ;;  %v2301_v36 = vmul.f32 %v7883_v41, %v8288_v21  ;;  %14704 = vst [vmem:[#allocation174_spill] sm:$0xff] %v8340_v0  ;;  %v8345_v41 = vsel %vm8277_vm9, 1.0, %v14399_v24  ;;  %v8350_v55 = vsel %vm8304_vm14, 1.0, %v14399_v24  ;;  %vm14707_vm5 = vcmp.ge.s32.totalorder %v8094_v59, 0 }
  0xda   :  { %v8323_v4 = vpop.permute.xlu1 %2193  ;;  %v2012_v39 = vadd.f32 %v1996_v43, %v1846_v50  ;;  %v2277_v26 = vadd.f32 %v2261_v2, %v2144_v63  ;;  %14705 = vst [vmem:[#allocation175_spill] sm:$0xff] %v8345_v41  ;;  %14706 = vst [vmem:[#allocation176_spill] sm:$0xff] %v8350_v55  ;;  %v2527_v49 = vmul.f32 %v8319_v33, %v8050_v54  ;;  %v8371_v59 = vsel %vm8333_vm6, 1.0, %v14399_v24 }
  0xdb   :  { %v2588_v20 = vpop.permute.xlu0 %2587  ;;  %1806 = vperm.xlu1 %6152, %v1739_v27   ;;  %vm8356_vm4 = vmand %vm14707_vm5, %vm674_vm1  ;;  %v2276_v27 = vadd.f32 %v2260_v30, %v2143_v17  ;;  %v2526_v25 = vmul.f32 %v8319_v33, %v8052_v62  ;;  %v1710_v43 = vmul.f32 %v8127_v51, %v7633_v40  ;;  %14710 = vst [vmem:[#allocation177_spill] sm:$0xff] %v8371_v59  ;;  %vm14711_vm15 = vcmp.le.s32.totalorder %v7935_v22, 7 }
  0xdc   :  { %1801 = vperm.xlu0 %6153, %v1738_v18   ;;  %v2262_v18 = vmul.f32 %v8224_v9, %v7803_v37  ;;  %v2145_v2 = vadd.f32 %v2129_v10, %v2012_v39  ;;  %v2410_v29 = vadd.f32 %v2394_v11, %v2277_v26  ;;  %vm14712_vm12 = vcmp.ge.s32.totalorder %v7935_v22, 0  ;;  %vm8409_vm14 = vmand %vm14010_vm11, %vm468_vm0 }
  0xdd   :  { %vm8377_vm7 = vmand %vm14712_vm12, %vm14711_vm15  ;;  %vm663_vm1 = vcmp.ge.s32.totalorder %v8100_v15, 0  ;;  %vm679_vm13 = vcmp.le.s32.totalorder %v8100_v15, 7  ;;  %v2409_v62 = vadd.f32 %v2393_v34, %v2276_v27  ;;  %v2395_v40 = vmul.f32 %v8266_v56, %v7967_v46  ;;  %v14718_v46 = vld [vmem:[#allocation163_spill] sm:$0xff] }
  0xde   :  { %v2660_v54 = vmul.f32 %v8340_v0, %v2583_v13  ;;  %v2659_v30 = vmul.f32 %v8340_v0, %v2578_v57  ;;  %v8387_v16 = vpop.permute.xlu1 %2652  ;;  %vm14715_vm2 = vcmp.ge.s32.totalorder %v7661_v23, 0  ;;  %v1843_v10 = vmul.f32 %v8145_v53, %v7572_v1  ;;  %v8416_v1 = vld [vmem:[%s13770_s0 + $0x68] sm:$0xff]  ;;  %v9019_v23 = vld [vmem:[%s13770_s0 + $0x70] sm:$0xff] }
  0xdf   :  { %v8389_v50 = vpop.permute.xlu0 %2198  ;;  %vm8395_vm9 = vmand %vm8356_vm4, %vm14715_vm2  ;;  %2361 = vperm.xlu1 %6152, %v2302_v7   ;;  %v1905_v13 = vmul.f32 %v14718_v46, %v8345_v41  ;;  %v1904_v57 = vmul.f32 %v8122_v48, %v8350_v55  ;;  %v2278_v17 = vadd.f32 %v2262_v18, %v2145_v2  ;;  %v2543_v34 = vadd.f32 %v2527_v49, %v2410_v29  ;;  %v14726_v18 = vld [vmem:[#allocation162_spill] sm:$0xff]  ;;  %v14728_v29 = vld [vmem:[#allocation116_spill] sm:$0xff] }
  0xe0   :  { %2356 = vperm.xlu0 %6153, %v2301_v36   ;;  %v2542_v7 = vadd.f32 %v2526_v25, %v2409_v62  ;;  %v8422_v36 = vld [vmem:[%s13771_s1 + $0x8] ss:$0 sm:$0xff]  ;;  %vm14722_vm0 = vcmp.ge.s32.totalorder %v14721_v28, 0  ;;  %vm151_vm5 = vcmp.ge.s32.totalorder %v8180_v35, 0  ;;  %vm167_vm15 = vcmp.le.s32.totalorder %v8180_v35, 7 }
  0xe1   :  { %vm8428_vm6 = vmand %vm8377_vm7, %vm14722_vm0  ;;  %v8434_v26 = vand.u32 7, %v86_v5  ;;  %v1859_v27 = vadd.f32 %v1843_v10, %v1710_v43  ;;  %v2528_v49 = vmul.f32 %v8319_v33, %v14726_v18  ;;  %v2435_v25 = vmul.f32 %v8108_v61, %v8371_v59  ;;  %v14729_v43 = vld [vmem:[#allocation149_spill] sm:$0xff]  ;;  %v14733_v18 = vld [vmem:[#allocation159_spill] sm:$0xff] }
  0xe2   :  { %v8443_v2 = vsel %vm8395_vm9, 1.0, %v14399_v24  ;;  %v2009_v62 = vmul.f32 %v8169_v19, %v14728_v29  ;;  %v2411_v11 = vadd.f32 %v2395_v40, %v2278_v17  ;;  %v2676_v41 = vadd.f32 %v2660_v54, %v2543_v34  ;;  %v2716_v5 = vpop.permute.xlu1 %2715  ;;  %v8469_v34 = vld [vmem:[%s13772_s2] ss:$0 sm:$0xff] }
  0xe3   :  { %14725 = vst [vmem:[#allocation163_spill] sm:$0xff] %v8434_v26  ;;  %14727 = vst [vmem:[#allocation148_spill] sm:$0xff] %v8443_v2  ;;  %v2675_v12 = vadd.f32 %v2659_v30, %v2542_v7  ;;  %v2711_v55 = vpop.permute.xlu0 %2710  ;;  %vm14730_vm12 = vcmp.ge.s32.totalorder %v14729_v43, 0  ;;  %vm14024_vm0 = vcmp.ge.s32.totalorder %v14733_v18, 0  ;;  %v2661_v63 = vmul.f32 %v8340_v0, %v2588_v20  ;;  %1972 = vperm.xlu1 %6152, %v1905_v13   ;;  %v14735_v30 = vld [vmem:[#allocation121_spill] sm:$0xff] }
  0xe4   :  { %vm8451_vm2 = vmand %vm8409_vm14, %vm14730_vm12  ;;  %v2793_v59 = vmul.f32 %v8422_v36, %v2716_v5  ;;  %v2792_v40 = vmul.f32 %v8422_v36, %v2711_v55  ;;  %1967 = vperm.xlu0 %6153, %v1904_v57   ;;  %v8462_v54 = vsel %vm8428_vm6, 1.0, %v14399_v24  ;;  %v2142_v17 = vmul.f32 %v8189_v6, %v14735_v30  ;;  %v14737_v30 = vld [vmem:[#allocation135_spill] sm:$0xff] }
  0xe5   :  { %14734 = vst [vmem:[#allocation162_spill] sm:$0xff] %v8462_v54  ;;  %v2434_v20 = vmul.f32 %v7952_v14, %v8443_v2  ;;  %v118_v13 = vadd.s32 4294967295, %v8434_v26  ;;  %v8475_v55 = vadd.s32 4294967295, %v8309_v8  ;;  %v2544_v57 = vadd.f32 %v2528_v49, %v2411_v11  ;;  %vm8513_vm6 = vmand %vm663_vm1, %vm679_vm13 }
  0xe6   :  { %v2809_v7 = vadd.f32 %v2793_v59, %v2676_v41  ;;  %v2808_v39 = vadd.f32 %v2792_v40, %v2675_v12  ;;  %v8480_v29 = vsel %vm8451_vm2, 1.0, %v14399_v24  ;;  %v2025_v5 = vadd.f32 %v2009_v62, %v1859_v27  ;;  %v8484_v43 = vpop.permute.xlu1 %1638  ;;  %v14741_v40 = vld [vmem:[#allocation152_spill] sm:$0xff] }
  0xe7   :  { %14736 = vst [vmem:[#allocation116_spill] sm:$0xff] %v8480_v29  ;;  %v2275_v21 = vmul.f32 %v8224_v9, %v14737_v30  ;;  %14738 = vst [vmem:[#allocation159_spill] sm:$0xff] %v8484_v43  ;;  %v2721_v14 = vpop.permute.xlu0 %2720  ;;  %v2038_v2 = vmul.f32 %v8238_v60, %v8462_v54  ;;  %v8491_v41 = vsel %vm8294_vm8, 1.0, %v14399_v24  ;;  %v2677_v12 = vadd.f32 %v2661_v63, %v2544_v57 }
  0xe8   :  { %14739 = vst [vmem:[#allocation121_spill] sm:$0xff] %v8491_v41  ;;  %v2832_v59 = vadd.f32 %v8469_v34, %v2809_v7  ;;  %v2831_v11 = vadd.f32 %v8469_v34, %v2808_v39  ;;  %2494 = vperm.xlu1 %6152, %v2435_v25   ;;  %v2794_v27 = vmul.f32 %v8422_v36, %v2721_v14  ;;  %v14740_v10 = vrot.slane %v8416_v1, 1  ;;  %v14750_v14 = vld [vmem:[#allocation122_spill] sm:$0xff] }
  0xe9   :  { %v2158_v49 = vadd.f32 %v2142_v17, %v2025_v5  ;;  %2489 = vperm.xlu0 %6153, %v2434_v20   ;;  %v2037_v62 = vmul.f32 %v8108_v61, %v8480_v29  ;;  %v14742_v30 = vrot.slane %v14741_v40, 1  ;;  %vm14743_vm9 = vcmp.lt.s32.totalorder %v6383_v3, 7  ;;  %v14746_v61 = vld [vmem:[#allocation150_spill] sm:$0xff] }
  0xea   :  { %v8507_v63 = vadd.s32 1, %v8309_v8  ;;  %v2408_v17 = vmul.f32 %v8266_v56, %v14746_v61  ;;  %v2810_v20 = vadd.f32 %v2794_v27, %v2677_v12  ;;  %v8522_v57 = vsel %vm8356_vm4, 1.0, %v14399_v24  ;;  %v8525_v39 = vpop.permute.xlu1 %1771  ;;  %v14754_v27 = vld [vmem:[#allocation168_spill] sm:$0xff] }
  0xeb   :  { %v8504_v54 = vsel %vm14743_vm9, %v14742_v30, %v14740_v10  ;;  %14747 = vst [vmem:[#allocation135_spill] sm:$0xff] %v8522_v57  ;;  %vm14023_vm12 = vcmp.ge.s32.totalorder %v8475_v55, 0  ;;  %v2291_v7 = vadd.f32 %v2275_v21, %v2158_v49  ;;  %14748 = vst [vmem:[#allocation152_spill] sm:$0xff] %v8525_v39  ;;  %v8527_v5 = vpop.permute.xlu0 %1643  ;;  %v2568_v15 = vmul.f32 %v8001_v58, %v8491_v41 }
  0xec   :  { %14749 = vst [vmem:[#allocation150_spill] sm:$0xff] %v8527_v5  ;;  %vm14751_vm1 = vcmp.le.s32.totalorder %v14750_v14, 7  ;;  %vm150_vm2 = vcmp.ge.s32.totalorder %v118_v13, 0  ;;  %vm166_vm9 = vcmp.le.s32.totalorder %v118_v13, 7  ;;  %v2541_v21 = vmul.f32 %v8319_v33, %v14754_v27  ;;  %2105 = vperm.xlu1 %6152, %v2038_v2   ;;  %v14760_v14 = vld [vmem:[#allocation125_spill] sm:$0xff] }
  0xed   :  { %vm8535_vm13 = vmand %vm8294_vm8, %vm14751_vm1  ;;  %v8541_v49 = vmax.f32 %v2832_v59, 0.0  ;;  %v8543_v10 = vmax.f32 %v2831_v11, 0.0  ;;  %v2833_v30 = vadd.f32 %v8469_v34, %v2810_v20  ;;  %2100 = vperm.xlu0 %6153, %v2037_v62   ;;  %v2567_v61 = vmul.f32 %v7799_v52, %v8522_v57  ;;  %v14785_v57 = vld [vmem:[#allocation42_spill] sm:$0xff] }
  0xee   :  { %vm8550_vm8 = vmand %vm151_vm5, %vm167_vm15  ;;  %v8559_v59 = vsel %vm8377_vm7, 1.0, %v14399_v24  ;;  %v8564_v2 = vsel %vm8409_vm14, 1.0, %v14399_v24  ;;  %vm407_vm1 = vcmp.le.s32.totalorder %v8249_v42, 7  ;;  %v8568_v35 = vadd.s32 1, %v7935_v22  ;;  %v8587_v8 = vpop.permute.xlu1 %2326 }
  0xef   :  { %14757 = vst [vmem:[#allocation122_spill] sm:$0xff] %v8559_v59  ;;  %14758 = vst [vmem:[#allocation168_spill] sm:$0xff] %v8564_v2  ;;  %v2424_v11 = vadd.f32 %v2408_v17, %v2291_v7  ;;  %v2674_v62 = vmul.f32 %v8340_v0, %v8387_v16  ;;  %v8572_v52 = vmax.f32 %v2833_v30, 0.0  ;;  %v8577_v20 = vsel %vm8535_vm13, 1.0, %v14399_v24  ;;  %v8589_v17 = vpop.permute.xlu0 %1776  ;;  %v14767_v7 = vld [vmem:[#allocation8_spill] sm:$0xff]  ;;  %v14782_v16 = vld [vmem:[#allocation22_spill] sm:$0xff] }
  0xf0   :  { %14759 = vst [vmem:[#allocation178_spill] sm:$0xff] %v8577_v20  ;;  %vm14761_vm5 = vcmp.le.s32.totalorder %v14760_v14, 7  ;;  %14764 = vst [vmem:[#allocation125_spill] sm:$0xff] %v8589_v17  ;;  %v14768_v12 = vrot.slane %v14767_v7, 1  ;;  %v14769_v32 = vrot.slane %v8416_v1, 1  ;;  %vm2919_vm13 = vcmask 261120   ;;  %2627 = vperm.xlu1 %6152, %v2568_v15  }
  0xf1   :  { %vm8583_vm15 = vmand %vm8356_vm4, %vm14761_vm5  ;;  %vm14770_vm4 = vcmp.lt.s32.totalorder %v6383_v3, 7  ;;  %v8608_v14 = vadd.s32 1, %v7941_v44  ;;  %v8613_v22 = vsel %vm8513_vm6, 1.0, %v14399_v24  ;;  %v2557_v41 = vadd.f32 %v2541_v21, %v2424_v11  ;;  %2622 = vperm.xlu0 %6153, %v2567_v61   ;;  %v14792_v0 = vld [vmem:[#allocation46_spill] sm:$0xff] }
  0xf2   :  { %vm8595_vm11 = vmand %vm8550_vm8, %vm14024_vm0  ;;  %v8605_v30 = vsel %vm14770_vm4, %v14769_v32, %v14768_v12  ;;  %14771 = vst [vmem:[#allocation8_spill] sm:$0xff] %v8613_v22  ;;  %v2171_v7 = vmul.f32 %v14741_v40, %v8559_v59  ;;  %v2864_v32 = vrot.slane %v8541_v49, 7  ;;  %v2170_v44 = vmul.f32 %v8001_v58, %v8564_v2  ;;  %v14776_v58 = vld [vmem:[#allocation64_spill] sm:$0xff]  ;;  %v2786_v59 = vpop.permute.xlu1 %2785 }
  0xf3   :  { %vm8619_vm5 = vmand %vm150_vm2, %vm166_vm9  ;;  %v2701_v15 = vmul.f32 %v14718_v46, %v8577_v20  ;;  %vm661_vm4 = vcmp.ge.s32.totalorder %v8568_v35, 0  ;;  %v2690_v13 = vadd.f32 %v2674_v62, %v2557_v41  ;;  %v8634_v11 = vsel %vm8583_vm15, 1.0, %v14399_v24  ;;  %v8646_v20 = vpop.permute.xlu0 %2331  ;;  %v14780_v62 = vld [vmem:[#allocation63_spill] sm:$0xff] }
  0xf4   :  { %14774 = vst [vmem:[#allocation179_spill] sm:$0xff] %v8634_v11  ;;  %v8639_v61 = vsel %vm8595_vm11, 1.0, %v14399_v24  ;;  %vm406_vm2 = vcmp.le.s32.totalorder %v8507_v63, 7  ;;  %v8644_v12 = vmul.f32 %v8541_v49, %v14776_v58  ;;  %vm8652_vm9 = vmand %vm8619_vm5, %vm14023_vm12  ;;  %v8658_v27 = vmul.f32 %v8572_v52, %v14780_v62  ;;  %v14784_v58 = vld [vmem:[#allocation43_spill] sm:$0xff]  ;;  %2238 = vperm.xlu1 %6152, %v2171_v7  }
  0xf5   :  { %14775 = vst [vmem:[#allocation180_spill] sm:$0xff] %v8639_v61  ;;  %v8662_v21 = vmul.f32 %v8541_v49, %v14782_v16  ;;  %v3155_v2 = vmul.f32 %v8543_v10, %v14784_v58  ;;  %v3156_v5 = vmul.f32 %v8541_v49, %v14785_v57  ;;  %v2807_v43 = vmul.f32 %v8422_v36, %v2786_v59 }
  0xf6   :  { %14777 = vst [vmem:[#allocation64_spill] sm:$0xff] %v8644_v12  ;;  %14781 = vst [vmem:[#allocation63_spill] sm:$0xff] %v8658_v27  ;;  %v14786_v17 = vrot.slane %v8572_v52, 7  ;;  %vm14787_vm11 = vcmp.lt.s32.totalorder %v6383_v3, 1  ;;  %v14789_v62 = vrot.slane %v8543_v10, 7  ;;  %v8683_v58 = vmul.f32 %v8572_v52, %v14792_v0  ;;  %2233 = vperm.xlu0 %6153, %v2170_v44   ;;  %v8703_v0 = vpop.permute.xlu1 %1942  ;;  %v14824_v27 = vld [vmem:[#allocation151_spill] sm:$0xff] }
  0xf7   :  { %14783 = vst [vmem:[#allocation22_spill] sm:$0xff] %v8662_v21  ;;  %vm14790_vm15 = vmmov %vm14787_vm11  ;;  %v2700_v57 = vmul.f32 %v8122_v48, %v8634_v11  ;;  %vm677_vm12 = vcmp.le.s32.totalorder %v8568_v35, 7  ;;  %v8694_v7 = vsel %vm8652_vm9, 1.0, %v14399_v24  ;;  %v8699_v44 = vsel %vm8550_vm8, 1.0, %v14399_v24  ;;  %v14801_v48 = vld [vmem:[#allocation44_spill] sm:$0xff] }
  0xf8   :  { %v8673_v39 = vsel %vm14787_vm11, %v2864_v32, %v14786_v17  ;;  %v8679_v16 = vsel %vm14790_vm15, %v14789_v62, %v2864_v32  ;;  %14793 = vst [vmem:[#allocation46_spill] sm:$0xff] %v8683_v58  ;;  %v2823_v17 = vadd.f32 %v2807_v43, %v2690_v13  ;;  %14794 = vst [vmem:[#allocation181_spill] sm:$0xff] %v8694_v7  ;;  %v8705_v32 = vpop.permute.xlu0 %1937  ;;  %v14800_v62 = vld [vmem:[#allocation26_spill] sm:$0xff]  ;;  %2760 = vperm.xlu1 %6152, %v2701_v15   ;;  %v14805_v15 = vld [vmem:[#allocation156_spill] sm:$0xff] }
  0xf9   :  { %14788 = vst [vmem:[#allocation43_spill] sm:$0xff] %v8673_v39  ;;  %14791 = vst [vmem:[#allocation42_spill] sm:$0xff] %v8679_v16  ;;  %v1608_v43 = vmul.f32 %v8246_v38, %v8639_v61  ;;  %v3171_v41 = vpack.c.bf16 %v3156_v5, %v3155_v2  ;;  %v2897_v59 = vmul.f32 %v8679_v16, %v14800_v62  ;;  %v8726_v37 = vsel %vm8619_vm5, 1.0, %v14399_v24  ;;  %v14812_v61 = vld [vmem:[#allocation131_spill] sm:$0xff] }
  0xfa   :  { %14795 = vst [vmem:[#allocation182_spill] sm:$0xff] %v8699_v44  ;;  %14796 = vst [vmem:[#allocation183_spill] sm:$0xff] %v8703_v0  ;;  %v2898_v11 = vmul.f32 %v8673_v39, %v14801_v48  ;;  %v2846_v58 = vadd.f32 %v8469_v34, %v2823_v17  ;;  %v2993_v2 = vrot.slane %v8543_v10, 1  ;;  %2755 = vperm.xlu0 %6153, %v2700_v57   ;;  %vm676_vm11 = vcmp.le.s32.totalorder %v8608_v14, 7 }
  0xfb   :  { %14797 = vst [vmem:[#allocation184_spill] sm:$0xff] %v8705_v32  ;;  %vm8713_vm9 = vmand %vm8377_vm7, %vm14028_vm10  ;;  %v1607_v17 = vmul.f32 %v8238_v60, %v8694_v7  ;;  %vm471_vm15 = vcmp.le.s32.totalorder %v14805_v15, 7  ;;  %vm14077_vm0 = vcmp.ge.s32.totalorder %v8434_v26, 0  ;;  %v1740_v13 = vmul.f32 %v14741_v40, %v8726_v37  ;;  %v14813_v7 = vld [vmem:[#allocation136_spill] sm:$0xff] }
  0xfc   :  { %14802 = vst [vmem:[#allocation26_spill] sm:$0xff] %v8726_v37  ;;  %vm8732_vm7 = vmand %vm8513_vm6, %vm407_vm1  ;;  %v2912_v48 = vpack.c.bf16 %v2898_v11, %v2897_v59  ;;  %v8742_v62 = vmax.f32 %v2846_v58, 0.0  ;;  %v8747_v21 = vsel %vm8713_vm9, 1.0, %v14399_v24  ;;  %v8759_v11 = vpop.permute.xlu1 %2464  ;;  %v8761_v58 = vpop.permute.xlu0 %2459  ;;  %v1741_v59 = vmul.f32 %v8416_v1, %v8699_v44  ;;  %1683 = vperm.xlu1 %6152, %v1608_v43  }
  0xfd   :  { %3179 = vst.msk [vmem:[#allocation2 + $0x8] sm:$0xff] %vm2919_vm13, %v3171_v41  ;;  %14807 = vst [vmem:[#allocation185_spill] sm:$0xff] %v8747_v21  ;;  %vm470_vm9 = vcmp.le.s32.totalorder %v8434_v26, 7  ;;  %v8779_v41 = vsel %vm8732_vm7, 1.0, %v14399_v24  ;;  %v1831_v44 = vmul.f32 %v8145_v53, %v14812_v61  ;;  %v1832_v37 = vmul.f32 %v8145_v53, %v14813_v7  ;;  %v14818_v61 = vld [vmem:[#allocation128_spill] sm:$0xff] }
  0xfe   :  { %14806 = vst [vmem:[#allocation44_spill] sm:$0xff] %v8742_v62  ;;  %vm8753_vm10 = vmand %vm8409_vm14, %vm404_vm3  ;;  %v14816_v12 = vrot.slane %v8541_v49, 1  ;;  %v1698_v7 = vmul.f32 %v8127_v51, %v14818_v61  ;;  %1678 = vperm.xlu0 %6153, %v1607_v17   ;;  %v2304_v43 = vmul.f32 %v8504_v54, %v8747_v21  ;;  %v14822_v17 = vld [vmem:[#allocation132_spill] sm:$0xff]  ;;  %v14823_v21 = vld [vmem:[#allocation145_spill] sm:$0xff]  ;;  %v1998_v16 = vmul.f32 %v8169_v19, %v14824_v27 }
  0xff   :  { %vm8771_vm14 = vmand %vm661_vm4, %vm677_vm12  ;;  %2921 = vst.msk [vmem:[#allocation2 + $0x18] sm:$0xff] %vm2919_vm13, %v2912_v48  ;;  %vm14817_vm4 = vcmp.lt.s32.totalorder %v6383_v3, 7  ;;  %v8808_v31 = vsel %vm8753_vm10, 1.0, %v14399_v24  ;;  %v1699_v61 = vmul.f32 %v8127_v51, %v14822_v17  ;;  %v1997_v57 = vmul.f32 %v8169_v19, %v14823_v21  ;;  %v14840_v19 = vld [vmem:[#allocation161_spill] sm:$0xff] }
 0x100   :  { %vm8790_vm12 = vmand %vm8550_vm8, %vm407_vm1  ;;  %v8799_v48 = vsel %vm14817_vm4, %v2993_v2, %v14816_v12  ;;  %v8820_v12 = vmul.f32 %v8742_v62, %v8613_v22  ;;  %vm14825_vm10 = vcmp.ge.s32.totalorder %v14721_v28, 0  ;;  %v14828_v39 = vrot.slane %v8742_v62, 1  ;;  %v8842_v17 = vpop.permute.xlu1 %2075  ;;  %v8844_v21 = vpop.permute.xlu0 %2070  ;;  %1816 = vperm.xlu1 %6152, %v1741_v59  }
 0x101   :  { %vm8814_vm8 = vmand %vm8619_vm5, %vm406_vm2  ;;  %14831 = vst [vmem:[#allocation128_spill] sm:$0xff] %v8842_v17  ;;  %v8849_v28 = vsel %vm8790_vm12, 1.0, %v14399_v24  ;;  %v1847_v35 = vadd.f32 %v1831_v44, %v1698_v7  ;;  %v1848_v32 = vadd.f32 %v1832_v37, %v1699_v61  ;;  %v2130_v0 = vmul.f32 %v8189_v6, %v14840_v19 }
 0x102   :  { %14821 = vst [vmem:[#allocation131_spill] sm:$0xff] %v8820_v12  ;;  %vm8832_vm5 = vmand %vm8771_vm14, %vm14825_vm10  ;;  %1811 = vperm.xlu0 %6153, %v1740_v13   ;;  %v2303_v44 = vmul.f32 %v14718_v46, %v8808_v31  ;;  %v8884_v19 = vsel %vm8814_vm8, 1.0, %v14399_v24  ;;  %v2264_v13 = vmul.f32 %v8224_v9, %v8389_v50  ;;  %vm14849_vm8 = vcmp.ge.s32.totalorder %v14733_v18, 0  ;;  %v14858_v12 = vld [vmem:[#allocation30_spill] sm:$0xff] }
 0x103   :  { %vm14829_vm7 = vmmov %vm14817_vm4  ;;  %14832 = vst [vmem:[#allocation132_spill] sm:$0xff] %v8844_v21  ;;  %vm14834_vm4 = vcmp.ge.s32.totalorder %v8608_v14, 0  ;;  %v14838_v21 = vld [vmem:[#allocation70_spill] sm:$0xff]  ;;  %v14841_v14 = vld [vmem:[#allocation169_spill] sm:$0xff]  ;;  %v2013_v7 = vadd.f32 %v1997_v57, %v1847_v35  ;;  %v2014_v61 = vadd.f32 %v1998_v16, %v1848_v32  ;;  %v8901_v16 = vsel %vm8832_vm5, 1.0, %v14399_v24 }
 0x104   :  { %v8840_v22 = vsel %vm14829_vm7, %v14828_v39, %v2993_v2  ;;  %14833 = vst [vmem:[#allocation145_spill] sm:$0xff] %v8849_v28  ;;  %vm8855_vm10 = vmand %vm14834_vm4, %vm676_vm11  ;;  %v14837_v2 = vld [vmem:[#allocation80_spill] sm:$0xff]  ;;  %v8865_v17 = vmul.f32 %v8543_v10, %v14838_v21  ;;  %v2131_v51 = vmul.f32 %v8189_v6, %v14841_v14  ;;  %vm14842_vm11 = vcmp.ge.s32.totalorder %v14805_v15, 0  ;;  %v2598_v46 = vpop.permute.xlu1 %2597  ;;  %v2593_v5 = vpop.permute.xlu0 %2592  ;;  %2371 = vperm.xlu1 %6152, %v2304_v43  }
 0x105   :  { %14830 = vst [vmem:[#allocation136_spill] sm:$0xff] %v8840_v22  ;;  %v3393_v39 = vmul.f32 %v8840_v22, %v8779_v41  ;;  %v3394_v62 = vmul.f32 %v8799_v48, %v14837_v2  ;;  %vm8875_vm12 = vmand %vm14842_vm11, %vm471_vm15  ;;  %v2263_v21 = vmul.f32 %v8224_v9, %v8323_v4  ;;  %v14846_v2 = vld [vmem:[#allocation149_spill] sm:$0xff]  ;;  %v2146_v50 = vadd.f32 %v2130_v0, %v2013_v7 }
 0x106   :  { %14839 = vst [vmem:[#allocation151_spill] sm:$0xff] %v8865_v17  ;;  %14845 = vst [vmem:[#allocation80_spill] sm:$0xff] %v8884_v19  ;;  %vm14847_vm15 = vcmp.ge.s32.totalorder %v14846_v2, 0  ;;  %v2147_v32 = vadd.f32 %v2131_v51, %v2014_v61  ;;  %v2396_v57 = vmul.f32 %v8266_v56, %v8587_v8  ;;  %v2397_v29 = vmul.f32 %v8266_v56, %v8646_v20 }
 0x107   :  { %v3402_v37 = vpack.c.bf16 %v3394_v62, %v3393_v39  ;;  %vm708_vm7 = vmand %vm8855_vm10, %vm14847_vm15  ;;  %v1907_v62 = vmul.f32 %v8605_v30, %v8849_v28  ;;  %14848 = vst [vmem:[#allocation70_spill] sm:$0xff] %v8901_v16  ;;  %2366 = vperm.xlu0 %6153, %v2303_v44   ;;  %v1906_v0 = vmul.f32 %v8504_v54, %v8884_v19  ;;  %vm14861_vm15 = vcmp.le.s32.totalorder %v8060_v45, 7  ;;  %v15006_v19 = vld [vmem:[#allocation135_spill] sm:$0xff] }
 0x108   :  { %vm8907_vm4 = vmand %vm8875_vm12, %vm14849_vm8  ;;  %v8927_v51 = vsel %vm708_vm7, 1.0, %v14399_v24  ;;  %v2279_v8 = vadd.f32 %v2263_v21, %v2146_v50  ;;  %v2280_v35 = vadd.f32 %v2264_v13, %v2147_v32  ;;  %v2530_v20 = vmul.f32 %v8319_v33, %v8759_v11  ;;  %v8933_v14 = vpop.permute.xlu1 %2208  ;;  %v14896_v63 = vld [vmem:[#allocation128_spill] sm:$0xff] }
 0x109   :  { %3410 = vst.msk [vmem:[#allocation2 + $0xb8] sm:$0xff] %vm2919_vm13, %v3402_v37  ;;  %vm8920_vm5 = vmand %vm14077_vm0, %vm470_vm9  ;;  %v2529_v43 = vmul.f32 %v8319_v33, %v8761_v58  ;;  %v8935_v37 = vpop.permute.xlu0 %2203  ;;  %v2437_v44 = vmul.f32 %v8246_v38, %v8901_v16  ;;  %v8942_v7 = vsel %vm8907_vm4, 1.0, %v14399_v24  ;;  %vm14855_vm9 = vcmp.ge.s32.totalorder %v8475_v55, 0  ;;  %v14856_v58 = vld [vmem:[#allocation174_spill] sm:$0xff]  ;;  %1982 = vperm.xlu1 %6152, %v1907_v62  }
 0x10a   :  { %14854 = vst [vmem:[#allocation161_spill] sm:$0xff] %v8942_v7  ;;  %vm502_vm11 = vmand %vm8920_vm5, %vm14855_vm9  ;;  %v2412_v11 = vadd.f32 %v2396_v57, %v2279_v8  ;;  %v2413_v61 = vadd.f32 %v2397_v29, %v2280_v35  ;;  %v2663_v21 = vmul.f32 %v14856_v58, %v2598_v46  ;;  %v2662_v13 = vmul.f32 %v14856_v58, %v2593_v5 }
 0x10b   :  { %1977 = vperm.xlu0 %6153, %v1906_v0   ;;  %v2436_v2 = vmul.f32 %v8238_v60, %v8927_v51  ;;  %v8953_v32 = vsel %vm502_vm11, 1.0, %v14399_v24  ;;  %v2040_v57 = vmul.f32 %v14858_v12, %v8942_v7  ;;  %v8964_v62 = vsel %vm8771_vm14, 1.0, %v14399_v24  ;;  %vm821_vm7 = vmand %vm8771_vm14, %vm14861_vm15 }
 0x10c   :  { %v2546_v50 = vadd.f32 %v2530_v20, %v2413_v61  ;;  %v2545_v4 = vadd.f32 %v2529_v43, %v2412_v11  ;;  %14857 = vst [vmem:[#allocation169_spill] sm:$0xff] %v8953_v32  ;;  %v2731_v59 = vpop.permute.xlu1 %2730  ;;  %v2039_v60 = vmul.f32 %v8246_v38, %v8953_v32  ;;  %14859 = vst [vmem:[#allocation149_spill] sm:$0xff] %v8964_v62  ;;  %v8969_v20 = vsel %vm8855_vm10, 1.0, %v14399_v24 }
 0x10d   :  { %v2726_v15 = vpop.permute.xlu0 %2725  ;;  %v2796_v46 = vmul.f32 %v8422_v36, %v2731_v59  ;;  %2504 = vperm.xlu1 %6152, %v2437_v44   ;;  %v2570_v11 = vmul.f32 %v8416_v1, %v8964_v62  ;;  %v2569_v61 = vmul.f32 %v14741_v40, %v8969_v20  ;;  %vm820_vm8 = vmand %vm8855_vm10, %vm404_vm3  ;;  %vm14863_vm4 = vcmp.lt.s32.totalorder %v6383_v3, 7  ;;  %v14886_v62 = vld [vmem:[#allocation152_spill] sm:$0xff] }
 0x10e   :  { %v2679_v29 = vadd.f32 %v2663_v21, %v2546_v50  ;;  %v2678_v8 = vadd.f32 %v2662_v13, %v2545_v4  ;;  %v2795_v5 = vmul.f32 %v8422_v36, %v2726_v15  ;;  %v2995_v15 = vrot.slane %v8572_v52, 1  ;;  %vm14865_vm10 = vmmov %vm14863_vm4 }
 0x10f   :  { %2499 = vperm.xlu0 %6153, %v2436_v2   ;;  %v8985_v21 = vsel %vm8875_vm12, 1.0, %v14399_v24  ;;  %v646_v13 = vadd.s32 1, %v8434_v26  ;;  %v8993_v50 = vsel %vm8920_vm5, 1.0, %v14399_v24  ;;  %vm615_vm9 = vmand %vm8875_vm12, %vm407_vm1  ;;  %vm14872_vm12 = vcmp.ge.s32.totalorder %v14733_v18, 0  ;;  %v14884_v26 = vld [vmem:[#allocation74_spill] sm:$0xff] }
 0x110   :  { %v2812_v0 = vadd.f32 %v2796_v46, %v2679_v29  ;;  %v2811_v35 = vadd.f32 %v2795_v5, %v2678_v8  ;;  %v8971_v59 = vpop.permute.xlu1 %1653  ;;  %14860 = vst [vmem:[#allocation174_spill] sm:$0xff] %v8985_v21  ;;  %v14862_v29 = vrot.slane %v8541_v49, 1  ;;  %v2173_v47 = vmul.f32 %v9019_v23, %v8985_v21  ;;  %vm614_vm11 = vmand %vm8920_vm5, %vm406_vm2 }
 0x111   :  { %v8973_v43 = vpop.permute.xlu0 %1648  ;;  %2115 = vperm.xlu1 %6152, %v2040_v57   ;;  %v2172_v27 = vmul.f32 %v8416_v1, %v8993_v50  ;;  %v9026_v49 = vsel %vm821_vm7, 1.0, %v14399_v24  ;;  %vm662_vm3 = vcmp.ge.s32.totalorder %v646_v13, 0  ;;  %vm678_vm14 = vcmp.le.s32.totalorder %v646_v13, 7  ;;  %v14867_v1 = vld [vmem:[#allocation73_spill] sm:$0xff]  ;;  %vm711_vm5 = vmand %vm8513_vm6, %vm14872_vm12 }
 0x112   :  { %v2835_v38 = vadd.f32 %v8469_v34, %v2812_v0  ;;  %v2834_v44 = vadd.f32 %v8469_v34, %v2811_v35  ;;  %v9013_v8 = vsel %vm14863_vm4, %v14862_v29, %v2995_v15  ;;  %14864 = vst [vmem:[#allocation30_spill] sm:$0xff] %v9026_v49  ;;  %v9035_v5 = vsel %vm820_vm8, 1.0, %v14399_v24  ;;  %v14868_v0 = vld [vmem:[#allocation72_spill] sm:$0xff]  ;;  %vm9057_vm1 = vmand %vm662_vm3, %vm678_vm14 }
 0x113   :  { %2110 = vperm.xlu0 %6153, %v2039_v60   ;;  %14866 = vst [vmem:[#allocation186_spill] sm:$0xff] %v9035_v5  ;;  %v3379_v60 = vmul.f32 %v9013_v8, %v14867_v1  ;;  %v2702_v13 = vmul.f32 %v8504_v54, %v9035_v5  ;;  %v9064_v39 = vsel %vm615_vm9, 1.0, %v14399_v24  ;;  %v9071_v29 = vsel %vm614_vm11, 1.0, %v14399_v24  ;;  %vm822_vm4 = vmand %vm9057_vm1, %vm406_vm2 }
 0x114   :  { %v8988_v2 = vmax.f32 %v2834_v44, 0.0  ;;  %v8999_v40 = vmax.f32 %v2835_v38, 0.0  ;;  %v9001_v4 = vpop.permute.xlu1 %1786  ;;  %14871 = vst [vmem:[#allocation73_spill] sm:$0xff] %v9064_v39  ;;  %14873 = vst [vmem:[#allocation72_spill] sm:$0xff] %v9071_v29  ;;  %vm14874_vm15 = vcmp.ge.s32.totalorder %v8475_v55, 0  ;;  %vm14875_vm8 = vcmp.lt.s32.totalorder %v6383_v3, 1 }
 0x115   :  { %v9003_v57 = vpop.permute.xlu0 %1781  ;;  %2637 = vperm.xlu1 %6152, %v2570_v11   ;;  %vm710_vm7 = vmand %vm9057_vm1, %vm14874_vm15  ;;  %v14876_v54 = vrot.slane %v8572_v52, 7  ;;  %v9097_v55 = vsel %vm711_vm5, 1.0, %v14399_v24  ;;  %v2133_v11 = vmul.f32 %v8189_v6, %v14896_v63 }
 0x116   :  { %v14052_v45 = vrot.slane %v8988_v2, 1  ;;  %v2866_v42 = vrot.slane %v8988_v2, 7  ;;  %v14051_v22 = vrot.slane %v8999_v40, 7  ;;  %vm14877_vm6 = vmmov %vm14875_vm8 }
 0x117   :  { %2632 = vperm.xlu0 %6153, %v2569_v61   ;;  %vm14910_vm2 = vmmov %vm14877_vm6 }
 0x118   :  { %v9032_v46 = vsel %vm14865_vm10, %v2995_v15, %v14052_v45  ;;  %v9045_v38 = vpop.permute.xlu1 %2341  ;;  %v2703_v15 = vmul.f32 %v8605_v30, %v9026_v49  ;;  %v9086_v18 = vsel %vm14875_vm8, %v2866_v42, %v14051_v22  ;;  %v9092_v25 = vsel %vm14877_vm6, %v14876_v54, %v2866_v42  ;;  %v14881_v22 = vld [vmem:[#allocation67_spill] sm:$0xff]  ;;  %vm14916_vm3 = vmmov %vm14865_vm10 }
 0x119   :  { %v3380_v35 = vmul.f32 %v9032_v46, %v14868_v0  ;;  %v9047_v44 = vpop.permute.xlu0 %2336  ;;  %2248 = vperm.xlu1 %6152, %v2173_v47   ;;  %v2305_v0 = vmul.f32 %v8605_v30, %v9071_v29  ;;  %v3158_v45 = vmul.f32 %v8988_v2, %v14881_v22  ;;  %v9106_v42 = vsel %vm710_vm7, 1.0, %v14399_v24  ;;  %v14885_v30 = vld [vmem:[#allocation15_spill] sm:$0xff]  ;;  %vm14923_vm14 = vmmov %vm14916_vm3 }
 0x11a   :  { %v2900_v17 = vmul.f32 %v9086_v18, %v14884_v26  ;;  %v2439_v28 = vmul.f32 %v14885_v30, %v9097_v55  ;;  %v9123_v26 = vsel %vm9057_vm1, 1.0, %v14399_v24  ;;  %vm14936_vm10 = vmmov %vm14916_vm3  ;;  %v14980_v29 = vld [vmem:[#allocation147_spill] sm:$0xff] }
 0x11b   :  { %v3395_v61 = vpack.c.bf16 %v3380_v35, %v3379_v60  ;;  %2243 = vperm.xlu0 %6153, %v2172_v27   ;;  %v14878_v27 = vld [vmem:[#allocation32_spill] sm:$0xff]  ;;  %v14880_v35 = vld [vmem:[#allocation45_spill] sm:$0xff]  ;;  %14888 = vst [vmem:[#allocation67_spill] sm:$0xff] %v9123_v26  ;;  %vm14937_vm9 = vmmov %vm14910_vm2 }
 0x11c   :  { %v9074_v47 = vpop.permute.xlu1 %1952  ;;  %v2306_v60 = vmul.f32 %v14878_v27, %v9064_v39  ;;  %14879 = vst [vmem:[#allocation32_spill] sm:$0xff] %v9097_v55  ;;  %14882 = vst [vmem:[#allocation45_spill] sm:$0xff] %v9106_v42 }
 0x11d   :  { %3403 = vst.msk [vmem:[#allocation2 + $0x10] sm:$0xff] %vm2919_vm13, %v3395_v61  ;;  %v9076_v1 = vpop.permute.xlu0 %1947  ;;  %2770 = vperm.xlu1 %6152, %v2703_v15   ;;  %v3157_v61 = vmul.f32 %v8572_v52, %v14880_v35  ;;  %v14883_v15 = vld [vmem:[#allocation47_spill] sm:$0xff]  ;;  %v1833_v52 = vmul.f32 %v8145_v53, %v14886_v62  ;;  %v14887_v35 = vld [vmem:[#allocation125_spill] sm:$0xff]  ;;  %v14891_v62 = vld [vmem:[#allocation150_spill] sm:$0xff] }
 0x11e   :  { %v2899_v54 = vmul.f32 %v9092_v25, %v14883_v15  ;;  %v1834_v22 = vmul.f32 %v8145_v53, %v14887_v35  ;;  %v2438_v15 = vmul.f32 %v14858_v12, %v9106_v42  ;;  %v14892_v53 = vld [vmem:[#allocation183_spill] sm:$0xff]  ;;  %v9155_v42 = vsel %vm822_vm4, 1.0, %v14399_v24  ;;  %vm14939_vm11 = vmmov %vm14910_vm2 }
 0x11f   :  { %2765 = vperm.xlu0 %6153, %v2702_v13   ;;  %v3172_v39 = vpack.c.bf16 %v3158_v45, %v3157_v61  ;;  %v14889_v45 = vld [vmem:[#allocation159_spill] sm:$0xff]  ;;  %v14890_v61 = vld [vmem:[#allocation160_spill] sm:$0xff]  ;;  %vm14960_vm1 = vmmov %vm14916_vm3 }
 0x120   :  { %v2475_v7 = vpop.permute.xlu1 %2474  ;;  %v2913_v21 = vpack.c.bf16 %v2900_v17, %v2899_v54  ;;  %v1700_v30 = vmul.f32 %v14890_v61, %v14889_v45  ;;  %v1701_v55 = vmul.f32 %v14890_v61, %v14891_v62  ;;  %v6274_v45 = vld [vmem:[%s13770_s0 + $0x78] sm:$0xff]  ;;  %v14895_v61 = vld [vmem:[#allocation8_spill] sm:$0xff]  ;;  %vm14962_vm12 = vmmov %vm14960_vm1 }
 0x121   :  { %v2470_v13 = vpop.permute.xlu0 %2469  ;;  %2381 = vperm.xlu1 %6152, %v2306_v60   ;;  %3180 = vst.msk [vmem:[#allocation2 + $0x20] sm:$0xff] %vm2919_vm13, %v3172_v39  ;;  %v14893_v60 = vld [vmem:[#allocation166_spill] sm:$0xff]  ;;  %v2572_v62 = vmul.f32 %v6274_v45, %v14895_v61  ;;  %v14900_v45 = vld [vmem:[#allocation44_spill] sm:$0xff]  ;;  %vm14968_vm5 = vmmov %vm14910_vm2 }
 0x122   :  { %v2000_v17 = vmul.f32 %v14893_v60, %v14892_v53  ;;  %2922 = vst.msk [vmem:[#allocation2 + $0x30] sm:$0xff] %vm2919_vm13, %v2913_v21  ;;  %v1849_v53 = vadd.f32 %v1833_v52, %v1700_v30  ;;  %v2266_v52 = vmul.f32 %v8224_v9, %v8933_v14  ;;  %v2399_v14 = vmul.f32 %v8266_v56, %v9045_v38  ;;  %vm14971_vm15 = vmmov %vm14910_vm2 }
 0x123   :  { %2376 = vperm.xlu0 %6153, %v2305_v0   ;;  %v14894_v0 = vld [vmem:[#allocation184_spill] sm:$0xff]  ;;  %vm14985_vm7 = vmmov %vm14960_vm1 }
 0x124   :  { %v1999_v54 = vmul.f32 %v14893_v60, %v14894_v0  ;;  %v3413_v12 = vld [vmem:[#allocation2 + $0x10] sm:$0xff]  ;;  %v9139_v39 = vpop.permute.xlu1 %2085  ;;  %v1850_v60 = vadd.f32 %v1834_v22, %v1701_v55  ;;  %v14897_v0 = vld [vmem:[#allocation132_spill] sm:$0xff]  ;;  %v2265_v55 = vmul.f32 %v8224_v9, %v8935_v37  ;;  %v2398_v9 = vmul.f32 %v8266_v56, %v9047_v44  ;;  %vm14986_vm8 = vmmov %vm14960_vm1 }
 0x125   :  { %6092 = vmatprep.mubr.msk.bf16.mxu1 %vm2919_vm13, %v3413_v12  ;;  %v9142_v35 = vpop.permute.xlu0 %2080  ;;  %v2132_v21 = vmul.f32 %v8189_v6, %v14897_v0  ;;  %2514 = vperm.xlu1 %6152, %v2439_v28   ;;  %v2571_v12 = vmul.f32 %v9019_v23, %v9123_v26  ;;  %v14898_v6 = vld [vmem:[#allocation19_spill] sm:$0xff]  ;;  %v14899_v37 = vld [vmem:[#allocation17_spill] sm:$0xff]  ;;  %v14901_v56 = vld [vmem:[#allocation24_spill] sm:$0xff] }
 0x126   :  { %v2016_v16 = vadd.f32 %v2000_v17, %v1850_v60  ;;  %v2015_v32 = vadd.f32 %v1999_v54, %v1849_v53  ;;  %v2705_v28 = vmul.f32 %v14898_v6, %v8779_v41  ;;  %v6156_v23 = vld [vmem:[%s13773_s3 + $0x40] sm:$0xff]   ;;  %v2704_v41 = vmul.f32 %v14878_v27, %v9155_v42  ;;  %v6158_v0 = vld [vmem:[%s13773_s3 + $0x48] sm:$0xff]   ;;  %v14979_v26 = vld [vmem:[#allocation114_spill] sm:$0xff] }
 0x127   :  { %2509 = vperm.xlu0 %6153, %v2438_v15   ;;  %v6157_v15 = vld [vmem:[%s13773_s3] sm:$0xff]   ;;  %v2928_v61 = vmul.f32 %v14900_v45, %v14899_v37  ;;  %5852 = vmatprep.subr.bf16.mxu0 %v6156_v23  ;;  %v2929_v44 = vmul.f32 %v8543_v10, %v14901_v56  ;;  %vm14988_vm6 = vmmov %vm14910_vm2 }
 0x128   :  { %v2608_v22 = vpop.permute.xlu1 %2607  ;;  %v2149_v17 = vadd.f32 %v2133_v11, %v2016_v16  ;;  %v2148_v54 = vadd.f32 %v2132_v21, %v2015_v32  ;;  %v2532_v16 = vmul.f32 %v8319_v33, %v2475_v7  ;;  %v2531_v32 = vmul.f32 %v8319_v33, %v2470_v13  ;;  %5853 = vmatpush3.bf16.msra.mxu0 %v6157_v15  ;;  %v6159_v33 = vld [vmem:[%s13773_s3 + $0x8] sm:$0xff]   ;;  %vm14996_vm4 = vmmov %vm14910_vm2 }
 0x129   :  { %v2603_v30 = vpop.permute.xlu0 %2602  ;;  %2647 = vperm.xlu1 %6152, %v2572_v62   ;;  %v14902_v62 = vld [vmem:[#allocation50_spill] sm:$0xff]  ;;  %v14065_v11 = vrot.slane %v14900_v45, 7  ;;  %v2665_v21 = vmul.f32 %v14856_v58, %v2608_v22  ;;  %v14904_v6 = vld [vmem:[#allocation28_spill] sm:$0xff]  ;;  %5854 = vmatprep.subr.bf16.mxu0 %v6158_v0 }
 0x12a   :  { %v2282_v53 = vadd.f32 %v2266_v52, %v2149_v17  ;;  %v2281_v60 = vadd.f32 %v2265_v55, %v2148_v54  ;;  %v3188_v27 = vmul.f32 %v9013_v8, %v14902_v62  ;;  %v14903_v52 = vld [vmem:[#allocation51_spill] sm:$0xff]  ;;  %v3026_v23 = vmul.f32 %v8799_v48, %v14904_v6  ;;  %v14905_v37 = vld [vmem:[#allocation20_spill] sm:$0xff]  ;;  %v14912_v62 = vld [vmem:[#allocation42_spill] sm:$0xff] }
 0x12b   :  { %2642 = vperm.xlu0 %6153, %v2571_v12   ;;  %v2664_v12 = vmul.f32 %v14856_v58, %v2603_v30  ;;  %v3187_v55 = vmul.f32 %v8799_v48, %v14903_v52  ;;  %v2944_v54 = vpack.c.bf16 %v2929_v44, %v2928_v61  ;;  %v14906_v56 = vld [vmem:[#allocation136_spill] sm:$0xff]  ;;  %v14908_v30 = vld [vmem:[#allocation43_spill] sm:$0xff]  ;;  %v2997_v61 = vrot.slane %v8999_v40, 1  ;;  %v6161_v6 = vld [vmem:[%s13773_s3 + $0x10] sm:$0xff]  }
 0x12c   :  { %v9179_v38 = vpop.permute.xlu1 %2218  ;;  %v2415_v7 = vadd.f32 %v2399_v14, %v2282_v53  ;;  %v2414_v13 = vadd.f32 %v2398_v9, %v2281_v60  ;;  %v3025_v14 = vmul.f32 %v14906_v56, %v14905_v37  ;;  %5855 = vmatpush3.bf16.msra.mxu0 %v6159_v33  ;;  %v14907_v58 = vld [vmem:[#allocation56_spill] sm:$0xff]  ;;  %v14915_v37 = vrot.slane %v8988_v2, 1 }
 0x12d   :  { %v9181_v63 = vpop.permute.xlu0 %2213  ;;  %2780 = vperm.xlu1 %6152, %v2705_v28   ;;  %v3203_v53 = vpack.c.bf16 %v3188_v27, %v3187_v55  ;;  %v3252_v28 = vmul.f32 %v14908_v30, %v14907_v58  ;;  %v14917_v58 = vld [vmem:[#allocation53_spill] sm:$0xff] }
 0x12e   :  { %v2548_v15 = vadd.f32 %v2532_v16, %v2415_v7  ;;  %v2547_v17 = vadd.f32 %v2531_v32, %v2414_v13  ;;  %v3041_v7 = vpack.c.bf16 %v3026_v23, %v3025_v14  ;;  %v14913_v13 = vld [vmem:[#allocation36_spill] sm:$0xff]  ;;  %v9240_v14 = vsel %vm14916_vm3, %v14915_v37, %v2997_v61  ;;  %vm15011_vm3 = vmmov %vm14960_vm1 }
 0x12f   :  { %2775 = vperm.xlu0 %6153, %v2704_v41   ;;  %v14909_v41 = vrot.slane %v8543_v10, 7  ;;  %v14911_v10 = vld [vmem:[#allocation57_spill] sm:$0xff] }
 0x130   :  { %v2741_v9 = vpop.permute.xlu1 %2740  ;;  %v2681_v60 = vadd.f32 %v2665_v21, %v2548_v15  ;;  %v2680_v16 = vadd.f32 %v2664_v12, %v2547_v17  ;;  %v3251_v27 = vmul.f32 %v14912_v62, %v14911_v10  ;;  %v14914_v17 = vld [vmem:[#allocation35_spill] sm:$0xff] }
 0x131   :  { %v2736_v22 = vpop.permute.xlu0 %2735  ;;  %v9210_v48 = vsel %vm14910_vm2, %v14065_v11, %v14909_v41  ;;  %v2798_v32 = vmul.f32 %v8422_v36, %v2741_v9  ;;  %2960 = vrot.lane.b32.xlu1 %v2944_v54, %s6312_s29  ;;  %v3091_v54 = vmul.f32 %v14912_v62, %v14914_v17  ;;  %v14918_v41 = vld [vmem:[#allocation78_spill] sm:$0xff]  ;;  %v14919_v10 = vld [vmem:[#allocation63_spill] sm:$0xff]  ;;  %v14920_v62 = vld [vmem:[#allocation64_spill] sm:$0xff]  ;;  %vm2984_vm2 = vcmask 523520  }
 0x132   :  { %v2797_v44 = vmul.f32 %v8422_v36, %v2736_v22  ;;  %v3090_v52 = vmul.f32 %v9210_v48, %v14913_v13  ;;  %v3267_v55 = vpack.c.bf16 %v3252_v28, %v3251_v27  ;;  %v6160_v36 = vld [vmem:[%s13773_s3 + $0x50] sm:$0xff]   ;;  %v3189_v28 = vmul.f32 %v9032_v46, %v14917_v58 }
 0x133   :  { %3219 = vrot.lane.b32.xlu0 %v3203_v53, %s6312_s29  ;;  %v2814_v0 = vadd.f32 %v2798_v32, %v2681_v60  ;;  %5856 = vmatprep.subr.bf16.mxu0 %v6160_v36  ;;  %v3190_v60 = vmul.f32 %v9240_v14, %v14918_v41  ;;  %v14921_v27 = vpack.c.bf16 %v14919_v10, %v14920_v62  ;;  %v14929_v41 = vld [vmem:[#allocation22_spill] sm:$0xff] }
 0x134   :  { %v2813_v33 = vadd.f32 %v2797_v44, %v2680_v16  ;;  %v9221_v21 = vpop.permute.xlu1 %1663  ;;  %v3106_v22 = vpack.c.bf16 %v3091_v54, %v3090_v52  ;;  %5857 = vmatpush3.bf16.msra.mxu0 %v6161_v6  ;;  %v6162_v44 = vld [vmem:[%s13773_s3 + $0x58] sm:$0xff]   ;;  %v14924_v52 = vld [vmem:[#allocation52_spill] sm:$0xff] }
 0x135   :  { %v9223_v12 = vpop.permute.xlu0 %1658  ;;  %v2837_v15 = vadd.f32 %v8469_v34, %v2814_v0  ;;  %3057 = vrot.lane.b32.xlu1 %v3041_v7, %s6313_s15  ;;  %v6163_v0 = vld [vmem:[%s13773_s3 + $0x18] sm:$0xff]   ;;  %5858 = vmatprep.subr.bf16.mxu0 %v6162_v44  ;;  %v14931_v44 = vld [vmem:[#allocation33_spill] sm:$0xff] }
 0x136   :  { %v2836_v23 = vadd.f32 %v8469_v34, %v2813_v33  ;;  %v14922_v33 = vld [vmem:[#allocation75_spill] sm:$0xff]  ;;  %v3027_v10 = vmul.f32 %v9013_v8, %v14931_v44 }
 0x137   :  { %3283 = vrot.lane.b32.xlu0 %v3267_v55, %s6313_s15  ;;  %v9253_v16 = vmax.f32 %v2837_v15, 0.0  ;;  %v3381_v7 = vmul.f32 %v9240_v14, %v14922_v33  ;;  %v3028_v55 = vmul.f32 %v9032_v46, %v14924_v52  ;;  %v3204_v15 = vpack.c.bf16 %v3190_v60, %v3189_v28  ;;  %v14926_v54 = vld [vmem:[#allocation59_spill] sm:$0xff]  ;;  %v14932_v33 = vld [vmem:[#allocation68_spill] sm:$0xff] }
 0x138   :  { %v9243_v9 = vmax.f32 %v2836_v23, 0.0  ;;  %v9245_v34 = vpop.permute.xlu1 %1796  ;;  %v14925_v23 = vld [vmem:[#allocation97_spill] sm:$0xff]  ;;  %v3253_v37 = vmul.f32 %v9092_v25, %v14926_v54  ;;  %5859 = vmatpush3.bf16.msra.mxu0 %v6163_v0  ;;  %v3317_v52 = vmul.f32 %v8988_v2, %v14932_v33  ;;  %v6165_v8 = vld [vmem:[%s13773_s3 + $0x20] sm:$0xff]  }
 0x139   :  { %v9247_v53 = vpop.permute.xlu0 %1791  ;;  %3122 = vrot.lane.b32.xlu1 %v3106_v22, %s6314_s16  ;;  %v14927_v22 = vld [vmem:[#allocation85_spill] sm:$0xff]  ;;  %v14067_v28 = vrot.slane %v9253_v16, 1  ;;  %v14066_v62 = vrot.slane %v9253_v16, 7 }
 0x13a   :  { %v2998_v32 = vrot.slane %v9243_v9, 1  ;;  %v3254_v58 = vmul.f32 %v9086_v18, %v14927_v22  ;;  %v2868_v60 = vrot.slane %v9243_v9, 7  ;;  %v3042_v22 = vpack.c.bf16 %v3028_v55, %v3027_v10  ;;  %v14935_v10 = vld [vmem:[#allocation41_spill] sm:$0xff] }
 0x13b   :  { %3347 = vrot.lane.b32.xlu0 %v14921_v27, %s6314_s16  ;;  %v6164_v27 = vld [vmem:[%s13773_s3 + $0x60] sm:$0xff]   ;;  %v6167_v33 = vld [vmem:[%s13773_s3 + $0x28] sm:$0xff]  }
 0x13c   :  { %v9271_v13 = vsel %vm14923_vm14, %v2997_v61, %v2998_v32  ;;  %v9275_v36 = vpop.permute.xlu1 %2351  ;;  %v14928_v61 = vld [vmem:[#allocation46_spill] sm:$0xff]  ;;  %5860 = vmatprep.subr.bf16.mxu0 %v6164_v27  ;;  %v3268_v44 = vpack.c.bf16 %v3254_v58, %v3253_v37  ;;  %v3092_v27 = vmul.f32 %v14908_v30, %v14935_v10  ;;  %v9341_v30 = vsel %vm14936_vm10, %v2998_v32, %v14067_v28  ;;  %v14941_v10 = vld [vmem:[#allocation76_spill] sm:$0xff]  ;;  %vm15012_vm14 = vmmov %vm14960_vm1 }
 0x13d   :  { %v9277_v6 = vpop.permute.xlu0 %2346  ;;  %v3382_v17 = vmul.f32 %v9271_v13, %v14925_v23  ;;  %v14930_v46 = vpack.c.bf16 %v14928_v61, %v14929_v41  ;;  %v14933_v23 = vld [vmem:[#allocation93_spill] sm:$0xff]  ;;  %v14934_v61 = vld [vmem:[#allocation58_spill] sm:$0xff]  ;;  %5861 = vmatpush3.bf16.msra.mxu0 %v6165_v8  ;;  %v9347_v37 = vsel %vm14937_vm9, %v2868_v60, %v14066_v62  ;;  %v14938_v58 = vrot.slane %v8999_v40, 7  ;;  %v14942_v62 = vld [vmem:[#allocation71_spill] sm:$0xff] }
 0x13e   :  { %v3318_v54 = vmul.f32 %v8999_v40, %v14933_v23  ;;  %v3093_v41 = vmul.f32 %v9092_v25, %v14934_v61  ;;  %v14940_v8 = vld [vmem:[#allocation49_spill] sm:$0xff]  ;;  %v2933_v11 = vmul.f32 %v8999_v40, %v14941_v10  ;;  %vm15014_vm10 = vmmov %vm14996_vm4 }
 0x13f   :  { %2962 = vrot.lane.b32.xlu1 %v14930_v46, %s6312_s29  ;;  %3221 = vrot.lane.b32.xlu0 %v3204_v15, %s6312_s29  ;;  %v3396_v0 = vpack.c.bf16 %v3382_v17, %v3381_v7  ;;  %v6166_v15 = vld [vmem:[%s13773_s3 + $0x68] sm:$0xff]   ;;  %v9313_v7 = vld [vmem:[%s13771_s1] ss:$0 sm:$0xff]  ;;  %vm15020_vm9 = vmmov %vm14996_vm4 }
 0x140   :  { %v1703_v17 = vmul.f32 %v9313_v7, %v8971_v59  ;;  %v1702_v46 = vmul.f32 %v9313_v7, %v8973_v43  ;;  %v9320_v55 = vpop.permute.xlu1 %1962  ;;  %v9332_v59 = vld [vmem:[%s13771_s1 + $0x1] ss:$0 sm:$0xff]  ;;  %v3332_v32 = vpack.c.bf16 %v3318_v54, %v3317_v52  ;;  %5862 = vmatprep.subr.bf16.mxu0 %v6166_v15  ;;  %v3107_v61 = vpack.c.bf16 %v3093_v41, %v3092_v27  ;;  %v6169_v41 = vld [vmem:[%s13773_s3 + $0x30] sm:$0xff]  }
 0x141   :  { %3404 = vst.msk [vmem:[#allocation2 + $0x28] sm:$0xff] %vm2919_vm13, %v3396_v0  ;;  %v9322_v25 = vpop.permute.xlu0 %1957  ;;  %v1836_v43 = vmul.f32 %v9332_v59, %v9001_v4  ;;  %v2889_v0 = vsel %vm14939_vm11, %v14938_v58, %v2868_v60  ;;  %v6168_v4 = vld [vmem:[%s13773_s3 + $0x70] sm:$0xff]   ;;  %v1835_v23 = vmul.f32 %v9332_v59, %v9003_v57  ;;  %v3159_v60 = vmul.f32 %v8999_v40, %v14942_v62  ;;  %v14943_v58 = vld [vmem:[#allocation95_spill] sm:$0xff] }
 0x142   :  { %v3160_v28 = vmul.f32 %v9243_v9, %v14943_v58  ;;  %v14945_v54 = vld [vmem:[#allocation103_spill] sm:$0xff]  ;;  %5863 = vmatpush3.bf16.msra.mxu0 %v6167_v33  ;;  %v14946_v15 = vld [vmem:[#allocation77_spill] sm:$0xff]  ;;  %vm3081_vm11 = vcmask 785920  }
 0x143   :  { %3059 = vrot.lane.b32.xlu1 %v3042_v22, %s6313_s15  ;;  %3285 = vrot.lane.b32.xlu0 %v3268_v44, %s6313_s15  ;;  %v2932_v22 = vmul.f32 %v8988_v2, %v14940_v8  ;;  %v14944_v44 = vld [vmem:[#allocation81_spill] sm:$0xff]  ;;  %v3192_v2 = vmul.f32 %v9341_v30, %v14945_v54  ;;  %v2901_v40 = vmul.f32 %v2889_v0, %v14946_v15  ;;  %v14947_v62 = vld [vmem:[#allocation99_spill] sm:$0xff]  ;;  %v9384_v8 = vld [vmem:[%s13771_s1 + $0x2] ss:$0 sm:$0xff] }
 0x144   :  { %v9367_v24 = vpop.permute.xlu1 %2484  ;;  %v3191_v52 = vmul.f32 %v9271_v13, %v14944_v44  ;;  %v2902_v27 = vmul.f32 %v9347_v37, %v14947_v62  ;;  %v2002_v10 = vmul.f32 %v9384_v8, %v9074_v47  ;;  %5864 = vmatprep.subr.bf16.mxu0 %v6168_v4  ;;  %v6170_v33 = vld [vmem:[%s13773_s3 + $0x78] sm:$0xff]   ;;  %v3173_v58 = vpack.c.bf16 %v3160_v28, %v3159_v60  ;;  %v9398_v47 = vld [vmem:[%s13771_s1 + $0x3] ss:$0 sm:$0xff] }
 0x145   :  { %v9369_v57 = vpop.permute.xlu0 %2479  ;;  %v1852_v44 = vadd.f32 %v1836_v43, %v1703_v17  ;;  %v1851_v54 = vadd.f32 %v1835_v23, %v1702_v46  ;;  %v2001_v15 = vmul.f32 %v9384_v8, %v9076_v1  ;;  %v2135_v4 = vmul.f32 %v9398_v47, %v9139_v39  ;;  %v14948_v46 = vld [vmem:[#allocation83_spill] sm:$0xff]  ;;  %v14949_v60 = vld [vmem:[#allocation84_spill] sm:$0xff] }
 0x146   :  { %v2914_v62 = vpack.c.bf16 %v2902_v27, %v2901_v40  ;;  %v2946_v28 = vpack.c.bf16 %v2933_v11, %v2932_v22  ;;  %v3030_v43 = vmul.f32 %v9271_v13, %v14948_v46  ;;  %3181 = vst.msk [vmem:[#allocation2 + $0x38] sm:$0xff] %vm2919_vm13, %v3173_v58  ;;  %v3255_v40 = vmul.f32 %v2889_v0, %v14949_v60  ;;  %v14950_v39 = vld [vmem:[#allocation107_spill] sm:$0xff] }
 0x147   :  { %3124 = vrot.lane.b32.xlu1 %v3107_v61, %s6314_s16  ;;  %3349 = vrot.lane.b32.xlu0 %v3332_v32, %s6314_s16  ;;  %v2134_v61 = vmul.f32 %v9398_v47, %v9142_v35  ;;  %v3205_v32 = vpack.c.bf16 %v3192_v2, %v3191_v52  ;;  %v3256_v27 = vmul.f32 %v9347_v37, %v14950_v39  ;;  %v6171_v35 = vld [vmem:[%s13773_s3 + $0x38] sm:$0xff]   ;;  %v9425_v2 = vld [vmem:[%s13771_s1 + $0x4] ss:$0 sm:$0xff] }
 0x148   :  { %v3416_v17 = vld [vmem:[#allocation2 + $0x28] sm:$0xff]  ;;  %v9407_v1 = vpop.permute.xlu1 %2095  ;;  %5865 = vmatpush3.bf16.msra.mxu0 %v6169_v41  ;;  %2923 = vst.msk [vmem:[#allocation2 + $0x48] sm:$0xff] %vm2919_vm13, %v2914_v62  ;;  %v2018_v11 = vadd.f32 %v2002_v10, %v1852_v44  ;;  %v14951_v13 = vld [vmem:[#allocation55_spill] sm:$0xff]  ;;  %v2017_v52 = vadd.f32 %v2001_v15, %v1851_v54  ;;  %v2268_v41 = vmul.f32 %v9425_v2, %v9179_v38  ;;  %v9440_v38 = vld [vmem:[%s13771_s1 + $0x5] ss:$0 sm:$0xff] }
 0x149   :  { %6093 = vmatmul.mubr.msk.bf16.vlgmr.msra.gmra.mrb[0].mxu1 %vm2919_vm13, %v3416_v17  ;;  %v9410_v23 = vpop.permute.xlu0 %2090  ;;  %v3029_v22 = vmul.f32 %v9240_v14, %v14951_v13  ;;  %5866 = vmatprep.subr.bf16.mxu0 %v6170_v33  ;;  %v2267_v58 = vmul.f32 %v9425_v2, %v9181_v63  ;;  %v14952_v62 = vld [vmem:[#allocation89_spill] sm:$0xff]  ;;  %v3269_v15 = vpack.c.bf16 %v3256_v27, %v3255_v40  ;;  %v14953_v17 = vld [vmem:[#allocation92_spill] sm:$0xff]  ;;  %v14954_v60 = vld [vmem:[#allocation115_spill] sm:$0xff] }
 0x14a   :  { %v2151_v10 = vadd.f32 %v2135_v4, %v2018_v11  ;;  %v2150_v14 = vadd.f32 %v2134_v61, %v2017_v52  ;;  %v3319_v46 = vmul.f32 %v9243_v9, %v14953_v17  ;;  %v3320_v39 = vmul.f32 %v9253_v16, %v14954_v60  ;;  %v14955_v4 = vld [vmem:[#allocation61_spill] sm:$0xff]  ;;  %v14956_v40 = vld [vmem:[#allocation79_spill] sm:$0xff]  ;;  %v9479_v60 = vld [vmem:[%s13771_s1 + $0x8] ss:$0 sm:$0xff] }
 0x14b   :  { %2964 = vrot.lane.b32.xlu1 %v2946_v28, %s6312_s29  ;;  %3223 = vrot.lane.b32.xlu0 %v3205_v32, %s6312_s29  ;;  %v3043_v44 = vpack.c.bf16 %v3030_v43, %v3029_v22  ;;  %v3095_v28 = vmul.f32 %v2889_v0, %v14952_v62  ;;  %v2401_v63 = vmul.f32 %v9440_v38, %v9275_v36 }
 0x14c   :  { %v2618_v33 = vpop.permute.xlu1 %2617  ;;  %5867 = vmatpush3.bf16.msra.mxu0 %v6171_v35  ;;  %v2400_v0 = vmul.f32 %v9440_v38, %v9277_v6  ;;  %v3094_v61 = vmul.f32 %v9086_v18, %v14955_v4  ;;  %v2284_v43 = vadd.f32 %v2268_v41, %v2151_v10  ;;  %v2283_v32 = vadd.f32 %v2267_v58, %v2150_v14  ;;  %v9455_v35 = vld [vmem:[%s13771_s1 + $0x6] ss:$0 sm:$0xff]  ;;  %v14957_v18 = vld [vmem:[#allocation101_spill] sm:$0xff]  ;;  %v9470_v10 = vld [vmem:[%s13771_s1 + $0x7] ss:$0 sm:$0xff] }
 0x14d   :  { %v2613_v54 = vpop.permute.xlu0 %2612  ;;  %v2934_v27 = vmul.f32 %v9243_v9, %v14956_v40  ;;  %v2534_v36 = vmul.f32 %v9455_v35, %v9367_v24  ;;  %v2533_v6 = vmul.f32 %v9455_v35, %v9369_v57  ;;  %v2935_v13 = vmul.f32 %v9253_v16, %v14957_v18 }
 0x14e   :  { %v3108_v11 = vpack.c.bf16 %v3095_v28, %v3094_v61  ;;  %v3333_v9 = vpack.c.bf16 %v3320_v39, %v3319_v46  ;;  %v2417_v41 = vadd.f32 %v2401_v63, %v2284_v43  ;;  %v2416_v58 = vadd.f32 %v2400_v0, %v2283_v32  ;;  %v9491_v61 = vld [vmem:[%s13772_s2] ss:$0 sm:$0xff] }
 0x14f   :  { %3061 = vrot.lane.b32.xlu1 %v3043_v44, %s6313_s15  ;;  %3287 = vrot.lane.b32.xlu0 %v3269_v15, %s6313_s15  ;;  %v2667_v24 = vmul.f32 %v9470_v10, %v2618_v33  ;;  %v2666_v57 = vmul.f32 %v9470_v10, %v2613_v54  ;;  %v2947_v28 = vpack.c.bf16 %v2935_v13, %v2934_v27  ;;  %v14958_v13 = vld [vmem:[#allocation96_spill] sm:$0xff] }
 0x150   :  { %v9463_v22 = vpop.permute.xlu1 %2228  ;;  %v2550_v44 = vadd.f32 %v2534_v36, %v2417_v41  ;;  %v2549_v62 = vadd.f32 %v2533_v6, %v2416_v58  ;;  %v14959_v58 = vrot.slane %v9253_v16, 1 }
 0x151   :  { %v9465_v52 = vpop.permute.xlu0 %2223 }
 0x152   :  { %v2683_v17 = vadd.f32 %v2667_v24, %v2550_v44  ;;  %v2682_v46 = vadd.f32 %v2666_v57, %v2549_v62  ;;  %v14961_v57 = vld [vmem:[#allocation82_spill] sm:$0xff] }
 0x153   :  { %3126 = vrot.lane.b32.xlu1 %v3108_v11, %s6314_s16  ;;  %3351 = vrot.lane.b32.xlu0 %v3333_v9, %s6314_s16  ;;  %v3383_v9 = vmul.f32 %v9341_v30, %v14958_v13  ;;  %v3031_v44 = vmul.f32 %v9341_v30, %v14961_v57 }
 0x154   :  { %v2751_v14 = vpop.permute.xlu1 %2750 }
 0x155   :  { %v2746_v15 = vpop.permute.xlu0 %2745  ;;  %v2800_v33 = vmul.f32 %v9479_v60, %v2751_v14 }
 0x156   :  { %v2799_v54 = vmul.f32 %v9479_v60, %v2746_v15 }
 0x157   :  { %2966 = vrot.lane.b32.xlu1 %v2947_v28, %s6312_s29  ;;  %v2816_v39 = vadd.f32 %v2800_v33, %v2683_v17  ;;  %v14963_v17 = vld [vmem:[#allocation105_spill] sm:$0xff]  ;;  %v14964_v33 = vld [vmem:[#allocation120_spill] sm:$0xff] }
 0x158   :  { %v2815_v63 = vadd.f32 %v2799_v54, %v2682_v46  ;;  %v9484_v0 = vpop.permute.xlu1 %1673 }
 0x159   :  { %v9486_v4 = vpop.permute.xlu0 %1668  ;;  %v2839_v43 = vadd.f32 %v9491_v61, %v2816_v39  ;;  %v14965_v39 = vld [vmem:[#allocation102_spill] sm:$0xff] }
 0x15a   :  { %v2838_v32 = vadd.f32 %v9491_v61, %v2815_v63 }
 0x15b   :  { %v9495_v40 = vmax.f32 %v2839_v43, 0.0  ;;  %v14966_v43 = vld [vmem:[#allocation130_spill] sm:$0xff] }
 0x15c   :  { %v2854_v27 = vmax.f32 %v2838_v32, 0.0  ;;  %v9497_v36 = vpop.permute.xlu1 %1806  ;;  %v14967_v32 = vrot.slane %v9253_v16, 7 }
 0x15d   :  { %v9499_v6 = vpop.permute.xlu0 %1801  ;;  %v14069_v18 = vrot.slane %v9495_v40, 1  ;;  %v14970_v56 = vrot.slane %v9495_v40, 7 }
 0x15e   :  { %v3000_v11 = vrot.slane %v2854_v27, 1  ;;  %v2870_v41 = vrot.slane %v2854_v27, 7  ;;  %v3321_v49 = vmul.f32 %v2854_v27, %v14979_v26  ;;  %v1837_v26 = vmul.f32 %v9332_v59, %v9247_v53 }
 0x15f   :  { %v2136_v53 = vmul.f32 %v9398_v47, %v9410_v23 }
 0x160   :  { %v3017_v24 = vsel %vm14960_vm1, %v14959_v58, %v3000_v11  ;;  %v9514_v62 = vsel %vm14962_vm12, %v3000_v11, %v14069_v18  ;;  %v2362_v14 = vpop.permute.xlu1 %2361  ;;  %v2887_v11 = vsel %vm14968_vm5, %v14967_v32, %v2870_v41  ;;  %v14969_v18 = vld [vmem:[#allocation111_spill] sm:$0xff]  ;;  %vm3146_vm1 = vcmask 1048320   ;;  %vm15031_vm12 = vmmov %vm14996_vm4 }
 0x161   :  { %v9517_v15 = vpop.permute.xlu0 %2356  ;;  %v3032_v46 = vmul.f32 %v3017_v24, %v14963_v17  ;;  %v3384_v54 = vmul.f32 %v3017_v24, %v14964_v33  ;;  %v3193_v63 = vmul.f32 %v3017_v24, %v14965_v39  ;;  %v3194_v30 = vmul.f32 %v9514_v62, %v14966_v43  ;;  %v14972_v24 = vld [vmem:[#allocation106_spill] sm:$0xff]  ;;  %vm15034_vm5 = vmmov %vm15011_vm3 }
 0x162   :  { %v3097_v28 = vmul.f32 %v2887_v11, %v14969_v18  ;;  %v9533_v17 = vsel %vm14971_vm15, %v2870_v41, %v14970_v56  ;;  %v3257_v33 = vmul.f32 %v2887_v11, %v14972_v24  ;;  %v14975_v56 = vld [vmem:[#allocation100_spill] sm:$0xff]  ;;  %v14978_v24 = vld [vmem:[#allocation118_spill] sm:$0xff]  ;;  %vm15036_vm15 = vmmov %vm15011_vm3 }
 0x163   :  { %v3044_v13 = vpack.c.bf16 %v3032_v46, %v3031_v44  ;;  %v3397_v58 = vpack.c.bf16 %v3384_v54, %v3383_v9  ;;  %v3206_v57 = vpack.c.bf16 %v3194_v30, %v3193_v63  ;;  %v14973_v44 = vld [vmem:[#allocation88_spill] sm:$0xff]  ;;  %v14974_v46 = vld [vmem:[#allocation138_spill] sm:$0xff]  ;;  %v2936_v41 = vmul.f32 %v2854_v27, %v14975_v56 }
 0x164   :  { %v9536_v39 = vpop.permute.xlu1 %1972  ;;  %v3096_v18 = vmul.f32 %v9347_v37, %v14973_v44  ;;  %v3258_v54 = vmul.f32 %v9533_v17, %v14974_v46  ;;  %v14976_v63 = vld [vmem:[#allocation94_spill] sm:$0xff]  ;;  %v3322_v37 = vmul.f32 %v9495_v40, %v14980_v29  ;;  %v2004_v56 = vmul.f32 %v9384_v8, %v9320_v55 }
 0x165   :  { %3405 = vst.msk [vmem:[#allocation2 + $0x40] sm:$0xff] %vm2919_vm13, %v3397_v58  ;;  %3063 = vrot.lane.b32.xlu1 %v3044_v13, %s6313_s15  ;;  %3225 = vrot.lane.b32.xlu0 %v3206_v57, %s6312_s29  ;;  %v9541_v9 = vpop.permute.xlu0 %1967  ;;  %v3161_v43 = vmul.f32 %v9253_v16, %v14976_v63  ;;  %v14977_v58 = vld [vmem:[#allocation127_spill] sm:$0xff]  ;;  %v3162_v57 = vmul.f32 %v2854_v27, %v14978_v24  ;;  %v14981_v44 = vld [vmem:[#allocation98_spill] sm:$0xff] }
 0x166   :  { %v3109_v30 = vpack.c.bf16 %v3097_v28, %v3096_v18  ;;  %v3270_v32 = vpack.c.bf16 %v3258_v54, %v3257_v33  ;;  %v2937_v13 = vmul.f32 %v9495_v40, %v14977_v58  ;;  %v2903_v5 = vmul.f32 %v2887_v11, %v14981_v44  ;;  %v14982_v28 = vld [vmem:[#allocation124_spill] sm:$0xff] }
 0x167   :  { %v3174_v16 = vpack.c.bf16 %v3162_v57, %v3161_v43  ;;  %v2904_v33 = vmul.f32 %v9533_v17, %v14982_v28  ;;  %v1838_v18 = vmul.f32 %v9332_v59, %v9245_v34  ;;  %v1705_v11 = vmul.f32 %v9313_v7, %v9221_v21 }
 0x168   :  { %v2495_v46 = vpop.permute.xlu1 %2494  ;;  %v2948_v27 = vpack.c.bf16 %v2937_v13, %v2936_v41  ;;  %v3334_v43 = vpack.c.bf16 %v3322_v37, %v3321_v49  ;;  %v2003_v34 = vmul.f32 %v9384_v8, %v9322_v25  ;;  %v2137_v21 = vmul.f32 %v9398_v47, %v9407_v1 }
 0x169   :  { %3128 = vrot.lane.b32.xlu1 %v3109_v30, %s6314_s16  ;;  %3289 = vrot.lane.b32.xlu0 %v3270_v32, %s6313_s15  ;;  %v2490_v54 = vpop.permute.xlu0 %2489  ;;  %3182 = vst.msk [vmem:[#allocation2 + $0x50] sm:$0xff] %vm2919_vm13, %v3174_v16  ;;  %v2915_v29 = vpack.c.bf16 %v2904_v33, %v2903_v5  ;;  %v1704_v30 = vmul.f32 %v9313_v7, %v9223_v12 }
 0x16a   :  { %v1854_v5 = vadd.f32 %v1838_v18, %v1705_v11  ;;  %v2270_v25 = vmul.f32 %v9425_v2, %v9463_v22  ;;  %v2269_v58 = vmul.f32 %v9425_v2, %v9465_v52  ;;  %v2403_v1 = vmul.f32 %v9440_v38, %v2362_v14 }
 0x16b   :  { %2924 = vst.msk [vmem:[#allocation2 + $0x60] sm:$0xff] %vm2919_vm13, %v2915_v29  ;;  %v1853_v12 = vadd.f32 %v1837_v26, %v1704_v30  ;;  %v2402_v44 = vmul.f32 %v9440_v38, %v9517_v15  ;;  %v2536_v23 = vmul.f32 %v9455_v35, %v2495_v46  ;;  %v2535_v33 = vmul.f32 %v9455_v35, %v2490_v54 }
 0x16c   :  { %v3419_v63 = vld [vmem:[#allocation2 + $0x40] sm:$0xff]  ;;  %v9574_v32 = vpop.permute.xlu1 %2105  ;;  %v2020_v55 = vadd.f32 %v2004_v56, %v1854_v5 }
 0x16d   :  { %6096 = vmatprep.mubr.msk.bf16.mxu1 %vm2919_vm13, %v3419_v63  ;;  %2968 = vrot.lane.b32.xlu1 %v2948_v27, %s6312_s29  ;;  %v9582_v49 = vpop.permute.xlu0 %2100  ;;  %v2019_v41 = vadd.f32 %v2003_v34, %v1853_v12 }
 0x16e   :  { %3353 = vrot.lane.b32.xlu0 %v3334_v43, %s6314_s16  ;;  %v2153_v24 = vadd.f32 %v2137_v21, %v2020_v55 }
 0x16f   :  { %v2152_v37 = vadd.f32 %v2136_v53, %v2019_v41 }
 0x170   :  { %v2628_v13 = vpop.permute.xlu1 %2627  ;;  %v2286_v16 = vadd.f32 %v2270_v25, %v2153_v24 }
 0x171   :  { %v2623_v57 = vpop.permute.xlu0 %2622  ;;  %v2285_v28 = vadd.f32 %v2269_v58, %v2152_v37  ;;  %v2669_v52 = vmul.f32 %v9470_v10, %v2628_v13  ;;  %v14983_v37 = vld [vmem:[#allocation119_spill] sm:$0xff] }
 0x172   :  { %v2419_v18 = vadd.f32 %v2403_v1, %v2286_v16  ;;  %v2668_v14 = vmul.f32 %v9470_v10, %v2623_v57 }
 0x173   :  { %v2418_v27 = vadd.f32 %v2402_v44, %v2285_v28  ;;  %v3385_v44 = vmul.f32 %v9514_v62, %v14983_v37  ;;  %v14995_v37 = vld [vmem:[#allocation142_spill] sm:$0xff] }
 0x174   :  { %v9595_v22 = vpop.permute.xlu1 %2238  ;;  %v2552_v29 = vadd.f32 %v2536_v23, %v2419_v18  ;;  %v14984_v23 = vrot.slane %v9495_v40, 1  ;;  %v14987_v18 = vrot.slane %v9495_v40, 7 }
 0x175   :  { %v9598_v26 = vpop.permute.xlu0 %2233  ;;  %v2551_v11 = vadd.f32 %v2535_v33, %v2418_v27 }
 0x176   :  { %v2685_v15 = vadd.f32 %v2669_v52, %v2552_v29 }
 0x177   :  { %v2684_v43 = vadd.f32 %v2668_v14, %v2551_v11  ;;  %v14989_v14 = vld [vmem:[#allocation104_spill] sm:$0xff]  ;;  %v14990_v11 = vld [vmem:[#allocation134_spill] sm:$0xff] }
 0x178   :  { %v2761_v56 = vpop.permute.xlu1 %2760  ;;  %v3033_v29 = vmul.f32 %v9514_v62, %v14989_v14 }
 0x179   :  { %v2802_v63 = vmul.f32 %v9479_v60, %v2761_v56  ;;  %v2756_v46 = vpop.permute.xlu0 %2755 }
 0x17a   :  { %v2801_v54 = vmul.f32 %v9479_v60, %v2756_v46  ;;  %v14992_v46 = vld [vmem:[#allocation129_spill] sm:$0xff] }
 0x17b   :  { %v2818_v30 = vadd.f32 %v2802_v63, %v2685_v15  ;;  %v14991_v15 = vld [vmem:[#allocation158_spill] sm:$0xff] }
 0x17c   :  { %v2817_v34 = vadd.f32 %v2801_v54, %v2684_v43  ;;  %v9603_v5 = vpop.permute.xlu1 %1683  ;;  %v14993_v54 = vld [vmem:[#allocation172_spill] sm:$0xff] }
 0x17d   :  { %v2841_v21 = vadd.f32 %v9491_v61, %v2818_v30  ;;  %v9606_v12 = vpop.permute.xlu0 %1678 }
 0x17e   :  { %v2840_v53 = vadd.f32 %v9491_v61, %v2817_v34  ;;  %v14994_v34 = vld [vmem:[#allocation155_spill] sm:$0xff] }
 0x17f   :  { %v9609_v55 = vmax.f32 %v2841_v21, 0.0 }
 0x180   :  { %v2856_v25 = vmax.f32 %v2840_v53, 0.0  ;;  %v9611_v41 = vpop.permute.xlu1 %1816 }
 0x181   :  { %v9613_v58 = vpop.permute.xlu0 %1811  ;;  %v14075_v13 = vrot.slane %v9609_v55, 1  ;;  %v14074_v57 = vrot.slane %v9609_v55, 7 }
 0x182   :  { %v3002_v24 = vrot.slane %v2856_v25, 1  ;;  %v2872_v1 = vrot.slane %v2856_v25, 7  ;;  %v3164_v21 = vmul.f32 %v2856_v25, %v14994_v34 }
 0x184   :  { %v9619_v16 = vpop.permute.xlu1 %2371  ;;  %v3015_v28 = vsel %vm14985_vm7, %v14984_v23, %v3002_v24  ;;  %v9629_v33 = vsel %vm14986_vm8, %v3002_v24, %v14075_v13  ;;  %v2885_v52 = vsel %vm14988_vm6, %v14987_v18, %v2872_v1  ;;  %v9650_v62 = vsel %vm14996_vm4, %v2872_v1, %v14074_v57  ;;  %vm15037_vm7 = vmmov %vm15011_vm3 }
 0x185   :  { %v3034_v56 = vmul.f32 %v3015_v28, %v14990_v11  ;;  %v3386_v63 = vmul.f32 %v3015_v28, %v14991_v15  ;;  %v3195_v43 = vmul.f32 %v3015_v28, %v14992_v46  ;;  %v3196_v30 = vmul.f32 %v9629_v33, %v14993_v54  ;;  %v14997_v11 = vld [vmem:[#allocation137_spill] sm:$0xff]  ;;  %vm15043_vm8 = vmmov %vm14996_vm4 }
 0x186   :  { %v9635_v27 = vpop.permute.xlu0 %2366  ;;  %v3099_v23 = vmul.f32 %v2885_v52, %v14995_v37  ;;  %v3259_v28 = vmul.f32 %v2885_v52, %v14997_v11  ;;  %v14998_v15 = vld [vmem:[#allocation117_spill] sm:$0xff]  ;;  %vm15044_vm6 = vmmov %vm14996_vm4 }
 0x187   :  { %v3045_v53 = vpack.c.bf16 %v3034_v56, %v3033_v29  ;;  %v3398_v24 = vpack.c.bf16 %v3386_v63, %v3385_v44  ;;  %v3207_v14 = vpack.c.bf16 %v3196_v30, %v3195_v43  ;;  %v3163_v46 = vmul.f32 %v9495_v40, %v14998_v15  ;;  %v14999_v29 = vld [vmem:[#allocation110_spill] sm:$0xff]  ;;  %v15000_v63 = vld [vmem:[#allocation148_spill] sm:$0xff] }
 0x188   :  { %v9652_v18 = vpop.permute.xlu1 %1982  ;;  %v3098_v56 = vmul.f32 %v9533_v17, %v14999_v29  ;;  %v3260_v1 = vmul.f32 %v9650_v62, %v15000_v63  ;;  %v15001_v43 = vld [vmem:[#allocation170_spill] sm:$0xff]  ;;  %v3324_v63 = vmul.f32 %v9609_v55, %v15006_v19  ;;  %v2006_v19 = vmul.f32 %v9384_v8, %v9536_v39 }
 0x189   :  { %3406 = vst.msk [vmem:[#allocation2 + $0x58] sm:$0xff] %vm2919_vm13, %v3398_v24  ;;  %3065 = vrot.lane.b32.xlu1 %v3045_v53, %s6313_s15  ;;  %3227 = vrot.lane.b32.xlu0 %v3207_v14, %s6312_s29  ;;  %v2939_v54 = vmul.f32 %v9609_v55, %v15001_v43  ;;  %v3175_v30 = vpack.c.bf16 %v3164_v21, %v3163_v46  ;;  %v15002_v40 = vld [vmem:[#allocation126_spill] sm:$0xff]  ;;  %v15003_v24 = vld [vmem:[#allocation123_spill] sm:$0xff]  ;;  %v15004_v53 = vld [vmem:[#allocation165_spill] sm:$0xff] }
 0x18a   :  { %v9659_v44 = vpop.permute.xlu0 %1977  ;;  %v3110_v34 = vpack.c.bf16 %v3099_v23, %v3098_v56  ;;  %v2938_v37 = vmul.f32 %v2856_v25, %v15002_v40  ;;  %v2905_v11 = vmul.f32 %v2885_v52, %v15003_v24  ;;  %v2906_v15 = vmul.f32 %v9650_v62, %v15004_v53  ;;  %v15005_v17 = vld [vmem:[#allocation146_spill] sm:$0xff] }
 0x18b   :  { %v3271_v13 = vpack.c.bf16 %v3260_v1, %v3259_v28  ;;  %v3323_v29 = vmul.f32 %v2856_v25, %v15005_v17  ;;  %3183 = vst.msk [vmem:[#allocation2 + $0x68] sm:$0xff] %vm2919_vm13, %v3175_v30  ;;  %v1840_v21 = vmul.f32 %v9332_v59, %v9497_v36  ;;  %v1839_v52 = vmul.f32 %v9332_v59, %v9499_v6 }
 0x18c   :  { %v2505_v57 = vpop.permute.xlu1 %2504  ;;  %v2916_v14 = vpack.c.bf16 %v2906_v15, %v2905_v11  ;;  %v1707_v25 = vmul.f32 %v9313_v7, %v9484_v0  ;;  %v2949_v28 = vpack.c.bf16 %v2939_v54, %v2938_v37  ;;  %v1706_v36 = vmul.f32 %v9313_v7, %v9486_v4 }
 0x18d   :  { %3130 = vrot.lane.b32.xlu1 %v3110_v34, %s6314_s16  ;;  %3291 = vrot.lane.b32.xlu0 %v3271_v13, %s6313_s15  ;;  %v2005_v46 = vmul.f32 %v9384_v8, %v9541_v9  ;;  %v3335_v6 = vpack.c.bf16 %v3324_v63, %v3323_v29  ;;  %v2139_v13 = vmul.f32 %v9398_v47, %v9574_v32 }
 0x18e   :  { %v2500_v23 = vpop.permute.xlu0 %2499  ;;  %2925 = vst.msk [vmem:[#allocation2 + $0x78] sm:$0xff] %vm2919_vm13, %v2916_v14  ;;  %v1856_v43 = vadd.f32 %v1840_v21, %v1707_v25  ;;  %v1855_v39 = vadd.f32 %v1839_v52, %v1706_v36  ;;  %v2138_v54 = vmul.f32 %v9398_v47, %v9582_v49  ;;  %v2272_v9 = vmul.f32 %v9425_v2, %v9595_v22 }
 0x18f   :  { %v2271_v34 = vmul.f32 %v9425_v2, %v9598_v26  ;;  %v2405_v37 = vmul.f32 %v9440_v38, %v9619_v16  ;;  %v2404_v49 = vmul.f32 %v9440_v38, %v9635_v27  ;;  %v2538_v15 = vmul.f32 %v9455_v35, %v2505_v57 }
 0x190   :  { %v2116_v56 = vpop.permute.xlu1 %2115  ;;  %v3422_v1 = vld [vmem:[#allocation2 + $0x58] sm:$0xff]  ;;  %v2022_v4 = vadd.f32 %v2006_v19, %v1856_v43  ;;  %v2021_v30 = vadd.f32 %v2005_v46, %v1855_v39  ;;  %v2537_v22 = vmul.f32 %v9455_v35, %v2500_v23  ;;  %v1842_v14 = vmul.f32 %v9332_v59, %v9611_v41 }
 0x191   :  { %6097 = vmatmul.mubr.msk.bf16.gmra.mrb[4].mxu1 %vm2919_vm13, %v3422_v1  ;;  %2970 = vrot.lane.b32.xlu1 %v2949_v28, %s6312_s29  ;;  %v1841_v27 = vmul.f32 %v9332_v59, %v9613_v58  ;;  %v1709_v57 = vmul.f32 %v9313_v7, %v9603_v5  ;;  %v2008_v23 = vmul.f32 %v9384_v8, %v9652_v18 }
 0x192   :  { %v2111_v0 = vpop.permute.xlu0 %2110  ;;  %3355 = vrot.lane.b32.xlu0 %v3335_v6, %s6314_s16  ;;  %v2155_v40 = vadd.f32 %v2139_v13, %v2022_v4  ;;  %v2154_v11 = vadd.f32 %v2138_v54, %v2021_v30  ;;  %v1708_v36 = vmul.f32 %v9313_v7, %v9606_v12  ;;  %v2007_v41 = vmul.f32 %v9384_v8, %v9659_v44 }
 0x193   :  { %v1858_v59 = vadd.f32 %v1842_v14, %v1709_v57  ;;  %v2141_v58 = vmul.f32 %v9398_v47, %v2116_v56  ;;  %v2140_v18 = vmul.f32 %v9398_v47, %v2111_v0 }
 0x194   :  { %v2638_v32 = vpop.permute.xlu1 %2637  ;;  %v2288_v53 = vadd.f32 %v2272_v9, %v2155_v40  ;;  %v2287_v17 = vadd.f32 %v2271_v34, %v2154_v11  ;;  %v1857_v13 = vadd.f32 %v1841_v27, %v1708_v36  ;;  %v15007_v11 = vld [vmem:[#allocation157_spill] sm:$0xff] }
 0x195   :  { %v2671_v26 = vmul.f32 %v9470_v10, %v2638_v32  ;;  %v2024_v54 = vadd.f32 %v2008_v23, %v1858_v59  ;;  %v15010_v23 = vrot.slane %v9609_v55, 1  ;;  %v15017_v59 = vld [vmem:[#allocation171_spill] sm:$0xff] }
 0x196   :  { %v2633_v24 = vpop.permute.xlu0 %2632  ;;  %v2421_v63 = vadd.f32 %v2405_v37, %v2288_v53  ;;  %v2420_v16 = vadd.f32 %v2404_v49, %v2287_v17  ;;  %v2023_v12 = vadd.f32 %v2007_v41, %v1857_v13  ;;  %v3387_v49 = vmul.f32 %v9629_v33, %v15007_v11  ;;  %v15015_v41 = vld [vmem:[#allocation176_spill] sm:$0xff]  ;;  %v15023_v11 = vld [vmem:[#allocation26_spill] sm:$0xff] }
 0x197   :  { %v2670_v52 = vmul.f32 %v9470_v10, %v2633_v24  ;;  %v2157_v34 = vadd.f32 %v2141_v58, %v2024_v54 }
 0x198   :  { %v2249_v29 = vpop.permute.xlu1 %2248  ;;  %v2554_v25 = vadd.f32 %v2538_v15, %v2421_v63  ;;  %v2553_v19 = vadd.f32 %v2537_v22, %v2420_v16  ;;  %v2156_v32 = vadd.f32 %v2140_v18, %v2023_v12  ;;  %v15008_v63 = vld [vmem:[#allocation133_spill] sm:$0xff]  ;;  %v15018_v18 = vld [vmem:[#allocation168_spill] sm:$0xff] }
 0x199   :  { %v2274_v8 = vmul.f32 %v9425_v2, %v2249_v29 }
 0x19a   :  { %v2244_v21 = vpop.permute.xlu0 %2243  ;;  %v2687_v46 = vadd.f32 %v2671_v26, %v2554_v25  ;;  %v2686_v43 = vadd.f32 %v2670_v52, %v2553_v19  ;;  %v3035_v26 = vmul.f32 %v9629_v33, %v15008_v63 }
 0x19b   :  { %v2273_v44 = vmul.f32 %v9425_v2, %v2244_v21  ;;  %v2290_v53 = vadd.f32 %v2274_v8, %v2157_v34  ;;  %v15021_v34 = vld [vmem:[#allocation177_spill] sm:$0xff] }
 0x19c   :  { %v2771_v28 = vpop.permute.xlu1 %2770 }
 0x19d   :  { %v2804_v1 = vmul.f32 %v9479_v60, %v2771_v28  ;;  %v2289_v2 = vadd.f32 %v2273_v44, %v2156_v32  ;;  %v15013_v28 = vrot.slane %v9609_v55, 7 }
 0x19e   :  { %v2766_v6 = vpop.permute.xlu0 %2765 }
 0x19f   :  { %v2803_v5 = vmul.f32 %v9479_v60, %v2766_v6  ;;  %v2820_v39 = vadd.f32 %v2804_v1, %v2687_v46  ;;  %v15016_v1 = vld [vmem:[#allocation179_spill] sm:$0xff] }
 0x1a0   :  { %v2382_v7 = vpop.permute.xlu1 %2381 }
 0x1a1   :  { %v2819_v4 = vadd.f32 %v2803_v5, %v2686_v43  ;;  %v2843_v9 = vadd.f32 %v9491_v61, %v2820_v39  ;;  %v2407_v47 = vmul.f32 %v9440_v38, %v2382_v7  ;;  %v15019_v7 = vld [vmem:[#allocation116_spill] sm:$0xff] }
 0x1a2   :  { %v2377_v30 = vpop.permute.xlu0 %2376 }
 0x1a3   :  { %v2842_v56 = vadd.f32 %v9491_v61, %v2819_v4  ;;  %v9730_v40 = vmax.f32 %v2843_v9, 0.0  ;;  %v2406_v0 = vmul.f32 %v9440_v38, %v2377_v30  ;;  %v2423_v14 = vadd.f32 %v2407_v47, %v2290_v53  ;;  %v15009_v38 = vld [vmem:[#allocation141_spill] sm:$0xff] }
 0x1a4   :  { %v2515_v24 = vpop.permute.xlu1 %2514  ;;  %v3100_v52 = vmul.f32 %v9650_v62, %v15009_v38 }
 0x1a5   :  { %v2858_v37 = vmax.f32 %v2842_v56, 0.0  ;;  %v3005_v17 = vrot.slane %v9730_v40, 1  ;;  %v2540_v22 = vmul.f32 %v9455_v35, %v2515_v24  ;;  %v2422_v16 = vadd.f32 %v2406_v0, %v2289_v2  ;;  %v15022_v56 = vld [vmem:[#allocation154_spill] sm:$0xff] }
 0x1a6   :  { %v2510_v15 = vpop.permute.xlu0 %2509  ;;  %v2875_v27 = vrot.slane %v9730_v40, 7 }
 0x1a7   :  { %v3004_v29 = vrot.slane %v2858_v37, 1  ;;  %v2874_v21 = vrot.slane %v2858_v37, 7  ;;  %v2539_v25 = vmul.f32 %v9455_v35, %v2510_v15  ;;  %v2556_v43 = vadd.f32 %v2540_v22, %v2423_v14  ;;  %v15026_v14 = vld [vmem:[#allocation181_spill] sm:$0xff] }
 0x1a8   :  { %v2648_v57 = vpop.permute.xlu1 %2647  ;;  %v3166_v39 = vmul.f32 %v2858_v37, %v15018_v18 }
 0x1a9   :  { %v3013_v19 = vsel %vm15011_vm3, %v15010_v23, %v3004_v29  ;;  %v9752_v33 = vsel %vm15012_vm14, %v3004_v29, %v3005_v17  ;;  %v2883_v62 = vsel %vm15014_vm10, %v15013_v28, %v2874_v21  ;;  %v2673_v36 = vmul.f32 %v9470_v10, %v2648_v57  ;;  %v15027_v57 = vld [vmem:[#allocation121_spill] sm:$0xff] }
 0x1aa   :  { %v2643_v35 = vpop.permute.xlu0 %2642  ;;  %v3036_v46 = vmul.f32 %v3013_v19, %v15015_v41  ;;  %v3388_v6 = vmul.f32 %v3013_v19, %v15016_v1  ;;  %v3197_v58 = vmul.f32 %v3013_v19, %v15017_v59  ;;  %v3198_v13 = vmul.f32 %v9752_v33, %v8808_v31 }
 0x1ab   :  { %v2672_v5 = vmul.f32 %v9470_v10, %v2643_v35  ;;  %v3101_v12 = vmul.f32 %v2883_v62, %v15019_v7  ;;  %v9771_v8 = vsel %vm15020_vm9, %v2874_v21, %v2875_v27  ;;  %v2555_v44 = vadd.f32 %v2539_v25, %v2422_v16 }
 0x1ac   :  { %v3046_v54 = vpack.c.bf16 %v3036_v46, %v3035_v26  ;;  %v3399_v4 = vpack.c.bf16 %v3388_v6, %v3387_v49  ;;  %v2781_v9 = vpop.permute.xlu1 %2780  ;;  %v3208_v30 = vpack.c.bf16 %v3198_v13, %v3197_v58  ;;  %v3261_v10 = vmul.f32 %v2883_v62, %v15021_v34  ;;  %v15025_v26 = vld [vmem:[#allocation164_spill] sm:$0xff]  ;;  %v15028_v6 = vld [vmem:[#allocation27_spill] sm:$0xff] }
 0x1ad   :  { %v3165_v31 = vmul.f32 %v9609_v55, %v15022_v56  ;;  %v2689_v32 = vadd.f32 %v2673_v36, %v2556_v43  ;;  %v2806_v47 = vmul.f32 %v9479_v60, %v2781_v9  ;;  %v3262_v24 = vmul.f32 %v9771_v8, %v8927_v51  ;;  %v15024_v55 = vld [vmem:[#allocation167_spill] sm:$0xff]  ;;  %v15029_v43 = vld [vmem:[#allocation178_spill] sm:$0xff] }
 0x1ae   :  { %3407 = vst.msk [vmem:[#allocation2 + $0x70] sm:$0xff] %vm2919_vm13, %v3399_v4  ;;  %3067 = vrot.lane.b32.xlu1 %v3046_v54, %s6313_s15  ;;  %v2776_v0 = vpop.permute.xlu0 %2775  ;;  %v2941_v49 = vmul.f32 %v9730_v40, %v15023_v11  ;;  %v2688_v53 = vadd.f32 %v2672_v5, %v2555_v44  ;;  %3229 = vrot.lane.b32.xlu0 %v3208_v30, %s6312_s29  ;;  %v15032_v4 = vld [vmem:[#allocation175_spill] sm:$0xff]  ;;  %v15035_v30 = vld [vmem:[#allocation18_spill] sm:$0xff]  ;;  %v15040_v11 = vld [vmem:[#allocation185_spill] sm:$0xff] }
 0x1af   :  { %v2805_v2 = vmul.f32 %v9479_v60, %v2776_v0  ;;  %v2940_v15 = vmul.f32 %v2858_v37, %v15024_v55  ;;  %v3176_v22 = vpack.c.bf16 %v3166_v39, %v3165_v31  ;;  %v2822_v29 = vadd.f32 %v2806_v47, %v2689_v32  ;;  %v15038_v47 = vld [vmem:[#allocation80_spill] sm:$0xff] }
 0x1b0   :  { %v3111_v63 = vpack.c.bf16 %v3101_v12, %v3100_v52  ;;  %v2907_v21 = vmul.f32 %v2883_v62, %v15025_v26  ;;  %v2908_v16 = vmul.f32 %v9771_v8, %v15026_v14  ;;  %v2961_v51 = vpop.permute.xlu1 %2960  ;;  %v3272_v25 = vpack.c.bf16 %v3262_v24, %v3261_v10  ;;  %v15039_v24 = vld [vmem:[#allocation186_spill] sm:$0xff] }
 0x1b1   :  { %v2821_v38 = vadd.f32 %v2805_v2, %v2688_v53  ;;  %v3325_v23 = vmul.f32 %v2858_v37, %v15027_v57  ;;  %v3326_v19 = vmul.f32 %v9730_v40, %v8969_v20  ;;  %3184 = vst.msk [vmem:[#allocation2 + $0x80] sm:$0xff] %vm2919_vm13, %v3176_v22  ;;  %v2845_v60 = vadd.f32 %v9491_v61, %v2822_v29  ;;  %v15041_v53 = vld [vmem:[#allocation72_spill] sm:$0xff] }
 0x1b2   :  { %3132 = vrot.lane.b32.xlu1 %v3111_v63, %s6314_s16  ;;  %v3220_v52 = vpop.permute.xlu0 %3219  ;;  %v2917_v28 = vpack.c.bf16 %v2908_v16, %v2907_v21  ;;  %3293 = vrot.lane.b32.xlu0 %v3272_v25, %s6313_s15  ;;  %v2950_v37 = vpack.c.bf16 %v2941_v49, %v2940_v15  ;;  %v3389_v5 = vmul.f32 %v9752_v33, %v15029_v43  ;;  %v15030_v39 = vrot.slane %v14900_v45, 7  ;;  %v15042_v15 = vld [vmem:[#allocation30_spill] sm:$0xff]  ;;  %v15045_v21 = vld [vmem:[#allocation169_spill] sm:$0xff]  ;;  %v15054_v43 = vld [vmem:[#allocation180_spill] sm:$0xff] }
 0x1b3   :  { %v2844_v62 = vadd.f32 %v9491_v61, %v2821_v38  ;;  %3243 = vst.msk [vmem:[#allocation2 + $0x8] sm:$0xff] %vm2984_vm2, %v3220_v52  ;;  %v9798_v36 = vmax.f32 %v2845_v60, 0.0  ;;  %v3336_v46 = vpack.c.bf16 %v3326_v19, %v3325_v23  ;;  %v2896_v61 = vmul.f32 %v9210_v48, %v15028_v6  ;;  %v15046_v25 = vld [vmem:[#allocation70_spill] sm:$0xff]  ;;  %v15047_v23 = vld [vmem:[#allocation45_spill] sm:$0xff] }
 0x1b4   :  { %2926 = vst.msk [vmem:[#allocation2 + $0x90] sm:$0xff] %vm2919_vm13, %v2917_v28  ;;  %v3058_v35 = vpop.permute.xlu1 %3057  ;;  %v3037_v7 = vmul.f32 %v9752_v33, %v15032_v4  ;;  %v15033_v12 = vrot.slane %v14900_v45, 1  ;;  %v15048_v60 = vld [vmem:[#allocation162_spill] sm:$0xff] }
 0x1b5   :  { %v9801_v20 = vmax.f32 %v2844_v62, 0.0  ;;  %v3425_v41 = vld [vmem:[#allocation2 + $0x70] sm:$0xff]  ;;  %v2877_v1 = vrot.slane %v9798_v36, 7  ;;  %v3007_v58 = vrot.slane %v9798_v36, 1  ;;  %v3102_v52 = vmul.f32 %v9771_v8, %v15048_v60 }
 0x1b6   :  { %6100 = vmatprep.mubr.msk.bf16.mxu1 %vm2919_vm13, %v3425_v41  ;;  %2972 = vrot.lane.b32.xlu1 %v2950_v37, %s6312_s29  ;;  %v3284_v59 = vpop.permute.xlu0 %3283  ;;  %v15049_v28 = vld [vmem:[#allocation122_spill] sm:$0xff] }
 0x1b7   :  { %3357 = vrot.lane.b32.xlu0 %v3336_v46, %s6314_s16  ;;  %3307 = vst.msk [vmem:[#allocation2 + $0x8] sm:$0xff] %vm3081_vm11, %v3284_v59  ;;  %v3006_v13 = vrot.slane %v9801_v20, 1  ;;  %v2876_v18 = vrot.slane %v9801_v20, 7  ;;  %v9819_v54 = vsel %vm15031_vm12, %v2877_v1, %v15030_v39  ;;  %v9827_v44 = vsel %vm15034_vm5, %v3007_v58, %v15033_v12  ;;  %v15050_v37 = vld [vmem:[#allocation174_spill] sm:$0xff]  ;;  %v15056_v39 = vld [vmem:[#allocation67_spill] sm:$0xff] }
 0x1b8   :  { %v3168_v9 = vmul.f32 %v9801_v20, %v8993_v50  ;;  %v2895_v34 = vmul.f32 %v9819_v54, %v15035_v30  ;;  %v3123_v10 = vpop.permute.xlu1 %3122  ;;  %v3392_v31 = vmul.f32 %v9827_v44, %v9155_v42  ;;  %v3167_v62 = vmul.f32 %v9730_v40, %v15049_v28  ;;  %v15067_v28 = vld [vmem:[#allocation151_spill] sm:$0xff] }
 0x1b9   :  { %v3011_v56 = vsel %vm15036_vm15, %v3005_v17, %v3006_v13  ;;  %v3010_v33 = vsel %vm15037_vm7, %v3006_v13, %v3007_v58  ;;  %v2881_v22 = vsel %vm15043_vm8, %v2875_v27, %v2876_v18  ;;  %v9853_v42 = vsel %vm15044_vm6, %v2876_v18, %v2877_v1  ;;  %v15052_v1 = vld [vmem:[#allocation23_spill] sm:$0xff]  ;;  %v15055_v13 = vld [vmem:[#allocation149_spill] sm:$0xff] }
 0x1ba   :  { %v3348_v32 = vpop.permute.xlu0 %3347  ;;  %v3038_v0 = vmul.f32 %v3011_v56, %v15038_v47  ;;  %v3390_v50 = vmul.f32 %v3011_v56, %v15039_v24  ;;  %v3199_v49 = vmul.f32 %v3011_v56, %v15040_v11  ;;  %v3200_v2 = vmul.f32 %v3010_v33, %v15041_v53  ;;  %v15059_v56 = vld [vmem:[#allocation31_spill] sm:$0xff]  ;;  %v15060_v24 = vld [vmem:[#allocation73_spill] sm:$0xff]  ;;  %v15061_v53 = vld [vmem:[#allocation54_spill] sm:$0xff] }
 0x1bb   :  { %v2911_v55 = vpack.c.bf16 %v2896_v61, %v2895_v34  ;;  %3371 = vst.msk [vmem:[#allocation2 + $0x8] sm:$0xff] %vm3146_vm1, %v3348_v32  ;;  %v3391_v17 = vmul.f32 %v3010_v33, %v15042_v15  ;;  %v3103_v14 = vmul.f32 %v2881_v22, %v15045_v21  ;;  %v3263_v57 = vmul.f32 %v2881_v22, %v15046_v25  ;;  %v15053_v61 = vld [vmem:[#allocation48_spill] sm:$0xff]  ;;  %v15063_v15 = vld [vmem:[#allocation161_spill] sm:$0xff] }
 0x1bc   :  { %v3047_v29 = vpack.c.bf16 %v3038_v0, %v3037_v7  ;;  %v3400_v63 = vpack.c.bf16 %v3390_v50, %v3389_v5  ;;  %v3209_v26 = vpack.c.bf16 %v3200_v2, %v3199_v49  ;;  %v2963_v16 = vpop.permute.xlu1 %2962  ;;  %v3264_v19 = vmul.f32 %v9853_v42, %v15047_v23  ;;  %v15057_v7 = vld [vmem:[#allocation29_spill] sm:$0xff]  ;;  %v15062_v2 = vld [vmem:[#allocation136_spill] sm:$0xff]  ;;  %v3434_v23 = vld [vmem:[#allocation2 + $0xb8] sm:$0xff] }
 0x1bd   :  { %2920 = vst.msk [vmem:[#allocation2] sm:$0xff] %vm2919_vm13, %v2911_v55  ;;  %v3401_v38 = vpack.c.bf16 %v3392_v31, %v3391_v17  ;;  %v3169_v41 = vmul.f32 %v9798_v36, %v15050_v37  ;;  %v2943_v6 = vmul.f32 %v9798_v36, %v15052_v1  ;;  %v3170_v8 = vmul.f32 %v14900_v45, %v15053_v61  ;;  %v15065_v21 = vld [vmem:[#allocation32_spill] sm:$0xff] }
 0x1be   :  { %2985 = vst.msk [vmem:[#allocation2] sm:$0xff] %vm2984_vm2, %v2961_v51  ;;  %2986 = vst.msk [vmem:[#allocation2 + $0x18] sm:$0xff] %vm2984_vm2, %v2963_v16  ;;  %3069 = vrot.lane.b32.xlu1 %v3047_v29, %s6313_s15  ;;  %3231 = vrot.lane.b32.xlu0 %v3209_v26, %s6312_s29  ;;  %v3222_v27 = vpop.permute.xlu0 %3221  ;;  %v15051_v51 = vld [vmem:[#allocation182_spill] sm:$0xff]  ;;  %v3112_v40 = vpack.c.bf16 %v3103_v14, %v3102_v52  ;;  %v3273_v59 = vpack.c.bf16 %v3264_v19, %v3263_v57 }
 0x1bf   :  { %3408 = vst.msk [vmem:[#allocation2 + $0x88] sm:$0xff] %vm2919_vm13, %v3400_v63  ;;  %3409 = vst.msk [vmem:[#allocation2 + $0xa0] sm:$0xff] %vm2919_vm13, %v3401_v38  ;;  %v2942_v46 = vmul.f32 %v9801_v20, %v15051_v51  ;;  %v3177_v58 = vpack.c.bf16 %v3168_v9, %v3167_v62  ;;  %v3327_v18 = vmul.f32 %v9801_v20, %v15055_v13  ;;  %v15066_v38 = vld [vmem:[#allocation60_spill] sm:$0xff]  ;;  %v15068_v62 = vld [vmem:[#allocation131_spill] sm:$0xff] }
 0x1c0   :  { %3082 = vst.msk [vmem:[#allocation2] sm:$0xff] %vm3081_vm11, %v3058_v35  ;;  %v2909_v35 = vmul.f32 %v2881_v22, %v15054_v43  ;;  %v3060_v5 = vpop.permute.xlu1 %3059  ;;  %v3328_v4 = vmul.f32 %v9798_v36, %v15056_v39  ;;  %v2910_v12 = vmul.f32 %v9853_v42, %v15057_v7  ;;  %v3178_v30 = vpack.c.bf16 %v3170_v8, %v3169_v41  ;;  %v15058_v36 = vld [vmem:[#allocation145_spill] sm:$0xff]  ;;  %v15064_v22 = vld [vmem:[#allocation40_spill] sm:$0xff] }
 0x1c1   :  { %3244 = vst.msk [vmem:[#allocation2 + $0x20] sm:$0xff] %vm2984_vm2, %v3222_v27  ;;  %v2951_v34 = vpack.c.bf16 %v2943_v6, %v2942_v46  ;;  %v3040_v31 = vmul.f32 %v9827_v44, %v15059_v56  ;;  %v3201_v50 = vmul.f32 %v9827_v44, %v15060_v24  ;;  %v3202_v44 = vmul.f32 %v15062_v2, %v15061_v53  ;;  %v15070_v2 = vld [vmem:[#allocation37_spill] sm:$0xff] }
 0x1c2   :  { %3147 = vst.msk [vmem:[#allocation2] sm:$0xff] %vm3146_vm1, %v3123_v10  ;;  %3134 = vrot.lane.b32.xlu1 %v3112_v40, %s6314_s16  ;;  %3295 = vrot.lane.b32.xlu0 %v3273_v59, %s6313_s15  ;;  %v3286_v45 = vpop.permute.xlu0 %3285  ;;  %v3412_v9 = vld [vmem:[#allocation2 + $0x8] sm:$0xff]  ;;  %v2918_v20 = vpack.c.bf16 %v2910_v12, %v2909_v35  ;;  %v3039_v10 = vmul.f32 %v3010_v33, %v15058_v36  ;;  %vm1164_vm7 = vcmp.le.s32.totalorder %v15070_v2, 6 }
 0x1c3   :  { %3083 = vst.msk [vmem:[#allocation2 + $0x18] sm:$0xff] %vm3081_vm11, %v3060_v5  ;;  %3308 = vst.msk [vmem:[#allocation2 + $0x20] sm:$0xff] %vm3081_vm11, %v3286_v45  ;;  %3642 = vmatprep.mubr.bf16.mxu0 %v3412_v9  ;;  %v3337_v0 = vpack.c.bf16 %v3328_v4, %v3327_v18  ;;  %v3104_v17 = vmul.f32 %v9853_v42, %v15063_v15  ;;  %v3105_v29 = vmul.f32 %v9819_v54, %v15064_v22  ;;  %v15073_v22 = vld [vmem:[#allocation34_spill] sm:$0xff] }
 0x1c4   :  { %3185 = vst.msk [vmem:[#allocation2 + $0x98] sm:$0xff] %vm2919_vm13, %v3177_v58  ;;  %3186 = vst.msk [vmem:[#allocation2 + $0xb0] sm:$0xff] %vm2919_vm13, %v3178_v30  ;;  %v3125_v32 = vpop.permute.xlu1 %3124  ;;  %v3048_v55 = vpack.c.bf16 %v3040_v31, %v3039_v10  ;;  %v3210_v26 = vpack.c.bf16 %v3202_v44, %v3201_v50  ;;  %v3265_v14 = vmul.f32 %v9819_v54, %v15065_v21  ;;  %v844_v44 = vadd.s32 4294967294, %v15070_v2 }
 0x1c5   :  { %2927 = vst.msk [vmem:[#allocation2 + $0xa8] sm:$0xff] %vm2919_vm13, %v2918_v20  ;;  %v3266_v42 = vmul.f32 %v9210_v48, %v15066_v38  ;;  %v3113_v25 = vpack.c.bf16 %v3105_v29, %v3104_v17  ;;  %v15069_v37 = vpack.c.bf16 %v15067_v28, %v15068_v62  ;;  %v15071_v17 = vmov 0  ;;  %v15076_v38 = vld [vmem:[#allocation38_spill] sm:$0xff] }
 0x1c6   :  { %v3428_v47 = vld [vmem:[#allocation2 + $0x88] sm:$0xff]  ;;  %3148 = vst.msk [vmem:[#allocation2 + $0x18] sm:$0xff] %vm3146_vm1, %v3125_v32  ;;  %2974 = vrot.lane.b32.xlu1 %v2951_v34, %s6312_s29  ;;  %v3350_v33 = vpop.permute.xlu0 %3349  ;;  %v3431_v11 = vld [vmem:[#allocation2 + $0xa0] sm:$0xff]  ;;  %3359 = vrot.lane.b32.xlu0 %v3337_v0, %s6314_s16  ;;  %vm892_vm4 = vcmp.le.s32.totalorder %v844_v44, 6  ;;  %vm14082_vm14 = vcmp.le.s32.totalorder %v15073_v22, 6  ;;  %v15090_v28 = vmov 0 }
 0x1c7   :  { %6101 = vmatmul.mubr.msk.bf16.gmra.mrb[8].mxu1 %vm2919_vm13, %v3428_v47  ;;  %3372 = vst.msk [vmem:[#allocation2 + $0x20] sm:$0xff] %vm3146_vm1, %v3350_v33  ;;  %v3274_v19 = vpack.c.bf16 %v3266_v42, %v3265_v14  ;;  %v845_v42 = vadd.s32 4294967294, %v15076_v38 }
 0x1c8   :  { %6104 = vmatprep.mubr.msk.bf16.mxu1 %vm2919_vm13, %v3431_v11  ;;  %v2965_v63 = vpop.permute.xlu1 %2964 }
 0x1c9   :  { %v3411_v49 = vld [vmem:[#allocation2] sm:$0xff]  ;;  %2987 = vst.msk [vmem:[#allocation2 + $0x30] sm:$0xff] %vm2984_vm2, %v2965_v63  ;;  %vm893_vm9 = vcmp.le.s32.totalorder %v845_v42, 6 }
 0x1ca   :  { %3643 = vmatmul.mubr.bf16.vlgmr.msra.gmra.mrb[0].mxu0 %v3411_v49  ;;  %3071 = vrot.lane.b32.xlu1 %v3048_v55, %s6313_s15  ;;  %v3224_v16 = vpop.permute.xlu0 %3223 }
 0x1cb   :  { %3233 = vrot.lane.b32.xlu0 %v3210_v26, %s6312_s29  ;;  %3245 = vst.msk [vmem:[#allocation2 + $0x38] sm:$0xff] %vm2984_vm2, %v3224_v16 }
 0x1cc   :  { %v3062_v57 = vpop.permute.xlu1 %3061 }
 0x1cd   :  { %3084 = vst.msk [vmem:[#allocation2 + $0x30] sm:$0xff] %vm3081_vm11, %v3062_v57  ;;  %v3414_v60 = vld [vmem:[#allocation2 + $0x18] sm:$0xff] }
 0x1ce   :  { %3136 = vrot.lane.b32.xlu1 %v3113_v25, %s6314_s16  ;;  %v3288_v54 = vpop.permute.xlu0 %3287  ;;  %v3415_v27 = vld [vmem:[#allocation2 + $0x20] sm:$0xff]  ;;  %v15077_v25 = vld [vmem:[#allocation62_spill] sm:$0xff] }
 0x1cf   :  { %6105 = vmatmul.mubr.msk.bf16.gmra.mrb[12].mxu1 %vm2919_vm13, %v3434_v23  ;;  %3297 = vrot.lane.b32.xlu0 %v3274_v19, %s6313_s15  ;;  %3309 = vst.msk [vmem:[#allocation2 + $0x38] sm:$0xff] %vm3081_vm11, %v3288_v54  ;;  %vm876_vm13 = vcmp.ge.s32.totalorder %v844_v44, 0  ;;  %v846_v57 = vadd.s32 4294967294, %v15077_v25  ;;  %v15078_v23 = vmov 0  ;;  %v15080_v19 = vld [vmem:[#allocation39_spill] sm:$0xff]  ;;  %v9991_v54 = vadd.s32 4294967294, %v15073_v22 }
 0x1d0   :  { %3650 = vmatprep.mubr.bf16.mxu0 %v3415_v27  ;;  %v3127_v48 = vpop.permute.xlu1 %3126  ;;  %vm9967_vm3 = vmand %vm876_vm13, %vm892_vm4  ;;  %vm14079_vm5 = vcmp.le.s32.totalorder %v15080_v19, 6  ;;  %v15082_v27 = vmov 0  ;;  %vm15089_vm4 = vcmp.ge.s32.totalorder %v15070_v2, 0  ;;  %v15150_v44 = vmov 0 }
 0x1d1   :  { %3149 = vst.msk [vmem:[#allocation2 + $0x30] sm:$0xff] %vm3146_vm1, %v3127_v48  ;;  %v15072_v17 = vsel %vm9967_vm3, 4294967295, %v15071_v17  ;;  %vm9976_vm10 = vmand %vm9967_vm3, %vm14082_vm14  ;;  %vm894_vm15 = vcmp.le.s32.totalorder %v846_v57, 6  ;;  %v15086_v48 = vld [vmem:[#allocation65_spill] sm:$0xff] }
 0x1d2   :  { %3651 = vmatmul.mubr.bf16.gmra.mrb[4].mxu0 %v3414_v60  ;;  %v3352_v52 = vpop.permute.xlu0 %3351  ;;  %15081 = vst [vmem:[#allocation47_spill] sm:$0xff] %v9991_v54  ;;  %v15084_v60 = vmov 0  ;;  %vm14078_vm6 = vcmp.le.s32.totalorder %v15086_v48, 6 }
 0x1d3   :  { %3361 = vrot.lane.b32.xlu0 %v15069_v37, %s6314_s16  ;;  %3373 = vst.msk [vmem:[#allocation2 + $0x38] sm:$0xff] %vm3146_vm1, %v3352_v52  ;;  %v15087_v52 = vmov 0 }
 0x1d4   :  { %v2967_v41 = vpop.permute.xlu1 %2966 }
 0x1d5   :  { %2988 = vst.msk [vmem:[#allocation2 + $0x48] sm:$0xff] %vm2984_vm2, %v2967_v41  ;;  %v15093_v41 = vmov 0 }
 0x1d7   :  { %v3226_v51 = vpop.permute.xlu0 %3225 }
 0x1d8   :  { %3246 = vst.msk [vmem:[#allocation2 + $0x50] sm:$0xff] %vm2984_vm2, %v3226_v51  ;;  %v3064_v46 = vpop.permute.xlu1 %3063  ;;  %v3417_v6 = vld [vmem:[#allocation2 + $0x30] sm:$0xff] }
 0x1d9   :  { %3085 = vst.msk [vmem:[#allocation2 + $0x48] sm:$0xff] %vm3081_vm11, %v3064_v46  ;;  %v15095_v51 = vld [vmem:[#allocation14_spill] sm:$0xff] }
 0x1da   :  { %v3418_v1 = vld [vmem:[#allocation2 + $0x38] sm:$0xff]  ;;  %v10031_v46 = vadd.s32 2, %v15095_v51 }
 0x1db   :  { %3658 = vmatprep.mubr.bf16.mxu0 %v3418_v1  ;;  %v3290_v61 = vpop.permute.xlu0 %3289  ;;  %v15096_v1 = vld [vmem:[#allocation12_spill] sm:$0xff] }
 0x1dc   :  { %3659 = vmatmul.mubr.bf16.gmra.mrb[8].mxu0 %v3417_v6  ;;  %3310 = vst.msk [vmem:[#allocation2 + $0x50] sm:$0xff] %vm3081_vm11, %v3290_v61  ;;  %v3129_v8 = vpop.permute.xlu1 %3128  ;;  %v15098_v6 = vmov 0  ;;  %vm14080_vm0 = vcmp.le.s32.totalorder %v10031_v46, 6  ;;  %v15101_v61 = vmov 0 }
 0x1dd   :  { %3150 = vst.msk [vmem:[#allocation2 + $0x48] sm:$0xff] %vm3146_vm1, %v3129_v8  ;;  %v10050_v8 = vadd.s32 2, %v15073_v22 }
 0x1e0   :  { %v3354_v40 = vpop.permute.xlu0 %3353  ;;  %v2969_v59 = vpop.permute.xlu1 %2968 }
 0x1e1   :  { %3374 = vst.msk [vmem:[#allocation2 + $0x50] sm:$0xff] %vm3146_vm1, %v3354_v40  ;;  %v1339_v40 = vadd.s32 2, %v15096_v1 }
 0x1e2   :  { %2989 = vst.msk [vmem:[#allocation2 + $0x60] sm:$0xff] %vm2984_vm2, %v2969_v59  ;;  %v1340_v59 = vadd.s32 2, %v15070_v2  ;;  %v15146_v2 = vmov 0 }
 0x1e4   :  { %v3420_v43 = vld [vmem:[#allocation2 + $0x48] sm:$0xff]  ;;  %vm1356_vm14 = vcmp.ge.s32.totalorder %v1340_v59, 0 }
 0x1e8   :  { %v3421_v58 = vld [vmem:[#allocation2 + $0x50] sm:$0xff] }
 0x1e9   :  { %3666 = vmatprep.mubr.bf16.mxu0 %v3421_v58  ;;  %v15103_v58 = vmov 0 }
 0x1ea   :  { %3667 = vmatmul.mubr.bf16.gmra.mrb[12].mxu0 %v3420_v43  ;;  %v15106_v43 = vmov 0 }
 0x1fb   :  { %v3066_v35 = vpop.permute.xlu1 %3065  ;;  %v3228_v5 = vpop.permute.xlu0 %3227 }
 0x1fc   :  { %3086 = vst.msk [vmem:[#allocation2 + $0x60] sm:$0xff] %vm3081_vm11, %v3066_v35  ;;  %v10071_v35 = vadd.s32 2, %v15080_v19 }
 0x1fd   :  { %3247 = vst.msk [vmem:[#allocation2 + $0x68] sm:$0xff] %vm2984_vm2, %v3228_v5  ;;  %v15108_v5 = vmov 0 }
 0x1ff   :  { %v3131_v13 = vpop.permute.xlu1 %3130  ;;  %v3292_v18 = vpop.permute.xlu0 %3291 }
 0x200   :  { %3151 = vst.msk [vmem:[#allocation2 + $0x60] sm:$0xff] %vm3146_vm1, %v3131_v13  ;;  %v15110_v13 = vmov 0 }
 0x201   :  { %3311 = vst.msk [vmem:[#allocation2 + $0x68] sm:$0xff] %vm3081_vm11, %v3292_v18  ;;  %v15113_v18 = vmov 0 }
 0x203   :  { %v2971_v39 = vpop.permute.xlu1 %2970 }
 0x204   :  { %2990 = vst.msk [vmem:[#allocation2 + $0x78] sm:$0xff] %vm2984_vm2, %v2971_v39  ;;  %v3356_v4 = vpop.permute.xlu0 %3355  ;;  %v15116_v39 = vmov 0 }
 0x205   :  { %3375 = vst.msk [vmem:[#allocation2 + $0x68] sm:$0xff] %vm3146_vm1, %v3356_v4  ;;  %v15118_v4 = vmov 0 }
 0x207   :  { %v3423_v12 = vld [vmem:[#allocation2 + $0x60] sm:$0xff] }
 0x20c   :  { %v3424_v7 = vld [vmem:[#allocation2 + $0x68] sm:$0xff] }
 0x20d   :  { %3674 = vmatprep.mubr.bf16.mxu0 %v3424_v7  ;;  %v15121_v7 = vmov 0 }
 0x20e   :  { %3675 = vmatmul.mubr.bf16.gmra.mrb[16].mxu0 %v3423_v12 }
 0x21c   :  { %v9944_v45 = vpop.f32.mrb[0].mxu1 }
 0x21d   :  { %v9946_v9 = vpop.f32.mrb[1].mxu1 }
 0x21e   :  { %v9948_v30 = vpop.f32.mrb[2].mxu1 }
 0x21f   :  { %v9950_v20 = vpop.f32.mrb[3].mxu1 }
 0x220   :  { %v3068_v34 = vpop.permute.xlu1 %3067  ;;  %v3230_v36 = vpop.permute.xlu0 %3229 }
 0x221   :  { %3087 = vst.msk [vmem:[#allocation2 + $0x78] sm:$0xff] %vm3081_vm11, %v3068_v34 }
 0x222   :  { %3248 = vst.msk [vmem:[#allocation2 + $0x80] sm:$0xff] %vm2984_vm2, %v3230_v36 }
 0x224   :  { %v3133_v10 = vpop.permute.xlu1 %3132  ;;  %v3294_v56 = vpop.permute.xlu0 %3293 }
 0x225   :  { %3152 = vst.msk [vmem:[#allocation2 + $0x78] sm:$0xff] %vm3146_vm1, %v3133_v10 }
 0x226   :  { %3312 = vst.msk [vmem:[#allocation2 + $0x80] sm:$0xff] %vm3081_vm11, %v3294_v56  ;;  %v10124_v56 = vadd.s32 2, %v15086_v48 }
 0x228   :  { %v2973_v31 = vpop.permute.xlu1 %2972  ;;  %15125 = vst [vmem:[#allocation160_spill] sm:$0xff] %v10124_v56 }
 0x229   :  { %2991 = vst.msk [vmem:[#allocation2 + $0x90] sm:$0xff] %vm2984_vm2, %v2973_v31  ;;  %v3358_v32 = vpop.permute.xlu0 %3357  ;;  %v1341_v31 = vadd.s32 2, %v15076_v38 }
 0x22a   :  { %3376 = vst.msk [vmem:[#allocation2 + $0x80] sm:$0xff] %vm3146_vm1, %v3358_v32  ;;  %v1342_v32 = vadd.s32 2, %v15077_v25 }
 0x22c   :  { %v3426_v50 = vld [vmem:[#allocation2 + $0x78] sm:$0xff] }
 0x230   :  { %v3070_v47 = vpop.permute.xlu1 %3069  ;;  %v3232_v0 = vpop.permute.xlu0 %3231 }
 0x231   :  { %3088 = vst.msk [vmem:[#allocation2 + $0x90] sm:$0xff] %vm3081_vm11, %v3070_v47  ;;  %v3427_v24 = vld [vmem:[#allocation2 + $0x80] sm:$0xff]  ;;  %v15126_v47 = vld [vmem:[#allocation66_spill] sm:$0xff] }
 0x232   :  { %3249 = vst.msk [vmem:[#allocation2 + $0x98] sm:$0xff] %vm2984_vm2, %v3232_v0  ;;  %3682 = vmatprep.mubr.bf16.mxu0 %v3427_v24  ;;  %v15128_v0 = vmov 0  ;;  %v15130_v24 = vmov 0 }
 0x233   :  { %3683 = vmatmul.mubr.bf16.gmra.mrb[20].mxu0 %v3426_v50  ;;  %v15134_v50 = vmov 0 }
 0x234   :  { %v3135_v33 = vpop.permute.xlu1 %3134  ;;  %v3296_v11 = vpop.permute.xlu0 %3295 }
 0x235   :  { %3153 = vst.msk [vmem:[#allocation2 + $0x90] sm:$0xff] %vm3146_vm1, %v3135_v33  ;;  %v15137_v33 = vld [vmem:[#allocation69_spill] sm:$0xff] }
 0x236   :  { %3313 = vst.msk [vmem:[#allocation2 + $0x98] sm:$0xff] %vm3081_vm11, %v3296_v11  ;;  %v10152_v11 = vadd.s32 2, %v15137_v33 }
 0x238   :  { %v2975_v49 = vpop.permute.xlu1 %2974  ;;  %v3360_v53 = vpop.permute.xlu0 %3359  ;;  %15138 = vst [vmem:[#allocation166_spill] sm:$0xff] %v10152_v11 }
 0x239   :  { %2992 = vst.msk [vmem:[#allocation2 + $0xa8] sm:$0xff] %vm2984_vm2, %v2975_v49  ;;  %v15139_v49 = vmov 0 }
 0x23a   :  { %3377 = vst.msk [vmem:[#allocation2 + $0x98] sm:$0xff] %vm3146_vm1, %v3360_v53  ;;  %v15142_v53 = vmov 0 }
 0x23c   :  { %v3072_v55 = vpop.permute.xlu1 %3071  ;;  %v3429_v14 = vld [vmem:[#allocation2 + $0x90] sm:$0xff] }
 0x23d   :  { %3089 = vst.msk [vmem:[#allocation2 + $0xa8] sm:$0xff] %vm3081_vm11, %v3072_v55  ;;  %v3234_v15 = vpop.permute.xlu0 %3233  ;;  %v15153_v55 = vmov 0 }
 0x23e   :  { %3250 = vst.msk [vmem:[#allocation2 + $0xb0] sm:$0xff] %vm2984_vm2, %v3234_v15  ;;  %vm877_vm2 = vcmp.ge.s32.totalorder %v845_v42, 0  ;;  %v843_v15 = vadd.s32 4294967294, %v15096_v1 }
 0x23f   :  { %vm9985_vm12 = vmand %vm877_vm2, %vm893_vm9  ;;  %vm14081_vm9 = vcmp.ge.s32.totalorder %v9991_v54, 0 }
 0x240   :  { %v3137_v63 = vpop.permute.xlu1 %3136  ;;  %v15079_v23 = vsel %vm9985_vm12, 4294967295, %v15078_v23  ;;  %vm10017_vm2 = vmand %vm15089_vm4, %vm1164_vm7  ;;  %vm15097_vm7 = vcmp.ge.s32.totalorder %v15096_v1, 0 }
 0x241   :  { %3154 = vst.msk [vmem:[#allocation2 + $0xa8] sm:$0xff] %vm3146_vm1, %v3137_v63  ;;  %v3298_v26 = vpop.permute.xlu0 %3297  ;;  %v3430_v21 = vld [vmem:[#allocation2 + $0x98] sm:$0xff]  ;;  %v15091_v28 = vsel %vm10017_vm2, 4294967295, %v15090_v28  ;;  %v15156_v63 = vld [vmem:[#allocation16_spill] sm:$0xff] }
 0x242   :  { %3314 = vst.msk [vmem:[#allocation2 + $0xb0] sm:$0xff] %vm3081_vm11, %v3298_v26  ;;  %3690 = vmatprep.mubr.bf16.mxu0 %v3430_v21  ;;  %vm878_vm11 = vcmp.ge.s32.totalorder %v846_v57, 0  ;;  %15092 = vst [vmem:[#allocation74_spill] sm:$0xff] %v15091_v28  ;;  %v15162_v57 = vld [vmem:[#allocation13_spill] sm:$0xff] }
 0x243   :  { %3691 = vmatmul.mubr.bf16.gmra.mrb[24].mxu0 %v3429_v14  ;;  %vm10002_vm8 = vmand %vm878_vm11, %vm894_vm15  ;;  %vm1163_vm15 = vcmp.le.s32.totalorder %v15096_v1, 6  ;;  %v15159_v14 = vld [vmem:[#allocation156_spill] sm:$0xff]  ;;  %v15166_v1 = vld [vmem:[#allocation87_spill] sm:$0xff] }
 0x244   :  { %v15085_v60 = vsel %vm10002_vm8, 4294967295, %v15084_v60  ;;  %vm10011_vm13 = vmand %vm10002_vm8, %vm14078_vm6  ;;  %vm1372_vm8 = vcmp.le.s32.totalorder %v1340_v59, 6 }
 0x245   :  { %v3362_v16 = vpop.permute.xlu0 %3361  ;;  %v15088_v52 = vsel %vm10011_vm13, 4294967295, %v15087_v52  ;;  %vm10026_vm11 = vmand %vm10017_vm2, %vm14081_vm9  ;;  %vm1371_vm9 = vcmp.le.s32.totalorder %v1339_v40, 6 }
 0x246   :  { %3378 = vst.msk [vmem:[#allocation2 + $0xb0] sm:$0xff] %vm3146_vm1, %v3362_v16  ;;  %vm9997_vm1 = vmand %vm9985_vm12, %vm14079_vm5  ;;  %v15094_v41 = vsel %vm10026_vm11, 4294967295, %v15093_v41  ;;  %vm15105_vm12 = vcmp.ge.s32.totalorder %v15076_v38, 0  ;;  %v1351_v16 = vadd.s32 2, %v15159_v14  ;;  %v15171_v14 = vmov 0 }
 0x247   :  { %v15083_v27 = vsel %vm9997_vm1, 4294967295, %v15082_v27  ;;  %vm10036_vm4 = vmand %vm15097_vm7, %vm1163_vm15  ;;  %vm1165_vm15 = vcmp.le.s32.totalorder %v15076_v38, 6  ;;  %vm14087_vm7 = vcmp.le.s32.totalorder %v10050_v8, 6  ;;  %v15160_v38 = vld [vmem:[#allocation11_spill] sm:$0xff] }
 0x248   :  { %v3432_v37 = vld [vmem:[#allocation2 + $0xa8] sm:$0xff]  ;;  %v15099_v6 = vsel %vm10036_vm4, 4294967295, %v15098_v6  ;;  %vm10045_vm6 = vmand %vm10036_vm4, %vm14080_vm0  ;;  %vm1355_vm0 = vcmp.ge.s32.totalorder %v1339_v40, 0  ;;  %v10208_v40 = vld [vmem:[%s13774_s4] ss:$0 sm:$0xff] }
 0x249   :  { %15100 = vst [vmem:[#allocation15_spill] sm:$0xff] %v15099_v6  ;;  %v15102_v61 = vsel %vm10045_vm6, 4294967295, %v15101_v61  ;;  %vm10060_vm5 = vmand %vm10017_vm2, %vm14087_vm7  ;;  %vm14089_vm7 = vcmp.le.s32.totalorder %v15095_v51, 6 }
 0x24a   :  { %v15104_v58 = vsel %vm10060_vm5, 4294967295, %v15103_v58  ;;  %vm10066_vm6 = vmand %vm15105_vm12, %vm1165_vm15  ;;  %vm15115_vm15 = vcmp.le.s32.totalorder %v15073_v22, 6  ;;  %vm1374_vm5 = vcmp.le.s32.totalorder %v1342_v32, 6  ;;  %15167 = vst [vmem:[#allocation50_spill] sm:$0xff] %v10208_v40 }
 0x24b   :  { %v15107_v43 = vsel %vm10066_vm6, 4294967295, %v15106_v43  ;;  %vm10073_vm11 = vmand %vm1355_vm0, %vm1371_vm9  ;;  %vm15120_vm9 = vcmp.ge.s32.totalorder %v9991_v54, 0 }
 0x24c   :  { %v15109_v5 = vsel %vm10073_vm11, 4294967295, %v15108_v5  ;;  %vm10078_vm2 = vmand %vm1356_vm14, %vm1372_vm8  ;;  %vm14090_vm14 = vcmp.le.s32.totalorder %v10071_v35, 6 }
 0x24d   :  { %v3433_v62 = vld [vmem:[#allocation2 + $0xb0] sm:$0xff]  ;;  %v15111_v13 = vsel %vm10078_vm2, 4294967295, %v15110_v13  ;;  %vm10086_vm12 = vmand %vm10073_vm11, %vm14089_vm7  ;;  %vm15133_vm11 = vcmp.ge.s32.totalorder %v15126_v47, 0 }
 0x24e   :  { %3698 = vmatprep.mubr.bf16.mxu0 %v3433_v62  ;;  %15112 = vst [vmem:[#allocation152_spill] sm:$0xff] %v15111_v13  ;;  %v15114_v18 = vsel %vm10086_vm12, 4294967295, %v15113_v18  ;;  %vm10094_vm0 = vmand %vm10078_vm2, %vm15115_vm15  ;;  %vm1166_vm15 = vcmp.le.s32.totalorder %v15077_v25, 6  ;;  %vm1373_vm12 = vcmp.le.s32.totalorder %v1341_v31, 6  ;;  %v1352_v62 = vadd.s32 2, %v15162_v57 }
 0x24f   :  { %3699 = vmatmul.mubr.bf16.gmra.mrb[28].mxu0 %v3432_v37  ;;  %v15117_v39 = vsel %vm10094_vm0, 4294967295, %v15116_v39  ;;  %vm10103_vm8 = vmand %vm10066_vm6, %vm14090_vm14  ;;  %vm15127_vm14 = vcmp.ge.s32.totalorder %v15077_v25, 0  ;;  %vm1357_vm0 = vcmp.ge.s32.totalorder %v1341_v31, 0  ;;  %v15164_v37 = vmov 0 }
 0x250   :  { %v15119_v4 = vsel %vm10103_vm8, 4294967295, %v15118_v4  ;;  %vm10111_vm7 = vmand %vm9967_vm3, %vm15120_vm9  ;;  %vm1167_vm9 = vcmp.le.s32.totalorder %v15126_v47, 6  ;;  %vm1358_vm3 = vcmp.ge.s32.totalorder %v1342_v32, 0  ;;  %v10262_v13 = vadd.s32 4294967294, %v15095_v51 }
 0x251   :  { %v15122_v7 = vsel %vm10111_vm7, 4294967295, %v15121_v7  ;;  %vm10132_vm2 = vmand %vm15127_vm14, %vm1166_vm15  ;;  %vm14096_vm7 = vcmp.le.s32.totalorder %v10124_v56, 6 }
 0x252   :  { %v15129_v0 = vsel %vm10132_vm2, 4294967295, %v15128_v0  ;;  %vm10141_vm8 = vmand %vm10132_vm2, %vm14096_vm7  ;;  %15196 = vst [vmem:[#allocation63_spill] sm:$0xff] %v10262_v13 }
 0x253   :  { %v15131_v24 = vsel %vm10141_vm8, 4294967295, %v15130_v24  ;;  %vm10147_vm14 = vmand %vm15133_vm11, %vm1167_vm9  ;;  %vm15145_vm8 = vcmp.le.s32.totalorder %v15080_v19, 6  ;;  %vm15149_vm11 = vcmp.le.s32.totalorder %v15086_v48, 6  ;;  %vm891_vm9 = vcmp.le.s32.totalorder %v843_v15, 6 }
 0x254   :  { %15132 = vst [vmem:[#allocation150_spill] sm:$0xff] %v15131_v24  ;;  %v15135_v50 = vsel %vm10147_vm14, 4294967295, %v15134_v50  ;;  %vm10154_vm15 = vmand %vm1357_vm0, %vm1373_vm12  ;;  %vm1162_vm0 = vcmp.le.s32.totalorder %v15156_v63, 6  ;;  %v15359_v24 = vld [vmem:[#allocation14_spill] sm:$0xff] }
 0x255   :  { %15136 = vst [vmem:[#allocation183_spill] sm:$0xff] %v15135_v50  ;;  %v15140_v49 = vsel %vm10154_vm15, 4294967295, %v15139_v49  ;;  %vm10158_vm7 = vmand %vm1358_vm3, %vm1374_vm5  ;;  %vm14099_vm3 = vcmp.le.s32.totalorder %v10152_v11, 6 }
 0x256   :  { %15141 = vst [vmem:[#allocation184_spill] sm:$0xff] %v15140_v49  ;;  %v15143_v53 = vsel %vm10158_vm7, 4294967295, %v15142_v53  ;;  %vm10166_vm2 = vmand %vm10154_vm15, %vm15145_vm8  ;;  %vm875_vm8 = vcmp.ge.s32.totalorder %v843_v15, 0  ;;  %vm1383_vm15 = vcmp.le.s32.totalorder %v1351_v16, 6  ;;  %v15183_v15 = vmov 0 }
 0x257   :  { %15144 = vst [vmem:[#allocation8_spill] sm:$0xff] %v15143_v53  ;;  %v15147_v2 = vsel %vm10166_vm2, 4294967295, %v15146_v2  ;;  %vm10174_vm12 = vmand %vm10158_vm7, %vm15149_vm11  ;;  %vm1161_vm11 = vcmp.le.s32.totalorder %v15160_v38, 6  ;;  %vm1367_vm2 = vcmp.ge.s32.totalorder %v1351_v16, 0 }
 0x258   :  { %15148 = vst [vmem:[#allocation128_spill] sm:$0xff] %v15147_v2  ;;  %v15151_v44 = vsel %vm10174_vm12, 4294967295, %v15150_v44  ;;  %vm10183_vm5 = vmand %vm10147_vm14, %vm14099_vm3  ;;  %vm15163_vm3 = vcmp.ge.s32.totalorder %v15156_v63, 0  ;;  %vm15186_vm14 = vcmp.le.s32.totalorder %v15095_v51, 6  ;;  %v15224_v51 = vmov 0.0  }
 0x259   :  { %15152 = vst [vmem:[#allocation132_spill] sm:$0xff] %v15151_v44  ;;  %v15154_v55 = vsel %vm10183_vm5, 4294967295, %v15153_v55  ;;  %vm10200_vm7 = vmand %vm15163_vm3, %vm1162_vm0  ;;  %vm1168_vm5 = vcmp.le.s32.totalorder %v15166_v1, 6  ;;  %vm15174_vm0 = vcmp.ge.s32.totalorder %v15160_v38, 0 }
 0x25a   :  { %15155 = vst [vmem:[#allocation19_spill] sm:$0xff] %v15154_v55  ;;  %v15165_v37 = vsel %vm10200_vm7, 4294967295, %v15164_v37  ;;  %vm10216_vm3 = vmand %vm875_vm8, %vm891_vm9  ;;  %v15178_v55 = vld [vmem:[#allocation10_spill] sm:$0xff]  ;;  %vm15182_vm8 = vcmp.ge.s32.totalorder %v15166_v1, 0 }
 0x25b   :  { %v15172_v14 = vsel %vm10216_vm3, 4294967295, %v15171_v14  ;;  %vm10222_vm12 = vmand %vm15174_vm0, %vm1161_vm11  ;;  %v10227_v44 = vadd.s32 2, %v15178_v55  ;;  %vm1368_vm11 = vcmp.ge.s32.totalorder %v1352_v62, 0  ;;  %vm1384_vm0 = vcmp.le.s32.totalorder %v1352_v62, 6 }
 0x25c   :  { %15173 = vst [vmem:[#allocation20_spill] sm:$0xff] %v15172_v14  ;;  %vm10234_vm9 = vmand %vm15182_vm8, %vm1168_vm5 }
 0x25d   :  { %15179 = vst [vmem:[#allocation43_spill] sm:$0xff] %v10227_v44  ;;  %v15184_v15 = vsel %vm10234_vm9, 4294967295, %v15183_v15  ;;  %vm10243_vm6 = vmand %vm10216_vm3, %vm15186_vm14  ;;  %vm14141_vm14 = vcmp.le.s32.totalorder %v10227_v44, 6 }
 0x25e   :  { %15185 = vst [vmem:[#allocation42_spill] sm:$0xff] %v15184_v15  ;;  %vm10255_vm8 = vmand %vm1367_vm2, %vm1383_vm15 }
 0x25f   :  { %vm10267_vm13 = vmand %vm1368_vm11, %vm1384_vm0  ;;  %vm15220_vm0 = vcmp.ge.s32.totalorder %v10262_v13, 0 }
 0x264   :  { %v10115_v12 = vpop.f32.mrb[4].mxu1 }
 0x265   :  { %15123 = vst [vmem:[#allocation125_spill] sm:$0xff] %v10115_v12  ;;  %v10117_v34 = vpop.f32.mrb[5].mxu1 }
 0x266   :  { %v10119_v36 = vpop.f32.mrb[6].mxu1 }
 0x267   :  { %15124 = vst [vmem:[#allocation159_spill] sm:$0xff] %v10119_v36  ;;  %v10121_v10 = vpop.f32.mrb[7].mxu1 }
 0x29a   :  { %v10189_v26 = vpop.f32.mrb[8].mxu1 }
 0x29b   :  { %15157 = vst [vmem:[#allocation17_spill] sm:$0xff] %v10189_v26  ;;  %v10191_v21 = vpop.f32.mrb[9].mxu1  ;;  %v15169_v26 = vld [vmem:[#allocation21_spill] sm:$0xff] }
 0x29c   :  { %15158 = vst [vmem:[#allocation44_spill] sm:$0xff] %v10191_v21  ;;  %v10195_v25 = vpop.f32.mrb[10].mxu1  ;;  %v10213_v53 = vadd.s32 4294967294, %v15169_v26  ;;  %v15175_v21 = vmov 0 }
 0x29d   :  { %v5868_v42 = vpop.f32.mrb[0].mxu0  ;;  %15161 = vst [vmem:[#allocation24_spill] sm:$0xff] %v10195_v25  ;;  %v10210_v31 = vpop.f32.mrb[11].mxu1  ;;  %v15176_v21 = vsel %vm10222_vm12, 4294967295, %v15175_v21 }
 0x29e   :  { %v5869_v59 = vpop.f32.mrb[1].mxu0  ;;  %15168 = vst [vmem:[#allocation51_spill] sm:$0xff] %v10210_v31  ;;  %15170 = vst [vmem:[#allocation28_spill] sm:$0xff] %v10213_v53  ;;  %vm14134_vm5 = vcmp.ge.s32.totalorder %v10213_v53, 0 }
 0x29f   :  { %v5870_v32 = vadd.f32 %v5869_v59, %v5868_v42  ;;  %v5871_v25 = vpop.f32.mrb[2].mxu0  ;;  %15177 = vst [vmem:[#allocation56_spill] sm:$0xff] %v15176_v21  ;;  %v15180_v42 = vld [vmem:[#allocation91_spill] sm:$0xff]  ;;  %vm10291_vm11 = vmand %vm10200_vm7, %vm14134_vm5 }
 0x2a0   :  { %v5872_v57 = vpop.f32.mrb[3].mxu0  ;;  %v10230_v59 = vadd.s32 2, %v15180_v42 }
 0x2a1   :  { %v3645_v31 = vadd.f32 %v5870_v32, %v10208_v40  ;;  %v5873_v2 = vadd.f32 %v5872_v57, %v5871_v25  ;;  %v15190_v32 = vld [vmem:[#allocation153_spill] sm:$0xff]  ;;  %v15192_v57 = vmov 0 }
 0x2a2   :  { %15181 = vst [vmem:[#allocation57_spill] sm:$0xff] %v10230_v59  ;;  %v10249_v49 = vpop.f32.mrb[12].mxu1  ;;  %v10253_v25 = vadd.s32 2, %v15190_v32  ;;  %v15193_v57 = vsel %vm10255_vm8, 4294967295, %v15192_v57  ;;  %vm14133_vm3 = vcmp.le.s32.totalorder %v10230_v59, 6  ;;  %vm15210_vm1 = vcmp.le.s32.totalorder %v15190_v32, 6 }
 0x2a3   :  { %v3742_v16 = vadd.f32 %v9946_v9, %v3645_v31  ;;  %v3648_v54 = vadd.f32 %v5873_v2, %v10208_v40  ;;  %15189 = vst [vmem:[#allocation36_spill] sm:$0xff] %v10249_v49  ;;  %15194 = vst [vmem:[#allocation53_spill] sm:$0xff] %v15193_v57  ;;  %v10259_v62 = vpop.f32.mrb[13].mxu1  ;;  %v1337_v9 = vadd.s32 2, %v15160_v38  ;;  %v847_v57 = vadd.s32 4294967294, %v15126_v47  ;;  %v15428_v2 = vld [vmem:[#allocation63_spill] sm:$0xff] }
 0x2a4   :  { %15191 = vst [vmem:[#allocation35_spill] sm:$0xff] %v10253_v25  ;;  %15195 = vst [vmem:[#allocation78_spill] sm:$0xff] %v10259_v62  ;;  %v10274_v11 = vpop.f32.mrb[14].mxu1  ;;  %v15200_v62 = vmov 0  ;;  %vm14151_vm5 = vcmp.le.s32.totalorder %v10253_v25, 6 }
 0x2a5   :  { %v3804_v31 = vmax.f32 %v3742_v16, 0.0  ;;  %v10272_v49 = vadd.f32 %v9950_v20, %v3648_v54  ;;  %v5874_v50 = vpop.f32.mrb[4].mxu0  ;;  %15199 = vst [vmem:[#allocation64_spill] sm:$0xff] %v10274_v11  ;;  %vm10281_vm15 = vmand %vm10234_vm9, %vm14133_vm3  ;;  %v10285_v56 = vpop.f32.mrb[15].mxu1  ;;  %v10296_v54 = vadd.s32 2, %v15169_v26  ;;  %v1338_v16 = vadd.s32 2, %v15156_v63 }
 0x2a6   :  { %v15201_v62 = vsel %vm10281_vm15, 4294967295, %v15200_v62  ;;  %v5875_v38 = vpop.f32.mrb[5].mxu0  ;;  %15203 = vst [vmem:[#allocation52_spill] sm:$0xff] %v10285_v56  ;;  %v15207_v11 = vld [vmem:[#allocation25_spill] sm:$0xff]  ;;  %vm10305_vm3 = vmand %vm10222_vm12, %vm14141_vm14 }
 0x2a7   :  { %15202 = vst [vmem:[#allocation75_spill] sm:$0xff] %v15201_v62  ;;  %15206 = vst [vmem:[#allocation97_spill] sm:$0xff] %v10296_v54  ;;  %v3805_v62 = vmax.f32 %v10272_v49, 0.0  ;;  %v5876_v59 = vadd.f32 %v5875_v38, %v5874_v50  ;;  %v5877_v15 = vpop.f32.mrb[6].mxu0  ;;  %v10320_v49 = vrot.slane %v3804_v31, 1  ;;  %vm15214_vm14 = vcmp.le.s32.totalorder %v15207_v11, 6 }
 0x2a8   :  { %v5878_v36 = vpop.f32.mrb[7].mxu0  ;;  %vm10316_vm7 = vmand %vm10255_vm8, %vm15210_vm1  ;;  %vm1354_vm9 = vcmp.ge.s32.totalorder %v1338_v16, 0  ;;  %vm1370_vm15 = vcmp.le.s32.totalorder %v1338_v16, 6  ;;  %v10381_v29 = vadd.s32 4294967294, %v15207_v11  ;;  %v10425_v50 = vadd.s32 4294967294, %v15080_v19 }
 0x2a9   :  { %15213 = vst [vmem:[#allocation59_spill] sm:$0xff] %v10320_v49  ;;  %v3821_v38 = vrot.slane %v3805_v62, 1  ;;  %v3653_v63 = vadd.f32 %v5876_v59, %v10208_v40  ;;  %v5879_v28 = vadd.f32 %v5878_v36, %v5877_v15  ;;  %vm10327_vm2 = vmand %vm10267_vm13, %vm15214_vm14  ;;  %vm15219_vm14 = vcmp.lt.s32.totalorder %v6383_v3, 7 }
 0x2aa   :  { %vm10337_vm12 = vmand %vm10255_vm8, %vm14151_vm5  ;;  %15231 = vst [vmem:[#allocation46_spill] sm:$0xff] %v10381_v29  ;;  %v10407_v16 = vsel %vm10316_vm7, 1.0, %v15224_v51  ;;  %v10412_v20 = vsel %vm10327_vm2, 1.0, %v15224_v51  ;;  %v10447_v19 = vadd.s32 4294967294, %v15086_v48 }
 0x2ab   :  { %v3850_v59 = vsel %vm15219_vm14, %v10320_v49, %v3821_v38  ;;  %v3750_v15 = vadd.f32 %v9944_v45, %v3653_v63  ;;  %v3656_v32 = vadd.f32 %v5879_v28, %v10208_v40  ;;  %vm10350_vm1 = vmand %vm10036_vm4, %vm15220_vm0  ;;  %v1051_v49 = vsel %vm10243_vm6, 1.0, %v15224_v51  ;;  %15238 = vst [vmem:[#allocation68_spill] sm:$0xff] %v10407_v16 }
 0x2ac   :  { %v10355_v12 = vmax.f32 %v3804_v31, %v3850_v59  ;;  %v10363_v45 = vsel %vm9976_vm10, 1.0, %v15224_v51  ;;  %v848_v28 = vadd.s32 4294967294, %v15166_v1  ;;  %vm15225_vm14 = vcmp.le.s32.totalorder %v1337_v9, 6  ;;  %vm10376_vm8 = vmand %vm1354_vm9, %vm1370_vm15  ;;  %15239 = vst [vmem:[#allocation93_spill] sm:$0xff] %v10412_v20 }
 0x2ad   :  { %vm15226_vm0 = vcmp.ge.s32.totalorder %v1337_v9, 0  ;;  %v15227_v63 = vmov 0  ;;  %v3806_v47 = vmax.f32 %v3750_v15, 0.0  ;;  %v10373_v31 = vadd.f32 %v9948_v30, %v3656_v32  ;;  %15243 = vst [vmem:[#allocation58_spill] sm:$0xff] %v10425_v50  ;;  %15250 = vst [vmem:[#allocation49_spill] sm:$0xff] %v10447_v19 }
 0x2ae   :  { %15223 = vst [vmem:[#allocation85_spill] sm:$0xff] %v10355_v12  ;;  %vm10368_vm5 = vmand %vm15226_vm0, %vm15225_vm14  ;;  %v10384_v59 = vadd.s32 2, %v15207_v11  ;;  %v10389_v9 = vsel %vm10291_vm11, 1.0, %v15224_v51  ;;  %vm15233_vm10 = vcmp.le.s32.totalorder %v10296_v54, 6  ;;  %vm15234_vm6 = vnez %v15165_v37 }
 0x2af   :  { %v15228_v63 = vsel %vm10368_vm5, 4294967295, %v15227_v63  ;;  %vm10395_vm14 = vmand %vm15234_vm6, %vm15233_vm10  ;;  %v10402_v32 = vsel %vm10305_vm3, 1.0, %v15224_v51  ;;  %v3822_v15 = vrot.slane %v3806_v47, 1  ;;  %vm879_vm15 = vcmp.ge.s32.totalorder %v847_v57, 0  ;;  %v5880_v13 = vpop.f32.mrb[8].mxu0 }
 0x2b0   :  { %15232 = vst [vmem:[#allocation22_spill] sm:$0xff] %v10384_v59  ;;  %15237 = vst [vmem:[#allocation33_spill] sm:$0xff] %v10402_v32  ;;  %vm895_vm11 = vcmp.le.s32.totalorder %v847_v57, 6  ;;  %vm15240_vm3 = vcmp.le.s32.totalorder %v15178_v55, 6  ;;  %vm15244_vm10 = vcmp.le.s32.totalorder %v15169_v26, 6  ;;  %v10438_v11 = vsel %vm10337_vm12, 1.0, %v15224_v51 }
 0x2b1   :  { %vm10420_vm0 = vmand %vm10368_vm5, %vm15240_vm3  ;;  %15247 = vst [vmem:[#allocation41_spill] sm:$0xff] %v10438_v11  ;;  %vm15248_vm3 = vcmp.lt.s32.totalorder %v6383_v3, 7  ;;  %v15249_v20 = vmax.f32 %v10373_v31, 0.0  ;;  %v10459_v11 = vadd.s32 4294967294, %v15178_v55  ;;  %vm15258_vm12 = vcmp.lt.s32.totalorder %v6383_v3, 7  ;;  %v15483_v57 = vld [vmem:[#allocation150_spill] sm:$0xff] }
 0x2b2   :  { %vm10431_vm9 = vmand %vm10376_vm8, %vm15244_vm10  ;;  %v3849_v1 = vsel %vm15248_vm3, %v3821_v38, %v3822_v15  ;;  %vm15251_vm10 = vcmp.le.s32.totalorder %v10227_v44, 6  ;;  %v5881_v38 = vpop.f32.mrb[9].mxu0  ;;  %vm15255_vm3 = vnez %v15083_v27  ;;  %vm15259_vm4 = vnez %v15088_v52 }
 0x2b3   :  { %v10444_v16 = vrot.slane %v15249_v20, 1  ;;  %vm10453_vm7 = vmand %vm10368_vm5, %vm15251_vm10  ;;  %v3853_v36 = vmax.f32 %v3805_v62, %v3849_v1  ;;  %15254 = vst [vmem:[#allocation76_spill] sm:$0xff] %v10459_v11  ;;  %v10464_v20 = vsel %vm15255_vm3, 1.0, %v15224_v51  ;;  %vm14166_vm10 = vcmp.le.s32.totalorder %v15137_v33, 6  ;;  %v5883_v48 = vpop.f32.mrb[10].mxu0 }
 0x2b4   :  { %vm10468_vm2 = vmand %vm879_vm15, %vm895_vm11  ;;  %v5882_v62 = vadd.f32 %v5881_v38, %v5880_v13  ;;  %v10479_v27 = vsel %vm15259_vm4, 1.0, %v15224_v51  ;;  %vm15260_vm3 = vcmp.le.s32.totalorder %v848_v28, 6  ;;  %vm15261_vm5 = vcmp.ge.s32.totalorder %v848_v28, 0  ;;  %v5884_v32 = vpop.f32.mrb[11].mxu0 }
 0x2b5   :  { %v3848_v1 = vsel %vm15258_vm12, %v3822_v15, %v10444_v16  ;;  %vm10483_vm6 = vmand %vm15261_vm5, %vm15260_vm3  ;;  %vm14168_vm15 = vcmp.le.s32.totalorder %v15180_v42, 6  ;;  %v10491_v15 = vmax.f32 %v10355_v12, %v3853_v36  ;;  %v10496_v52 = vsel %vm10350_vm1, 1.0, %v15224_v51 }
 0x2b6   :  { %v10488_v53 = vmax.f32 %v3806_v47, %v3848_v1  ;;  %vm14174_vm4 = vcmp.ge.s32.totalorder %v10425_v50, 0  ;;  %vm15265_vm5 = vcmp.le.s32.totalorder %v10384_v59, 6  ;;  %v3661_v47 = vadd.f32 %v5882_v62, %v10208_v40  ;;  %vm10513_vm1 = vmand %vm10468_vm2, %vm14166_vm10 }
 0x2b7   :  { %15264 = vst [vmem:[#allocation71_spill] sm:$0xff] %v10491_v15  ;;  %vm10503_vm11 = vmand %vm10267_vm13, %vm15265_vm5  ;;  %v5885_v28 = vadd.f32 %v5884_v32, %v5883_v48  ;;  %vm14173_vm12 = vcmp.ge.s32.totalorder %v10447_v19, 0  ;;  %v10520_v38 = vsel %vm10395_vm14, 1.0, %v15224_v51  ;;  %v10527_v48 = vmul.f32 %v10491_v15, %v1051_v49 }
 0x2b8   :  { %v10524_v1 = vmax.f32 %v3853_v36, %v10488_v53  ;;  %vm15271_vm5 = vnez %v15094_v41  ;;  %vm10538_vm10 = vmand %vm10483_vm6, %vm14168_vm15  ;;  %v10545_v36 = vsel %vm10420_vm0, 1.0, %v15224_v51  ;;  %v3758_v49 = vadd.f32 %v10117_v34, %v3661_v47 }
 0x2b9   :  { %15270 = vst [vmem:[#allocation95_spill] sm:$0xff] %v10527_v48  ;;  %v10532_v32 = vsel %vm15271_vm5, 1.0, %v15224_v51  ;;  %v3664_v62 = vadd.f32 %v5885_v28, %v10208_v40  ;;  %vm15274_vm5 = vnez %v15107_v43  ;;  %v10561_v56 = vsel %vm10431_vm9, 1.0, %v15224_v51 }
 0x2ba   :  { %vm10554_vm3 = vmand %vm15274_vm5, %vm14174_vm4  ;;  %vm15277_vm0 = vnez %v15102_v61  ;;  %v10572_v12 = vmul.f32 %v10524_v1, %v10363_v45  ;;  %vm15279_vm15 = vnez %v15129_v0  ;;  %v10585_v61 = vsel %vm10453_vm7, 1.0, %v15224_v51 }
 0x2bb   :  { %v10566_v34 = vsel %vm15277_vm0, 1.0, %v15224_v51  ;;  %vm10578_vm14 = vmand %vm15279_vm15, %vm14173_vm12  ;;  %15282 = vst [vmem:[#allocation103_spill] sm:$0xff] %v10585_v61  ;;  %v3808_v47 = vmax.f32 %v3758_v49, 0.0  ;;  %v10588_v28 = vadd.f32 %v10121_v10, %v3664_v62  ;;  %v10593_v45 = vsel %vm10513_vm1, 1.0, %v15224_v51 }
 0x2bc   :  { %15278 = vst [vmem:[#allocation81_spill] sm:$0xff] %v10572_v12  ;;  %v10596_v59 = vadd.s32 4294967294, %v15137_v33  ;;  %vm15284_vm9 = vcmp.le.s32.totalorder %v10296_v54, 6  ;;  %v15287_v49 = vrot.slane %v10524_v1, 6  ;;  %v15288_v10 = vrot.slane %v10491_v15, 6 }
 0x2bd   :  { %vm10602_vm0 = vmand %vm10376_vm8, %vm15284_vm9  ;;  %vm15289_vm7 = vcmp.lt.s32.totalorder %v6383_v3, 2  ;;  %v10619_v54 = vsel %vm10538_vm10, 1.0, %v15224_v51  ;;  %v10622_v33 = vadd.s32 4294967294, %v15180_v42  ;;  %vm15292_vm1 = vcmp.le.s32.totalorder %v10031_v46, 6 }
 0x2be   :  { %15283 = vst [vmem:[#allocation77_spill] sm:$0xff] %v10596_v59  ;;  %v10612_v25 = vsel %vm15289_vm7, %v15288_v10, %v15287_v49  ;;  %vm15293_vm9 = vnez %v15109_v5  ;;  %v3824_v49 = vrot.slane %v3808_v47, 1  ;;  %v10641_v30 = vsel %vm10503_vm11, 1.0, %v15224_v51  ;;  %vm15297_vm7 = vmmov %vm15292_vm1 }
 0x2bf   :  { %15290 = vst [vmem:[#allocation99_spill] sm:$0xff] %v10612_v25  ;;  %15291 = vst [vmem:[#allocation83_spill] sm:$0xff] %v10622_v33  ;;  %v10635_v62 = vmul.f32 %v10612_v25, %v10389_v9  ;;  %v10654_v9 = vsel %vm10554_vm3, 1.0, %v15224_v51  ;;  %v10659_v10 = vsel %vm10578_vm14, 1.0, %v15224_v51  ;;  %v4016_v13 = vrot.slane %v10524_v1, 2  ;;  %v15337_v25 = vld [vmem:[#allocation109_spill] sm:$0xff] }
 0x2c0   :  { %vm10628_vm12 = vmand %vm15293_vm9, %vm15292_vm1  ;;  %vm15298_vm1 = vnez %v15172_v14  ;;  %vm15301_vm11 = vnez %v15104_v58  ;;  %vm15303_vm10 = vnez %v15072_v17  ;;  %vm15306_vm3 = vcmp.lt.s32.totalorder %v6383_v3, 7 }
 0x2c1   :  { %15296 = vst [vmem:[#allocation84_spill] sm:$0xff] %v10635_v62  ;;  %vm10647_vm4 = vmand %vm15298_vm1, %vm15297_vm7  ;;  %v10665_v46 = vsel %vm15301_vm11, 1.0, %v15224_v51  ;;  %vm15302_vm7 = vcmp.le.s32.totalorder %v10050_v8, 6  ;;  %v3847_v22 = vsel %vm15306_vm3, %v10444_v16, %v3824_v49  ;;  %v15307_v12 = vmax.f32 %v10588_v28, 0.0 }
 0x2c2   :  { %vm10671_vm1 = vmand %vm15303_vm10, %vm15302_vm7  ;;  %v10686_v58 = vsel %vm10602_vm0, 1.0, %v15224_v51  ;;  %vm15308_vm10 = vnez %v15114_v18  ;;  %vm15309_vm11 = vcmp.ge.s32.totalorder %v10425_v50, 0  ;;  %vm15310_vm7 = vnez %v15079_v23  ;;  %v15336_v50 = vld [vmem:[#allocation86_spill] sm:$0xff] }
 0x2c3   :  { %v10680_v62 = vrot.slane %v15307_v12, 1  ;;  %v10691_v17 = vsel %vm15308_vm10, 1.0, %v15224_v51  ;;  %vm10697_vm3 = vmand %vm15310_vm7, %vm15309_vm11  ;;  %v15313_v12 = vmax.f32 %v10373_v31, 0.0  ;;  %vm15314_vm0 = vnez %v15117_v39  ;;  %v5886_v39 = vpop.f32.mrb[12].mxu0 }
 0x2c4   :  { %v10708_v18 = vsel %vm15314_vm0, 1.0, %v15224_v51  ;;  %vm15315_vm10 = vnez %v15119_v4  ;;  %vm15316_vm11 = vcmp.ge.s32.totalorder %v10447_v19, 0  ;;  %vm15317_vm9 = vnez %v15085_v60 }
 0x2c5   :  { %v3855_v14 = vmax.f32 %v15313_v12, %v3847_v22  ;;  %v10713_v42 = vsel %vm15315_vm10, 1.0, %v15224_v51  ;;  %vm10719_vm15 = vmand %vm15317_vm9, %vm15316_vm11  ;;  %vm15320_vm14 = vcmp.lt.s32.totalorder %v6383_v3, 7  ;;  %v10729_v12 = vsel %vm10628_vm12, 1.0, %v15224_v51 }
 0x2c6   :  { %v3846_v22 = vsel %vm15320_vm14, %v3824_v49, %v10680_v62  ;;  %15321 = vst [vmem:[#allocation107_spill] sm:$0xff] %v10729_v12  ;;  %vm15322_vm0 = vnez %v15122_v7  ;;  %v10739_v6 = vsel %vm10647_vm4, 1.0, %v15224_v51  ;;  %vm15325_vm10 = vcmp.le.s32.totalorder %v10071_v35, 6  ;;  %v5887_v7 = vpop.f32.mrb[13].mxu0 }
 0x2c7   :  { %v10734_v4 = vsel %vm15322_vm0, 1.0, %v15224_v51  ;;  %15324 = vst [vmem:[#allocation89_spill] sm:$0xff] %v10739_v6  ;;  %vm10745_vm14 = vmand %vm15310_vm7, %vm15325_vm10  ;;  %v10750_v61 = vmax.f32 %v10488_v53, %v3855_v14  ;;  %v10752_v12 = vmax.f32 %v3808_v47, %v3846_v22  ;;  %v15329_v19 = vrot.slane %v10491_v15, 2  ;;  %v5889_v22 = vpop.f32.mrb[14].mxu0  ;;  %v15403_v53 = vld [vmem:[#allocation39_spill] sm:$0xff] }
 0x2c8   :  { %15323 = vst [vmem:[#allocation55_spill] sm:$0xff] %v10734_v4  ;;  %vm15330_vm12 = vcmp.lt.s32.totalorder %v6383_v3, 6  ;;  %v10763_v23 = vsel %vm10671_vm1, 1.0, %v15224_v51  ;;  %vm15332_vm4 = vcmp.le.s32.totalorder %v15178_v55, 6  ;;  %vm15333_vm7 = vnez %v15176_v21  ;;  %v15368_v4 = vld [vmem:[#allocation34_spill] sm:$0xff] }
 0x2c9   :  { %15328 = vst [vmem:[#allocation92_spill] sm:$0xff] %v10750_v61  ;;  %v10758_v48 = vsel %vm15330_vm12, %v15329_v19, %v4016_v13  ;;  %15331 = vst [vmem:[#allocation115_spill] sm:$0xff] %v10763_v23  ;;  %v5888_v47 = vadd.f32 %v5887_v7, %v5886_v39  ;;  %v849_v6 = vadd.s32 4294967294, %v15336_v50  ;;  %v10775_v19 = vadd.s32 4294967294, %v15337_v25  ;;  %v5890_v7 = vpop.f32.mrb[15].mxu0  ;;  %v15348_v50 = vld [vmem:[#allocation33_spill] sm:$0xff] }
 0x2ca   :  { %vm10769_vm11 = vmand %vm15333_vm7, %vm15332_vm4  ;;  %v10780_v41 = vsel %vm10697_vm3, 1.0, %v15224_v51  ;;  %vm15339_vm1 = vcmp.le.s32.totalorder %v15169_v26, 6  ;;  %vm15340_vm0 = vnez %v15165_v37  ;;  %v10791_v39 = vmax.f32 %v3855_v14, %v10752_v12  ;;  %v15351_v23 = vld [vmem:[#allocation28_spill] sm:$0xff] }
 0x2cb   :  { %15338 = vst [vmem:[#allocation61_spill] sm:$0xff] %v10780_v41  ;;  %vm10786_vm10 = vmand %vm15340_vm0, %vm15339_vm1  ;;  %v3886_v55 = vrot.slane %v10750_v61, 6  ;;  %v10796_v25 = vmul.f32 %v10750_v61, %v10464_v20  ;;  %v4017_v16 = vrot.slane %v10750_v61, 2  ;;  %vm15344_vm3 = vcmp.ge.s32.totalorder %v10459_v11, 0  ;;  %v15417_v11 = vld [vmem:[#allocation90_spill] sm:$0xff] }
 0x2cc   :  { %vm15345_vm12 = vnez %v15228_v63  ;;  %v3669_v14 = vadd.f32 %v5888_v47, %v10208_v40  ;;  %v5891_v26 = vadd.f32 %v5890_v7, %v5889_v22  ;;  %v10810_v41 = vmul.f32 %v10758_v48, %v15348_v50  ;;  %v15361_v7 = vld [vmem:[#allocation15_spill] sm:$0xff] }
 0x2cd   :  { %15343 = vst [vmem:[#allocation79_spill] sm:$0xff] %v10796_v25  ;;  %vm10803_vm4 = vmand %vm15345_vm12, %vm15344_vm3  ;;  %v10814_v20 = vmul.f32 %v10750_v61, %v10545_v36  ;;  %vm15352_vm1 = vcmp.ge.s32.totalorder %v15351_v23, 0  ;;  %v15355_v47 = vrot.slane %v10524_v1, 6  ;;  %vm15356_vm3 = vcmp.lt.s32.totalorder %v6383_v3, 2  ;;  %v15365_v23 = vld [vmem:[#allocation125_spill] sm:$0xff] }
 0x2ce   :  { %15349 = vst [vmem:[#allocation101_spill] sm:$0xff] %v10810_v41  ;;  %vm10820_vm0 = vmand %vm10376_vm8, %vm15352_vm1  ;;  %v10833_v36 = vmul.f32 %v10791_v39, %v10479_v27  ;;  %vm15358_vm12 = vcmp.lt.s32.totalorder %v6383_v3, 6  ;;  %vm15360_vm8 = vcmp.le.s32.totalorder %v15359_v24, 6  ;;  %vm15362_vm1 = vnez %v15361_v7  ;;  %v15370_v24 = vld [vmem:[#allocation74_spill] sm:$0xff] }
 0x2cf   :  { %15350 = vst [vmem:[#allocation96_spill] sm:$0xff] %v10814_v20  ;;  %v10829_v50 = vsel %vm15356_vm3, %v15355_v47, %v3886_v55  ;;  %v10837_v22 = vsel %vm15358_vm12, %v4016_v13, %v4017_v16  ;;  %vm10843_vm7 = vmand %vm15362_vm1, %vm15360_vm8  ;;  %v3766_v61 = vadd.f32 %v15365_v23, %v3669_v14  ;;  %v3672_v47 = vadd.f32 %v5891_v26, %v10208_v40  ;;  %v15396_v20 = vld [vmem:[#allocation166_spill] sm:$0xff]  ;;  %v15501_v40 = vld [vmem:[#allocation99_spill] sm:$0xff] }
 0x2d0   :  { %15357 = vst [vmem:[#allocation82_spill] sm:$0xff] %v10833_v36  ;;  %v10851_v27 = vmul.f32 %v10829_v50, %v10496_v52  ;;  %v10855_v13 = vmul.f32 %v10837_v22, %v10520_v38  ;;  %vm15369_vm3 = vcmp.le.s32.totalorder %v15368_v4, 6  ;;  %vm15371_vm12 = vnez %v15370_v24  ;;  %v15383_v4 = vld [vmem:[#allocation160_spill] sm:$0xff] }
 0x2d1   :  { %vm10861_vm8 = vmand %vm15371_vm12, %vm15369_vm3  ;;  %v15372_v7 = vmov 0  ;;  %v15374_v23 = vrot.slane %v10791_v39, 6  ;;  %vm15375_vm1 = vcmp.lt.s32.totalorder %v6383_v3, 2  ;;  %v10875_v38 = vmul.f32 %v10791_v39, %v10561_v56 }
 0x2d2   :  { %15366 = vst [vmem:[#allocation105_spill] sm:$0xff] %v10851_v27  ;;  %15367 = vst [vmem:[#allocation120_spill] sm:$0xff] %v10855_v13  ;;  %v15373_v7 = vsel %vm10861_vm8, 4294967295, %v15372_v7  ;;  %vm15377_vm3 = vcmp.ge.s32.totalorder %v10381_v29, 0  ;;  %v3810_v24 = vmax.f32 %v3766_v61, 0.0  ;;  %v10919_v60 = vsel %vm10745_vm14, 1.0, %v15224_v51 }
 0x2d3   :  { %v10869_v26 = vsel %vm15375_vm1, %v3886_v55, %v15374_v23  ;;  %15376 = vst [vmem:[#allocation102_spill] sm:$0xff] %v10875_v38  ;;  %vm10882_vm12 = vmand %vm10267_vm13, %vm15377_vm3  ;;  %v15380_v55 = vld [vmem:[#allocation159_spill] sm:$0xff]  ;;  %vm15384_vm1 = vcmp.le.s32.totalorder %v15383_v4, 6  ;;  %vm15388_vm13 = vcmp.lt.s32.totalorder %v6383_v3, 6  ;;  %v15390_v61 = vmov 0 }
 0x2d4   :  { %v10887_v23 = vadd.f32 %v15380_v55, %v3672_v47  ;;  %v10891_v52 = vmul.f32 %v10869_v26, %v10532_v32  ;;  %vm10899_vm8 = vmand %vm15317_vm9, %vm15384_vm1  ;;  %v15387_v47 = vrot.slane %v10791_v39, 2  ;;  %v10914_v55 = vsel %vm10719_vm15, 1.0, %v15224_v51  ;;  %v15439_v27 = vld [vmem:[#allocation103_spill] sm:$0xff] }
 0x2d5   :  { %vm15389_vm9 = vcmp.ge.s32.totalorder %v10596_v59, 0  ;;  %vm15393_vm15 = vcmp.ge.s32.totalorder %v10622_v33, 0  ;;  %v15407_v13 = vmax.f32 %v10588_v28, 0.0  ;;  %v10994_v43 = vsel %vm10843_vm7, 1.0, %v15224_v51 }
 0x2d6   :  { %15381 = vst [vmem:[#allocation130_spill] sm:$0xff] %v10887_v23  ;;  %15382 = vst [vmem:[#allocation111_spill] sm:$0xff] %v10891_v52  ;;  %v10909_v32 = vsel %vm15388_vm13, %v4017_v16, %v15387_v47  ;;  %v3826_v16 = vrot.slane %v3810_v24, 1  ;;  %vm897_vm13 = vcmp.le.s32.totalorder %v849_v6, 6  ;;  %v10960_v47 = vsel %vm10786_vm10, 1.0, %v15224_v51 }
 0x2d7   :  { %vm10925_vm3 = vmand %vm10468_vm2, %vm15389_vm9  ;;  %v10934_v56 = vmul.f32 %v10909_v32, %v10566_v34  ;;  %vm15397_vm9 = vcmp.le.s32.totalorder %v15396_v20, 6  ;;  %v10955_v34 = vsel %vm10769_vm11, 1.0, %v15224_v51  ;;  %v15401_v44 = vmax.f32 %v10887_v23, 0.0 }
 0x2d8   :  { %v15391_v61 = vsel %vm10925_vm3, 4294967295, %v15390_v61  ;;  %vm10940_vm14 = vmand %vm10483_vm6, %vm15393_vm15  ;;  %vm15400_vm15 = vcmp.lt.s32.totalorder %v6383_v3, 7  ;;  %vm15404_vm11 = vcmp.le.s32.totalorder %v15403_v53, 6  ;;  %v15408_v53 = vld [vmem:[#allocation65_spill] sm:$0xff]  ;;  %vm15410_vm10 = vnez %v15129_v0 }
 0x2d9   :  { %15392 = vst [vmem:[#allocation106_spill] sm:$0xff] %v10934_v56  ;;  %vm10948_vm3 = vmand %vm10468_vm2, %vm15397_vm9  ;;  %v3845_v38 = vsel %vm15400_vm15, %v10680_v62, %v3826_v16  ;;  %v10967_v41 = vrot.slane %v15401_v44, 1  ;;  %vm898_vm9 = vcmp.le.s32.totalorder %v10775_v19, 6  ;;  %v10984_v62 = vsel %vm10803_vm4, 1.0, %v15224_v51  ;;  %v15492_v56 = vld [vmem:[#allocation132_spill] sm:$0xff] }
 0x2da   :  { %vm10975_vm1 = vmand %vm15274_vm5, %vm15404_vm11  ;;  %v3857_v25 = vmax.f32 %v15407_v13, %v3845_v38  ;;  %v10989_v44 = vsel %vm10820_vm0, 1.0, %v15224_v51  ;;  %vm15409_vm5 = vcmp.le.s32.totalorder %v15408_v53, 6  ;;  %vm15413_vm4 = vcmp.lt.s32.totalorder %v6383_v3, 7  ;;  %v15424_v53 = vld [vmem:[#allocation113_spill] sm:$0xff] }
 0x2db   :  { %15402 = vst [vmem:[#allocation88_spill] sm:$0xff] %v10967_v41  ;;  %vm11000_vm15 = vmand %vm15410_vm10, %vm15409_vm5  ;;  %v3844_v37 = vsel %vm15413_vm4, %v3826_v16, %v10967_v41  ;;  %vm15414_vm0 = vcmp.ge.s32.totalorder %v849_v6, 0  ;;  %vm14207_vm7 = vcmp.le.s32.totalorder %v15417_v11, 6  ;;  %vm15418_vm2 = vnez %v15373_v7 }
 0x2dc   :  { %vm11009_vm11 = vmand %vm15414_vm0, %vm897_vm13  ;;  %v11017_v0 = vsel %vm15418_vm2, 1.0, %v15224_v51  ;;  %v11022_v13 = vsel %vm10882_vm12, 1.0, %v15224_v51  ;;  %v11025_v38 = vmax.f32 %v10752_v12, %v3857_v25  ;;  %v11027_v6 = vmax.f32 %v3810_v24, %v3844_v37 }
 0x2dd   :  { %vm15420_vm13 = vcmp.ge.s32.totalorder %v10775_v19, 0  ;;  %v15421_v16 = vmov 0  ;;  %vm14200_vm10 = vcmp.le.s32.totalorder %v15424_v53, 6  ;;  %v11039_v7 = vsel %vm10899_vm8, 1.0, %v15224_v51 }
 0x2de   :  { %15419 = vst [vmem:[#allocation138_spill] sm:$0xff] %v11027_v6  ;;  %vm11031_vm5 = vmand %vm15420_vm13, %vm898_vm9  ;;  %v11042_v14 = vadd.s32 4294967294, %v15417_v11  ;;  %vm15426_vm12 = vnez %v15391_v61  ;;  %v11052_v19 = vsel %vm10940_vm14, 1.0, %v15224_v51  ;;  %v11057_v24 = vsel %vm10948_vm3, 1.0, %v15224_v51 }
 0x2df   :  { %v15422_v16 = vsel %vm11031_vm5, 4294967295, %v15421_v16  ;;  %v11047_v12 = vsel %vm15426_vm12, 1.0, %v15224_v51  ;;  %15427 = vst [vmem:[#allocation127_spill] sm:$0xff] %v11057_v24  ;;  %vm15429_vm8 = vcmp.ge.s32.totalorder %v15428_v2, 0  ;;  %vm15430_vm9 = vnez %v15109_v5  ;;  %vm11079_vm3 = vmand %vm11009_vm11, %vm14207_vm7 }
 0x2e0   :  { %15423 = vst [vmem:[#allocation100_spill] sm:$0xff] %v15422_v16  ;;  %15425 = vst [vmem:[#allocation94_spill] sm:$0xff] %v11042_v14  ;;  %v11068_v61 = vmax.f32 %v3857_v25, %v11027_v6  ;;  %v3888_v49 = vrot.slane %v11025_v38, 6  ;;  %v11073_v36 = vmul.f32 %v11025_v38, %v10593_v45  ;;  %v4019_v5 = vrot.slane %v11025_v38, 2  ;;  %v15513_v16 = vld [vmem:[#allocation66_spill] sm:$0xff] }
 0x2e1   :  { %vm11063_vm4 = vmand %vm15430_vm9, %vm15429_vm8  ;;  %v11093_v45 = vadd.s32 4294967294, %v15424_v53  ;;  %v4336_v52 = vmul.f32 %v10909_v32, %v15439_v27  ;;  %v11099_v2 = vmul.f32 %v11025_v38, %v10691_v17  ;;  %v11104_v29 = vsel %vm10975_vm1, 1.0, %v15224_v51  ;;  %v15445_v17 = vld [vmem:[#allocation183_spill] sm:$0xff] }
 0x2e2   :  { %15433 = vst [vmem:[#allocation118_spill] sm:$0xff] %v11073_v36  ;;  %vm11088_vm14 = vmand %vm11031_vm5, %vm14200_vm10  ;;  %v15441_v4 = vrot.slane %v10791_v39, 6  ;;  %vm15442_vm0 = vcmp.lt.s32.totalorder %v6383_v3, 2  ;;  %v11115_v27 = vmul.f32 %v11068_v61, %v10619_v54  ;;  %vm15444_vm13 = vcmp.ge.s32.totalorder %v10596_v59, 0  ;;  %v15453_v54 = vld [vmem:[#allocation42_spill] sm:$0xff]  ;;  %v15486_v59 = vld [vmem:[#allocation128_spill] sm:$0xff] }
 0x2e3   :  { %15438 = vst [vmem:[#allocation114_spill] sm:$0xff] %v11093_v45  ;;  %15440 = vst [vmem:[#allocation147_spill] sm:$0xff] %v11099_v2  ;;  %vm15446_vm12 = vnez %v15445_v17  ;;  %v15449_v20 = vrot.slane %v10791_v39, 2  ;;  %vm15450_vm1 = vcmp.lt.s32.totalorder %v6383_v3, 6  ;;  %vm15452_vm9 = vcmp.ge.s32.totalorder %v10622_v33, 0  ;;  %v15490_v2 = vld [vmem:[#allocation93_spill] sm:$0xff] }
 0x2e4   :  { %v11111_v24 = vsel %vm15442_vm0, %v15441_v4, %v3888_v49  ;;  %15443 = vst [vmem:[#allocation98_spill] sm:$0xff] %v11115_v27  ;;  %vm11121_vm8 = vmand %vm15446_vm12, %vm15444_vm13  ;;  %vm15454_vm0 = vnez %v15453_v54  ;;  %vm15460_vm13 = vcmp.lt.s32.totalorder %v6383_v3, 2  ;;  %v11208_v31 = vsel %vm11063_vm4, 1.0, %v15224_v51 }
 0x2e5   :  { %v4043_v6 = vsel %vm15450_vm1, %v15449_v20, %v4019_v5  ;;  %v11131_v4 = vmul.f32 %v11111_v24, %v10654_v9  ;;  %vm11137_vm10 = vmand %vm15454_vm0, %vm15452_vm9  ;;  %v11147_v20 = vmul.f32 %v11068_v61, %v10708_v18  ;;  %v15459_v9 = vrot.slane %v11068_v61, 6 }
 0x2e6   :  { %v11142_v23 = vmul.f32 %v4043_v6, %v10665_v46  ;;  %v4337_v41 = vmul.f32 %v4043_v6, %v10686_v58  ;;  %vm15461_vm9 = vcmp.le.s32.totalorder %v10050_v8, 6  ;;  %v15462_v46 = vld [vmem:[#allocation152_spill] sm:$0xff]  ;;  %v14210_v18 = vrot.slane %v11068_v61, 2  ;;  %v15494_v58 = vld [vmem:[#allocation19_spill] sm:$0xff] }
 0x2e7   :  { %15451 = vst [vmem:[#allocation124_spill] sm:$0xff] %v11131_v4  ;;  %15458 = vst [vmem:[#allocation104_spill] sm:$0xff] %v11147_v20  ;;  %v11153_v33 = vsel %vm15460_vm13, %v3888_v49, %v15459_v9  ;;  %vm15463_vm7 = vnez %v15462_v46  ;;  %vm15467_vm13 = vcmp.le.s32.totalorder %v10071_v35, 6  ;;  %v15468_v8 = vld [vmem:[#allocation184_spill] sm:$0xff]  ;;  %vm15472_vm0 = vcmp.lt.s32.totalorder %v6383_v3, 6  ;;  %v15473_v35 = vld [vmem:[#allocation47_spill] sm:$0xff] }
 0x2e8   :  { %15457 = vst [vmem:[#allocation119_spill] sm:$0xff] %v11142_v23  ;;  %vm11162_vm2 = vmand %vm15463_vm7, %vm15461_vm9  ;;  %v11169_v53 = vmul.f32 %v11153_v33, %v10659_v10  ;;  %v4352_v9 = vpack.c.bf16 %v4337_v41, %v4336_v52  ;;  %vm15469_vm9 = vnez %v15468_v8  ;;  %v11186_v10 = vsel %vm11079_vm3, 1.0, %v15224_v51  ;;  %v15552_v8 = vld [vmem:[#allocation173_spill] sm:$0xff] }
 0x2e9   :  { %vm11179_vm1 = vmand %vm15469_vm9, %vm15467_vm13  ;;  %v11192_v41 = vsel %vm15472_vm0, %v4019_v5, %v14210_v18  ;;  %v11195_v52 = vadd.s32 2, %v15417_v11  ;;  %vm15474_vm12 = vcmp.ge.s32.totalorder %v15473_v35, 0  ;;  %v11215_v49 = vsel %vm11088_vm14, 1.0, %v15224_v51  ;;  %v15479_v35 = vld [vmem:[#allocation57_spill] sm:$0xff]  ;;  %v15488_v18 = vld [vmem:[#allocation68_spill] sm:$0xff] }
 0x2ea   :  { %15466 = vst [vmem:[#allocation134_spill] sm:$0xff] %v11169_v53  ;;  %vm11201_vm13 = vmand %vm15463_vm7, %vm15474_vm12  ;;  %vm15477_vm3 = vcmask 523264   ;;  %v11220_v46 = vmul.f32 %v11192_v41, %v10713_v42  ;;  %vm15480_vm7 = vcmp.le.s32.totalorder %v15479_v35, 6  ;;  %v11233_v25 = vsel %vm11000_vm15, 1.0, %v15224_v51  ;;  %v15500_v11 = vld [vmem:[#allocation55_spill] sm:$0xff] }
 0x2eb   :  { %4360 = vst.msk [vmem:[#allocation3 + $0x20] sm:$0xff] %vm15477_vm3, %v4352_v9  ;;  %vm11226_vm4 = vmand %vm10483_vm6, %vm15480_vm7  ;;  %v11238_v9 = vsel %vm11121_vm8, 1.0, %v15224_v51  ;;  %v11243_v42 = vsel %vm11137_vm10, 1.0, %v15224_v51  ;;  %vm14223_vm6 = vcmp.ge.s32.totalorder %v11093_v45, 0  ;;  %vm15484_vm14 = vnez %v15483_v57 }
 0x2ec   :  { %15478 = vst [vmem:[#allocation158_spill] sm:$0xff] %v11220_v46  ;;  %v11249_v5 = vsel %vm15484_vm14, 1.0, %v15224_v51  ;;  %vm15485_vm15 = vcmp.ge.s32.totalorder %v11042_v14, 0  ;;  %v11258_v28 = vsel %vm11162_vm2, 1.0, %v15224_v51  ;;  %vm15487_vm10 = vnez %v15486_v59  ;;  %vm946_vm0 = vmand %vm11031_vm5, %vm14223_vm6 }
 0x2ed   :  { %vm945_vm12 = vmand %vm11009_vm11, %vm15485_vm15  ;;  %v11263_v21 = vsel %vm15487_vm10, 1.0, %v15224_v51  ;;  %v11267_v57 = vmul.f32 %v10491_v15, %v15488_v18  ;;  %v11271_v20 = vmul.f32 %v10524_v1, %v15490_v2  ;;  %vm15493_vm8 = vnez %v15492_v56  ;;  %v15498_v56 = vld [vmem:[#allocation41_spill] sm:$0xff] }
 0x2ee   :  { %v11276_v23 = vsel %vm15493_vm8, 1.0, %v15224_v51  ;;  %vm15495_vm2 = vnez %v15494_v58  ;;  %v11286_v59 = vsel %vm11179_vm1, 1.0, %v15224_v51  ;;  %v1436_v2 = vsel %vm11201_vm13, 1.0, %v15224_v51 }
 0x2ef   :  { %15489 = vst [vmem:[#allocation129_spill] sm:$0xff] %v11267_v57  ;;  %15491 = vst [vmem:[#allocation172_spill] sm:$0xff] %v11271_v20  ;;  %v11281_v27 = vsel %vm15495_vm2, 1.0, %v15224_v51  ;;  %v4350_v4 = vmul.f32 %v10758_v48, %v15498_v56  ;;  %v11298_v58 = vsel %vm11226_vm4, 1.0, %v15224_v51  ;;  %v11301_v53 = vsel %vm945_vm12, 1.0, %v15224_v51  ;;  %v15504_v57 = vld [vmem:[#allocation115_spill] sm:$0xff] }
 0x2f0   :  { %15496 = vst [vmem:[#allocation155_spill] sm:$0xff] %v11281_v27  ;;  %15497 = vst [vmem:[#allocation142_spill] sm:$0xff] %v11286_v59  ;;  %v4351_v36 = vmul.f32 %v10837_v22, %v10641_v30  ;;  %v11307_v35 = vmul.f32 %v15501_v40, %v15500_v11  ;;  %v15503_v59 = vld [vmem:[#allocation89_spill] sm:$0xff]  ;;  %v4051_v56 = vmul.f32 %v10837_v22, %v15504_v57  ;;  %v15507_v22 = vld [vmem:[#allocation140_spill] sm:$0xff]  ;;  %vm15510_vm13 = vnez %v15445_v17 }
 0x2f1   :  { %15499 = vst [vmem:[#allocation137_spill] sm:$0xff] %v11301_v53  ;;  %v4050_v18 = vmul.f32 %v10758_v48, %v15503_v59  ;;  %v15505_v20 = vld [vmem:[#allocation61_spill] sm:$0xff]  ;;  %v3922_v27 = vmul.f32 %v10869_v26, %v10914_v55  ;;  %v4052_v53 = vmul.f32 %v10909_v32, %v10919_v60  ;;  %v4053_v30 = vmul.f32 %v4043_v6, %v11039_v7  ;;  %v15506_v48 = vld [vmem:[#allocation108_spill] sm:$0xff] }
 0x2f2   :  { %15502 = vst [vmem:[#allocation117_spill] sm:$0xff] %v11307_v35  ;;  %v3921_v37 = vmul.f32 %v10829_v50, %v15505_v20  ;;  %v11325_v11 = vadd.s32 4294967294, %v15506_v48  ;;  %v11328_v57 = vadd.s32 4294967294, %v15507_v22  ;;  %v4359_v20 = vpack.c.bf16 %v4351_v36, %v4350_v4  ;;  %v15508_v6 = vld [vmem:[#allocation69_spill] sm:$0xff] }
 0x2f3   :  { %v4065_v59 = vpack.c.bf16 %v4051_v56, %v4050_v18  ;;  %v4066_v55 = vpack.c.bf16 %v4053_v30, %v4052_v53  ;;  %v3923_v32 = vmul.f32 %v11111_v24, %v11047_v12  ;;  %v3924_v60 = vmul.f32 %v11153_v33, %v11052_v19  ;;  %v15528_v30 = vld [vmem:[#allocation139_spill] sm:$0xff] }
 0x2f4   :  { %v3935_v35 = vpack.c.bf16 %v3922_v27, %v3921_v37  ;;  %vm15509_vm1 = vcmp.le.s32.totalorder %v15508_v6, 6  ;;  %v11343_v46 = vadd.s32 2, %v15513_v16  ;;  %vm15514_vm7 = vcmask 523264   ;;  %v15516_v27 = vld [vmem:[#allocation87_spill] sm:$0xff] }
 0x2f5   :  { %vm11338_vm3 = vmand %vm15510_vm13, %vm15509_vm1  ;;  %4367 = vst.msk [vmem:[#allocation3 + $0x138] sm:$0xff] %vm15514_vm7, %v4359_v20  ;;  %v11348_v53 = vsel %vm946_vm0, 1.0, %v15224_v51  ;;  %v4144_v12 = vmul.f32 %v10491_v15, %v10955_v34  ;;  %v4145_v19 = vmul.f32 %v10524_v1, %v10960_v47  ;;  %v11355_v17 = vadd.s32 2, %v15516_v27  ;;  %v15519_v34 = vld [vmem:[#allocation92_spill] sm:$0xff] }
 0x2f6   :  { %vm15515_vm4 = vmmov %vm15514_vm7  ;;  %v3936_v16 = vpack.c.bf16 %v3924_v60, %v3923_v32  ;;  %v4240_v4 = vmul.f32 %v10829_v50, %v10984_v62  ;;  %v4241_v18 = vmul.f32 %v10869_v26, %v10989_v44  ;;  %v4146_v56 = vmul.f32 %v15519_v34, %v10994_v43  ;;  %v5892_v62 = vpop.f32.mrb[16].mxu0  ;;  %v15521_v44 = vld [vmem:[#allocation112_spill] sm:$0xff] }
 0x2f7   :  { %4073 = vst.msk [vmem:[#allocation3 + $0x30] sm:$0xff] %vm15515_vm4, %v4065_v59  ;;  %vm15517_vm14 = vmmov %vm15515_vm4  ;;  %v4160_v36 = vpack.c.bf16 %v4145_v19, %v4144_v12  ;;  %v4147_v1 = vmul.f32 %v10791_v39, %v11017_v0  ;;  %v11370_v47 = vsel %vm11338_vm3, 1.0, %v15224_v51  ;;  %vm883_vm12 = vcmp.ge.s32.totalorder %v11325_v11, 0  ;;  %v15535_v59 = vld [vmem:[#allocation109_spill] sm:$0xff]  ;;  %v15536_v60 = vld [vmem:[#allocation144_spill] sm:$0xff] }
 0x2f8   :  { %3944 = vst.msk [vmem:[#allocation3 + $0x50] sm:$0xff] %vm15517_vm14, %v3935_v35  ;;  %vm15518_vm15 = vmmov %vm15515_vm4  ;;  %vm884_vm10 = vcmp.ge.s32.totalorder %v11328_v57, 0  ;;  %vm899_vm8 = vcmp.le.s32.totalorder %v11325_v11, 6  ;;  %vm900_vm2 = vcmp.le.s32.totalorder %v11328_v57, 6  ;;  %v4256_v50 = vpack.c.bf16 %v4241_v18, %v4240_v4  ;;  %v15538_v19 = vld [vmem:[#allocation163_spill] sm:$0xff]  ;;  %v15544_v18 = vld [vmem:[#allocation50_spill] sm:$0xff] }
 0x2f9   :  { %4074 = vst.msk [vmem:[#allocation3 + $0x58] sm:$0xff] %vm15518_vm15, %v4066_v55  ;;  %vm15520_vm0 = vmmov %vm15515_vm4  ;;  %v4242_v26 = vmul.f32 %v11111_v24, %v11208_v31  ;;  %v4243_v39 = vmul.f32 %v11153_v33, %v1436_v2  ;;  %v11381_v43 = vadd.s32 4294967294, %v15521_v44  ;;  %vm1375_vm13 = vcmp.le.s32.totalorder %v11343_v46, 6  ;;  %v15523_v24 = vld [vmem:[#allocation58_spill] sm:$0xff]  ;;  %v5893_v2 = vpop.f32.mrb[17].mxu0  ;;  %v15576_v15 = vld [vmem:[#allocation88_spill] sm:$0xff] }
 0x2fa   :  { %3945 = vst.msk [vmem:[#allocation3 + $0x78] sm:$0xff] %vm15520_vm0, %v3936_v16  ;;  %vm15522_vm3 = vmmov %vm15520_vm0  ;;  %v4161_v0 = vpack.c.bf16 %v4147_v1, %v4146_v56  ;;  %v4148_v35 = vmul.f32 %v11025_v38, %v11104_v29  ;;  %v4149_v37 = vmul.f32 %v11068_v61, %v11233_v25  ;;  %vm15524_vm7 = vcmp.ge.s32.totalorder %v15523_v24, 0  ;;  %v15527_v31 = vld [vmem:[#allocation86_spill] sm:$0xff]  ;;  %v15529_v38 = vld [vmem:[#allocation91_spill] sm:$0xff]  ;;  %v5895_v32 = vpop.f32.mrb[18].mxu0 }
 0x2fb   :  { %4168 = vst.msk [vmem:[#allocation3 + $0x10] sm:$0xff] %vm15522_vm3, %v4160_v36  ;;  %vm11394_vm4 = vmand %vm15469_vm9, %vm15524_vm7  ;;  %vm1169_vm14 = vcmp.le.s32.totalorder %v15527_v31, 6  ;;  %v11400_v20 = vadd.s32 4294967294, %v15528_v30  ;;  %vm1360_vm15 = vcmp.ge.s32.totalorder %v11355_v17, 0  ;;  %v4257_v29 = vpack.c.bf16 %v4243_v39, %v4242_v26  ;;  %v5896_v12 = vpop.f32.mrb[19].mxu0  ;;  %v15545_v56 = vld [vmem:[#allocation11_spill] sm:$0xff] }
 0x2fc   :  { %4264 = vst.msk [vmem:[#allocation3 + $0x18] sm:$0xff] %vm15520_vm0, %v4256_v50  ;;  %vm15530_vm3 = vcmp.le.s32.totalorder %v15529_v38, 6  ;;  %vm15531_vm6 = vnez %v15453_v54  ;;  %v11414_v25 = vmul.f32 %v15501_v40, %v11022_v13  ;;  %vm1170_vm9 = vcmp.le.s32.totalorder %v15535_v59, 6  ;;  %4169 = vst.msk [vmem:[#allocation3 + $0x38] sm:$0xff] %vm15520_vm0, %v4161_v0  ;;  %v15539_v13 = vld [vmem:[#allocation113_spill] sm:$0xff]  ;;  %v15547_v26 = vld [vmem:[#allocation16_spill] sm:$0xff] }
 0x2fd   :  { %vm11408_vm1 = vmand %vm15531_vm6, %vm15530_vm3  ;;  %v5894_v55 = vadd.f32 %v5893_v2, %v5892_v62  ;;  %v11418_v7 = vadd.s32 4294967294, %v15536_v60  ;;  %vm1376_vm7 = vcmp.le.s32.totalorder %v11355_v17, 6  ;;  %v4162_v54 = vpack.c.bf16 %v4149_v37, %v4148_v35  ;;  %v15548_v0 = vld [vmem:[#allocation13_spill] sm:$0xff]  ;;  %v15549_v35 = vld [vmem:[#allocation44_spill] sm:$0xff] }
 0x2fe   :  { %15534 = vst [vmem:[#allocation110_spill] sm:$0xff] %v11414_v25  ;;  %v11424_v27 = vadd.s32 4294967294, %v15538_v19  ;;  %v11427_v40 = vadd.s32 2, %v15539_v13  ;;  %v11430_v16 = vadd.s32 2, %v15521_v44  ;;  %vm15542_vm3 = vmmov %vm15520_vm0  ;;  %v11436_v4 = vsel %vm11394_vm4, 1.0, %v15224_v51  ;;  %v15550_v2 = vld [vmem:[#allocation143_spill] sm:$0xff] }
 0x2ff   :  { %15537 = vst [vmem:[#allocation148_spill] sm:$0xff] %v11418_v7  ;;  %4265 = vst.msk [vmem:[#allocation3 + $0x40] sm:$0xff] %vm15542_vm3, %v4257_v29  ;;  %v3677_v36 = vadd.f32 %v5894_v55, %v15544_v18  ;;  %v5897_v34 = vadd.f32 %v5896_v12, %v5895_v32  ;;  %v11440_v1 = vadd.s32 4294967294, %v15545_v56  ;;  %v11446_v50 = vsel %vm11408_vm1, 1.0, %v15224_v51 }
 0x300   :  { %15540 = vst [vmem:[#allocation170_spill] sm:$0xff] %v11427_v40  ;;  %15541 = vst [vmem:[#allocation126_spill] sm:$0xff] %v11430_v16  ;;  %v11449_v39 = vadd.s32 4294967294, %v15547_v26  ;;  %v11454_v62 = vadd.s32 2, %v15527_v31  ;;  %v11461_v33 = vadd.s32 2, %v15535_v59  ;;  %v11466_v29 = vadd.s32 4294967294, %v15550_v2 }
 0x301   :  { %15543 = vst [vmem:[#allocation123_spill] sm:$0xff] %v11436_v4  ;;  %4170 = vst.msk [vmem:[#allocation3 + $0x60] sm:$0xff] %vm15520_vm0, %v4162_v54  ;;  %v3774_v37 = vadd.f32 %v15549_v35, %v3677_v36  ;;  %v3680_v24 = vadd.f32 %v5897_v34, %v15544_v18  ;;  %v11469_v55 = vadd.s32 4294967294, %v15552_v8  ;;  %v15554_v54 = vld [vmem:[#allocation51_spill] sm:$0xff]  ;;  %v15556_v18 = vld [vmem:[#allocation156_spill] sm:$0xff]  ;;  %v11482_v34 = vadd.s32 4294967294, %v15548_v0 }
 0x302   :  { %15546 = vst [vmem:[#allocation165_spill] sm:$0xff] %v11446_v50  ;;  %15551 = vst [vmem:[#allocation146_spill] sm:$0xff] %v11466_v29  ;;  %v11476_v36 = vadd.s32 4294967294, %v15556_v18  ;;  %v15557_v35 = vmov 0  ;;  %v11506_v11 = vadd.s32 2, %v15506_v48  ;;  %v15565_v57 = vmov 0 }
 0x303   :  { %15553 = vst [vmem:[#allocation135_spill] sm:$0xff] %v11469_v55  ;;  %v3812_v32 = vmax.f32 %v3774_v37, 0.0  ;;  %v11472_v12 = vadd.f32 %v15554_v54, %v3680_v24  ;;  %vm11490_vm6 = vmand %vm883_vm12, %vm899_vm8  ;;  %v15559_v37 = vmov 0  ;;  %v15562_v24 = vld [vmem:[#allocation153_spill] sm:$0xff]  ;;  %v15568_v26 = vmov 0  ;;  %v15582_v50 = vld [vmem:[#allocation8_spill] sm:$0xff] }
 0x304   :  { %v15558_v35 = vsel %vm11490_vm6, 4294967295, %v15557_v35  ;;  %vm11498_vm0 = vmand %vm884_vm10, %vm900_vm2  ;;  %v11510_v54 = vadd.s32 4294967294, %v15562_v24  ;;  %vm15564_vm10 = vcmp.ge.s32.totalorder %v11343_v46, 0  ;;  %v11530_v25 = vadd.s32 2, %v15507_v22 }
 0x305   :  { %15555 = vst [vmem:[#allocation157_spill] sm:$0xff] %v11472_v12  ;;  %v3828_v56 = vrot.slane %v3812_v32, 1  ;;  %v15560_v37 = vsel %vm11498_vm0, 4294967295, %v15559_v37  ;;  %vm11517_vm2 = vmand %vm15564_vm10, %vm1375_vm13  ;;  %vm15572_vm8 = vcmp.ge.s32.totalorder %v15527_v31, 0  ;;  %v15573_v46 = vmov 0  ;;  %v15580_v31 = vld [vmem:[#allocation49_spill] sm:$0xff] }
 0x306   :  { %15561 = vst [vmem:[#allocation133_spill] sm:$0xff] %v15560_v37  ;;  %15563 = vst [vmem:[#allocation141_spill] sm:$0xff] %v11510_v54  ;;  %v15566_v57 = vsel %vm11517_vm2, 4294967295, %v15565_v57  ;;  %vm15577_vm13 = vcmp.lt.s32.totalorder %v6383_v3, 7  ;;  %v15578_v17 = vmax.f32 %v11472_v12, 0.0  ;;  %vm15592_vm10 = vcmp.le.s32.totalorder %v11400_v20, 6 }
 0x307   :  { %15567 = vst [vmem:[#allocation176_spill] sm:$0xff] %v15566_v57  ;;  %vm11525_vm3 = vmand %vm1360_vm15, %vm1376_vm7  ;;  %v3843_v16 = vsel %vm15577_vm13, %v15576_v15, %v3828_v56  ;;  %vm15586_vm13 = vcmp.ge.s32.totalorder %v15535_v59, 0  ;;  %v15587_v15 = vmov 0  ;;  %vm15593_vm12 = vcmp.ge.s32.totalorder %v11400_v20, 0  ;;  %v15728_v37 = vld [vmem:[#allocation21_spill] sm:$0xff] }
 0x308   :  { %v15569_v26 = vsel %vm11525_vm3, 4294967295, %v15568_v26  ;;  %15571 = vst [vmem:[#allocation171_spill] sm:$0xff] %v11530_v25  ;;  %vm11536_vm4 = vmand %vm15572_vm8, %vm1169_vm14  ;;  %v11545_v13 = vrot.slane %v15578_v17, 1  ;;  %vm15581_vm14 = vcmp.ge.s32.totalorder %v15580_v31, 0  ;;  %vm15583_vm8 = vnez %v15582_v50  ;;  %v15590_v17 = vld [vmem:[#allocation130_spill] sm:$0xff] }
 0x309   :  { %15570 = vst [vmem:[#allocation179_spill] sm:$0xff] %v15569_v26  ;;  %v15574_v46 = vsel %vm11536_vm4, 4294967295, %v15573_v46  ;;  %vm11555_vm1 = vmand %vm15583_vm8, %vm15581_vm14  ;;  %v15591_v12 = vmax.f32 %v15590_v17, 0.0  ;;  %v15594_v31 = vmov 0  ;;  %vm15597_vm8 = vcmp.le.s32.totalorder %v15506_v48, 6 }
 0x30a   :  { %15575 = vst [vmem:[#allocation168_spill] sm:$0xff] %v15574_v46  ;;  %15579 = vst [vmem:[#allocation116_spill] sm:$0xff] %v11545_v13  ;;  %v15599_v20 = vmov 0  ;;  %vm15603_vm3 = vcmp.le.s32.totalorder %v15507_v22, 6  ;;  %vm15604_vm2 = vcmp.ge.s32.totalorder %v15507_v22, 0  ;;  %v15615_v22 = vld [vmem:[#allocation138_spill] sm:$0xff] }
 0x30b   :  { %vm11563_vm5 = vmand %vm15586_vm13, %vm1170_vm9  ;;  %v3859_v24 = vmax.f32 %v15591_v12, %v3843_v16  ;;  %v15605_v16 = vmov 0  ;;  %v11613_v12 = vadd.s32 2, %v15536_v60  ;;  %vm15622_vm7 = vcmp.ge.s32.totalorder %v11449_v39, 0  ;;  %v15724_v46 = vld [vmem:[#allocation10_spill] sm:$0xff] }
 0x30c   :  { %v15588_v15 = vsel %vm11563_vm5, 4294967295, %v15587_v15  ;;  %vm11573_vm15 = vmand %vm15593_vm12, %vm15592_vm10  ;;  %vm15598_vm5 = vcmp.ge.s32.totalorder %v15506_v48, 0  ;;  %vm15602_vm10 = vcmp.lt.s32.totalorder %v6383_v3, 7  ;;  %v15610_v48 = vmov 0 }
 0x30d   :  { %15589 = vst [vmem:[#allocation177_spill] sm:$0xff] %v15588_v15  ;;  %v15595_v31 = vsel %vm11573_vm15, 4294967295, %v15594_v31  ;;  %vm11587_vm12 = vmand %vm15598_vm5, %vm15597_vm8  ;;  %v3842_v59 = vsel %vm15602_vm10, %v3828_v56, %v11545_v13  ;;  %vm15608_vm5 = vcmp.le.s32.totalorder %v11424_v27, 6  ;;  %vm15609_vm8 = vcmp.ge.s32.totalorder %v11424_v27, 0 }
 0x30e   :  { %15596 = vst [vmem:[#allocation154_spill] sm:$0xff] %v15595_v31  ;;  %v15600_v20 = vsel %vm11587_vm12, 4294967295, %v15599_v20  ;;  %vm11600_vm9 = vmand %vm15604_vm2, %vm15603_vm3  ;;  %v11617_v56 = vadd.s32 2, %v15550_v2  ;;  %v3874_v17 = vmax.f32 %v15615_v22, %v3859_v24  ;;  %v11620_v13 = vmax.f32 %v3812_v32, %v3842_v59 }
 0x30f   :  { %15601 = vst [vmem:[#allocation26_spill] sm:$0xff] %v15600_v20  ;;  %v15606_v16 = vsel %vm11600_vm9, 4294967295, %v15605_v16  ;;  %vm11608_vm13 = vmand %vm15609_vm8, %vm15608_vm5  ;;  %vm15617_vm3 = vcmp.le.s32.totalorder %v11440_v1, 6  ;;  %vm15618_vm2 = vcmp.ge.s32.totalorder %v11440_v1, 0  ;;  %v15619_v27 = vmov 0  ;;  %v15625_v1 = vld [vmem:[#allocation107_spill] sm:$0xff] }
 0x310   :  { %15607 = vst [vmem:[#allocation167_spill] sm:$0xff] %v15606_v16  ;;  %v15611_v48 = vsel %vm11608_vm13, 4294967295, %v15610_v48  ;;  %15613 = vst [vmem:[#allocation181_spill] sm:$0xff] %v11613_v12  ;;  %vm15621_vm10 = vcmp.le.s32.totalorder %v11449_v39, 6  ;;  %v15623_v22 = vmov 0  ;;  %v11644_v32 = vmul.f32 %v11192_v41, %v15625_v1 }
 0x311   :  { %15612 = vst [vmem:[#allocation164_spill] sm:$0xff] %v15611_v48  ;;  %15614 = vst [vmem:[#allocation121_spill] sm:$0xff] %v11617_v56  ;;  %v11648_v59 = vadd.s32 2, %v15528_v30  ;;  %v11651_v56 = vadd.s32 2, %v15538_v19  ;;  %v15630_v39 = vmov 0  ;;  %v11662_v12 = vmax.f32 %v3859_v24, %v11620_v13 }
 0x312   :  { %15616 = vst [vmem:[#allocation27_spill] sm:$0xff] %v11620_v13  ;;  %vm11626_vm5 = vmand %vm15618_vm2, %vm15617_vm3  ;;  %v3890_v1 = vrot.slane %v3874_v17, 6  ;;  %v11665_v25 = vmul.f32 %v3874_v17, %v11186_v10  ;;  %vm15635_vm8 = vcmp.le.s32.totalorder %v15528_v30, 6  ;;  %vm15636_vm3 = vcmp.ge.s32.totalorder %v15528_v30, 0  ;;  %v15646_v30 = vld [vmem:[#allocation127_spill] sm:$0xff] }
 0x313   :  { %v15620_v27 = vsel %vm11626_vm5, 4294967295, %v15619_v27  ;;  %vm11636_vm13 = vmand %vm15622_vm7, %vm15621_vm10  ;;  %15626 = vst [vmem:[#allocation178_spill] sm:$0xff] %v11648_v59  ;;  %vm15628_vm7 = vcmp.le.s32.totalorder %v15548_v0, 6  ;;  %vm15629_vm10 = vcmp.ge.s32.totalorder %v15548_v0, 0  ;;  %v4021_v0 = vrot.slane %v3874_v17, 2 }
 0x314   :  { %v15624_v22 = vsel %vm11636_vm13, 4294967295, %v15623_v22  ;;  %15627 = vst [vmem:[#allocation175_spill] sm:$0xff] %v11651_v56  ;;  %vm11657_vm2 = vmand %vm15629_vm10, %vm15628_vm7  ;;  %v15637_v56 = vmov 0  ;;  %vm15640_vm10 = vcmp.le.s32.totalorder %v15538_v19, 6  ;;  %vm15641_vm9 = vcmp.ge.s32.totalorder %v15538_v19, 0 }
 0x315   :  { %v15631_v39 = vsel %vm11657_vm2, 4294967295, %v15630_v39  ;;  %15633 = vst [vmem:[#allocation80_spill] sm:$0xff] %v11662_v12  ;;  %15634 = vst [vmem:[#allocation186_spill] sm:$0xff] %v11665_v25  ;;  %v15642_v24 = vmov 0  ;;  %v11685_v10 = vmul.f32 %v3874_v17, %v11263_v21  ;;  %v11690_v13 = vmul.f32 %v11192_v41, %v15646_v30 }
 0x316   :  { %15632 = vst [vmem:[#allocation18_spill] sm:$0xff] %v15631_v39  ;;  %vm11671_vm14 = vmand %vm15636_vm3, %vm15635_vm8  ;;  %v11695_v40 = vsel %vm11555_vm1, 1.0, %v15224_v51  ;;  %v11698_v19 = vmul.f32 %v3874_v17, %v11370_v47  ;;  %v14249_v39 = vrot.slane %v11662_v12, 6  ;;  %v15647_v59 = vrot.slane %v11068_v61, 6 }
 0x317   :  { %v15638_v56 = vsel %vm11671_vm14, 4294967295, %v15637_v56  ;;  %vm11680_vm15 = vmand %vm15641_vm9, %vm15640_vm10  ;;  %15645 = vst [vmem:[#allocation30_spill] sm:$0xff] %v11685_v10  ;;  %vm15648_vm9 = vcmp.lt.s32.totalorder %v6383_v3, 2  ;;  %v11709_v41 = vmul.f32 %v11662_v12, %v11215_v49  ;;  %v15650_v30 = vrot.slane %v11068_v61, 2 }
 0x318   :  { %15639 = vst [vmem:[#allocation185_spill] sm:$0xff] %v15638_v56  ;;  %v15643_v24 = vsel %vm11680_vm15, 4294967295, %v15642_v24  ;;  %v11705_v21 = vsel %vm15648_vm9, %v15647_v59, %v3890_v1  ;;  %vm15651_vm1 = vcmp.lt.s32.totalorder %v6383_v3, 6  ;;  %vm15652_vm8 = vcmp.le.s32.totalorder %v11476_v36, 6  ;;  %v15840_v20 = vld [vmem:[#allocation121_spill] sm:$0xff] }
 0x319   :  { %15644 = vst [vmem:[#allocation72_spill] sm:$0xff] %v15643_v24  ;;  %15649 = vst [vmem:[#allocation169_spill] sm:$0xff] %v11709_v41  ;;  %v4041_v4 = vsel %vm15651_vm1, %v15650_v30, %v4021_v0  ;;  %vm15653_vm3 = vcmp.ge.s32.totalorder %v11476_v36, 0  ;;  %v15654_v47 = vmov 0  ;;  %v11725_v17 = vmul.f32 %v11705_v21, %v11238_v9  ;;  %v6180_v24 = vld [vmem:[%s13775_s5 + $0x58] sm:$0xff]  }
 0x31a   :  { %vm11719_vm10 = vmand %vm15653_vm3, %vm15652_vm8  ;;  %v11728_v49 = vmul.f32 %v4041_v4, %v11249_v5  ;;  %v4339_v61 = vmul.f32 %v4041_v4, %v11258_v28  ;;  %v11733_v59 = vmul.f32 %v11662_v12, %v11276_v23  ;;  %vm15660_vm9 = vcmp.le.s32.totalorder %v11482_v34, 6 }
 0x31b   :  { %v15655_v47 = vsel %vm11719_vm10, 4294967295, %v15654_v47  ;;  %15657 = vst [vmem:[#allocation45_spill] sm:$0xff] %v11725_v17  ;;  %vm15661_vm1 = vcmp.ge.s32.totalorder %v11482_v34, 0  ;;  %v15662_v36 = vmov 0  ;;  %vm15665_vm3 = vcmp.le.s32.totalorder %v11195_v52, 6 }
 0x31c   :  { %15656 = vst [vmem:[#allocation70_spill] sm:$0xff] %v15655_v47  ;;  %15658 = vst [vmem:[#allocation162_spill] sm:$0xff] %v11728_v49  ;;  %v15666_v5 = vmov 0  ;;  %vm15668_vm7 = vcmp.lt.s32.totalorder %v6383_v3, 2  ;;  %v15670_v28 = vmov 0  ;;  %v15673_v63 = vmov 0 }
 0x31d   :  { %15659 = vst [vmem:[#allocation122_spill] sm:$0xff] %v11733_v59  ;;  %vm11739_vm8 = vmand %vm15661_vm1, %vm15660_vm9  ;;  %v3909_v23 = vsel %vm15668_vm7, %v3890_v1, %v14249_v39  ;;  %vm15669_vm9 = vcmp.ge.s32.totalorder %v11042_v14, 0  ;;  %vm15675_vm7 = vcmp.le.s32.totalorder %v15536_v60, 6  ;;  %v15676_v34 = vmov 0  ;;  %v15715_v59 = vld [vmem:[#allocation166_spill] sm:$0xff]  ;;  %v6177_v49 = vld [vmem:[%s13775_s5 + $0x80] sm:$0xff]  }
 0x31e   :  { %v15663_v36 = vsel %vm11739_vm8, 4294967295, %v15662_v36  ;;  %vm11747_vm2 = vmand %vm11009_vm11, %vm15665_vm3  ;;  %vm15672_vm11 = vcmp.le.s32.totalorder %v15521_v44, 6  ;;  %v15680_v1 = vmov 0  ;;  %v4055_v9 = vmul.f32 %v4041_v4, %v11298_v58  ;;  %v15689_v58 = vld [vmem:[#allocation160_spill] sm:$0xff] }
 0x31f   :  { %15664 = vst [vmem:[#allocation174_spill] sm:$0xff] %v15663_v36  ;;  %v15667_v5 = vsel %vm11747_vm2, 4294967295, %v15666_v5  ;;  %vm11761_vm1 = vmand %vm11536_vm4, %vm15669_vm9  ;;  %vm15678_vm9 = vcmp.le.s32.totalorder %v15556_v18, 6  ;;  %v11792_v39 = vmul.f32 %v3909_v23, %v11243_v42  ;;  %v15686_v25 = vmov 0 }
 0x320   :  { %v15671_v28 = vsel %vm11761_vm1, 4294967295, %v15670_v28  ;;  %vm11769_vm3 = vmand %vm11490_vm6, %vm15672_vm11  ;;  %vm15679_vm1 = vcmp.ge.s32.totalorder %v15556_v18, 0  ;;  %vm15684_vm11 = vcmp.ge.s32.totalorder %v11093_v45, 0  ;;  %v4353_v14 = vpack.c.bf16 %v4339_v61, %v11644_v32  ;;  %v6174_v61 = vld [vmem:[%s13775_s5 + $0x48] sm:$0xff]  }
 0x321   :  { %v15674_v63 = vsel %vm11769_vm3, 4294967295, %v15673_v63  ;;  %vm11777_vm2 = vmand %vm11498_vm0, %vm15675_vm7  ;;  %15683 = vst [vmem:[#allocation23_spill] sm:$0xff] %v11792_v39  ;;  %vm15685_vm7 = vnez %v15588_v15  ;;  %v15692_v42 = vmov 0  ;;  %v15696_v4 = vmov 0 }
 0x322   :  { %v15677_v34 = vsel %vm11777_vm2, 4294967295, %v15676_v34  ;;  %vm11785_vm8 = vmand %vm15679_vm1, %vm15678_vm9  ;;  %vm15690_vm1 = vcmp.le.s32.totalorder %v15689_v58, 6  ;;  %vm15691_vm9 = vnez %v15582_v50  ;;  %vm15698_vm3 = vcmp.le.s32.totalorder %v15529_v38, 6  ;;  %v6172_v50 = vld [vmem:[%s13775_s5 + $0x40] sm:$0xff]  }
 0x323   :  { %v15681_v1 = vsel %vm11785_vm8, 4294967295, %v15680_v1  ;;  %vm11798_vm0 = vmand %vm15685_vm7, %vm15684_vm11  ;;  %vm15694_vm11 = vcmp.le.s32.totalorder %v15508_v6, 6  ;;  %vm15699_vm8 = vnez %v15569_v26  ;;  %v15700_v32 = vmov 0  ;;  %v6173_v6 = vld [vmem:[%s13775_s5] sm:$0xff]   ;;  %5926 = vmatprep.subr.bf16.mxu1 %v6172_v50  ;;  %v6183_v26 = vld [vmem:[%s13775_s5 + $0x88] sm:$0xff]  }
 0x324   :  { %15682 = vst [vmem:[#allocation182_spill] sm:$0xff] %v15681_v1  ;;  %v15687_v25 = vsel %vm11798_vm0, 4294967295, %v15686_v25  ;;  %vm11811_vm6 = vmand %vm15691_vm9, %vm15690_vm1  ;;  %vm15695_vm0 = vnez %v15566_v57  ;;  %vm15702_vm1 = vcmp.ge.s32.totalorder %v11381_v43, 0  ;;  %v15703_v38 = vmov 0  ;;  %5927 = vmatpush3.bf16.msra.mxu1 %v6173_v6 }
 0x325   :  { %v15693_v42 = vsel %vm11811_vm6, 4294967295, %v15692_v42  ;;  %vm11819_vm2 = vmand %vm15695_vm0, %vm15694_vm11  ;;  %vm15705_vm9 = vcmp.ge.s32.totalorder %v11418_v7, 0  ;;  %vm15706_vm11 = vnez %v15606_v16  ;;  %v15707_v58 = vmov 0  ;;  %5928 = vmatprep.subr.bf16.mxu1 %v6174_v61 }
 0x326   :  { %v15697_v4 = vsel %vm11819_vm2, 4294967295, %v15696_v4  ;;  %vm11827_vm7 = vmand %vm15699_vm8, %vm15698_vm3  ;;  %v15709_v30 = vrot.slane %v11662_v12, 2  ;;  %vm15710_vm2 = vcmp.lt.s32.totalorder %v6383_v3, 6  ;;  %vm15712_vm6 = vcmp.le.s32.totalorder %v11195_v52, 6  ;;  %v15723_v3 = vld [vmem:[#allocation137_spill] sm:$0xff] }
 0x327   :  { %v15701_v32 = vsel %vm11827_vm7, 4294967295, %v15700_v32  ;;  %vm11844_vm3 = vmand %vm11587_vm12, %vm15702_vm1  ;;  %v15713_v10 = vmov 0  ;;  %v15717_v18 = vmov 0  ;;  %v4067_v45 = vpack.c.bf16 %v4055_v9, %v11690_v13  ;;  %v15743_v13 = vld [vmem:[#allocation142_spill] sm:$0xff] }
 0x328   :  { %v15704_v38 = vsel %vm11844_vm3, 4294967295, %v15703_v38  ;;  %vm11852_vm7 = vmand %vm15706_vm11, %vm15705_vm9  ;;  %v11860_v41 = vsel %vm15710_vm2, %v4021_v0, %v15709_v30  ;;  %vm15716_vm3 = vcmp.le.s32.totalorder %v15715_v59, 6  ;;  %vm15720_vm2 = vcmp.ge.s32.totalorder %v11454_v62, 0  ;;  %v6175_v59 = vld [vmem:[%s13775_s5 + $0xc0] sm:$0xff]  }
 0x329   :  { %v15708_v58 = vsel %vm11852_vm7, 4294967295, %v15707_v58  ;;  %15711 = vst [vmem:[#allocation48_spill] sm:$0xff] %v11860_v41  ;;  %vm11866_vm1 = vmand %vm11536_vm4, %vm15712_vm6  ;;  %vm15719_vm7 = vcmp.le.s32.totalorder %v11454_v62, 6  ;;  %v15721_v0 = vmov 0  ;;  %v11887_v30 = vadd.s32 2, %v15552_v8  ;;  %5990 = vmatprep.subr.bf16.mxu0 %v6175_v59  ;;  %v15778_v59 = vld [vmem:[#allocation46_spill] sm:$0xff] }
 0x32a   :  { %v15714_v10 = vsel %vm11866_vm1, 4294967295, %v15713_v10  ;;  %vm11874_vm9 = vmand %vm15695_vm0, %vm15716_vm3  ;;  %v3925_v62 = vmul.f32 %v11705_v21, %v15723_v3  ;;  %vm15725_vm6 = vcmp.le.s32.totalorder %v15724_v46, 6  ;;  %v15726_v57 = vmov 0  ;;  %v15741_v46 = vld [vmem:[#allocation155_spill] sm:$0xff]  ;;  %5991 = vmatpush3.bf16.msra.mxu0 %v6177_v49  ;;  %v15806_v49 = vld [vmem:[#allocation90_spill] sm:$0xff] }
 0x32b   :  { %v15718_v18 = vsel %vm11874_vm9, 4294967295, %v15717_v18  ;;  %vm11882_vm11 = vmand %vm15720_vm2, %vm15719_vm7  ;;  %vm15729_vm3 = vcmp.le.s32.totalorder %v15728_v37, 6  ;;  %v15730_v7 = vmov 0  ;;  %vm15732_vm4 = vcmp.le.s32.totalorder %v15550_v2, 6 }
 0x32c   :  { %v15722_v0 = vsel %vm11882_vm11, 4294967295, %v15721_v0  ;;  %vm11902_vm7 = vmand %vm11626_vm5, %vm15725_vm6  ;;  %vm15733_vm0 = vnez %v15595_v31  ;;  %v15734_v3 = vmov 0  ;;  %vm15736_vm6 = vcmp.le.s32.totalorder %v15552_v8, 6  ;;  %v15751_v31 = vld [vmem:[#allocation56_spill] sm:$0xff] }
 0x32d   :  { %v15727_v57 = vsel %vm11902_vm7, 4294967295, %v15726_v57  ;;  %vm11910_vm2 = vmand %vm11636_vm13, %vm15729_vm3  ;;  %vm15737_vm7 = vnez %v15611_v48  ;;  %v15738_v37 = vmov 0  ;;  %vm15740_vm3 = vcmask 523264  }
 0x32e   :  { %v15731_v7 = vsel %vm11910_vm2, 4294967295, %v15730_v7  ;;  %vm11920_vm9 = vmand %vm15733_vm0, %vm15732_vm4  ;;  %4361 = vst.msk [vmem:[#allocation3 + $0x48] sm:$0xff] %vm15740_vm3, %v4353_v14  ;;  %v11935_v9 = vmul.f32 %v11860_v41, %v15741_v46  ;;  %v11939_v17 = vmul.f32 %v11860_v41, %v15743_v13  ;;  %vm15745_vm4 = vcmp.le.s32.totalorder %v11461_v33, 6  ;;  %v15749_v14 = vld [vmem:[#allocation76_spill] sm:$0xff] }
 0x32f   :  { %v15735_v3 = vsel %vm11920_vm9, 4294967295, %v15734_v3  ;;  %vm11928_vm1 = vmand %vm15737_vm7, %vm15736_vm6  ;;  %vm15746_vm0 = vcmp.ge.s32.totalorder %v11461_v33, 0  ;;  %v15747_v39 = vmov 0  ;;  %v3926_v48 = vmul.f32 %v3909_v23, %v11348_v53 }
 0x330   :  { %v15739_v37 = vsel %vm11928_vm1, 4294967295, %v15738_v37  ;;  %15742 = vst [vmem:[#allocation180_spill] sm:$0xff] %v11935_v9  ;;  %15744 = vst [vmem:[#allocation149_spill] sm:$0xff] %v11939_v17  ;;  %vm15750_vm6 = vcmp.ge.s32.totalorder %v15749_v14, 0  ;;  %vm15752_vm3 = vnez %v15751_v31  ;;  %v15753_v46 = vmov 0  ;;  %v15761_v31 = vld [vmem:[#allocation153_spill] sm:$0xff] }
 0x331   :  { %vm11945_vm9 = vmand %vm15746_vm0, %vm15745_vm4  ;;  %vm15755_vm1 = vcmp.ge.s32.totalorder %v11466_v29, 0  ;;  %v15756_v33 = vmov 0  ;;  %vm15758_vm0 = vcmp.ge.s32.totalorder %v11469_v55, 0  ;;  %v15759_v53 = vmov 0  ;;  %v15770_v17 = vld [vmem:[#allocation178_spill] sm:$0xff]  ;;  %v6181_v9 = vld [vmem:[%s13775_s5 + $0xc8] sm:$0xff]  }
 0x332   :  { %v15748_v39 = vsel %vm11945_vm9, 4294967295, %v15747_v39  ;;  %vm11954_vm7 = vmand %vm15752_vm3, %vm15750_vm6  ;;  %vm15762_vm6 = vcmp.le.s32.totalorder %v15761_v31, 6  ;;  %v15763_v50 = vmov 0  ;;  %v15768_v13 = vmov 0  ;;  %v6176_v31 = vld [vmem:[%s13775_s5 + $0x8] sm:$0xff]   ;;  %v15780_v29 = vld [vmem:[#allocation18_spill] sm:$0xff]  ;;  %5992 = vmatprep.subr.bf16.mxu0 %v6181_v9 }
 0x333   :  { %v15754_v46 = vsel %vm11954_vm7, 4294967295, %v15753_v46  ;;  %vm11962_vm2 = vmand %vm11671_vm14, %vm15755_vm1  ;;  %vm15766_vm1 = vcmp.le.s32.totalorder %v11506_v11, 6  ;;  %v4245_v47 = vmul.f32 %v3909_v23, %v11695_v40  ;;  %v15773_v55 = vld [vmem:[#allocation25_spill] sm:$0xff]  ;;  %v15776_v6 = vmov 0  ;;  %5929 = vmatpush3.bf16.msra.mxu1 %v6176_v31  ;;  %5993 = vmatpush3.bf16.msra.mxu0 %v6183_v26 }
 0x334   :  { %v15757_v33 = vsel %vm11962_vm2, 4294967295, %v15756_v33  ;;  %vm11970_vm4 = vmand %vm11680_vm15, %vm15758_vm0  ;;  %vm15767_vm2 = vcmp.ge.s32.totalorder %v11506_v11, 0  ;;  %v15772_v11 = vld [vmem:[#allocation123_spill] sm:$0xff]  ;;  %vm15786_vm13 = vnez %v15588_v15  ;;  %v15787_v40 = vmov 0 }
 0x335   :  { %v15760_v53 = vsel %vm11970_vm4, 4294967295, %v15759_v53  ;;  %vm11978_vm3 = vmand %vm11719_vm10, %vm15762_vm6  ;;  %vm15771_vm6 = vcmask 523264   ;;  %v4244_v41 = vmul.f32 %v11705_v21, %v15772_v11  ;;  %vm15779_vm4 = vcmp.ge.s32.totalorder %v15778_v59, 0  ;;  %v15789_v21 = vld [vmem:[#allocation57_spill] sm:$0xff]  ;;  %v15794_v11 = vld [vmem:[#allocation171_spill] sm:$0xff] }
 0x336   :  { %v15764_v50 = vsel %vm11978_vm3, 4294967295, %v15763_v50  ;;  %vm11986_vm7 = vmand %vm15767_vm2, %vm15766_vm1  ;;  %4075 = vst.msk [vmem:[#allocation3 + $0x80] sm:$0xff] %vm15771_vm6, %v4067_v45  ;;  %vm15774_vm2 = vcmp.le.s32.totalorder %v15773_v55, 6  ;;  %vm15775_vm1 = vnez %v15663_v36  ;;  %vm15781_vm10 = vnez %v15780_v29  ;;  %v15784_v45 = vld [vmem:[#allocation170_spill] sm:$0xff]  ;;  %v15800_v15 = vld [vmem:[#allocation175_spill] sm:$0xff] }
 0x337   :  { %15765 = vst [vmem:[#allocation67_spill] sm:$0xff] %v15764_v50  ;;  %v15769_v13 = vsel %vm11986_vm7, 4294967295, %v15768_v13  ;;  %vm12006_vm0 = vmand %vm15775_vm1, %vm15774_vm2  ;;  %v15782_v50 = vmov 0  ;;  %vm15785_vm6 = vcmp.le.s32.totalorder %v15784_v45, 6  ;;  %vm15790_vm2 = vcmp.le.s32.totalorder %v15789_v21, 6  ;;  %v6178_v21 = vld [vmem:[%s13775_s5 + $0x50] sm:$0xff]  }
 0x338   :  { %v15777_v6 = vsel %vm12006_vm0, 4294967295, %v15776_v6  ;;  %vm12014_vm3 = vmand %vm15781_vm10, %vm15779_vm4  ;;  %v15791_v23 = vmov 0  ;;  %vm15795_vm4 = vcmp.le.s32.totalorder %v15794_v11, 6  ;;  %v15797_v55 = vmov 0  ;;  %5930 = vmatprep.subr.bf16.mxu1 %v6178_v21 }
 0x339   :  { %v15783_v50 = vsel %vm12014_vm3, 4294967295, %v15782_v50  ;;  %vm12022_vm5 = vmand %vm15786_vm13, %vm15785_vm6  ;;  %vm15796_vm3 = vcmp.ge.s32.totalorder %v15794_v11, 0  ;;  %v3937_v36 = vpack.c.bf16 %v3926_v48, %v3925_v62  ;;  %v15801_v11 = vld [vmem:[#allocation165_spill] sm:$0xff]  ;;  %vm15807_vm6 = vcmp.le.s32.totalorder %v15806_v49, 6 }
 0x33a   :  { %v15788_v40 = vsel %vm12022_vm5, 4294967295, %v15787_v40  ;;  %vm12030_vm1 = vmand %vm15699_vm8, %vm15790_vm2  ;;  %v4151_v59 = vmul.f32 %v11662_v12, %v15801_v11  ;;  %vm15803_vm2 = vnez %v15681_v1  ;;  %v15808_v61 = vmov 0  ;;  %v15810_v48 = vld [vmem:[#allocation113_spill] sm:$0xff]  ;;  %v15815_v11 = vld [vmem:[#allocation126_spill] sm:$0xff] }
 0x33b   :  { %v15792_v23 = vsel %vm12030_vm1, 4294967295, %v15791_v23  ;;  %vm12038_vm0 = vmand %vm15796_vm3, %vm15795_vm4  ;;  %vm15802_vm3 = vcmp.ge.s32.totalorder %v11510_v54, 0  ;;  %vm15811_vm8 = vcmp.le.s32.totalorder %v15810_v48, 6  ;;  %v15812_v62 = vmov 0  ;;  %v15816_v12 = vld [vmem:[#allocation181_spill] sm:$0xff]  ;;  %v15999_v48 = vld [vmem:[#allocation70_spill] sm:$0xff] }
 0x33c   :  { %15793 = vst [vmem:[#allocation29_spill] sm:$0xff] %v15792_v23  ;;  %v15798_v55 = vsel %vm12038_vm0, 4294967295, %v15797_v55  ;;  %vm12056_vm4 = vmand %vm15803_vm2, %vm15802_vm3  ;;  %v15804_v23 = vmov 0  ;;  %vm14304_vm3 = vcmp.le.s32.totalorder %v15815_v11, 6  ;;  %v6187_v49 = vld [vmem:[%s13775_s5 + $0xd0] sm:$0xff]   ;;  %v4258_v54 = vpack.c.bf16 %v4245_v47, %v4244_v41 }
 0x33d   :  { %15799 = vst [vmem:[#allocation145_spill] sm:$0xff] %v15798_v55  ;;  %v15805_v23 = vsel %vm12056_vm4, 4294967295, %v15804_v23  ;;  %vm12064_vm13 = vmand %vm11882_vm11, %vm15807_vm6  ;;  %vm14306_vm4 = vcmp.le.s32.totalorder %v15816_v12, 6  ;;  %v15823_v41 = vmov 0  ;;  %v15826_v47 = vmov 0  ;;  %v15862_v55 = vld [vmem:[#allocation35_spill] sm:$0xff]  ;;  %5994 = vmatprep.subr.bf16.mxu0 %v6187_v49 }
 0x33e   :  { %v15809_v61 = vsel %vm12064_vm13, 4294967295, %v15808_v61  ;;  %vm12072_vm1 = vmand %vm11945_vm9, %vm15811_vm8  ;;  %vm15819_vm8 = vnez %v15606_v16  ;;  %vm15822_vm13 = vcmp.le.s32.totalorder %v11195_v52, 6  ;;  %v15830_v52 = vmov 0  ;;  %v15870_v49 = vld [vmem:[#allocation75_spill] sm:$0xff] }
 0x33f   :  { %v15813_v62 = vsel %vm12072_vm1, 4294967295, %v15812_v62  ;;  %vm12085_vm6 = vmand %vm11587_vm12, %vm14304_vm3  ;;  %vm15825_vm3 = vcmp.le.s32.totalorder %v15784_v45, 6  ;;  %v4163_v9 = vpack.c.bf16 %v4151_v59, %v11698_v19  ;;  %v15843_v19 = vmov 0 }
 0x340   :  { %15814 = vst [vmem:[#allocation31_spill] sm:$0xff] %v15813_v62  ;;  %vm12093_vm1 = vmand %vm15819_vm8, %vm14306_vm4  ;;  %v15820_v62 = vmov 0  ;;  %vm15828_vm4 = vcmp.le.s32.totalorder %v15770_v17, 6  ;;  %vm15829_vm8 = vcmp.ge.s32.totalorder %v15770_v17, 0  ;;  %v15838_v17 = vmov 0 }
 0x341   :  { %v15821_v62 = vsel %vm12093_vm1, 4294967295, %v15820_v62  ;;  %vm12101_vm5 = vmand %vm11882_vm11, %vm15822_vm13  ;;  %vm15833_vm13 = vcmask 523264   ;;  %vm15834_vm11 = vcmp.le.s32.totalorder %v15521_v44, 6  ;;  %v15864_v21 = vmov 0 }
 0x342   :  { %v15824_v41 = vsel %vm12101_vm5, 4294967295, %v15823_v41  ;;  %vm12109_vm12 = vmand %vm11945_vm9, %vm15825_vm3  ;;  %3946 = vst.msk [vmem:[#allocation3 + $0xa0] sm:$0xff] %vm15833_vm13, %v3937_v36  ;;  %vm15837_vm9 = vcmp.le.s32.totalorder %v15536_v60, 6  ;;  %vm15842_vm5 = vcmp.ge.s32.totalorder %v15800_v15, 0  ;;  %v6179_v36 = vld [vmem:[%s13775_s5 + $0x10] sm:$0xff]  }
 0x343   :  { %v15827_v47 = vsel %vm12109_vm12, 4294967295, %v15826_v47  ;;  %vm12117_vm1 = vmand %vm15829_vm8, %vm15828_vm4  ;;  %vm14311_vm8 = vcmp.le.s32.totalorder %v15840_v20, 6  ;;  %vm15841_vm12 = vcmp.le.s32.totalorder %v15800_v15, 6  ;;  %5931 = vmatpush3.bf16.msra.mxu1 %v6179_v36  ;;  %v16013_v15 = vld [vmem:[#allocation17_spill] sm:$0xff] }
 0x344   :  { %v15831_v52 = vsel %vm12117_vm1, 4294967295, %v15830_v52  ;;  %vm12127_vm3 = vmand %vm11986_vm7, %vm15834_vm11  ;;  %5932 = vmatprep.subr.bf16.mxu1 %v6180_v24  ;;  %v15916_v24 = vld [vmem:[#allocation63_spill] sm:$0xff] }
 0x345   :  { %15832 = vst [vmem:[#allocation73_spill] sm:$0xff] %v15831_v52  ;;  %vm12135_vm4 = vmand %vm12038_vm0, %vm15837_vm9 }
 0x346   :  { %v15839_v17 = vsel %vm12135_vm4, 4294967295, %v15838_v17  ;;  %vm12145_vm11 = vmand %vm15842_vm5, %vm15841_vm12  ;;  %vm15849_vm12 = vcmp.le.s32.totalorder %v11887_v30, 6  ;;  %vm15852_vm4 = vcmp.le.s32.totalorder %v15815_v11, 6 }
 0x347   :  { %v15844_v19 = vsel %vm12145_vm11, 4294967295, %v15843_v19  ;;  %vm15846_vm9 = vmmov %vm15833_vm13 }
 0x348   :  { %15845 = vst [vmem:[#allocation54_spill] sm:$0xff] %v15844_v19  ;;  %4266 = vst.msk [vmem:[#allocation3 + $0x68] sm:$0xff] %vm15846_vm9, %v4258_v54 }
 0x349   :  { %vm12157_vm13 = vmand %vm11671_vm14, %vm14311_vm8  ;;  %vm15855_vm8 = vcmp.le.s32.totalorder %v15816_v12, 6 }
 0x34a   :  { %vm12165_vm5 = vmand %vm11680_vm15, %vm15849_vm12  ;;  %vm15858_vm12 = vcmask 523264  }
 0x34b   :  { %vm12173_vm9 = vmand %vm11986_vm7, %vm15852_vm4  ;;  %4171 = vst.msk [vmem:[#allocation3 + $0x88] sm:$0xff] %vm15858_vm12, %v4163_v9  ;;  %vm15859_vm4 = vcmp.le.s32.totalorder %v15550_v2, 6  ;;  %vm15866_vm12 = vnez %v15667_v5  ;;  %vm15868_vm7 = vnez %v15674_v63  ;;  %v15876_v63 = vld [vmem:[#allocation22_spill] sm:$0xff]  ;;  %v12561_v16 = vsel %vm12165_vm5, 1.0, %v15224_v51 }
 0x34c   :  { %vm12181_vm14 = vmand %vm12038_vm0, %vm15855_vm8  ;;  %vm15863_vm8 = vcmp.le.s32.totalorder %v15862_v55, 6  ;;  %v12208_v26 = vsel %vm15866_vm12, 1.0, %v15224_v51  ;;  %v12218_v2 = vsel %vm15868_vm7, 1.0, %v15224_v51  ;;  %vm15873_vm12 = vcmp.le.s32.totalorder %v15552_v8, 6 }
 0x34d   :  { %vm12193_vm15 = vmand %vm12117_vm1, %vm15859_vm4  ;;  %vm15867_vm4 = vnez %v15671_v28  ;;  %v15874_v28 = vmov 0  ;;  %vm15877_vm7 = vcmp.le.s32.totalorder %v15876_v63, 6  ;;  %v15884_v8 = vmov 0 }
 0x34e   :  { %vm12201_vm0 = vmand %vm15803_vm2, %vm15863_vm8  ;;  %v12213_v9 = vsel %vm15867_vm4, 1.0, %v15224_v51  ;;  %vm15869_vm8 = vnez %v15677_v34  ;;  %vm15871_vm2 = vnez %v15870_v49  ;;  %v15878_v34 = vmov 0 }
 0x34f   :  { %v15865_v21 = vsel %vm12201_vm0, 4294967295, %v15864_v21  ;;  %v12223_v1 = vsel %vm15869_vm8, 1.0, %v15224_v51  ;;  %v12228_v5 = vsel %vm15871_vm2, 1.0, %v15224_v51  ;;  %vm12234_vm4 = vmand %vm12145_vm11, %vm15873_vm12  ;;  %vm15880_vm8 = vcmp.le.s32.totalorder %v15840_v20, 6 }
 0x350   :  { %15872 = vst [vmem:[#allocation136_spill] sm:$0xff] %v12228_v5  ;;  %v15875_v28 = vsel %vm12234_vm4, 4294967295, %v15874_v28  ;;  %vm12242_vm0 = vmand %vm15781_vm10, %vm15877_vm7  ;;  %v15881_v49 = vmov 0  ;;  %vm15883_vm12 = vcmp.le.s32.totalorder %v11887_v30, 6  ;;  %vm15886_vm7 = vnez %v15687_v25  ;;  %v6182_v25 = vld [vmem:[%s13775_s5 + $0x18] sm:$0xff]  }
 0x351   :  { %v15879_v34 = vsel %vm12242_vm0, 4294967295, %v15878_v34  ;;  %vm12250_vm2 = vmand %vm12117_vm1, %vm15880_vm8  ;;  %v12265_v29 = vsel %vm15886_vm7, 1.0, %v15224_v51  ;;  %vm15888_vm10 = vnez %v15693_v42  ;;  %vm15889_vm8 = vnez %v15697_v4  ;;  %v15895_v4 = vld [vmem:[#allocation28_spill] sm:$0xff]  ;;  %5933 = vmatpush3.bf16.msra.mxu1 %v6182_v25 }
 0x352   :  { %v15882_v49 = vsel %vm12250_vm2, 4294967295, %v15881_v49  ;;  %vm12258_vm4 = vmand %vm12145_vm11, %vm15883_vm12  ;;  %15887 = vst [vmem:[#allocation161_spill] sm:$0xff] %v12265_v29  ;;  %v12270_v52 = vsel %vm15888_vm10, 1.0, %v15224_v51  ;;  %v12275_v5 = vsel %vm15889_vm8, 1.0, %v15224_v51  ;;  %vm15890_vm12 = vnez %v15701_v32 }
 0x353   :  { %v15885_v8 = vsel %vm12258_vm4, 4294967295, %v15884_v8  ;;  %v12280_v19 = vsel %vm15890_vm12, 1.0, %v15224_v51  ;;  %vm15891_vm7 = vcmp.ge.s32.totalorder %v15749_v14, 0  ;;  %vm15892_vm10 = vnez %v15620_v27  ;;  %v15923_v27 = vld [vmem:[#allocation100_spill] sm:$0xff] }
 0x354   :  { %vm12289_vm11 = vmand %vm15892_vm10, %vm15891_vm7  ;;  %v15893_v42 = vmov 0  ;;  %vm15896_vm8 = vcmp.ge.s32.totalorder %v15895_v4, 0  ;;  %vm15897_vm1 = vnez %v15624_v22  ;;  %v15898_v32 = vmov 0 }
 0x355   :  { %v15894_v42 = vsel %vm12289_vm11, 4294967295, %v15893_v42  ;;  %vm12297_vm4 = vmand %vm15897_vm1, %vm15896_vm8  ;;  %vm15900_vm12 = vnez %v15704_v38  ;;  %vm15902_vm2 = vnez %v15708_v58  ;;  %vm15904_vm7 = vnez %v15714_v10  ;;  %v6184_v38 = vld [vmem:[%s13775_s5 + $0x60] sm:$0xff]   ;;  %v15912_v10 = vld [vmem:[#allocation97_spill] sm:$0xff] }
 0x356   :  { %v15899_v32 = vsel %vm12297_vm4, 4294967295, %v15898_v32  ;;  %v12304_v36 = vsel %vm15900_vm12, 1.0, %v15224_v51  ;;  %v12309_v14 = vsel %vm15902_vm2, 1.0, %v15224_v51  ;;  %v12314_v4 = vsel %vm15904_vm7, 1.0, %v15224_v51  ;;  %5934 = vmatprep.subr.bf16.mxu1 %v6184_v38 }
 0x357   :  { %15901 = vst [vmem:[#allocation40_spill] sm:$0xff] %v12304_v36  ;;  %15903 = vst [vmem:[#allocation32_spill] sm:$0xff] %v12309_v14  ;;  %vm15906_vm8 = vnez %v15718_v18  ;;  %v15908_v36 = vld [vmem:[#allocation43_spill] sm:$0xff]  ;;  %v15910_v58 = vmov 0  ;;  %vm15913_vm7 = vcmp.le.s32.totalorder %v15912_v10, 6  ;;  %v15914_v18 = vmov 0 }
 0x358   :  { %15905 = vst [vmem:[#allocation60_spill] sm:$0xff] %v12314_v4  ;;  %v12319_v29 = vsel %vm15906_vm8, 1.0, %v15224_v51  ;;  %vm15909_vm12 = vcmp.le.s32.totalorder %v15908_v36, 6  ;;  %vm12336_vm4 = vmand %vm15897_vm1, %vm15913_vm7  ;;  %vm15917_vm8 = vcmp.ge.s32.totalorder %v15916_v24, 0  ;;  %v15918_v14 = vld [vmem:[#allocation20_spill] sm:$0xff]  ;;  %v15920_v36 = vmov 0 }
 0x359   :  { %15907 = vst [vmem:[#allocation151_spill] sm:$0xff] %v12319_v29  ;;  %vm12328_vm2 = vmand %vm15892_vm10, %vm15909_vm12  ;;  %v15915_v18 = vsel %vm12336_vm4, 4294967295, %v15914_v18  ;;  %vm15919_vm11 = vnez %v15918_v14  ;;  %vm15922_vm10 = vcmp.le.s32.totalorder %v15784_v45, 6  ;;  %vm15924_vm12 = vnez %v15923_v27  ;;  %v15941_v27 = vld [vmem:[#allocation133_spill] sm:$0xff] }
 0x35a   :  { %v15911_v58 = vsel %vm12328_vm2, 4294967295, %v15910_v58  ;;  %vm12344_vm0 = vmand %vm15919_vm11, %vm15917_vm8  ;;  %v15925_v10 = vmov 0  ;;  %vm15927_vm1 = vnez %v15727_v57  ;;  %vm15929_vm7 = vnez %v15731_v7  ;;  %v15939_v7 = vld [vmem:[#allocation148_spill] sm:$0xff]  ;;  %v15977_v4 = vld [vmem:[#allocation29_spill] sm:$0xff] }
 0x35b   :  { %v15921_v36 = vsel %vm12344_vm0, 4294967295, %v15920_v36  ;;  %vm12352_vm2 = vmand %vm15924_vm12, %vm15922_vm10  ;;  %v12359_v22 = vsel %vm15927_vm1, 1.0, %v15224_v51  ;;  %v12364_v14 = vsel %vm15929_vm7, 1.0, %v15224_v51  ;;  %vm15931_vm11 = vnez %v15735_v3 }
 0x35c   :  { %v15926_v10 = vsel %vm12352_vm2, 4294967295, %v15925_v10  ;;  %15928 = vst [vmem:[#allocation131_spill] sm:$0xff] %v12359_v22  ;;  %15930 = vst [vmem:[#allocation37_spill] sm:$0xff] %v12364_v14  ;;  %v12369_v45 = vsel %vm15931_vm11, 1.0, %v15224_v51  ;;  %vm15933_vm8 = vnez %v15739_v37  ;;  %vm15935_vm10 = vcmp.ge.s32.totalorder %v11381_v43, 0  ;;  %v5898_v14 = vpop.f32.mrb[20].mxu0 }
 0x35d   :  { %15932 = vst [vmem:[#allocation38_spill] sm:$0xff] %v12369_v45  ;;  %v12374_v24 = vsel %vm15933_vm8, 1.0, %v15224_v51  ;;  %vm15936_vm12 = vnez %v15558_v35  ;;  %v15937_v57 = vmov 0  ;;  %vm15940_vm7 = vcmp.ge.s32.totalorder %v15939_v7, 0  ;;  %v15951_v45 = vld [vmem:[#allocation67_spill] sm:$0xff] }
 0x35e   :  { %15934 = vst [vmem:[#allocation62_spill] sm:$0xff] %v12374_v24  ;;  %vm12380_vm1 = vmand %vm15936_vm12, %vm15935_vm10  ;;  %vm15942_vm2 = vnez %v15941_v27  ;;  %v15943_v3 = vmov 0  ;;  %vm15945_vm11 = vnez %v15754_v46  ;;  %vm15947_vm8 = vnez %v15757_v33  ;;  %v15966_v35 = vld [vmem:[#allocation135_spill] sm:$0xff]  ;;  %v5899_v27 = vpop.f32.mrb[21].mxu0  ;;  %v16070_v33 = vld [vmem:[#allocation116_spill] sm:$0xff] }
 0x35f   :  { %v15938_v57 = vsel %vm12380_vm1, 4294967295, %v15937_v57  ;;  %vm12388_vm0 = vmand %vm15942_vm2, %vm15940_vm7  ;;  %v12395_v37 = vsel %vm15945_vm11, 1.0, %v15224_v51  ;;  %v12400_v22 = vsel %vm15947_vm8, 1.0, %v15224_v51  ;;  %vm15949_vm10 = vnez %v15760_v53  ;;  %v15960_v53 = vld [vmem:[#allocation146_spill] sm:$0xff] }
 0x360   :  { %v15944_v3 = vsel %vm12388_vm0, 4294967295, %v15943_v3  ;;  %15946 = vst [vmem:[#allocation12_spill] sm:$0xff] %v12395_v37  ;;  %15948 = vst [vmem:[#allocation33_spill] sm:$0xff] %v12400_v22  ;;  %v12405_v24 = vsel %vm15949_vm10, 1.0, %v15224_v51  ;;  %vm15952_vm7 = vnez %v15951_v45  ;;  %vm15954_vm0 = vcmp.le.s32.totalorder %v15815_v11, 6  ;;  %v15962_v45 = vld [vmem:[#allocation154_spill] sm:$0xff] }
 0x361   :  { %15950 = vst [vmem:[#allocation14_spill] sm:$0xff] %v12405_v24  ;;  %v12410_v29 = vsel %vm15952_vm7, 1.0, %v15224_v51  ;;  %vm12416_vm11 = vmand %vm15936_vm12, %vm15954_vm0  ;;  %v15955_v46 = vmov 0  ;;  %vm15957_vm8 = vcmp.le.s32.totalorder %v15816_v12, 6  ;;  %vm15961_vm10 = vcmp.ge.s32.totalorder %v15960_v53, 0  ;;  %v15968_v24 = vld [vmem:[#allocation164_spill] sm:$0xff] }
 0x362   :  { %15953 = vst [vmem:[#allocation15_spill] sm:$0xff] %v12410_v29  ;;  %v15956_v46 = vsel %vm12416_vm11, 4294967295, %v15955_v46  ;;  %vm12424_vm1 = vmand %vm15942_vm2, %vm15957_vm8  ;;  %vm15963_vm7 = vnez %v15962_v45  ;;  %vm15967_vm0 = vcmp.ge.s32.totalorder %v15966_v35, 0  ;;  %vm15969_vm12 = vnez %v15968_v24 }
 0x363   :  { %vm12432_vm4 = vmand %vm15963_vm7, %vm15961_vm10  ;;  %v15970_v12 = vmov 0  ;;  %vm15972_vm2 = vnez %v15777_v6  ;;  %vm15974_vm8 = vnez %v15783_v50  ;;  %vm15976_vm10 = vnez %v15788_v40  ;;  %v6185_v6 = vld [vmem:[%s13775_s5 + $0x20] sm:$0xff]  }
 0x364   :  { %vm12440_vm11 = vmand %vm15969_vm12, %vm15967_vm0  ;;  %v12447_v37 = vsel %vm15972_vm2, 1.0, %v15224_v51  ;;  %v12452_v22 = vsel %vm15974_vm8, 1.0, %v15224_v51  ;;  %v12457_v29 = vsel %vm15976_vm10, 1.0, %v15224_v51  ;;  %vm15978_vm0 = vnez %v15977_v4  ;;  %5935 = vmatpush3.bf16.msra.mxu1 %v6185_v6 }
 0x365   :  { %v15971_v12 = vsel %vm12440_vm11, 4294967295, %v15970_v12  ;;  %15973 = vst [vmem:[#allocation125_spill] sm:$0xff] %v12447_v37  ;;  %15975 = vst [vmem:[#allocation34_spill] sm:$0xff] %v12452_v22  ;;  %v12462_v35 = vsel %vm15978_vm0, 1.0, %v15224_v51  ;;  %vm15979_vm2 = vcmp.le.s32.totalorder %v15840_v20, 6  ;;  %v5900_v40 = vadd.f32 %v5899_v27, %v5898_v14  ;;  %v5901_v22 = vpop.f32.mrb[22].mxu0 }
 0x366   :  { %vm12471_vm8 = vmand %vm15963_vm7, %vm15979_vm2  ;;  %vm15982_vm10 = vnez %v15805_v23  ;;  %vm15984_vm0 = vnez %v15809_v61  ;;  %v15985_v20 = vld [vmem:[#allocation31_spill] sm:$0xff]  ;;  %v6186_v14 = vld [vmem:[%s13775_s5 + $0x68] sm:$0xff]   ;;  %vm15987_vm7 = vcmp.le.s32.totalorder %v11887_v30, 6  ;;  %v5902_v61 = vpop.f32.mrb[23].mxu0  ;;  %v12504_v27 = vsel %vm12085_vm6, 1.0, %v15224_v51 }
 0x367   :  { %v12478_v4 = vsel %vm15982_vm10, 1.0, %v15224_v51  ;;  %v12483_v25 = vsel %vm15984_vm0, 1.0, %v15224_v51  ;;  %vm15986_vm11 = vnez %v15985_v20  ;;  %vm12497_vm2 = vmand %vm15969_vm12, %vm15987_vm7  ;;  %15990 = vst [vmem:[#allocation159_spill] sm:$0xff] %v12504_v27  ;;  %vm15993_vm10 = vnez %v15824_v41  ;;  %v15997_v20 = vld [vmem:[#allocation141_spill] sm:$0xff]  ;;  %v16004_v37 = vld [vmem:[#allocation46_spill] sm:$0xff]  ;;  %5936 = vmatprep.subr.bf16.mxu1 %v6186_v14 }
 0x368   :  { %15983 = vst [vmem:[#allocation74_spill] sm:$0xff] %v12478_v4  ;;  %v12488_v45 = vsel %vm15986_vm11, 1.0, %v15224_v51  ;;  %vm15991_vm11 = vnez %v15821_v62  ;;  %v12514_v30 = vsel %vm15993_vm10, 1.0, %v15224_v51  ;;  %vm15995_vm12 = vnez %v15827_v47  ;;  %v12532_v62 = vld [vmem:[%s13774_s4] ss:$0 sm:$0xff]  ;;  %v16026_v14 = vld [vmem:[#allocation77_spill] sm:$0xff] }
 0x369   :  { %v12509_v38 = vsel %vm15991_vm11, 1.0, %v15224_v51  ;;  %15994 = vst [vmem:[#allocation65_spill] sm:$0xff] %v12514_v30  ;;  %v12519_v24 = vsel %vm15995_vm12, 1.0, %v15224_v51  ;;  %vm15998_vm0 = vcmp.ge.s32.totalorder %v15997_v20, 0  ;;  %vm16000_vm6 = vnez %v15999_v48  ;;  %v16006_v30 = vld [vmem:[#allocation174_spill] sm:$0xff] }
 0x36a   :  { %15992 = vst [vmem:[#allocation39_spill] sm:$0xff] %v12509_v38  ;;  %15996 = vst [vmem:[#allocation103_spill] sm:$0xff] %v12519_v24  ;;  %v3685_v41 = vadd.f32 %v12532_v62, %v5900_v40  ;;  %v5903_v38 = vadd.f32 %v5902_v61, %v5901_v22  ;;  %v12538_v47 = vsel %vm12127_vm3, 1.0, %v15224_v51  ;;  %vm16003_vm11 = vnez %v15839_v17 }
 0x36b   :  { %vm12525_vm7 = vmand %vm16000_vm6, %vm15998_vm0  ;;  %v12543_v24 = vsel %vm16003_vm11, 1.0, %v15224_v51  ;;  %vm16005_vm10 = vcmp.ge.s32.totalorder %v16004_v37, 0  ;;  %vm16007_vm12 = vnez %v16006_v30  ;;  %v12556_v22 = vsel %vm12157_vm13, 1.0, %v15224_v51  ;;  %v16032_v30 = vld [vmem:[#allocation24_spill] sm:$0xff] }
 0x36c   :  { %vm12549_vm0 = vmand %vm16007_vm12, %vm16005_vm10  ;;  %v12566_v17 = vsel %vm12173_vm9, 1.0, %v15224_v51  ;;  %v12571_v37 = vsel %vm12181_vm14, 1.0, %v15224_v51  ;;  %vm16010_vm3 = vcmp.le.s32.totalorder %v15862_v55, 6  ;;  %v3782_v40 = vadd.f32 %v16013_v15, %v3685_v41  ;;  %v16036_v41 = vld [vmem:[#allocation83_spill] sm:$0xff] }
 0x36d   :  { %vm12577_vm13 = vmand %vm16000_vm6, %vm16010_vm3  ;;  %v3688_v54 = vadd.f32 %v12532_v62, %v5903_v38  ;;  %v12586_v61 = vsel %vm12193_vm15, 1.0, %v15224_v51  ;;  %vm16014_vm14 = vnez %v15865_v21  ;;  %vm16016_vm5 = vcmp.le.s32.totalorder %v15876_v63, 6  ;;  %v16038_v15 = vld [vmem:[#allocation179_spill] sm:$0xff] }
 0x36e   :  { %v12591_v31 = vsel %vm16014_vm14, 1.0, %v15224_v51  ;;  %vm12597_vm9 = vmand %vm16007_vm12, %vm16016_vm5  ;;  %vm16019_vm6 = vnez %v15875_v28  ;;  %vm16020_vm15 = vnez %v15879_v34  ;;  %vm16022_vm11 = vnez %v15882_v49  ;;  %v16028_v28 = vld [vmem:[#allocation176_spill] sm:$0xff] }
 0x36f   :  { %16015 = vst [vmem:[#allocation183_spill] sm:$0xff] %v12591_v31  ;;  %v12604_v56 = vsel %vm16019_vm6, 1.0, %v15224_v51  ;;  %v12609_v21 = vsel %vm16020_vm15, 1.0, %v15224_v51  ;;  %v12614_v63 = vsel %vm16022_vm11, 1.0, %v15224_v51  ;;  %vm16024_vm10 = vnez %v15885_v8 }
 0x370   :  { %16021 = vst [vmem:[#allocation42_spill] sm:$0xff] %v12609_v21  ;;  %16023 = vst [vmem:[#allocation152_spill] sm:$0xff] %v12614_v63  ;;  %v12619_v6 = vsel %vm16024_vm10, 1.0, %v15224_v51  ;;  %vm16027_vm12 = vcmp.ge.s32.totalorder %v16026_v14, 0  ;;  %vm16029_vm3 = vnez %v16028_v28  ;;  %v3814_v34 = vmax.f32 %v3782_v40, 0.0  ;;  %v16049_v28 = vld [vmem:[#allocation90_spill] sm:$0xff] }
 0x371   :  { %16025 = vst [vmem:[#allocation184_spill] sm:$0xff] %v12619_v6  ;;  %vm12625_vm14 = vmand %vm16029_vm3, %vm16027_vm12  ;;  %v12630_v48 = vadd.f32 %v16032_v30, %v3688_v54  ;;  %vm16033_vm5 = vnez %v15894_v42  ;;  %vm16034_vm6 = vnez %v15899_v32  ;;  %vm16037_vm15 = vcmp.ge.s32.totalorder %v16036_v41, 0 }
 0x372   :  { %v12635_v49 = vsel %vm16033_vm5, 1.0, %v15224_v51  ;;  %v12640_v8 = vsel %vm16034_vm6, 1.0, %v15224_v51  ;;  %vm16039_vm11 = vnez %v16038_v15  ;;  %vm16042_vm12 = vnez %v15911_v58  ;;  %v16051_v58 = vld [vmem:[#allocation168_spill] sm:$0xff]  ;;  %v16057_v15 = vld [vmem:[#allocation113_spill] sm:$0xff] }
 0x373   :  { %16035 = vst [vmem:[#allocation47_spill] sm:$0xff] %v12640_v8  ;;  %vm12646_vm10 = vmand %vm16039_vm11, %vm16037_vm15  ;;  %v12653_v40 = vsel %vm16042_vm12, 1.0, %v15224_v51  ;;  %vm16044_vm3 = vnez %v15915_v18  ;;  %vm16046_vm5 = vnez %v15921_v36  ;;  %vm16048_vm6 = vnez %v15926_v10 }
 0x374   :  { %16043 = vst [vmem:[#allocation150_spill] sm:$0xff] %v12653_v40  ;;  %v12658_v42 = vsel %vm16044_vm3, 1.0, %v15224_v51  ;;  %v12663_v32 = vsel %vm16046_vm5, 1.0, %v15224_v51  ;;  %v12668_v54 = vsel %vm16048_vm6, 1.0, %v15224_v51  ;;  %vm16050_vm15 = vcmp.le.s32.totalorder %v16049_v28, 6  ;;  %v16059_v28 = vld [vmem:[#allocation177_spill] sm:$0xff] }
 0x375   :  { %16045 = vst [vmem:[#allocation128_spill] sm:$0xff] %v12658_v42  ;;  %16047 = vst [vmem:[#allocation68_spill] sm:$0xff] %v12663_v32  ;;  %vm16052_vm11 = vnez %v16051_v58  ;;  %v16053_v30 = vmov 0  ;;  %v3830_v18 = vrot.slane %v3814_v34, 1  ;;  %vm16055_vm3 = vnez %v15938_v57  ;;  %v16071_v32 = vld [vmem:[#allocation9_spill] sm:$0xff] }
 0x376   :  { %vm12674_vm12 = vmand %vm16052_vm11, %vm16050_vm15  ;;  %v12682_v36 = vsel %vm16055_vm3, 1.0, %v15224_v51  ;;  %vm16056_vm5 = vnez %v15944_v3  ;;  %vm16058_vm6 = vcmp.le.s32.totalorder %v16057_v15, 6  ;;  %vm16060_vm15 = vnez %v16059_v28  ;;  %v16065_v28 = vld [vmem:[#allocation94_spill] sm:$0xff] }
 0x377   :  { %v16054_v30 = vsel %vm12674_vm12, 4294967295, %v16053_v30  ;;  %v12687_v10 = vsel %vm16056_vm5, 1.0, %v15224_v51  ;;  %vm12693_vm11 = vmand %vm16060_vm15, %vm16058_vm6  ;;  %vm16063_vm12 = vnez %v15956_v46  ;;  %v12705_v57 = vsel %vm12424_vm1, 1.0, %v15224_v51 }
 0x378   :  { %v12700_v41 = vsel %vm16063_vm12, 1.0, %v15224_v51  ;;  %v12710_v3 = vsel %vm12432_vm4, 1.0, %v15224_v51  ;;  %vm16064_vm3 = vnez %v15971_v12  ;;  %vm16066_vm5 = vcmp.ge.s32.totalorder %v16065_v28, 0  ;;  %v16075_v28 = vld [vmem:[#allocation114_spill] sm:$0xff] }
 0x379   :  { %v12715_v15 = vsel %vm16064_vm3, 1.0, %v15224_v51  ;;  %vm16067_vm12 = vnez %v15722_v0  ;;  %vm16072_vm1 = vcmp.lt.s32.totalorder %v16071_v32, 7  ;;  %v16073_v11 = vmax.f32 %v12630_v48, 0.0 }
 0x37a   :  { %vm12721_vm6 = vmand %vm16067_vm12, %vm16066_vm5  ;;  %v3841_v40 = vsel %vm16072_vm1, %v16070_v33, %v3830_v18  ;;  %v12735_v12 = vsel %vm12471_vm8, 1.0, %v15224_v51  ;;  %v12740_v0 = vsel %vm12497_vm2, 1.0, %v15224_v51  ;;  %vm16076_vm4 = vcmp.ge.s32.totalorder %v16075_v28, 0  ;;  %v16086_v28 = vld [vmem:[#allocation26_spill] sm:$0xff] }
 0x37b   :  { %v12730_v42 = vrot.slane %v16073_v11, 1  ;;  %16074 = vst [vmem:[#allocation93_spill] sm:$0xff] %v12740_v0  ;;  %vm16077_vm15 = vnez %v15748_v39  ;;  %v16080_v11 = vld [vmem:[#allocation157_spill] sm:$0xff]  ;;  %v12755_v50 = vsel %vm12525_vm7, 1.0, %v15224_v51  ;;  %v12760_v23 = vsel %vm12549_vm0, 1.0, %v15224_v51  ;;  %vm16088_vm12 = vmmov %vm16072_vm1 }
 0x37c   :  { %vm12746_vm3 = vmand %vm16077_vm15, %vm16076_vm4  ;;  %v16081_v6 = vmax.f32 %v16080_v11, 0.0  ;;  %16082 = vst [vmem:[#allocation132_spill] sm:$0xff] %v12755_v50  ;;  %v12765_v39 = vsel %vm12577_vm13, 1.0, %v15224_v51  ;;  %vm16085_vm8 = vcmp.le.s32.totalorder %v15521_v44, 6  ;;  %vm16087_vm2 = vnez %v16086_v28  ;;  %v16094_v11 = vld [vmem:[#allocation48_spill] sm:$0xff] }
 0x37d   :  { %16083 = vst [vmem:[#allocation19_spill] sm:$0xff] %v12760_v23  ;;  %16084 = vst [vmem:[#allocation41_spill] sm:$0xff] %v12765_v39  ;;  %v3840_v4 = vsel %vm16088_vm12, %v3830_v18, %v12730_v42  ;;  %v12777_v27 = vsel %vm12597_vm9, 1.0, %v15224_v51  ;;  %v12782_v59 = vsel %vm12625_vm14, 1.0, %v15224_v51  ;;  %v12787_v44 = vsel %vm12646_vm10, 1.0, %v15224_v51  ;;  %v16101_v23 = vld [vmem:[#allocation80_spill] sm:$0xff] }
 0x37e   :  { %v3861_v63 = vmax.f32 %v16081_v6, %v3841_v40  ;;  %vm1267_vm5 = vmand %vm16087_vm2, %vm16085_vm8  ;;  %16089 = vst [vmem:[#allocation55_spill] sm:$0xff] %v12777_v27  ;;  %vm16090_vm7 = vcmp.le.s32.totalorder %v15536_v60, 6  ;;  %v16091_v6 = vld [vmem:[#allocation167_spill] sm:$0xff]  ;;  %v12794_v55 = vmax.f32 %v3814_v34, %v3840_v4  ;;  %v4056_v28 = vmul.f32 %v16094_v11, %v12208_v26  ;;  %v5904_v60 = vpop.f32.mrb[24].mxu0 }
 0x37f   :  { %vm16092_vm0 = vnez %v16091_v6  ;;  %v16093_v40 = vld [vmem:[#allocation27_spill] sm:$0xff]  ;;  %vm16095_vm9 = vnez %v16054_v30  ;;  %vm16096_vm14 = vcmp.ge.s32.totalorder %v11381_v43, 0  ;;  %vm16097_vm10 = vnez %v15769_v13  ;;  %v5905_v30 = vpop.f32.mrb[25].mxu0 }
 0x380   :  { %vm1268_vm13 = vmand %vm16092_vm0, %vm16090_vm7  ;;  %v3876_v18 = vmax.f32 %v16093_v40, %v3861_v63  ;;  %v1281_v38 = vsel %vm16095_vm9, 1.0, %v15224_v51  ;;  %v1282_v14 = vsel %vm12693_vm11, 1.0, %v15224_v51  ;;  %v12811_v34 = vsel %vm12721_vm6, 1.0, %v15224_v51  ;;  %v5907_v40 = vpop.f32.mrb[26].mxu0 }
 0x381   :  { %vm1411_vm1 = vmand %vm16097_vm10, %vm16096_vm14  ;;  %v12816_v26 = vsel %vm12746_vm3, 1.0, %v15224_v51  ;;  %v12819_v43 = vsel %vm1267_vm5, 1.0, %v15224_v51  ;;  %v12822_v13 = vmax.f32 %v3861_v63, %v12794_v55  ;;  %v12825_v6 = vsel %vm1268_vm13, 1.0, %v15224_v51  ;;  %v5908_v39 = vpop.f32.mrb[27].mxu0  ;;  %v16106_v63 = vld [vmem:[#allocation136_spill] sm:$0xff] }
 0x382   :  { %v3892_v4 = vrot.slane %v3876_v18, 6  ;;  %v4023_v58 = vrot.slane %v3876_v18, 2  ;;  %v5906_v46 = vadd.f32 %v5905_v30, %v5904_v60  ;;  %v12828_v11 = vmul.f32 %v3876_v18, %v12218_v2 }
 0x383   :  { %v12831_v33 = vmul.f32 %v3876_v18, %v12275_v5  ;;  %v12834_v27 = vsel %vm1411_vm1, 1.0, %v15224_v51  ;;  %v16102_v50 = vrot.slane %v16101_v23, 6  ;;  %vm16103_vm11 = vcmp.lt.s32.totalorder %v16071_v32, 2 }
 0x384   :  { %16098 = vst [vmem:[#allocation99_spill] sm:$0xff] %v12828_v11  ;;  %16100 = vst [vmem:[#allocation115_spill] sm:$0xff] %v12834_v27  ;;  %v12843_v60 = vmul.f32 %v12822_v13, %v12223_v1  ;;  %v16104_v2 = vrot.slane %v16101_v23, 2  ;;  %vm16105_vm6 = vcmp.lt.s32.totalorder %v16071_v32, 6  ;;  %v3693_v30 = vadd.f32 %v12532_v62, %v5906_v46  ;;  %v16118_v11 = vld [vmem:[#allocation185_spill] sm:$0xff]  ;;  %v16125_v23 = vld [vmem:[#allocation72_spill] sm:$0xff] }
 0x385   :  { %16099 = vst [vmem:[#allocation89_spill] sm:$0xff] %v12831_v33  ;;  %v3908_v0 = vsel %vm16103_vm11, %v16102_v50, %v3892_v4  ;;  %v5909_v27 = vadd.f32 %v5908_v39, %v5907_v40  ;;  %v16108_v50 = vrot.slane %v12822_v13, 6  ;;  %vm16109_vm4 = vmmov %vm16103_vm11  ;;  %v12865_v46 = vmul.f32 %v12822_v13, %v12280_v19  ;;  %v16113_v39 = vld [vmem:[#allocation78_spill] sm:$0xff] }
 0x386   :  { %v4039_v5 = vsel %vm16105_vm6, %v16104_v2, %v4023_v58  ;;  %v12851_v21 = vmul.f32 %v3908_v0, %v12213_v9  ;;  %vm16110_vm15 = vcmp.ge.s32.totalorder %v15939_v7, 0  ;;  %v16111_v9 = vld [vmem:[#allocation145_spill] sm:$0xff]  ;;  %v3790_v40 = vadd.f32 %v16113_v39, %v3693_v30  ;;  %vm16136_vm11 = vmmov %vm16105_vm6 }
 0x387   :  { %v12854_v31 = vmul.f32 %v4039_v5, %v16106_v63  ;;  %v3907_v1 = vsel %vm16109_vm4, %v3892_v4, %v16108_v50  ;;  %v4341_v8 = vmul.f32 %v4039_v5, %v12270_v52  ;;  %vm16112_vm3 = vnez %v16111_v9  ;;  %v16114_v2 = vld [vmem:[#allocation161_spill] sm:$0xff]  ;;  %v16116_v52 = vld [vmem:[#allocation143_spill] sm:$0xff]  ;;  %v16129_v50 = vld [vmem:[#allocation52_spill] sm:$0xff] }
 0x388   :  { %vm1412_vm8 = vmand %vm16112_vm3, %vm16110_vm15  ;;  %v3696_v63 = vadd.f32 %v12532_v62, %v5909_v27  ;;  %v12874_v4 = vmul.f32 %v3907_v1, %v16114_v2  ;;  %vm16117_vm2 = vcmp.le.s32.totalorder %v16116_v52, 6  ;;  %vm16119_vm5 = vnez %v16118_v11  ;;  %v16122_v7 = vld [vmem:[#allocation149_spill] sm:$0xff] }
 0x389   :  { %16107 = vst [vmem:[#allocation61_spill] sm:$0xff] %v12854_v31  ;;  %vm12882_vm12 = vmand %vm16119_vm5, %vm16117_vm2  ;;  %v4354_v9 = vpack.c.bf16 %v4341_v8, %v16122_v7  ;;  %v14332_v27 = vrot.slane %v12822_v13, 2  ;;  %v4057_v39 = vmul.f32 %v4039_v5, %v12668_v54  ;;  %v16123_v2 = vld [vmem:[#allocation173_spill] sm:$0xff]  ;;  %vm16126_vm0 = vnez %v16125_v23  ;;  %v16143_v8 = vld [vmem:[#allocation60_spill] sm:$0xff] }
 0x38a   :  { %vm16124_vm7 = vcmp.le.s32.totalorder %v16123_v2, 6  ;;  %v3816_v11 = vmax.f32 %v3790_v40, 0.0  ;;  %v12900_v31 = vadd.f32 %v16129_v50, %v3696_v63  ;;  %v12905_v7 = vsel %vm1412_vm8, 1.0, %v15224_v51  ;;  %v16131_v54 = vld [vmem:[#allocation73_spill] sm:$0xff]  ;;  %v16137_v2 = vld [vmem:[#allocation135_spill] sm:$0xff] }
 0x38b   :  { %vm12895_vm13 = vmand %vm16126_vm0, %vm16124_vm7  ;;  %vm16130_vm9 = vcmp.ge.s32.totalorder %v15960_v53, 0  ;;  %vm16132_vm14 = vnez %v16131_v54  ;;  %vm16135_vm1 = vcmask 523264   ;;  %v4038_v23 = vsel %vm16136_vm11, %v4023_v58, %v14332_v27  ;;  %v16139_v53 = vld [vmem:[#allocation54_spill] sm:$0xff] }
 0x38c   :  { %vm12911_vm10 = vmand %vm16132_vm14, %vm16130_vm9  ;;  %4362 = vst.msk [vmem:[#allocation3 + $0x70] sm:$0xff] %vm16135_vm1, %v4354_v9  ;;  %v4068_v40 = vpack.c.bf16 %v4057_v39, %v4056_v28  ;;  %v3927_v63 = vmul.f32 %v3908_v0, %v12682_v36  ;;  %v3928_v50 = vmul.f32 %v3907_v1, %v12687_v10  ;;  %vm16138_vm6 = vcmp.ge.s32.totalorder %v16137_v2, 0  ;;  %v16144_v28 = vld [vmem:[#allocation153_spill] sm:$0xff]  ;;  %v16146_v36 = vld [vmem:[#allocation182_spill] sm:$0xff] }
 0x38d   :  { %vm16140_vm4 = vnez %v16139_v53  ;;  %v3832_v30 = vrot.slane %v3816_v11, 1  ;;  %v3817_v9 = vmax.f32 %v12900_v31, 0.0  ;;  %v12932_v33 = vmul.f32 %v4038_v23, %v16143_v8  ;;  %vm16150_vm5 = vmmov %vm16135_vm1  ;;  %v16151_v8 = vld [vmem:[#allocation25_spill] sm:$0xff] }
 0x38e   :  { %vm12926_vm15 = vmand %vm16140_vm4, %vm16138_vm6  ;;  %v4152_v58 = vmul.f32 %v3876_v18, %v1281_v38  ;;  %vm16145_vm3 = vcmp.le.s32.totalorder %v16144_v28, 6  ;;  %vm16147_vm8 = vnez %v16146_v36  ;;  %4076 = vst.msk [vmem:[#allocation3 + $0xa8] sm:$0xff] %vm16150_vm5, %v4068_v40  ;;  %v3938_v39 = vpack.c.bf16 %v3928_v50, %v3927_v63  ;;  %v16153_v18 = vld [vmem:[#allocation18_spill] sm:$0xff] }
 0x38f   :  { %vm12938_vm2 = vmand %vm16147_vm8, %vm16145_vm3  ;;  %v4246_v2 = vmul.f32 %v3908_v0, %v12782_v59  ;;  %v4247_v53 = vmul.f32 %v3907_v1, %v12787_v44  ;;  %v4153_v27 = vmul.f32 %v12822_v13, %v1282_v14  ;;  %vm16152_vm7 = vcmp.le.s32.totalorder %v16151_v8, 6  ;;  %v5910_v0 = vpop.f32.mrb[28].mxu0  ;;  %v16159_v14 = vld [vmem:[#allocation53_spill] sm:$0xff] }
 0x390   :  { %vm16154_vm0 = vnez %v16153_v18  ;;  %vm16157_vm14 = vcmp.lt.s32.totalorder %v16071_v32, 7  ;;  %v3833_v40 = vrot.slane %v3817_v9, 1  ;;  %v12962_v59 = vsel %vm12882_vm12, 1.0, %v15224_v51  ;;  %v5911_v50 = vpop.f32.mrb[29].mxu0  ;;  %vm16164_vm4 = vmmov %vm16150_vm5 }
 0x391   :  { %vm12950_vm9 = vmand %vm16154_vm0, %vm16152_vm7  ;;  %v3839_v28 = vsel %vm16157_vm14, %v12730_v42, %v3832_v30  ;;  %v12967_v44 = vsel %vm12895_vm13, 1.0, %v15224_v51  ;;  %vm16158_vm1 = vcmp.ge.s32.totalorder %v15997_v20, 0  ;;  %vm16160_vm11 = vnez %v16159_v14  ;;  %3947 = vst.msk [vmem:[#allocation3 + $0xc8] sm:$0xff] %vm16164_vm4, %v3938_v39  ;;  %v5913_v18 = vpop.f32.mrb[30].mxu0  ;;  %v16169_v14 = vld [vmem:[#allocation38_spill] sm:$0xff] }
 0x392   :  { %vm12973_vm6 = vmand %vm16160_vm11, %vm16158_vm1  ;;  %v16163_v1 = vmax.f32 %v12630_v48, 0.0  ;;  %v4259_v19 = vpack.c.bf16 %v4247_v53, %v4246_v2  ;;  %v4164_v36 = vpack.c.bf16 %v4153_v27, %v4152_v58  ;;  %v12983_v52 = vsel %vm12911_vm10, 1.0, %v15224_v51  ;;  %v5914_v58 = vpop.f32.mrb[31].mxu0 }
 0x393   :  { %vm16165_vm12 = vmmov %vm16157_vm14  ;;  %v5912_v8 = vadd.f32 %v5911_v50, %v5910_v0  ;;  %v12990_v48 = vsel %vm12926_vm15, 1.0, %v15224_v51  ;;  %v12995_v39 = vsel %vm12938_vm2, 1.0, %v15224_v51  ;;  %v13008_v54 = vsel %vm12973_vm6, 1.0, %v15224_v51  ;;  %v16170_v50 = vld [vmem:[#allocation36_spill] sm:$0xff] }
 0x394   :  { %v3863_v63 = vmax.f32 %v16163_v1, %v3839_v28  ;;  %v3838_v20 = vsel %vm16165_vm12, %v3832_v30, %v3833_v40  ;;  %vm16166_vm13 = vmmov %vm16164_vm4  ;;  %v13003_v30 = vsel %vm12950_vm9, 1.0, %v15224_v51  ;;  %v5915_v2 = vadd.f32 %v5914_v58, %v5913_v18  ;;  %v16177_v58 = vld [vmem:[#allocation64_spill] sm:$0xff] }
 0x395   :  { %v3864_v5 = vmax.f32 %v3816_v11, %v3838_v20  ;;  %4267 = vst.msk [vmem:[#allocation3 + $0x90] sm:$0xff] %vm16166_vm13, %v4259_v19  ;;  %vm16167_vm10 = vmmov %vm16164_vm4  ;;  %v3701_v10 = vadd.f32 %v12532_v62, %v5912_v8  ;;  %v4058_v53 = vmul.f32 %v4038_v23, %v12700_v41  ;;  %v16172_v41 = vrot.slane %v12822_v13, 6 }
 0x396   :  { %v3878_v27 = vmax.f32 %v12794_v55, %v3863_v63  ;;  %4172 = vst.msk [vmem:[#allocation3 + $0xb0] sm:$0xff] %vm16167_vm10, %v4164_v36  ;;  %v16168_v55 = vld [vmem:[#allocation151_spill] sm:$0xff]  ;;  %v3704_v42 = vadd.f32 %v12532_v62, %v5915_v2  ;;  %vm16173_vm15 = vcmp.lt.s32.totalorder %v16071_v32, 2  ;;  %v16175_v18 = vrot.slane %v12822_v13, 2  ;;  %vm16181_vm2 = vmmov %vm16165_vm12 }
 0x397   :  { %v4342_v11 = vmul.f32 %v4038_v23, %v16168_v55  ;;  %v13013_v28 = vmax.f32 %v3863_v63, %v3864_v5  ;;  %v3798_v19 = vadd.f32 %v16170_v50, %v3701_v10  ;;  %v16174_v63 = vld [vmem:[#allocation62_spill] sm:$0xff]  ;;  %vm16176_vm3 = vcmp.lt.s32.totalorder %v16071_v32, 6  ;;  %vm16179_vm8 = vmmov %vm16173_vm15 }
 0x398   :  { %v3894_v0 = vrot.slane %v3878_v27, 6  ;;  %v13016_v1 = vmul.f32 %v3878_v27, %v16169_v14  ;;  %v4025_v38 = vrot.slane %v3878_v27, 2  ;;  %v13021_v51 = vmul.f32 %v3878_v27, %v12483_v25  ;;  %vm16182_vm5 = vmmov %vm16164_vm4 }
 0x399   :  { %v13024_v36 = vmul.f32 %v3878_v27, %v12819_v43  ;;  %v3895_v20 = vrot.slane %v13013_v28, 6  ;;  %v13033_v8 = vmul.f32 %v13013_v28, %v16174_v63  ;;  %v3818_v62 = vmax.f32 %v3798_v19, 0.0  ;;  %v16178_v27 = vld [vmem:[#allocation40_spill] sm:$0xff]  ;;  %vm16183_vm7 = vmmov %vm16176_vm3 }
 0x39a   :  { %16171 = vst [vmem:[#allocation108_spill] sm:$0xff] %v13021_v51  ;;  %v3906_v23 = vsel %vm16173_vm15, %v16172_v41, %v3894_v0  ;;  %v4037_v25 = vsel %vm16176_vm3, %v16175_v18, %v4025_v38  ;;  %v3801_v43 = vadd.f32 %v16177_v58, %v3704_v42  ;;  %v13055_v50 = vmul.f32 %v13013_v28, %v12488_v45  ;;  %v16180_v41 = vld [vmem:[#allocation32_spill] sm:$0xff]  ;;  %vm16184_vm0 = vmmov %vm16181_vm2  ;;  %v16212_v45 = vld [vmem:[#allocation103_spill] sm:$0xff] }
 0x39b   :  { %v13041_v10 = vmul.f32 %v3906_v23, %v16178_v27  ;;  %v13044_v2 = vmul.f32 %v4037_v25, %v12457_v29  ;;  %v3905_v55 = vsel %vm16179_vm8, %v3894_v0, %v3895_v20  ;;  %v4343_v14 = vmul.f32 %v4037_v25, %v12462_v35  ;;  %v6188_v0 = vld [vmem:[%s13775_s5 + $0x28] sm:$0xff]   ;;  %v6189_v35 = vld [vmem:[%s13775_s5 + $0x90] sm:$0xff]   ;;  %vm16186_vm9 = vmmov %vm16184_vm0 }
 0x39c   :  { %v3834_v19 = vrot.slane %v3818_v62, 1  ;;  %v3819_v42 = vmax.f32 %v3801_v43, 0.0  ;;  %v13058_v63 = vmul.f32 %v3905_v55, %v16180_v41  ;;  %v4026_v58 = vrot.slane %v13013_v28, 2  ;;  %5937 = vmatpush3.bf16.msra.mxu1 %v6188_v0  ;;  %5995 = vmatpush3.bf16.msra.mxu0 %v6189_v35  ;;  %v16185_v35 = vld [vmem:[#allocation59_spill] sm:$0xff]  ;;  %vm16189_vm14 = vmmov %vm16164_vm4  ;;  %v16213_v29 = vld [vmem:[#allocation84_spill] sm:$0xff] }
 0x39d   :  { %v4355_v18 = vpack.c.bf16 %v4343_v14, %v4342_v11  ;;  %v4059_v43 = vmul.f32 %v4037_v25, %v12705_v57  ;;  %v3929_v13 = vmul.f32 %v3906_v23, %v12710_v3  ;;  %v6190_v57 = vld [vmem:[%s13775_s5 + $0x70] sm:$0xff]   ;;  %v3930_v25 = vmul.f32 %v3905_v55, %v12715_v15  ;;  %v16187_v3 = vld [vmem:[#allocation159_spill] sm:$0xff]  ;;  %vm16191_vm1 = vmmov %vm16164_vm4 }
 0x39e   :  { %v3837_v27 = vsel %vm16181_vm2, %v3833_v40, %v3834_v19  ;;  %v3835_v41 = vrot.slane %v3819_v42, 1  ;;  %v4036_v14 = vsel %vm16183_vm7, %v4025_v38, %v4026_v58  ;;  %v6191_v38 = vld [vmem:[%s13775_s5 + $0x30] sm:$0xff]   ;;  %5938 = vmatprep.subr.bf16.mxu1 %v6190_v57  ;;  %vm16196_vm11 = vmmov %vm16179_vm8 }
 0x39f   :  { %v3865_v11 = vmax.f32 %v3817_v9, %v3837_v27  ;;  %4363 = vst.msk [vmem:[#allocation3 + $0x98] sm:$0xff] %vm16182_vm5, %v4355_v18  ;;  %v4069_v40 = vpack.c.bf16 %v4059_v43, %v4058_v53  ;;  %v13092_v9 = vmul.f32 %v4036_v14, %v16187_v3  ;;  %v16188_v18 = vld [vmem:[#allocation65_spill] sm:$0xff]  ;;  %v4249_v3 = vmul.f32 %v3905_v55, %v12816_v26  ;;  %v16192_v26 = vld [vmem:[#allocation15_spill] sm:$0xff]  ;;  %vm16198_vm6 = vmmov %vm16176_vm3 }
 0x3a0   :  { %v3836_v0 = vsel %vm16184_vm0, %v3834_v19, %v3835_v41  ;;  %v3851_v31 = vsel %vm16186_vm9, %v3835_v41, %v16185_v35  ;;  %v13095_v27 = vmul.f32 %v4036_v14, %v16188_v18  ;;  %v3939_v19 = vpack.c.bf16 %v3930_v25, %v3929_v13  ;;  %5939 = vmatpush3.bf16.msra.mxu1 %v6191_v38  ;;  %v16194_v25 = vld [vmem:[#allocation131_spill] sm:$0xff]  ;;  %vm16199_vm4 = vmmov %vm16191_vm1  ;;  %v16214_v51 = vld [vmem:[#allocation74_spill] sm:$0xff] }
 0x3a1   :  { %v13100_v53 = vmax.f32 %v3864_v5, %v3865_v11  ;;  %v3866_v15 = vmax.f32 %v3818_v62, %v3836_v0  ;;  %v3867_v43 = vmax.f32 %v3819_v42, %v3851_v31  ;;  %4077 = vst.msk [vmem:[#allocation3 + $0xd0] sm:$0xff] %vm16189_vm14, %v4069_v40  ;;  %v13104_v41 = vmul.f32 %v4036_v14, %v12735_v12  ;;  %v16190_v42 = vld [vmem:[#allocation85_spill] sm:$0xff]  ;;  %v6192_v12 = vld [vmem:[%s13775_s5 + $0x78] sm:$0xff]   ;;  %vm16202_vm12 = vmmov %vm16179_vm8 }
 0x3a2   :  { %v4248_v35 = vmul.f32 %v3906_v23, %v12811_v34  ;;  %v13110_v18 = vmul.f32 %v13013_v28, %v12825_v6  ;;  %v6193_v34 = vld [vmem:[%s13775_s5 + $0xd8] sm:$0xff]   ;;  %3948 = vst.msk [vmem:[#allocation3 + $0xf0] sm:$0xff] %vm16191_vm1, %v3939_v19  ;;  %v16195_v31 = vld [vmem:[#allocation37_spill] sm:$0xff]  ;;  %5940 = vmatprep.subr.bf16.mxu1 %v6192_v12  ;;  %vm16203_vm13 = vmmov %vm16179_vm8 }
 0x3a3   :  { %v13112_v5 = vmax.f32 %v3865_v11, %v3866_v15  ;;  %v13114_v62 = vmax.f32 %v3866_v15, %v3867_v43  ;;  %v13117_v57 = vmax.f32 %v3867_v43, %v16190_v42  ;;  %v3896_v13 = vrot.slane %v13100_v53, 6  ;;  %v6194_v11 = vld [vmem:[%s13775_s5 + $0x38] sm:$0xff]   ;;  %5996 = vmatprep.subr.bf16.mxu0 %v6193_v34  ;;  %v16197_v19 = vld [vmem:[#allocation125_spill] sm:$0xff]  ;;  %vm16208_vm10 = vmmov %vm16179_vm8 }
 0x3a4   :  { %v13129_v6 = vmul.f32 %v13100_v53, %v16192_v26  ;;  %v4027_v23 = vrot.slane %v13100_v53, 2  ;;  %v13134_v55 = vmul.f32 %v13100_v53, %v12538_v47  ;;  %v6195_v14 = vld [vmem:[%s13775_s5 + $0x98] sm:$0xff]   ;;  %v4260_v40 = vpack.c.bf16 %v4249_v3, %v4248_v35  ;;  %5941 = vmatpush3.bf16.msra.mxu1 %v6194_v11  ;;  %v16206_v11 = vld [vmem:[#allocation12_spill] sm:$0xff]  ;;  %vm16209_vm15 = vmmov %vm16179_vm8 }
 0x3a5   :  { %v3950_v0 = vmul.f32 %v13114_v62, %v16194_v25  ;;  %v3951_v38 = vmul.f32 %v13117_v57, %v16195_v31  ;;  %v3899_v15 = vrot.slane %v13117_v57, 6  ;;  %v3897_v47 = vrot.slane %v13112_v5, 6  ;;  %5997 = vmatpush3.bf16.msra.mxu0 %v6195_v14  ;;  %v16200_v28 = vld [vmem:[#allocation71_spill] sm:$0xff]  ;;  %v16204_v25 = vld [vmem:[#allocation33_spill] sm:$0xff]  ;;  %vm16221_vm3 = vmmov %vm16191_vm1 }
 0x3a6   :  { %16193 = vst [vmem:[#allocation140_spill] sm:$0xff] %v13134_v55  ;;  %v13152_v43 = vsel %vm16196_vm11, %v3895_v20, %v3896_v13  ;;  %v13156_v35 = vmul.f32 %v13112_v5, %v16197_v19  ;;  %v3898_v3 = vrot.slane %v13114_v62, 6  ;;  %v13161_v42 = vsel %vm16198_vm6, %v4026_v58, %v4027_v23  ;;  %4268 = vst.msk [vmem:[#allocation3 + $0xb8] sm:$0xff] %vm16199_vm4, %v4260_v40  ;;  %v13181_v58 = vld [vmem:[%s13775_s5 + $0x100] sm:$0xff]   ;;  %v16207_v40 = vld [vmem:[#allocation14_spill] sm:$0xff] }
 0x3a7   :  { %v3966_v12 = vpack.c.bf16 %v3951_v38, %v3950_v0  ;;  %v16201_v34 = vrot.slane %v16200_v28, 6  ;;  %v13172_v26 = vsel %vm16203_vm13, %v3896_v13, %v3897_v47  ;;  %v13176_v31 = vmul.f32 %v13152_v43, %v16204_v25  ;;  %16205 = vst [vmem:[#allocation69_spill] sm:$0xff] %v13181_v58  ;;  %6108 = vmatprep.subr.bf16.mxu1 %v13181_v58  ;;  %vm16222_vm8 = vmmov %vm16198_vm6 }
 0x3a8   :  { %v13187_v0 = vmul.f32 %v13172_v26, %v16207_v40  ;;  %v13193_v38 = vsel %vm16208_vm10, %v3898_v3, %v3899_v15  ;;  %v13198_v19 = vsel %vm16209_vm15, %v3897_v47, %v3898_v3  ;;  %v4345_v13 = vmul.f32 %v13161_v42, %v16212_v45  ;;  %vm16223_vm2 = vmmov %vm16198_vm6 }
 0x3a9   :  { %v13168_v20 = vsel %vm16202_vm12, %v3899_v15, %v16201_v34  ;;  %3982 = vrot.lane.b32.xlu1 %v3966_v12, %s6313_s15  ;;  %v16210_v34 = vld [vmem:[#allocation34_spill] sm:$0xff]  ;;  %v13215_v47 = vmul.f32 %v13198_v19, %v16214_v51  ;;  %v13219_v3 = vmul.f32 %v13112_v5, %v12543_v24  ;;  %v6197_v51 = vld [vmem:[%s13775_s5 + $0xe0] sm:$0xff]   ;;  %v3917_v24 = vmul.f32 %v13198_v19, %v12635_v49  ;;  %vm16226_vm5 = vmmov %vm16223_vm2 }
 0x3aa   :  { %v4080_v14 = vmul.f32 %v13168_v20, %v16206_v11  ;;  %v13202_v25 = vmul.f32 %v13193_v38, %v16210_v34  ;;  %v16211_v11 = vld [vmem:[#allocation39_spill] sm:$0xff]  ;;  %v4356_v45 = vpack.c.bf16 %v4345_v13, %v13095_v27  ;;  %v13237_v34 = vmul.f32 %v13114_v62, %v12586_v61  ;;  %5998 = vmatprep.subr.bf16.mxu0 %v6197_v51  ;;  %vm16228_vm7 = vmmov %vm16223_vm2 }
 0x3ab   :  { %v13206_v40 = vmul.f32 %v13161_v42, %v16211_v11  ;;  %16215 = vst [vmem:[#allocation66_spill] sm:$0xff] %v13219_v3  ;;  %v13241_v27 = vmul.f32 %v13117_v57, %v12604_v56  ;;  %v6198_v13 = vld [vmem:[%s13775_s5 + $0xa0] sm:$0xff]   ;;  %v4030_v56 = vrot.slane %v13117_v57, 2  ;;  %v16227_v49 = vrot.slane %v16200_v28, 2  ;;  %vm16242_vm0 = vmmov %vm16191_vm1 }
 0x3ac   :  { %v4096_v15 = vpack.c.bf16 %v16213_v29, %v4080_v14  ;;  %v4028_v29 = vrot.slane %v13112_v5, 2  ;;  %v4029_v14 = vrot.slane %v13114_v62, 2  ;;  %16216 = vst [vmem:[#allocation87_spill] sm:$0xff] %v13237_v34  ;;  %v16219_v12 = vld [vmem:[#allocation95_spill] sm:$0xff]  ;;  %4364 = vst.msk [vmem:[#allocation3 + $0xc0] sm:$0xff] %vm16221_vm3, %v4356_v45  ;;  %5999 = vmatpush3.bf16.msra.mxu0 %v6198_v13 }
 0x3ad   :  { %16217 = vst [vmem:[#allocation92_spill] sm:$0xff] %v13241_v27  ;;  %v16229_v51 = vld [vmem:[#allocation47_spill] sm:$0xff]  ;;  %vm16246_vm9 = vmmov %vm16242_vm0 }
 0x3ae   :  { %4112 = vrot.lane.b32.xlu0 %v4096_v15, %s6313_s15  ;;  %v16218_v15 = vld [vmem:[#allocation81_spill] sm:$0xff]  ;;  %v4033_v11 = vsel %vm16222_vm8, %v4028_v29, %v4029_v14  ;;  %v4034_v61 = vsel %vm16223_vm2, %v4027_v23, %v4028_v29  ;;  %v4032_v29 = vsel %vm16226_vm5, %v4029_v14, %v4030_v56  ;;  %v16233_v23 = vld [vmem:[#allocation183_spill] sm:$0xff]  ;;  %v16235_v14 = vld [vmem:[#allocation42_spill] sm:$0xff]  ;;  %vm4006_vm5 = vcmask 1048064  }
 0x3af   :  { %v16220_v58 = vpack.c.bf16 %v16218_v15, %v16219_v12  ;;  %v13259_v55 = vmul.f32 %v4034_v61, %v12556_v22  ;;  %v13262_v12 = vmul.f32 %v4033_v11, %v12561_v16  ;;  %v4347_v45 = vmul.f32 %v4033_v11, %v12571_v37  ;;  %v16230_v15 = vld [vmem:[#allocation111_spill] sm:$0xff]  ;;  %vm16258_vm14 = vmmov %vm16242_vm0 }
 0x3b0   :  { %v4047_v22 = vsel %vm16228_vm7, %v4030_v56, %v16227_v49  ;;  %v3918_v16 = vmul.f32 %v13193_v38, %v16229_v51  ;;  %v13283_v34 = vmul.f32 %v4032_v29, %v16233_v23  ;;  %v6199_v56 = vld [vmem:[%s13775_s5 + $0xe8] sm:$0xff]   ;;  %v16236_v49 = vld [vmem:[#allocation82_spill] sm:$0xff]  ;;  %v16237_v51 = vld [vmem:[#allocation79_spill] sm:$0xff] }
 0x3b1   :  { %3984 = vrot.lane.b32.xlu1 %v16220_v58, %s6313_s15  ;;  %16224 = vst [vmem:[#allocation112_spill] sm:$0xff] %v13259_v55  ;;  %16225 = vst [vmem:[#allocation58_spill] sm:$0xff] %v13262_v12  ;;  %v4346_v58 = vmul.f32 %v4034_v61, %v12566_v17  ;;  %v16231_v17 = vld [vmem:[#allocation105_spill] sm:$0xff]  ;;  %v13286_v28 = vmul.f32 %v4047_v22, %v16235_v14  ;;  %v16238_v32 = vpack.c.bf16 %v16236_v49, %v16237_v51  ;;  %v16243_v55 = vld [vmem:[#allocation150_spill] sm:$0xff] }
 0x3b2   :  { %v16232_v3 = vpack.c.bf16 %v16230_v15, %v16231_v17  ;;  %16234 = vst [vmem:[#allocation86_spill] sm:$0xff] %v13283_v34  ;;  %v16240_v17 = vld [vmem:[#allocation184_spill] sm:$0xff]  ;;  %v4048_v12 = vmul.f32 %v4032_v29, %v16243_v55  ;;  %6000 = vmatprep.subr.bf16.mxu0 %v6199_v56  ;;  %v16245_v51 = vld [vmem:[#allocation93_spill] sm:$0xff]  ;;  %v16250_v55 = vld [vmem:[#allocation134_spill] sm:$0xff] }
 0x3b3   :  { %v4357_v13 = vpack.c.bf16 %v4347_v45, %v4346_v58  ;;  %v4349_v37 = vmul.f32 %v4047_v22, %v16240_v17  ;;  %v3933_v58 = vpack.c.bf16 %v3918_v16, %v3917_v24  ;;  %v16241_v45 = vld [vmem:[#allocation128_spill] sm:$0xff]  ;;  %v4061_v24 = vmul.f32 %v13161_v42, %v16245_v51  ;;  %v16253_v34 = vld [vmem:[#allocation117_spill] sm:$0xff]  ;;  %v16255_v51 = vld [vmem:[#allocation98_spill] sm:$0xff] }
 0x3b4   :  { %4114 = vrot.lane.b32.xlu0 %v16232_v3, %s6313_s15  ;;  %v16239_v3 = vld [vmem:[#allocation152_spill] sm:$0xff]  ;;  %v4049_v23 = vmul.f32 %v4047_v22, %v16241_v45  ;;  %v16249_v45 = vld [vmem:[#allocation41_spill] sm:$0xff]  ;;  %vm16260_vm1 = vmmov %vm16242_vm0 }
 0x3b5   :  { %3986 = vrot.lane.b32.xlu1 %v16238_v32, %s6313_s15  ;;  %v4348_v15 = vmul.f32 %v4032_v29, %v16239_v3  ;;  %v6200_v14 = vld [vmem:[%s13775_s5 + $0xa8] sm:$0xff]   ;;  %4365 = vst.msk [vmem:[#allocation3 + $0xe8] sm:$0xff] %vm16242_vm0, %v4357_v13  ;;  %v16248_v13 = vld [vmem:[#allocation19_spill] sm:$0xff]  ;;  %v4062_v27 = vmul.f32 %v4034_v61, %v16249_v45  ;;  %v4251_v45 = vmul.f32 %v13172_v26, %v12905_v7  ;;  %vm16261_vm11 = vmmov %vm16242_vm0 }
 0x3b6   :  { %v16244_v49 = vld [vmem:[#allocation68_spill] sm:$0xff]  ;;  %3942 = vst.msk [vmem:[#allocation3] sm:$0xff] %vm16246_vm9, %v3933_v58  ;;  %6001 = vmatpush3.bf16.msra.mxu0 %v6200_v14  ;;  %v3932_v17 = vmul.f32 %v13172_v26, %v16248_v13  ;;  %v4064_v56 = vpack.c.bf16 %v4049_v23, %v4048_v12  ;;  %v4070_v58 = vpack.c.bf16 %v4061_v24, %v13104_v41  ;;  %v16254_v14 = vld [vmem:[#allocation55_spill] sm:$0xff]  ;;  %vm16262_vm6 = vmmov %vm16242_vm0 }
 0x3b7   :  { %v3919_v32 = vmul.f32 %v13168_v20, %v16244_v49  ;;  %v4358_v16 = vpack.c.bf16 %v4349_v37, %v4348_v15  ;;  %v16247_v22 = vld [vmem:[#allocation132_spill] sm:$0xff]  ;;  %v6201_v37 = vld [vmem:[%s13775_s5 + $0xf0] sm:$0xff]   ;;  %v4063_v61 = vmul.f32 %v4033_v11, %v16254_v14  ;;  %v4165_v12 = vpack.c.bf16 %v13110_v18, %v13024_v36  ;;  %v16259_v23 = vld [vmem:[#allocation115_spill] sm:$0xff] }
 0x3b8   :  { %v3931_v3 = vmul.f32 %v13152_v43, %v16247_v22  ;;  %v16251_v29 = vld [vmem:[#allocation124_spill] sm:$0xff]  ;;  %v6202_v15 = vld [vmem:[%s13775_s5 + $0xb0] sm:$0xff]   ;;  %4072 = vst.msk [vmem:[#allocation3 + $0x8] sm:$0xff] %vm16260_vm1, %v4064_v56  ;;  %6002 = vmatprep.subr.bf16.mxu0 %v6201_v37  ;;  %v4156_v11 = vmul.f32 %v13100_v53, %v12962_v59  ;;  %v4157_v36 = vmul.f32 %v13112_v5, %v12967_v44  ;;  %vm16263_vm4 = vmmov %vm16242_vm0 }
 0x3b9   :  { %v16252_v49 = vpack.c.bf16 %v16250_v55, %v16251_v29  ;;  %v3934_v42 = vpack.c.bf16 %v16253_v34, %v3919_v32  ;;  %v16256_v22 = vld [vmem:[#allocation118_spill] sm:$0xff]  ;;  %4366 = vst.msk [vmem:[#allocation3 + $0x110] sm:$0xff] %vm16258_vm14, %v4358_v16  ;;  %v4250_v32 = vmul.f32 %v13152_v43, %v16259_v23  ;;  %v4071_v41 = vpack.c.bf16 %v4063_v61, %v4062_v27  ;;  %vm16264_vm12 = vmmov %vm16242_vm0  ;;  %v16265_v44 = vld [vmem:[#allocation23_spill] sm:$0xff] }
 0x3ba   :  { %v16257_v13 = vpack.c.bf16 %v16255_v51, %v16256_v22  ;;  %v3940_v34 = vpack.c.bf16 %v3932_v17, %v3931_v3  ;;  %4078 = vst.msk [vmem:[#allocation3 + $0xf8] sm:$0xff] %vm16262_vm6, %v4070_v58  ;;  %v4252_v18 = vmul.f32 %v13198_v19, %v12983_v52  ;;  %6003 = vmatpush3.bf16.msra.mxu0 %v6202_v15  ;;  %v16266_v53 = vld [vmem:[#allocation45_spill] sm:$0xff]  ;;  %v6204_v52 = vld [vmem:[%s13775_s5 + $0xf8] sm:$0xff]   ;;  %vm16268_vm13 = vmmov %vm16242_vm0 }
 0x3bb   :  { %4116 = vrot.lane.b32.xlu0 %v16252_v49, %s6313_s15  ;;  %3943 = vst.msk [vmem:[#allocation3 + $0x28] sm:$0xff] %vm16261_vm11, %v3934_v42  ;;  %v4261_v7 = vpack.c.bf16 %v4251_v45, %v4250_v32  ;;  %v4253_v43 = vmul.f32 %v13193_v38, %v12990_v48  ;;  %v4158_v26 = vmul.f32 %v13114_v62, %v12995_v39  ;;  %v16269_v39 = vld [vmem:[#allocation169_spill] sm:$0xff]  ;;  %v16270_v62 = vld [vmem:[#allocation186_spill] sm:$0xff]  ;;  %vm16272_vm10 = vmmov %vm16242_vm0 }
 0x3bc   :  { %3988 = vrot.lane.b32.xlu1 %v16257_v13, %s6313_s15  ;;  %3949 = vst.msk [vmem:[#allocation3 + $0x118] sm:$0xff] %vm16263_vm4, %v3940_v34  ;;  %v4159_v59 = vmul.f32 %v13117_v57, %v13003_v30  ;;  %v16267_v5 = vpack.c.bf16 %v16265_v44, %v16266_v53  ;;  %v4166_v19 = vpack.c.bf16 %v4157_v36, %v4156_v11  ;;  %v6205_v30 = vld [vmem:[%s13775_s5 + $0xb8] sm:$0xff]   ;;  %vm16273_vm15 = vmmov %vm16242_vm0  ;;  %v16280_v3 = vld [vmem:[#allocation101_spill] sm:$0xff] }
 0x3bd   :  { %4173 = vst.msk [vmem:[#allocation3 + $0xd8] sm:$0xff] %vm16264_vm12, %v4165_v12  ;;  %v4254_v48 = vmul.f32 %v13168_v20, %v13008_v54  ;;  %v16271_v38 = vpack.c.bf16 %v16269_v39, %v16270_v62  ;;  %v4262_v57 = vpack.c.bf16 %v4253_v43, %v4252_v18  ;;  %6004 = vmatprep.subr.bf16.mxu0 %v6204_v52  ;;  %v16274_v24 = vld [vmem:[#allocation110_spill] sm:$0xff]  ;;  %vm16275_vm3 = vmmov %vm16242_vm0  ;;  %v16279_v20 = vld [vmem:[#allocation120_spill] sm:$0xff] }
 0x3be   :  { %4079 = vst.msk [vmem:[#allocation3 + $0x120] sm:$0xff] %vm16268_vm13, %v4071_v41  ;;  %v4167_v27 = vpack.c.bf16 %v4159_v59, %v4158_v26  ;;  %6005 = vmatpush3.bf16.msra.mxu0 %v6205_v30  ;;  %vm16276_vm8 = vmmov %vm16242_vm0  ;;  %v16277_v54 = vpack.c.bf16 %v12874_v4, %v12851_v21  ;;  %v16281_v17 = vpack.c.bf16 %v16279_v20, %v16280_v3  ;;  %v16282_v55 = vld [vmem:[#allocation102_spill] sm:$0xff]  ;;  %v16283_v29 = vld [vmem:[#allocation96_spill] sm:$0xff] }
 0x3bf   :  { %4118 = vrot.lane.b32.xlu0 %v16267_v5, %s6313_s15  ;;  %4269 = vst.msk [vmem:[#allocation3 + $0xe0] sm:$0xff] %vm16272_vm10, %v4261_v7  ;;  %v4263_v16 = vpack.c.bf16 %v16274_v24, %v4254_v48  ;;  %vm16278_vm2 = vmmov %vm16242_vm0  ;;  %v16284_v49 = vpack.c.bf16 %v16282_v55, %v16283_v29  ;;  %v16285_v56 = vld [vmem:[#allocation99_spill] sm:$0xff]  ;;  %v16287_v21 = vpack.c.bf16 %v13058_v63, %v13041_v10  ;;  %v16289_v37 = vld [vmem:[#allocation106_spill] sm:$0xff] }
 0x3c0   :  { %3990 = vrot.lane.b32.xlu1 %v16271_v38, %s6313_s15  ;;  %4174 = vst.msk [vmem:[#allocation3 + $0x100] sm:$0xff] %vm16273_vm15, %v4166_v19  ;;  %v16286_v42 = vpack.c.bf16 %v12843_v60, %v16285_v56  ;;  %v16288_v4 = vld [vmem:[#allocation119_spill] sm:$0xff]  ;;  %v16291_v58 = vld [vmem:[#allocation104_spill] sm:$0xff]  ;;  %v16294_v60 = vpack.c.bf16 %v13033_v8, %v13016_v1  ;;  %v16295_v10 = vpack.c.bf16 %v13187_v0, %v13176_v31  ;;  %v16296_v63 = vld [vmem:[#allocation162_spill] sm:$0xff] }
 0x3c1   :  { %4270 = vst.msk [vmem:[#allocation3 + $0x108] sm:$0xff] %vm16275_vm3, %v4262_v57  ;;  %v16290_v15 = vpack.c.bf16 %v16288_v4, %v16289_v37  ;;  %v16292_v14 = vld [vmem:[#allocation147_spill] sm:$0xff]  ;;  %v16297_v51 = vld [vmem:[#allocation158_spill] sm:$0xff]  ;;  %v16302_v1 = vpack.c.bf16 %v13156_v35, %v13129_v6  ;;  %v16303_v8 = vpack.c.bf16 %v13202_v25, %v13215_v47  ;;  %v16304_v31 = vld [vmem:[#allocation61_spill] sm:$0xff]  ;;  %v16309_v6 = vpack.c.bf16 %v13044_v2, %v12932_v33 }
 0x3c2   :  { %4175 = vst.msk [vmem:[#allocation3 + $0x128] sm:$0xff] %vm16276_vm8, %v4167_v27  ;;  %v16293_v61 = vpack.c.bf16 %v16291_v58, %v16292_v14  ;;  %v16298_v22 = vpack.c.bf16 %v16296_v63, %v16297_v51  ;;  %v16299_v13 = vld [vmem:[#allocation122_spill] sm:$0xff]  ;;  %v16305_v0 = vld [vmem:[#allocation180_spill] sm:$0xff]  ;;  %v16307_v32 = vld [vmem:[#allocation89_spill] sm:$0xff]  ;;  %v16312_v47 = vpack.c.bf16 %v13206_v40, %v13092_v9 }
 0x3c3   :  { %4120 = vrot.lane.b32.xlu0 %v16277_v54, %s6313_s15  ;;  %4271 = vst.msk [vmem:[#allocation3 + $0x130] sm:$0xff] %vm16278_vm2, %v4263_v16  ;;  %v16300_v34 = vld [vmem:[#allocation30_spill] sm:$0xff]  ;;  %v16306_v23 = vpack.c.bf16 %v16304_v31, %v16305_v0  ;;  %v16308_v45 = vpack.c.bf16 %v12865_v46, %v16307_v32  ;;  %v16310_v35 = vld [vmem:[#allocation108_spill] sm:$0xff]  ;;  %v16320_v7 = vld [vmem:[#allocation87_spill] sm:$0xff] }
 0x3c4   :  { %4208 = vrot.lane.b32.xlu1 %v16281_v17, %s6313_s15  ;;  %v16301_v12 = vpack.c.bf16 %v16299_v13, %v16300_v34  ;;  %v16311_v25 = vpack.c.bf16 %v13055_v50, %v16310_v35  ;;  %v16313_v41 = vld [vmem:[#allocation66_spill] sm:$0xff]  ;;  %v16314_v11 = vld [vmem:[#allocation140_spill] sm:$0xff]  ;;  %v16325_v26 = vld [vmem:[#allocation129_spill] sm:$0xff] }
 0x3c5   :  { %v16315_v46 = vpack.c.bf16 %v16313_v41, %v16314_v11  ;;  %v16316_v36 = vld [vmem:[#allocation58_spill] sm:$0xff]  ;;  %v16317_v18 = vld [vmem:[#allocation112_spill] sm:$0xff]  ;;  %v16327_v30 = vld [vmem:[#allocation69_spill] sm:$0xff] }
 0x3c6   :  { %v16318_v33 = vpack.c.bf16 %v16316_v36, %v16317_v18  ;;  %v16319_v2 = vld [vmem:[#allocation92_spill] sm:$0xff]  ;;  %v16322_v43 = vld [vmem:[#allocation86_spill] sm:$0xff]  ;;  %vm16328_vm7 = vmmov %vm16242_vm0 }
 0x3c7   :  { %4304 = vrot.lane.b32.xlu0 %v16284_v49, %s6313_s15  ;;  %v16321_v50 = vpack.c.bf16 %v16319_v2, %v16320_v7  ;;  %v16323_v9 = vpack.c.bf16 %v13286_v28, %v16322_v43  ;;  %v16324_v40 = vld [vmem:[#allocation172_spill] sm:$0xff]  ;;  %v6206_v24 = vld [vmem:[%s13775_s5 + $0x110] sm:$0xff]   ;;  %v6207_v20 = vld [vmem:[%s13775_s5 + $0x118] sm:$0xff]  }
 0x3c8   :  { %3992 = vrot.lane.b32.xlu1 %v16286_v42, %s6313_s15  ;;  %v16326_v59 = vpack.c.bf16 %v16324_v40, %v16325_v26  ;;  %v6203_v39 = vld [vmem:[%s13775_s5 + $0x108] sm:$0xff]   ;;  %vm16329_vm9 = vmmov %vm16242_vm0 }
 0x3c9   :  { %vm16330_vm14 = vmmov %vm16242_vm0 }
 0x3ca   :  { %vm16331_vm1 = vmmov %vm16242_vm0 }
 0x3cb   :  { %4122 = vrot.lane.b32.xlu0 %v16287_v21, %s6313_s15  ;;  %vm16332_vm11 = vmmov %vm16242_vm0 }
 0x3cc   :  { %4210 = vrot.lane.b32.xlu1 %v16290_v15, %s6313_s15  ;;  %vm16333_vm6 = vmmov %vm16242_vm0 }
 0x3cd   :  { %vm16334_vm4 = vmmov %vm16242_vm0 }
 0x3ce   :  { %vm16339_vm10 = vmmov %vm16242_vm0 }
 0x3cf   :  { %4306 = vrot.lane.b32.xlu0 %v16293_v61, %s6313_s15  ;;  %vm16342_vm8 = vmmov %vm16242_vm0 }
 0x3d0   :  { %3994 = vrot.lane.b32.xlu1 %v16294_v60, %s6313_s15 }
 0x3d3   :  { %4124 = vrot.lane.b32.xlu0 %v16295_v10, %s6313_s15 }
 0x3d4   :  { %4212 = vrot.lane.b32.xlu1 %v16298_v22, %s6313_s15 }
 0x3d7   :  { %4308 = vrot.lane.b32.xlu0 %v16301_v12, %s6313_s15 }
 0x3d8   :  { %3996 = vrot.lane.b32.xlu1 %v16302_v1, %s6313_s15 }
 0x3db   :  { %4126 = vrot.lane.b32.xlu0 %v16303_v8, %s6313_s15 }
 0x3dc   :  { %4214 = vrot.lane.b32.xlu1 %v16306_v23, %s6313_s15 }
 0x3df   :  { %4310 = vrot.lane.b32.xlu0 %v16308_v45, %s6313_s15 }
 0x3e0   :  { %4216 = vrot.lane.b32.xlu1 %v16309_v6, %s6313_s15 }
 0x3e3   :  { %4312 = vrot.lane.b32.xlu0 %v16311_v25, %s6313_s15 }
 0x3e4   :  { %4218 = vrot.lane.b32.xlu1 %v16312_v47, %s6313_s15 }
 0x3e7   :  { %4314 = vrot.lane.b32.xlu0 %v16315_v46, %s6313_s15 }
 0x3e8   :  { %4220 = vrot.lane.b32.xlu1 %v16318_v33, %s6313_s15 }
 0x3eb   :  { %4316 = vrot.lane.b32.xlu0 %v16321_v50, %s6313_s15 }
 0x3ec   :  { %4222 = vrot.lane.b32.xlu1 %v16323_v9, %s6313_s15 }
 0x3ef   :  { %4318 = vrot.lane.b32.xlu0 %v16326_v59, %s6313_s15  ;;  %v4372_v59 = vld [vmem:[#allocation3 + $0x20] sm:$0xff]  ;;  %s6315_s15 = smov [#allocation5]  }
 0x3f0   :  { %s5709_s16 = sshll.u32 %s6315_s15, 4  ;;  %s5710_s16 = int_to_ptr.vmem [resolvable:$true] %s5709_s16 }
 0x3f1   :  { %s6286_s0 = scalar_lea.vmem %s5710_s16, 32  ;;  %p6291_p1 = scmp.lt.s32.totalorder %s5710_s16, %s5710_s16 }
 0x3f2   :  { %p6287_p0 = scmp.ne.s32.totalorder %s5710_s16, %s6286_s0  ;;  %p6292_p2 = scmp.lt.s32.totalorder %s6286_s0, %s6286_s0 }
 0x3f4   :  { %p6293_p3 = por %p6292_p2, %p6291_p1 }
 0x3f6   :  { %p6294_p4 = pnand %p6293_p3, %p6287_p0 }
 0x41b   :  { %v3983_v44 = vpop.permute.xlu1 %3982 }
 0x41c   :  { %4007 = vst.msk [vmem:[#allocation3] sm:$0xff] %vm4006_vm5, %v3983_v44 }
 0x420   :  { %v4113_v53 = vpop.permute.xlu0 %4112 }
 0x421   :  { %4136 = vst.msk [vmem:[#allocation3 + $0x8] sm:$0xff] %vm4006_vm5, %v4113_v53 }
 0x423   :  { %v3985_v5 = vpop.permute.xlu1 %3984  ;;  %v4368_v38 = vld [vmem:[#allocation3] sm:$0xff] }
 0x424   :  { %4008 = vst.msk [vmem:[#allocation3 + $0x28] sm:$0xff] %vm4006_vm5, %v3985_v5  ;;  %v4377_v5 = vld [vmem:[#allocation3 + $0x48] sm:$0xff] }
 0x426   :  { %v4115_v52 = vpop.permute.xlu0 %4114 }
 0x427   :  { %4137 = vst.msk [vmem:[#allocation3 + $0x30] sm:$0xff] %vm4006_vm5, %v4115_v52  ;;  %v3987_v28 = vpop.permute.xlu1 %3986  ;;  %v4382_v52 = vld [vmem:[#allocation3 + $0x70] sm:$0xff] }
 0x428   :  { %4009 = vst.msk [vmem:[#allocation3 + $0x50] sm:$0xff] %vm4006_vm5, %v3987_v28  ;;  %v4369_v48 = vld [vmem:[#allocation3 + $0x8] sm:$0xff] }
 0x429   :  { %4759 = vmatprep.mubr.bf16.mxu1 %v4369_v48  ;;  %v4387_v48 = vld [vmem:[#allocation3 + $0x98] sm:$0xff] }
 0x42a   :  { %4760 = vmatmul.mubr.bf16.vlgmr.msra.gmra.mrb[16].mxu1 %v4368_v38  ;;  %v4397_v38 = vld [vmem:[#allocation3 + $0xe8] sm:$0xff] }
 0x42b   :  { %6109 = vmatpush3.bf16.msra.mxu1 %v16327_v30  ;;  %v4373_v17 = vld [vmem:[#allocation3 + $0x28] sm:$0xff]  ;;  %v4402_v30 = vld [vmem:[#allocation3 + $0x110] sm:$0xff] }
 0x42c   :  { %6110 = vmatprep.subr.bf16.mxu1 %v6203_v39 }
 0x42d   :  { %v4117_v19 = vpop.permute.xlu0 %4116 }
 0x42e   :  { %4138 = vst.msk [vmem:[#allocation3 + $0x58] sm:$0xff] %vm4006_vm5, %v4117_v19  ;;  %v3989_v62 = vpop.permute.xlu1 %3988  ;;  %v4374_v27 = vld [vmem:[#allocation3 + $0x30] sm:$0xff] }
 0x42f   :  { %4010 = vst.msk [vmem:[#allocation3 + $0x78] sm:$0xff] %vm4006_vm5, %v3989_v62  ;;  %4767 = vmatprep.mubr.bf16.mxu1 %v4374_v27  ;;  %6111 = vmatpush3.bf16.msra.mxu1 %v6203_v39  ;;  %v4378_v21 = vld [vmem:[#allocation3 + $0x50] sm:$0xff]  ;;  %v4392_v39 = vld [vmem:[#allocation3 + $0xc0] sm:$0xff]  ;;  %v16335_v27 = vmov 0  }
 0x430   :  { %6112 = vmatprep.subr.bf16.mxu1 %v6206_v24 }
 0x431   :  { %v4119_v57 = vpop.permute.xlu0 %4118 }
 0x432   :  { %4139 = vst.msk [vmem:[#allocation3 + $0x80] sm:$0xff] %vm4006_vm5, %v4119_v57  ;;  %v3991_v16 = vpop.permute.xlu1 %3990  ;;  %4768 = vmatmul.mubr.bf16.gmra.mrb[20].mxu1 %v4373_v17  ;;  %v4407_v57 = vld [vmem:[#allocation3 + $0x138] sm:$0xff]  ;;  %v6216_v17 = vld [vmem:[%s13777_s7 + $0x24] ss:$8 sps:$4 sm:$0xff]  }
 0x433   :  { %4011 = vst.msk [vmem:[#allocation3 + $0xa0] sm:$0xff] %vm4006_vm5, %v3991_v16  ;;  %6113 = vmatpush3.bf16.msra.mxu1 %v6206_v24  ;;  %v6208_v24 = vld [vmem:[%s13777_s7] ss:$8 sps:$4 sm:$0xff]   ;;  %v6210_v16 = vld [vmem:[%s13777_s7 + $0x4] ss:$8 sps:$4 sm:$0xff]  }
 0x434   :  { %6114 = vmatprep.subr.bf16.mxu1 %v6207_v20 }
 0x435   :  { %v4121_v54 = vpop.permute.xlu0 %4120  ;;  %v4379_v55 = vld [vmem:[#allocation3 + $0x58] sm:$0xff] }
 0x436   :  { %4140 = vst.msk [vmem:[#allocation3 + $0xa8] sm:$0xff] %vm4006_vm5, %v4121_v54  ;;  %v4209_v3 = vpop.permute.xlu1 %4208  ;;  %4775 = vmatprep.mubr.bf16.mxu1 %v4379_v55  ;;  %v4383_v10 = vld [vmem:[#allocation3 + $0x78] sm:$0xff] }
 0x437   :  { %4232 = vst.msk [vmem:[#allocation3 + $0x10] sm:$0xff] %vm4006_vm5, %v4209_v3  ;;  %6115 = vmatpush3.bf16.msra.mxu1 %v6207_v20  ;;  %v6211_v54 = vld [vmem:[%s13777_s7 + $0x10] ss:$8 sps:$4 sm:$0xff]   ;;  %v6213_v20 = vld [vmem:[%s13777_s7 + $0x14] ss:$8 sps:$4 sm:$0xff]  }
 0x438   :  { %5183 = vmatprep.subr.bf16.mxu1 %v6210_v16  ;;  %v6214_v3 = vld [vmem:[%s13777_s7 + $0x20] ss:$8 sps:$4 sm:$0xff]   ;;  %v6219_v55 = vld [vmem:[%s13777_s7 + $0x34] ss:$8 sps:$4 sm:$0xff]  }
 0x439   :  { %v4305_v29 = vpop.permute.xlu0 %4304  ;;  %v4384_v4 = vld [vmem:[#allocation3 + $0x80] sm:$0xff] }
 0x43a   :  { %4328 = vst.msk [vmem:[#allocation3 + $0x18] sm:$0xff] %vm4006_vm5, %v4305_v29  ;;  %v3993_v49 = vpop.permute.xlu1 %3992  ;;  %4776 = vmatmul.mubr.bf16.gmra.mrb[24].mxu1 %v4378_v21  ;;  %v4388_v8 = vld [vmem:[#allocation3 + $0xa0] sm:$0xff]  ;;  %v6217_v29 = vld [vmem:[%s13777_s7 + $0x30] ss:$8 sps:$4 sm:$0xff]  }
 0x43b   :  { %4012 = vst.msk [vmem:[#allocation3 + $0xc8] sm:$0xff] %vm4006_vm5, %v3993_v49  ;;  %4783 = vmatprep.mubr.bf16.mxu1 %v4384_v4  ;;  %v6222_v49 = vld [vmem:[%s13777_s7 + $0x44] ss:$8 sps:$4 sm:$0xff]  }
 0x43d   :  { %v4123_v56 = vpop.permute.xlu0 %4122  ;;  %v4389_v63 = vld [vmem:[#allocation3 + $0xa8] sm:$0xff] }
 0x43e   :  { %4141 = vst.msk [vmem:[#allocation3 + $0xd0] sm:$0xff] %vm4006_vm5, %v4123_v56  ;;  %v4211_v42 = vpop.permute.xlu1 %4210  ;;  %v4370_v14 = vld [vmem:[#allocation3 + $0x10] sm:$0xff] }
 0x43f   :  { %4233 = vst.msk [vmem:[#allocation3 + $0x38] sm:$0xff] %vm4006_vm5, %v4211_v42 }
 0x441   :  { %v4307_v37 = vpop.permute.xlu0 %4306  ;;  %v4371_v15 = vld [vmem:[#allocation3 + $0x18] sm:$0xff] }
 0x442   :  { %4329 = vst.msk [vmem:[#allocation3 + $0x40] sm:$0xff] %vm4006_vm5, %v4307_v37  ;;  %4856 = vmatprep.mubr.bf16.mxu0 %v4371_v15  ;;  %v3995_v58 = vpop.permute.xlu1 %3994  ;;  %4784 = vmatmul.mubr.bf16.gmra.mrb[28].mxu1 %v4383_v10  ;;  %v4393_v25 = vld [vmem:[#allocation3 + $0xc8] sm:$0xff] }
 0x443   :  { %4013 = vst.msk [vmem:[#allocation3 + $0xf0] sm:$0xff] %vm4006_vm5, %v3995_v58  ;;  %4857 = vmatmul.mubr.bf16.vlgmr.msra.gmra.mrb[32].mxu0 %v4370_v14  ;;  %4791 = vmatprep.mubr.bf16.mxu1 %v4389_v63 }
 0x445   :  { %v4125_v61 = vpop.permute.xlu0 %4124  ;;  %v4394_v31 = vld [vmem:[#allocation3 + $0xd0] sm:$0xff] }
 0x446   :  { %4142 = vst.msk [vmem:[#allocation3 + $0xf8] sm:$0xff] %vm4006_vm5, %v4125_v61  ;;  %v4213_v60 = vpop.permute.xlu1 %4212  ;;  %v4375_v34 = vld [vmem:[#allocation3 + $0x38] sm:$0xff] }
 0x447   :  { %4234 = vst.msk [vmem:[#allocation3 + $0x60] sm:$0xff] %vm4006_vm5, %v4213_v60 }
 0x449   :  { %v4309_v51 = vpop.permute.xlu0 %4308  ;;  %v4376_v22 = vld [vmem:[#allocation3 + $0x40] sm:$0xff] }
 0x44a   :  { %4330 = vst.msk [vmem:[#allocation3 + $0x68] sm:$0xff] %vm4006_vm5, %v4309_v51  ;;  %4864 = vmatprep.mubr.bf16.mxu0 %v4376_v22  ;;  %v3997_v13 = vpop.permute.xlu1 %3996  ;;  %4792 = vmatmul.mubr.bf16.gmra.mrb[32].mxu1 %v4388_v8  ;;  %v4398_v7 = vld [vmem:[#allocation3 + $0xf0] sm:$0xff] }
 0x44b   :  { %4014 = vst.msk [vmem:[#allocation3 + $0x118] sm:$0xff] %vm4006_vm5, %v3997_v13  ;;  %4865 = vmatmul.mubr.bf16.gmra.mrb[36].mxu0 %v4375_v34  ;;  %4799 = vmatprep.mubr.bf16.mxu1 %v4394_v31 }
 0x44d   :  { %v4127_v12 = vpop.permute.xlu0 %4126  ;;  %v4399_v47 = vld [vmem:[#allocation3 + $0xf8] sm:$0xff] }
 0x44e   :  { %4143 = vst.msk [vmem:[#allocation3 + $0x120] sm:$0xff] %vm4006_vm5, %v4127_v12  ;;  %v4215_v1 = vpop.permute.xlu1 %4214  ;;  %v4380_v45 = vld [vmem:[#allocation3 + $0x60] sm:$0xff] }
 0x44f   :  { %4235 = vst.msk [vmem:[#allocation3 + $0x88] sm:$0xff] %vm4006_vm5, %v4215_v1  ;;  %v13552_v12 = vld [vmem:[%s13776_s6] ss:$0 sm:$0xff] }
 0x451   :  { %v4311_v0 = vpop.permute.xlu0 %4310  ;;  %v4381_v23 = vld [vmem:[#allocation3 + $0x68] sm:$0xff] }
 0x452   :  { %4331 = vst.msk [vmem:[#allocation3 + $0x90] sm:$0xff] %vm4006_vm5, %v4311_v0  ;;  %v4217_v32 = vpop.permute.xlu1 %4216  ;;  %4872 = vmatprep.mubr.bf16.mxu0 %v4381_v23  ;;  %4800 = vmatmul.mubr.bf16.gmra.mrb[36].mxu1 %v4393_v25  ;;  %v4403_v26 = vld [vmem:[#allocation3 + $0x118] sm:$0xff] }
 0x453   :  { %4236 = vst.msk [vmem:[#allocation3 + $0xb0] sm:$0xff] %vm4006_vm5, %v4217_v32  ;;  %4873 = vmatmul.mubr.bf16.gmra.mrb[40].mxu0 %v4380_v45  ;;  %4807 = vmatprep.mubr.bf16.mxu1 %v4399_v47 }
 0x455   :  { %v4313_v6 = vpop.permute.xlu0 %4312  ;;  %v4404_v50 = vld [vmem:[#allocation3 + $0x120] sm:$0xff] }
 0x456   :  { %4332 = vst.msk [vmem:[#allocation3 + $0xb8] sm:$0xff] %vm4006_vm5, %v4313_v6  ;;  %v4219_v35 = vpop.permute.xlu1 %4218  ;;  %v4385_v36 = vld [vmem:[#allocation3 + $0x88] sm:$0xff] }
 0x457   :  { %4237 = vst.msk [vmem:[#allocation3 + $0xd8] sm:$0xff] %vm4006_vm5, %v4219_v35 }
 0x459   :  { %v4315_v41 = vpop.permute.xlu0 %4314  ;;  %v4386_v11 = vld [vmem:[#allocation3 + $0x90] sm:$0xff] }
 0x45a   :  { %4333 = vst.msk [vmem:[#allocation3 + $0xe0] sm:$0xff] %vm4006_vm5, %v4315_v41  ;;  %v4221_v46 = vpop.permute.xlu1 %4220  ;;  %4880 = vmatprep.mubr.bf16.mxu0 %v4386_v11  ;;  %4808 = vmatmul.mubr.bf16.gmra.mrb[40].mxu1 %v4398_v7  ;;  %v4390_v9 = vld [vmem:[#allocation3 + $0xb0] sm:$0xff]  ;;  %v6257_v7 = vld [vmem:[%s13779_s9] sm:$0xff]  }
 0x45b   :  { %4238 = vst.msk [vmem:[#allocation3 + $0x100] sm:$0xff] %vm4006_vm5, %v4221_v46  ;;  %4881 = vmatmul.mubr.bf16.gmra.mrb[44].mxu0 %v4385_v36  ;;  %4815 = vmatprep.mubr.bf16.mxu1 %v4404_v50  ;;  %v6258_v50 = vld [vmem:[%s13779_s9 + $0x48] sm:$0xff]  }
 0x45d   :  { %v4317_v18 = vpop.permute.xlu0 %4316  ;;  %v4391_v33 = vld [vmem:[#allocation3 + $0xb8] sm:$0xff] }
 0x45e   :  { %4334 = vst.msk [vmem:[#allocation3 + $0x108] sm:$0xff] %vm4006_vm5, %v4317_v18  ;;  %v4223_v2 = vpop.permute.xlu1 %4222  ;;  %4888 = vmatprep.mubr.bf16.mxu0 %v4391_v33  ;;  %v4395_v44 = vld [vmem:[#allocation3 + $0xd8] sm:$0xff] }
 0x45f   :  { %4239 = vst.msk [vmem:[#allocation3 + $0x128] sm:$0xff] %vm4006_vm5, %v4223_v2  ;;  %v6256_v2 = vld [vmem:[%s13779_s9 + $0x40] sm:$0xff]  }
 0x460   :  { %6066 = vmatprep.subr.bf16.mxu0 %v6256_v2  ;;  %v6269_v2 = vld [vmem:[%s13779_s9 + $0x30] sm:$0xff]  }
 0x461   :  { %v4319_v43 = vpop.permute.xlu0 %4318  ;;  %v4396_v40 = vld [vmem:[#allocation3 + $0xe0] sm:$0xff]  ;;  %6067 = vmatpush3.bf16.msra.mxu0 %v6257_v7 }
 0x462   :  { %4335 = vst.msk [vmem:[#allocation3 + $0x130] sm:$0xff] %vm4006_vm5, %v4319_v43  ;;  %4816 = vmatmul.mubr.bf16.gmra.mrb[44].mxu1 %v4403_v26  ;;  %v4400_v28 = vld [vmem:[#allocation3 + $0x100] sm:$0xff]  ;;  %6068 = vmatprep.subr.bf16.mxu0 %v6258_v50 }
 0x463   :  { %4889 = vmatmul.mubr.bf16.gmra.mrb[48].mxu0 %v4390_v9  ;;  %6116 = vmatprep.mubr.msk.bf16.mxu1 %vm16328_vm7, %v4372_v59  ;;  %vm16345_vm7 = vmmov %vm16242_vm0 }
 0x464   :  { %4896 = vmatprep.mubr.bf16.mxu0 %v4396_v40 }
 0x465   :  { %v4401_v53 = vld [vmem:[#allocation3 + $0x108] sm:$0xff] }
 0x466   :  { %v4405_v62 = vld [vmem:[#allocation3 + $0x128] sm:$0xff] }
 0x469   :  { %v4406_v19 = vld [vmem:[#allocation3 + $0x130] sm:$0xff] }
 0x46a   :  { %6117 = vmatmul.mubr.msk.bf16.vlgmr.msra.gmra.mrb[48].mxu1 %vm16242_vm0, %v4377_v5 }
 0x46b   :  { %4897 = vmatmul.mubr.bf16.gmra.mrb[52].mxu0 %v4395_v44  ;;  %6120 = vmatprep.mubr.msk.bf16.mxu1 %vm16329_vm9, %v4382_v52  ;;  %v6260_v52 = vld [vmem:[%s13779_s9 + $0x50] sm:$0xff]  }
 0x46c   :  { %4904 = vmatprep.mubr.bf16.mxu0 %v4401_v53  ;;  %5184 = vmatpush1.bf16.msra.mxu1 %v6208_v24  ;;  %v6259_v53 = vld [vmem:[%s13779_s9 + $0x8] sm:$0xff]   ;;  %v6261_v24 = vld [vmem:[%s13779_s9 + $0x10] sm:$0xff]  }
 0x46d   :  { %5185 = vmatprep.subr.bf16.mxu1 %v6213_v20  ;;  %6069 = vmatpush3.bf16.msra.mxu0 %v6259_v53 }
 0x46e   :  { %6070 = vmatprep.subr.bf16.mxu0 %v6260_v52 }
 0x470   :  { %5186 = vmatpush1.bf16.msra.mxu1 %v6211_v54  ;;  %v6262_v54 = vld [vmem:[%s13779_s9 + $0x58] sm:$0xff]  }
 0x471   :  { %5187 = vmatprep.subr.bf16.mxu1 %v6216_v17  ;;  %6071 = vmatpush3.bf16.msra.mxu0 %v6261_v24 }
 0x472   :  { %6121 = vmatmul.mubr.msk.bf16.gmra.mrb[52].mxu1 %vm16330_vm14, %v4387_v48  ;;  %6072 = vmatprep.subr.bf16.mxu0 %v6262_v54  ;;  %vm16348_vm14 = vmmov %vm16331_vm1 }
 0x473   :  { %4905 = vmatmul.mubr.bf16.gmra.mrb[56].mxu0 %v4400_v28  ;;  %6124 = vmatprep.mubr.msk.bf16.mxu1 %vm16331_vm1, %v4392_v39 }
 0x474   :  { %4912 = vmatprep.mubr.bf16.mxu0 %v4406_v19  ;;  %5188 = vmatpush1.bf16.msra.mxu1 %v6214_v3 }
 0x475   :  { %5189 = vmatprep.subr.bf16.mxu1 %v6219_v55 }
 0x478   :  { %5190 = vmatpush1.bf16.msra.mxu1 %v6217_v29 }
 0x479   :  { %5282 = vmatprep.subr.bf16.mxu1 %v6222_v49 }
 0x47a   :  { %6125 = vmatmul.mubr.msk.bf16.gmra.mrb[56].mxu1 %vm16332_vm11, %v4397_v38  ;;  %vm16349_vm11 = vmmov %vm16331_vm1 }
 0x47b   :  { %4913 = vmatmul.mubr.bf16.gmra.mrb[60].mxu0 %v4405_v62  ;;  %6128 = vmatprep.mubr.msk.bf16.mxu1 %vm16333_vm6, %v4402_v30  ;;  %vm16350_vm6 = vmmov %vm16331_vm1 }
 0x482   :  { %6129 = vmatmul.mubr.msk.bf16.gmra.mrb[60].mxu1 %vm16334_vm4, %v4407_v57  ;;  %vm16351_vm4 = vmmov %vm16331_vm1 }
 0x483   :  { %5215 = vmatprep.mubr.bf16.mxu1 %v16335_v27 }
 0x4fd   :  { %v5942_v56 = vpop.f32.mrb[16].mxu1 }
 0x4fe   :  { %v5943_v42 = vpop.f32.mrb[17].mxu1 }
 0x4ff   :  { %v5944_v21 = vadd.f32 %v5943_v42, %v5942_v56  ;;  %v5945_v4 = vpop.f32.mrb[18].mxu1  ;;  %v6263_v56 = vld [vmem:[%s13779_s9 + $0x18] sm:$0xff]  }
 0x500   :  { %v5946_v37 = vpop.f32.mrb[19].mxu1  ;;  %6073 = vmatpush3.bf16.msra.mxu0 %v6263_v56 }
 0x501   :  { %v5947_v15 = vadd.f32 %v5946_v37, %v5945_v4  ;;  %v4762_v23 = vadd.f32 %v5944_v21, %v13552_v12  ;;  %v6264_v21 = vld [vmem:[%s13779_s9 + $0x60] sm:$0xff]  }
 0x502   :  { %6074 = vmatprep.subr.bf16.mxu0 %v6264_v21 }
 0x503   :  { %v4765_v35 = vadd.f32 %v5947_v15, %v13552_v12 }
 0x505   :  { %v5948_v58 = vpop.f32.mrb[20].mxu1 }
 0x506   :  { %v5949_v14 = vpop.f32.mrb[21].mxu1 }
 0x507   :  { %v5950_v61 = vadd.f32 %v5949_v14, %v5948_v58  ;;  %v5951_v60 = vpop.f32.mrb[22].mxu1 }
 0x508   :  { %v5952_v10 = vpop.f32.mrb[23].mxu1 }
 0x509   :  { %v5953_v63 = vadd.f32 %v5952_v10, %v5951_v60  ;;  %v4770_v26 = vadd.f32 %v5950_v61, %v13552_v12 }
 0x50b   :  { %v4773_v28 = vadd.f32 %v5953_v63, %v13552_v12  ;;  %v6265_v63 = vld [vmem:[%s13779_s9 + $0x20] sm:$0xff]  }
 0x50c   :  { %6075 = vmatpush3.bf16.msra.mxu0 %v6265_v63 }
 0x50d   :  { %v5954_v51 = vpop.f32.mrb[24].mxu1 }
 0x50e   :  { %v5955_v22 = vpop.f32.mrb[25].mxu1 }
 0x50f   :  { %v5956_v13 = vadd.f32 %v5955_v22, %v5954_v51  ;;  %v5957_v34 = vpop.f32.mrb[26].mxu1  ;;  %v6266_v22 = vld [vmem:[%s13779_s9 + $0x68] sm:$0xff]  }
 0x510   :  { %v5958_v1 = vpop.f32.mrb[27].mxu1  ;;  %6076 = vmatprep.subr.bf16.mxu0 %v6266_v22 }
 0x511   :  { %v5959_v8 = vadd.f32 %v5958_v1, %v5957_v34  ;;  %v4778_v55 = vadd.f32 %v5956_v13, %v13552_v12 }
 0x513   :  { %v4781_v4 = vadd.f32 %v5959_v8, %v13552_v12 }
 0x515   :  { %v5960_v47 = vpop.f32.mrb[28].mxu1 }
 0x516   :  { %v6006_v31 = vpop.f32.mrb[32].mxu0  ;;  %v5961_v11 = vpop.f32.mrb[29].mxu1 }
 0x517   :  { %v6007_v0 = vpop.f32.mrb[33].mxu0  ;;  %v5962_v46 = vadd.f32 %v5961_v11, %v5960_v47  ;;  %v5963_v36 = vpop.f32.mrb[30].mxu1 }
 0x518   :  { %v6008_v32 = vadd.f32 %v6007_v0, %v6006_v31  ;;  %v6009_v45 = vpop.f32.mrb[34].mxu0  ;;  %v5964_v33 = vpop.f32.mrb[31].mxu1 }
 0x519   :  { %v6010_v6 = vpop.f32.mrb[35].mxu0  ;;  %v5965_v43 = vadd.f32 %v5964_v33, %v5963_v36  ;;  %v4786_v8 = vadd.f32 %v5962_v46, %v13552_v12 }
 0x51a   :  { %v6011_v25 = vadd.f32 %v6010_v6, %v6009_v45  ;;  %v13556_v41 = vadd.f32 %v6008_v32, %v4762_v23  ;;  %v6267_v23 = vld [vmem:[%s13779_s9 + $0x28] sm:$0xff]   ;;  %v6268_v45 = vld [vmem:[%s13779_s9 + $0x70] sm:$0xff]  }
 0x51b   :  { %v4789_v6 = vadd.f32 %v5965_v43, %v13552_v12  ;;  %6077 = vmatpush3.bf16.msra.mxu0 %v6267_v23 }
 0x51c   :  { %v13558_v18 = vadd.f32 %v6011_v25, %v4765_v35  ;;  %6078 = vmatprep.subr.bf16.mxu0 %v6268_v45 }
 0x51d   :  { %v5966_v48 = vpop.f32.mrb[32].mxu1 }
 0x51e   :  { %v6012_v9 = vpop.f32.mrb[36].mxu0  ;;  %v5967_v62 = vpop.f32.mrb[33].mxu1 }
 0x51f   :  { %v6013_v40 = vpop.f32.mrb[37].mxu0  ;;  %v5968_v38 = vadd.f32 %v5967_v62, %v5966_v48  ;;  %v5969_v30 = vpop.f32.mrb[34].mxu1  ;;  %6079 = vmatpush3.bf16.msra.mxu0 %v6269_v2 }
 0x520   :  { %v6014_v59 = vadd.f32 %v6013_v40, %v6012_v9  ;;  %v6015_v44 = vpop.f32.mrb[38].mxu0  ;;  %v5970_v16 = vpop.f32.mrb[35].mxu1 }
 0x521   :  { %v6016_v5 = vpop.f32.mrb[39].mxu0  ;;  %v5971_v20 = vadd.f32 %v5970_v16, %v5969_v30  ;;  %v4794_v43 = vadd.f32 %v5968_v38, %v13552_v12 }
 0x522   :  { %v6017_v19 = vadd.f32 %v6016_v5, %v6015_v44  ;;  %v13577_v39 = vadd.f32 %v6014_v59, %v4770_v26 }
 0x523   :  { %v4797_v53 = vadd.f32 %v5971_v20, %v13552_v12 }
 0x524   :  { %v13579_v57 = vadd.f32 %v6017_v19, %v4773_v28 }
 0x525   :  { %v5972_v15 = vpop.f32.mrb[36].mxu1 }
 0x526   :  { %v6018_v3 = vpop.f32.mrb[40].mxu0  ;;  %v5973_v14 = vpop.f32.mrb[37].mxu1 }
 0x527   :  { %v6019_v17 = vpop.f32.mrb[41].mxu0  ;;  %v5974_v61 = vadd.f32 %v5973_v14, %v5972_v15  ;;  %v5975_v60 = vpop.f32.mrb[38].mxu1 }
 0x528   :  { %v6020_v29 = vadd.f32 %v6019_v17, %v6018_v3  ;;  %v6021_v49 = vpop.f32.mrb[42].mxu0  ;;  %v5976_v51 = vpop.f32.mrb[39].mxu1 }
 0x529   :  { %v6022_v42 = vpop.f32.mrb[43].mxu0  ;;  %v5977_v13 = vadd.f32 %v5976_v51, %v5975_v60  ;;  %v4802_v3 = vadd.f32 %v5974_v61, %v13552_v12 }
 0x52a   :  { %v6023_v37 = vadd.f32 %v6022_v42, %v6021_v49  ;;  %v13595_v58 = vadd.f32 %v6020_v29, %v4778_v55 }
 0x52b   :  { %v4805_v20 = vadd.f32 %v5977_v13, %v13552_v12 }
 0x52c   :  { %v13597_v10 = vadd.f32 %v6023_v37, %v4781_v4 }
 0x52d   :  { %v5978_v25 = vpop.f32.mrb[40].mxu1 }
 0x52e   :  { %v6024_v34 = vpop.f32.mrb[44].mxu0  ;;  %v5979_v11 = vpop.f32.mrb[41].mxu1 }
 0x52f   :  { %v6025_v1 = vpop.f32.mrb[45].mxu0  ;;  %v5980_v46 = vadd.f32 %v5979_v11, %v5978_v25  ;;  %v5981_v36 = vpop.f32.mrb[42].mxu1 }
 0x530   :  { %v6026_v31 = vadd.f32 %v6025_v1, %v6024_v34  ;;  %v6027_v0 = vpop.f32.mrb[46].mxu0  ;;  %v5982_v7 = vpop.f32.mrb[43].mxu1 }
 0x531   :  { %v6028_v32 = vpop.f32.mrb[47].mxu0  ;;  %v5983_v50 = vadd.f32 %v5982_v7, %v5981_v36  ;;  %v16336_v36 = vld [vmem:[#allocation9_spill] sm:$0xff] }
 0x532   :  { %v6029_v35 = vadd.f32 %v6028_v32, %v6027_v0  ;;  %v13613_v47 = vadd.f32 %v6026_v31, %v4786_v8  ;;  %v4810_v8 = vadd.f32 %v5980_v46, %v13552_v12  ;;  %vm16337_vm12 = vcmp.lt.s32.totalorder %v16336_v36, 6 }
 0x533   :  { %v4813_v11 = vadd.f32 %v5983_v50, %v13552_v12  ;;  %vm16338_vm13 = vmmov %vm16337_vm12 }
 0x534   :  { %v13615_v33 = vadd.f32 %v6029_v35, %v4789_v6  ;;  %vm16340_vm15 = vmmov %vm16337_vm12 }
 0x535   :  { %v5984_v52 = vpop.f32.mrb[44].mxu1  ;;  %vm16341_vm3 = vmmov %vm16337_vm12 }
 0x536   :  { %v6030_v9 = vpop.f32.mrb[48].mxu0  ;;  %v5985_v19 = vpop.f32.mrb[45].mxu1  ;;  %vm16343_vm2 = vmmov %vm16341_vm3 }
 0x537   :  { %v6031_v40 = vpop.f32.mrb[49].mxu0  ;;  %v5986_v48 = vadd.f32 %v5985_v19, %v5984_v52  ;;  %v5987_v62 = vpop.f32.mrb[46].mxu1  ;;  %vm16344_vm5 = vmmov %vm16343_vm2 }
 0x538   :  { %v6032_v26 = vadd.f32 %v6031_v40, %v6030_v9  ;;  %v6033_v59 = vpop.f32.mrb[50].mxu0  ;;  %v5988_v24 = vpop.f32.mrb[47].mxu1  ;;  %vm16346_vm0 = vmmov %vm16343_vm2 }
 0x539   :  { %v6034_v44 = vpop.f32.mrb[51].mxu0  ;;  %v13626_v16 = vadd.f32 %v5988_v24, %v5987_v62  ;;  %vm16347_vm9 = vmmov %vm16346_vm0 }
 0x53a   :  { %v6035_v5 = vadd.f32 %v6034_v44, %v6033_v59  ;;  %v13622_v28 = vadd.f32 %v6032_v26, %v4794_v43 }
 0x53c   :  { %v13624_v30 = vadd.f32 %v6035_v5, %v4797_v53 }
 0x53d   :  { %v6118_v56 = vpop.f32.mrb[48].mxu1 }
 0x53e   :  { %v6036_v54 = vpop.f32.mrb[52].mxu0  ;;  %v4964_v21 = vadd.f32 %v6118_v56, %v13577_v39  ;;  %v4955_v4 = vpop.f32.mrb[49].mxu1 }
 0x53f   :  { %v6037_v38 = vpop.f32.mrb[53].mxu0  ;;  %v4956_v37 = vadd.f32 %v4955_v4, %v13556_v41  ;;  %v6119_v15 = vpop.f32.mrb[50].mxu1 }
 0x540   :  { %v6038_v17 = vadd.f32 %v6037_v38, %v6036_v54  ;;  %v6039_v55 = vpop.f32.mrb[54].mxu0  ;;  %v5020_v60 = vmax.f32 %v4964_v21, 0.0  ;;  %v4967_v63 = vadd.f32 %v6119_v15, %v13579_v57  ;;  %v4958_v61 = vpop.f32.mrb[51].mxu1  ;;  %v4818_v54 = vadd.f32 %v5986_v48, %v13552_v12 }
 0x541   :  { %v6040_v29 = vpop.f32.mrb[55].mxu0  ;;  %v5018_v51 = vmax.f32 %v4956_v37, 0.0  ;;  %v4959_v22 = vadd.f32 %v4958_v61, %v13558_v18  ;;  %v4821_v21 = vadd.f32 %v13626_v16, %v13552_v12 }
 0x542   :  { %v6041_v49 = vadd.f32 %v6040_v29, %v6039_v55  ;;  %v4899_v42 = vadd.f32 %v6038_v17, %v4802_v3  ;;  %v5021_v13 = vmax.f32 %v4967_v63, 0.0  ;;  %v5036_v23 = vrot.slane %v5020_v60, 2 }
 0x543   :  { %v5019_v31 = vmax.f32 %v4959_v22, 0.0  ;;  %v5034_v45 = vrot.slane %v5018_v51, 2 }
 0x544   :  { %v13632_v14 = vadd.f32 %v6041_v49, %v4805_v20  ;;  %v5037_v41 = vrot.slane %v5021_v13, 2 }
 0x545   :  { %v5035_v6 = vrot.slane %v5019_v31, 2  ;;  %v6122_v25 = vpop.f32.mrb[52].mxu1 }
 0x546   :  { %v6042_v34 = vpop.f32.mrb[56].mxu0  ;;  %v5062_v18 = vsel %vm16337_vm12, %v5036_v23, %v5037_v41  ;;  %v4980_v2 = vadd.f32 %v6122_v25, %v13613_v47  ;;  %v4971_v7 = vpop.f32.mrb[53].mxu1 }
 0x547   :  { %v6043_v1 = vpop.f32.mrb[57].mxu0  ;;  %v5068_v46 = vmax.f32 %v5020_v60, %v5062_v18  ;;  %v5064_v9 = vsel %vm16338_vm13, %v5034_v45, %v5035_v6  ;;  %v4972_v40 = vadd.f32 %v4971_v7, %v13595_v58  ;;  %v6123_v43 = vpop.f32.mrb[54].mxu1 }
 0x548   :  { %v6044_v39 = vadd.f32 %v6043_v1, %v6042_v34  ;;  %v6045_v0 = vpop.f32.mrb[58].mxu0  ;;  %v5066_v26 = vmax.f32 %v5018_v51, %v5064_v9  ;;  %v5024_v59 = vmax.f32 %v4980_v2, 0.0  ;;  %v4983_v44 = vadd.f32 %v6123_v43, %v13615_v33  ;;  %v4974_v53 = vpop.f32.mrb[55].mxu1 }
 0x549   :  { %v6046_v32 = vpop.f32.mrb[59].mxu0  ;;  %v5022_v5 = vmax.f32 %v4972_v40, 0.0  ;;  %v4975_v50 = vadd.f32 %v4974_v53, %v13597_v10 }
 0x54a   :  { %v6047_v35 = vadd.f32 %v6046_v32, %v6045_v0  ;;  %v4907_v57 = vadd.f32 %v6044_v39, %v4810_v8  ;;  %v5082_v62 = vmax.f32 %v5066_v26, %v5068_v46  ;;  %v5025_v47 = vmax.f32 %v4983_v44, 0.0 }
 0x54b   :  { %v5038_v38 = vrot.slane %v5022_v5, 2  ;;  %v5023_v3 = vmax.f32 %v4975_v50, 0.0  ;;  %v5040_v55 = vrot.slane %v5024_v59, 2 }
 0x54c   :  { %v4910_v19 = vadd.f32 %v6047_v35, %v4813_v11  ;;  %5098 = vst.msk [vmem:[#allocation4] sm:$0xff] %vm16339_vm10, %v5082_v62  ;;  %v5041_v29 = vrot.slane %v5025_v47, 2 }
 0x54d   :  { %v5039_v20 = vrot.slane %v5023_v3, 2  ;;  %v6126_v56 = vpop.f32.mrb[56].mxu1 }
 0x54e   :  { %v6048_v52 = vpop.f32.mrb[60].mxu0  ;;  %v5058_v4 = vsel %vm16340_vm15, %v5040_v55, %v5041_v29  ;;  %v4996_v48 = vadd.f32 %v6126_v56, %v4899_v42  ;;  %v4987_v37 = vpop.f32.mrb[57].mxu1  ;;  %v6228_v55 = vld [vmem:[%s13777_s7 + $0x64] ss:$8 sps:$4 sm:$0xff]   ;;  %v6226_v29 = vld [vmem:[%s13777_s7 + $0x60] ss:$8 sps:$4 sm:$0xff]  }
 0x54f   :  { %v6049_v24 = vpop.f32.mrb[61].mxu0  ;;  %v5072_v15 = vmax.f32 %v5024_v59, %v5058_v4  ;;  %v5060_v60 = vsel %vm16341_vm3, %v5038_v38, %v5039_v20  ;;  %v4988_v63 = vadd.f32 %v4987_v37, %v13622_v28  ;;  %v6127_v61 = vpop.f32.mrb[58].mxu1  ;;  %v6220_v38 = vld [vmem:[%s13777_s7 + $0x40] ss:$8 sps:$4 sm:$0xff]   ;;  %v6237_v37 = vld [vmem:[%s13777_s7 + $0x94] ss:$8 sps:$4 sm:$0xff]  }
 0x550   :  { %v6050_v17 = vadd.f32 %v6049_v24, %v6048_v52  ;;  %v6051_v58 = vpop.f32.mrb[62].mxu0  ;;  %v5070_v51 = vmax.f32 %v5022_v5, %v5060_v60  ;;  %v5028_v22 = vmax.f32 %v4996_v48, 0.0  ;;  %v4990_v34 = vpop.f32.mrb[59].mxu1  ;;  %v4999_v1 = vadd.f32 %v6127_v61, %v13632_v14  ;;  %v6232_v4 = vld [vmem:[%s13777_s7 + $0x80] ss:$8 sps:$4 sm:$0xff]  }
 0x551   :  { %v6052_v33 = vpop.f32.mrb[63].mxu0  ;;  %v5026_v13 = vmax.f32 %v4988_v63, 0.0  ;;  %v4991_v12 = vadd.f32 %v4990_v34, %v13624_v30  ;;  %v6240_v60 = vld [vmem:[%s13777_s7 + $0xa4] ss:$8 sps:$4 sm:$0xff]   ;;  %v6238_v63 = vld [vmem:[%s13777_s7 + $0xa0] ss:$8 sps:$4 sm:$0xff]  }
 0x552   :  { %v6053_v49 = vadd.f32 %v6052_v33, %v6051_v58  ;;  %v4915_v10 = vadd.f32 %v6050_v17, %v4818_v54  ;;  %v5086_v8 = vmax.f32 %v5070_v51, %v5072_v15  ;;  %v5029_v42 = vmax.f32 %v4999_v1, 0.0  ;;  %v6225_v17 = vld [vmem:[%s13777_s7 + $0x54] ss:$8 sps:$4 sm:$0xff]   ;;  %v6223_v58 = vld [vmem:[%s13777_s7 + $0x50] ss:$8 sps:$4 sm:$0xff]  }
 0x553   :  { %v5042_v31 = vrot.slane %v5026_v13, 2  ;;  %v5027_v39 = vmax.f32 %v4991_v12, 0.0  ;;  %v5044_v0 = vrot.slane %v5028_v22, 2  ;;  %v5128_v24 = vld [vmem:[#allocation4] ss:$64 sm:$0x1] }
 0x554   :  { %v4918_v16 = vadd.f32 %v6053_v49, %v4821_v21  ;;  %5102 = vst.msk [vmem:[#allocation4 + $0x20] sm:$0xff] %vm16342_vm8, %v5086_v8  ;;  %v5045_v23 = vrot.slane %v5029_v42, 2  ;;  %v6231_v33 = vld [vmem:[%s13777_s7 + $0x74] ss:$8 sps:$4 sm:$0xff]   ;;  %v6229_v49 = vld [vmem:[%s13777_s7 + $0x70] ss:$8 sps:$4 sm:$0xff]  }
 0x555   :  { %v5043_v41 = vrot.slane %v5027_v39, 2  ;;  %v6130_v28 = vpop.f32.mrb[60].mxu1  ;;  %v5227_v56 = vld [vmem:[#allocation4 + $0x4] ss:$64 sm:$0x1] }
 0x556   :  { %v5012_v32 = vadd.f32 %v6130_v28, %v4915_v10  ;;  %v5003_v45 = vpop.f32.mrb[61].mxu1  ;;  %v5054_v6 = vsel %vm16343_vm2, %v5044_v0, %v5045_v23  ;;  %v6234_v21 = vld [vmem:[%s13777_s7 + $0x84] ss:$8 sps:$4 sm:$0xff]   ;;  %v6235_v15 = vld [vmem:[%s13777_s7 + $0x90] ss:$8 sps:$4 sm:$0xff]  }
 0x557   :  { %v5056_v14 = vsel %vm16344_vm5, %v5042_v31, %v5043_v41  ;;  %v5004_v30 = vadd.f32 %v5003_v45, %v4907_v57  ;;  %v6131_v35 = vpop.f32.mrb[62].mxu1  ;;  %v5076_v25 = vmax.f32 %v5028_v22, %v5054_v6  ;;  %v6243_v61 = vld [vmem:[%s13777_s7 + $0xb4] ss:$8 sps:$4 sm:$0xff]   ;;  %v6241_v22 = vld [vmem:[%s13777_s7 + $0xb0] ss:$8 sps:$4 sm:$0xff]  }
 0x558   :  { %v5074_v11 = vmax.f32 %v5026_v13, %v5056_v14  ;;  %v5006_v18 = vpop.f32.mrb[63].mxu1  ;;  %v5032_v2 = vmax.f32 %v5012_v32, 0.0  ;;  %v5015_v46 = vadd.f32 %v6131_v35, %v4918_v16  ;;  %v6246_v1 = vld [vmem:[%s13777_s7 + $0xc4] ss:$8 sps:$4 sm:$0xff]   ;;  %v6244_v12 = vld [vmem:[%s13777_s7 + $0xc0] ss:$8 sps:$4 sm:$0xff]  }
 0x559   :  { %v5030_v7 = vmax.f32 %v5004_v30, 0.0  ;;  %v5007_v9 = vadd.f32 %v5006_v18, %v4910_v19  ;;  %v6249_v8 = vld [vmem:[%s13777_s7 + $0xd4] ss:$8 sps:$4 sm:$0xff]   ;;  %v6247_v31 = vld [vmem:[%s13777_s7 + $0xd0] ss:$8 sps:$4 sm:$0xff]   ;;  %v5118_v14 = vsub.s32 0, %v16336_v36 }
 0x55a   :  { %v5090_v40 = vmax.f32 %v5074_v11, %v5076_v25  ;;  %v5033_v26 = vmax.f32 %v5015_v46, 0.0  ;;  %v5048_v44 = vrot.slane %v5032_v2, 2  ;;  %v6252_v42 = vld [vmem:[%s13777_s7 + $0xe4] ss:$8 sps:$4 sm:$0xff]   ;;  %v6250_v39 = vld [vmem:[%s13777_s7 + $0xe0] ss:$8 sps:$4 sm:$0xff]  }
 0x55b   :  { %v5046_v43 = vrot.slane %v5030_v7, 2  ;;  %v5031_v59 = vmax.f32 %v5007_v9, 0.0  ;;  %v5326_v34 = vld [vmem:[#allocation4 + $0x20] ss:$64 sm:$0x1]  ;;  %v6270_v45 = vld [vmem:[%s13779_s9 + $0x78] sm:$0xff]  }
 0x55c   :  { %5106 = vst.msk [vmem:[#allocation4 + $0x40] sm:$0xff] %vm16345_vm7, %v5090_v40  ;;  %v5049_v53 = vrot.slane %v5033_v26, 2  ;;  %v6255_v0 = vld [vmem:[%s13777_s7 + $0xf4] ss:$8 sps:$4 sm:$0xff]   ;;  %6080 = vmatprep.subr.bf16.mxu0 %v6270_v45  ;;  %v5114_v30 = vld [vmem:[%s13778_s8] sm:$0x3] }
 0x55d   :  { %v5047_v5 = vrot.slane %v5031_v59, 2  ;;  %v5425_v41 = vld [vmem:[#allocation4 + $0x24] ss:$64 sm:$0x1]  ;;  %v6271_v6 = vld [vmem:[%s13779_s9 + $0x38] sm:$0xff]   ;;  %v5122_v35 = vsub.s32 1, %v16336_v36  ;;  %v5119_v25 = vrot.slane %v5114_v30, %v5118_v14 }
 0x55e   :  { %v5050_v57 = vsel %vm16346_vm0, %v5048_v44, %v5049_v53  ;;  %6081 = vmatpush3.bf16.msra.mxu0 %v6271_v6  ;;  %v5835_v36 = vld [vmem:[%s13780_s10] ss:$0 sm:$0xff] }
 0x55f   :  { %v5052_v50 = vsel %vm16347_vm9, %v5046_v43, %v5047_v5  ;;  %v5080_v52 = vmax.f32 %v5032_v2, %v5050_v57  ;;  %v5123_v11 = vrot.slane %v5114_v30, %v5122_v35 }
 0x560   :  { %v5078_v62 = vmax.f32 %v5030_v7, %v5052_v50 }
 0x562   :  { %v5094_v47 = vmax.f32 %v5078_v62, %v5080_v52 }
 0x563   :  { %v5129_v19 = vld [vmem:[#allocation4] ss:$64 sm:$0x2]  ;;  %v5228_v20 = vld [vmem:[#allocation4 + $0x4] ss:$64 sm:$0x2] }
 0x564   :  { %v5130_v54 = vor.u32 %v5129_v19, %v5128_v24  ;;  %5110 = vst.msk [vmem:[#allocation4 + $0x60] sm:$0xff] %vm16348_vm14, %v5094_v47  ;;  %v5229_v10 = vor.u32 %v5228_v20, %v5227_v56 }
 0x566   :  { %v5131_v3 = vpack.c.bf16 %v5130_v54, %v5130_v54  ;;  %v5230_v48 = vpack.c.bf16 %v5229_v10, %v5229_v10 }
 0x568   :  { %5807 = vmatmul.mubr.msk.bf16.vlgmr.msra.gmra.mrb[64].mxu1 %vm16331_vm1, %v5131_v3 }
 0x569   :  { %5283 = vmatpush1.bf16.msra.mxu1 %v6220_v38  ;;  %5314 = vmatprep.mubr.bf16.mxu1 %v16335_v27 }
 0x56a   :  { %5284 = vmatprep.subr.bf16.mxu1 %v6225_v17 }
 0x56b   :  { %v5327_v51 = vld [vmem:[#allocation4 + $0x20] ss:$64 sm:$0x2]  ;;  %v5426_v23 = vld [vmem:[#allocation4 + $0x24] ss:$64 sm:$0x2] }
 0x56c   :  { %v5328_v13 = vor.u32 %v5327_v51, %v5326_v34  ;;  %v5427_v28 = vor.u32 %v5426_v23, %v5425_v41 }
 0x56d   :  { %5285 = vmatpush1.bf16.msra.mxu1 %v6223_v58 }
 0x56e   :  { %5286 = vmatprep.subr.bf16.mxu1 %v6228_v55  ;;  %v5329_v16 = vpack.c.bf16 %v5328_v13, %v5328_v13  ;;  %v5428_v32 = vpack.c.bf16 %v5427_v28, %v5427_v28 }
 0x571   :  { %5287 = vmatpush1.bf16.msra.mxu1 %v6226_v29 }
 0x572   :  { %5288 = vmatprep.subr.bf16.mxu1 %v6231_v33 }
 0x575   :  { %5289 = vmatpush1.bf16.msra.mxu1 %v6229_v49 }
 0x576   :  { %5381 = vmatprep.subr.bf16.mxu1 %v6234_v21 }
 0x578   :  { %5816 = vmatmul.mubr.msk.bf16.vlgmr.msra.gmra.mrb[64].mxu1 %vm16349_vm11, %v5230_v48 }
 0x579   :  { %5382 = vmatpush1.bf16.msra.mxu1 %v6232_v4  ;;  %5413 = vmatprep.mubr.bf16.mxu1 %v16335_v27 }
 0x57a   :  { %5383 = vmatprep.subr.bf16.mxu1 %v6237_v37 }
 0x57d   :  { %5384 = vmatpush1.bf16.msra.mxu1 %v6235_v15 }
 0x57e   :  { %5385 = vmatprep.subr.bf16.mxu1 %v6240_v60 }
 0x581   :  { %5386 = vmatpush1.bf16.msra.mxu1 %v6238_v63 }
 0x582   :  { %5387 = vmatprep.subr.bf16.mxu1 %v6243_v61 }
 0x585   :  { %5388 = vmatpush1.bf16.msra.mxu1 %v6241_v22 }
 0x586   :  { %5480 = vmatprep.subr.bf16.mxu1 %v6246_v1 }
 0x588   :  { %5825 = vmatmul.mubr.msk.bf16.vlgmr.msra.gmra.mrb[64].mxu1 %vm16350_vm6, %v5329_v16 }
 0x589   :  { %5481 = vmatpush1.bf16.msra.mxu1 %v6244_v12  ;;  %5512 = vmatprep.mubr.bf16.mxu1 %v16335_v27  ;;  %v6253_v27 = vld [vmem:[%s13777_s7 + $0xf0] ss:$8 sps:$4 sm:$0xff]  }
 0x58a   :  { %5482 = vmatprep.subr.bf16.mxu1 %v6249_v8 }
 0x58d   :  { %5483 = vmatpush1.bf16.msra.mxu1 %v6247_v31 }
 0x58e   :  { %5484 = vmatprep.subr.bf16.mxu1 %v6252_v42 }
 0x591   :  { %5485 = vmatpush1.bf16.msra.mxu1 %v6250_v39 }
 0x592   :  { %5486 = vmatprep.subr.bf16.mxu1 %v6255_v0 }
 0x595   :  { %5487 = vmatpush1.bf16.msra.mxu1 %v6253_v27 }
 0x598   :  { %5834 = vmatmul.mubr.msk.bf16.vlgmr.msra.gmra.mrb[64].mxu1 %vm16351_vm4, %v5428_v32 }
 0x66b   :  { %v5514_v18 = vpop.f32.mrb[64].mxu1 }
 0x66c   :  { %v6132_v2 = vadd.f32 %v5514_v18, %v5119_v25  ;;  %v5516_v7 = vpop.f32.mrb[65].mxu1 }
 0x66d   :  { %v6133_v46 = vadd.f32 %v5516_v7, %v5123_v11  ;;  %v5518_v9 = vpop.f32.mrb[66].mxu1 }
 0x66e   :  { %v5523_v40 = vmax.f32 %v6132_v2, 0.0  ;;  %v5519_v43 = vpop.f32.mrb[67].mxu1 }
 0x66f   :  { %v5524_v26 = vmax.f32 %v6133_v46, 0.0 }
 0x670   :  { %v5525_v44 = vpack.c.bf16 %v5523_v40, %v5523_v40 }
 0x671   :  { %v5526_v59 = vpack.c.bf16 %v5524_v26, %v5524_v26 }
 0x673   :  { %5694 = vmatprep.mubr.bf16.mxu0 %v5526_v59 }
 0x674   :  { %5695 = vmatmul.mubr.bf16.vlgmr.msra.gmra.mrb[64].mxu0 %v5525_v44 }
 0x747   :  { %v6082_v53 = vpop.f32.mrb[64].mxu0 }
 0x748   :  { %v6083_v5 = vpop.f32.mrb[65].mxu0 }
 0x749   :  { %v6084_v57 = vadd.f32 %v6083_v5, %v6082_v53  ;;  %v6085_v50 = vpop.f32.mrb[66].mxu0 }
 0x74a   :  { %v6086_v52 = vpop.f32.mrb[67].mxu0 }
 0x74b   :  { %v5697_v62 = vadd.f32 %v6084_v57, %v5835_v36 }
 0x74d   :  { %5702 = vst [vmem:[#allocation5] sm:$0x3] %v5697_v62 }
 0x74e   :  { %6297 = shalt.err (!%p6294_p4)
}
 0x74f   :  { %s6298_s5 = scalar_lea.hbm %s13781_s11, 32 }
 0x750   :  { %p6299_p5 = scmp.ne.s32.totalorder %s13781_s11, %s6298_s5  ;;  %p6302_p6 = scmp.lt.u32.totalorder %s6298_s5, %s13781_s11 }
 0x752   :  { %p6304_p7 = pnand %p6302_p6, %p6299_p5 }
 0x754   :  { %6307 = shalt.err (!%p6304_p7)
}
 0x755   :  { %5712 = dma.vmem_to_hbm [thread:$0]  %s5710_s16, 32, %s13781_s11, [#allocation6]  }
 0x756   :  { %6308 = dma.done.wait [#allocation6], 32  }
 0x757   :  { %6309 = vsyncadd [#allocation6], 4294967264 }
 0x758   :  { %5716 = vsyncpa [#allocation6], 1 }

</bundles_post_ra>
